<compile_context>
chip_gen: v5e
topology: v5e:2x2
jax: 0.10.0
libtpu: 0.0.40
codegen_flags: <defaults>
</compile_context>

<pallas_src>
import functools

import numpy as np
import jax
import jax.numpy as jnp
from jax.experimental import pallas as pl
from jax.experimental.pallas import tpu as pltpu

_NEG = -1.0e30  # finite "minus infinity" sentinel (never produces inf/nan downstream)


# ----------------------------------------------------------------------------
# Pallas kernel: one grid step == one batch element, fully fused.
# ----------------------------------------------------------------------------
def afnb_kernel(x_ref, y_ref, mask_ref, wphi_ref, wtg_ref, wmask_ref, o_ref,
                *, ic, s_real):
    # x_ref:    (1, C, N)     channels x pixels for this batch element
    # y_ref:    (1, C, Ny)    channels x pixels of the context input
    # mask_ref: (S_pad, Ny)   additive SPP bin mask: 0 in-bin, -1e30 out-of-bin
    #                         (padded rows >= s_real are all-zero: handled below)
    # wphi_ref: (IC, C)       conv_phi weight
    # wtg_ref:  (2IC, C)      [conv_theta; conv_g] weights stacked (fused matmul)
    # wmask_ref:(C, IC)       conv_mask weight
    # o_ref:    (1, C, N)
    x_cn = x_ref[0]                        # (C, N)   lane dim = N (lane-dense)
    y_cn = y_ref[0]                        # (C, Ny)
    addmask = mask_ref[...]                # (S_pad, Ny)
    s_pad = addmask.shape[0]

    # Fused theta/g 1x1 conv: one MXU push over y instead of two.
    tg = jnp.dot(wtg_ref[...], y_cn, preferred_element_type=jnp.float32)   # (2IC, Ny)
    theta = tg[:ic]                        # (IC, Ny)
    g = tg[ic:]                            # (IC, Ny)

    # conv_phi as (IC, C) @ (C, N)
    xq = jnp.dot(wphi_ref[...], x_cn, preferred_element_type=jnp.float32)  # (IC, N)

    # Spatial-pyramid adaptive max pooling: additive mask + max over the pixel
    # (lane) axis.  Invariant: every real bin is non-empty, so the -1e30
    # sentinel never survives the max for s < s_real.
    # theta is pooled directly in (S_pad, IC) orientation (ready for the score
    # matmul); g is pooled in (IC, S_pad) orientation (ready for the context
    # matmul) -> no in-kernel transposes, only canonical matmuls.
    theta_spp_t = jnp.max(addmask[:, None, :] + theta[None, :, :], axis=-1)  # (S_pad, IC)
    g_spp = jnp.max(g[:, None, :] + addmask[None, :, :], axis=-1)            # (IC, S_pad)

    # Zero the padded S entries (must be 0, not -inf) so padded attention
    # columns contribute nothing to the context.
    valid_col = jax.lax.broadcasted_iota(jnp.int32, (s_pad, 1), 0) < s_real
    valid_row = jax.lax.broadcasted_iota(jnp.int32, (1, s_pad), 1) < s_real
    theta_spp_t = jnp.where(valid_col, theta_spp_t, 0.0)
    g_spp = jnp.where(valid_row, g_spp, 0.0)

    # Attention scores in (S_pad, N) layout: PyTorch nn.Softmax(dim=1) on
    # (b, N, S) normalizes over N, which is the last (lane) axis here.
    scores = jnp.dot(theta_spp_t, xq, preferred_element_type=jnp.float32)    # (S_pad, N)
    m = jnp.max(scores, axis=-1, keepdims=True)
    e = jnp.exp(scores - m)
    denom = jnp.sum(e, axis=-1, keepdims=True)
    attn = e * pl.reciprocal(denom, approx=True)                             # (S_pad, N)

    # Context: (IC, S_pad) @ (S_pad, N), K aligned to 128.
    ctx = jnp.dot(g_spp, attn, preferred_element_type=jnp.float32)           # (IC, N)

    # conv_mask (1x1, IC -> C) + residual, written lane-dense (N last).
    out = jnp.dot(wmask_ref[...], ctx, preferred_element_type=jnp.float32) + x_cn
    o_ref[0] = out.astype(o_ref.dtype)


# ----------------------------------------------------------------------------
# Host-side glue
# ----------------------------------------------------------------------------
def build_additive_spp_mask(hy, wy, output_sizes, s_pad):
    """(S_pad, Hy*Wy) additive mask: 0 where pixel belongs to bin s, -1e30 else.

    PyTorch AdaptiveMaxPool2d bin boundaries: start=floor(i*H/O), end=ceil((i+1)*H/O).
    Bin order matches torch.cat([pool(x).view(b,c,-1) ...], dim=2).
    Padded rows (s >= S) are all-zero; their pooled values are zeroed in-kernel.
    """
    rows = []
    for o in output_sizes:
        for oi in range(o):
            h0 = (oi * hy) // o
            h1 = -((-(oi + 1) * hy) // o)
            for oj in range(o):
                w0 = (oj * wy) // o
                w1 = -((-(oj + 1) * wy) // o)
                m = np.full((hy, wy), _NEG, np.float32)
                m[h0:h1, w0:w1] = 0.0
                rows.append(m.reshape(-1))
    s_real = len(rows)
    assert s_pad >= s_real
    pad = [np.zeros(hy * wy, np.float32)] * (s_pad - s_real)
    return jnp.asarray(np.stack(rows + pad, axis=0)), s_real


def afnb_forward(x, y, w_phi, w_theta, w_g, w_mask, addmask, s_real):
    """x: (B,C,H,W), y: (B,C,Hy,Wy) NCHW; weights as (out, in) 2D."""
    b, c, h, w = x.shape
    _, _, hy, wy = y.shape
    ic = c // 2
    n = h * w
    ny = hy * wy
    s_pad = addmask.shape[0]

    # Zero-copy reshapes only -- no host-side transposes / extra HBM traffic.
    x_cn = x.reshape(b, c, n)                             # (B, C, N)
    y_cn = y.reshape(b, c, ny)                            # (B, C, Ny)
    w_tg = jnp.concatenate([w_theta, w_g], axis=0)        # (2IC, C) fused weight

    kernel = functools.partial(afnb_kernel, ic=ic, s_real=s_real)

    out_cn = pl.pallas_call(
        kernel,
        out_shape=jax.ShapeDtypeStruct((b, c, n), jnp.float32),
        grid_spec=pltpu.PrefetchScalarGridSpec(
            num_scalar_prefetch=0,
            grid=(b,),
            in_specs=[
                pl.BlockSpec((1, c, n), lambda i: (i, 0, 0)),     # x  (C, N)
                pl.BlockSpec((1, c, ny), lambda i: (i, 0, 0)),    # y  (C, Ny)
                pl.BlockSpec((s_pad, ny), lambda i: (0, 0)),      # additive SPP mask
                pl.BlockSpec((ic, c), lambda i: (0, 0)),          # w_phi
                pl.BlockSpec((2 * ic, c), lambda i: (0, 0)),      # [w_theta; w_g]
                pl.BlockSpec((c, ic), lambda i: (0, 0)),          # w_mask
            ],
            out_specs=pl.BlockSpec((1, c, n), lambda i: (i, 0, 0)),
        ),
        compiler_params=pltpu.CompilerParams(
            # Batch axis is parallel -> both TensorCores are fed on v7x (B>=2).
            dimension_semantics=("parallel",)),
    )(x_cn, y_cn, addmask, w_phi, w_tg, w_mask)

    return out_cn.reshape(b, c, h, w)


# ----------------------------------------------------------------------------
# Plain-JAX reference (mirrors the PyTorch forward exactly)
# ----------------------------------------------------------------------------
def afnb_reference(x, y, w_phi, w_theta, w_g, w_mask, output_sizes):
    b, c, h, w = x.shape
    ic = c // 2

    def conv1x1(inp, wt):  # wt: (out, in)
        return jnp.einsum('bchw,oc->bohw', inp, wt, precision='highest')

    def adaptive_max_pool(inp, o):
        _, _, hi, wi = inp.shape
        bins = []
        for oi in range(o):
            h0 = (oi * hi) // o
            h1 = -((-(oi + 1) * hi) // o)
            for oj in range(o):
                w0 = (oj * wi) // o
                w1 = -((-(oj + 1) * wi) // o)
                bins.append(jnp.max(inp[:, :, h0:h1, w0:w1], axis=(2, 3)))
        return jnp.stack(bins, axis=2)  # (B, C, O*O)

    def spp(inp):
        return jnp.concatenate([adaptive_max_pool(inp, o) for o in output_sizes],
                               axis=2)

    x_phi = conv1x1(x, w_phi).reshape(b, ic, h * w).transpose(0, 2, 1)
    y_theta = spp(conv1x1(y, w_theta))
    # NOTE: original PyTorch calls self.conv_g() with no input (a bug); we use y.
    y_g = spp(conv1x1(y, w_g)).transpose(0, 2, 1)
    scores = jnp.einsum('bnk,bks->bns', x_phi, y_theta, precision='highest')
    attn = jax.nn.softmax(scores, axis=1)          # dim=1 == the N axis
    ctx = jnp.einsum('bns,bsk->bnk', attn, y_g, precision='highest')
    ctx = ctx.transpose(0, 2, 1).reshape(b, ic, h, w)
    return conv1x1(ctx, w_mask) + x


if __name__ == "__main__":
    key = jax.random.PRNGKey(0)
    B, C, H, W = 2, 8, 16, 16           # channel=8 -> inter_channel=4, N=256
    Hy, Wy = 24, 24                     # context spatial size, Ny=576
    output_sizes = [1, 3, 6, 8]         # S = 1 + 9 + 36 + 64 = 110
    S = int(sum(o * o for o in output_sizes))
    S_PAD = 128                         # pad S to 128 for MXU/lane alignment

    kx, ky, k1, k2, k3, k4 = jax.random.split(key, 6)
    x = jax.random.normal(kx, (B, C, H, W), jnp.float32)
    y = jax.random.normal(ky, (B, C, Hy, Wy), jnp.float32)

    IC = C // 2
    # Deterministic synthetic 1x1 conv weights, stored as (out, in).
    w_phi = jax.random.normal(k1, (IC, C), jnp.float32) / np.sqrt(C)
    w_theta = jax.random.normal(k2, (IC, C), jnp.float32) / np.sqrt(C)
    # TODO(synk): original forward calls self.conv_g() with no input (PyTorch
    # bug / typo); implemented as conv_g(y), matching conv_theta's usage.
    w_g = jax.random.normal(k3, (IC, C), jnp.float32) / np.sqrt(C)
    w_mask = jax.random.normal(k4, (C, IC), jnp.float32) / np.sqrt(IC)

    addmask, s_real = build_additive_spp_mask(Hy, Wy, output_sizes, S_PAD)
    assert s_real == S

    out = afnb_forward(x, y, w_phi, w_theta, w_g, w_mask, addmask, s_real)
    out = jax.block_until_ready(out)

    ref = afnb_reference(x, y, w_phi, w_theta, w_g, w_mask, output_sizes)
    err = float(jnp.max(jnp.abs(out - ref)))
    assert out.shape == (B, C, H, W), out.shape
    assert bool(jnp.all(jnp.isfinite(out))), "non-finite output"
    assert err < 5e-2, f"max abs err {err}"
    print("KERNEL_OK")
</pallas_src>

<mosaic_0001>
module attributes {stable_mosaic.version = 11 : i64} {
  func.func @afnb_kernel(%arg0: i32, %arg1: memref<1x8x256xf32, #tpu.memory_space<vmem>>, %arg2: memref<1x8x576xf32, #tpu.memory_space<vmem>>, %arg3: memref<128x576xf32, #tpu.memory_space<vmem>>, %arg4: memref<4x8xf32, #tpu.memory_space<vmem>>, %arg5: memref<8x8xf32, #tpu.memory_space<vmem>>, %arg6: memref<8x4xf32, #tpu.memory_space<vmem>>, %arg7: memref<1x8x256xf32, #tpu.memory_space<vmem>>) attributes {dimension_semantics = [#tpu.dimension_semantics<parallel>], iteration_bounds = array<i64: 2>, scalar_prefetch = 0 : i64, scratch_operands = 0 : i64, tpu.core_type = #tpu.core_type<tc>, window_params = [{transform_indices = @transform_0, window_bounds = array<i64: 1, 8, 256>}, {transform_indices = @transform_1, window_bounds = array<i64: 1, 8, 576>}, {pipeline_mode = #tpu.pipeline_mode<synchronous>, transform_indices = @transform_2, window_bounds = array<i64: 128, 576>}, {pipeline_mode = #tpu.pipeline_mode<synchronous>, transform_indices = @transform_3, window_bounds = array<i64: 4, 8>}, {pipeline_mode = #tpu.pipeline_mode<synchronous>, transform_indices = @transform_4, window_bounds = array<i64: 8, 8>}, {pipeline_mode = #tpu.pipeline_mode<synchronous>, transform_indices = @transform_5, window_bounds = array<i64: 8, 4>}, {transform_indices = @transform_6, window_bounds = array<i64: 1, 8, 256>}]} {
    %c0 = arith.constant 0 : index
    %c0_0 = arith.constant 0 : index
    %c0_1 = arith.constant 0 : index
    %0 = vector.load %arg1[%c0, %c0_0, %c0_1] : memref<1x8x256xf32, #tpu.memory_space<vmem>>, vector<1x8x256xf32>
    %1 = vector.shape_cast %0 : vector<1x8x256xf32> to vector<8x256xf32>
    %c0_2 = arith.constant 0 : index
    %c0_3 = arith.constant 0 : index
    %c0_4 = arith.constant 0 : index
    %2 = vector.load %arg2[%c0_2, %c0_3, %c0_4] : memref<1x8x576xf32, #tpu.memory_space<vmem>>, vector<1x8x576xf32>
    %3 = vector.shape_cast %2 : vector<1x8x576xf32> to vector<8x576xf32>
    %c0_5 = arith.constant 0 : index
    %c0_6 = arith.constant 0 : index
    %4 = vector.load %arg3[%c0_5, %c0_6] : memref<128x576xf32, #tpu.memory_space<vmem>>, vector<128x576xf32>
    %c0_7 = arith.constant 0 : index
    %c0_8 = arith.constant 0 : index
    %5 = vector.load %arg5[%c0_7, %c0_8] : memref<8x8xf32, #tpu.memory_space<vmem>>, vector<8x8xf32>
    %cst = arith.constant dense<0.000000e+00> : vector<8x576xf32>
    %6 = tpu.matmul %5, %3, %cst {dimension_numbers = #tpu.dot_dimension_numbers<[1], [0], [0], [1], [0, 0, 1, 1], [], []>} : vector<8x8xf32>, vector<8x576xf32>, vector<8x576xf32> -> vector<8x576xf32>
    %7 = vector.extract_strided_slice %6 {offsets = [0, 0], sizes = [4, 576], strides = [1, 1]} : vector<8x576xf32> to vector<4x576xf32>
    %8 = vector.extract_strided_slice %6 {offsets = [4, 0], sizes = [4, 576], strides = [1, 1]} : vector<8x576xf32> to vector<4x576xf32>
    %c0_9 = arith.constant 0 : index
    %c0_10 = arith.constant 0 : index
    %9 = vector.load %arg4[%c0_9, %c0_10] : memref<4x8xf32, #tpu.memory_space<vmem>>, vector<4x8xf32>
    %cst_11 = arith.constant dense<0.000000e+00> : vector<4x256xf32>
    %10 = tpu.matmul %9, %1, %cst_11 {dimension_numbers = #tpu.dot_dimension_numbers<[1], [0], [0], [1], [0, 0, 1, 1], [], []>} : vector<4x8xf32>, vector<8x256xf32>, vector<4x256xf32> -> vector<4x256xf32>
    %11 = vector.shape_cast %4 : vector<128x576xf32> to vector<128x1x576xf32>
    %12 = vector.shape_cast %7 : vector<4x576xf32> to vector<1x4x576xf32>
    %13 = vector.broadcast %11 : vector<128x1x576xf32> to vector<128x4x576xf32>
    %14 = vector.broadcast %12 : vector<1x4x576xf32> to vector<128x4x576xf32>
    %15 = arith.addf %13, %14 : vector<128x4x576xf32>
    %cst_12 = arith.constant dense<0xFF800000> : vector<128x4xf32>
    %16 = vector.multi_reduction <maximumf>, %15, %cst_12 [2] : vector<128x4x576xf32> to vector<128x4xf32>
    %17 = vector.shape_cast %8 : vector<4x576xf32> to vector<4x1x576xf32>
    %18 = vector.shape_cast %4 : vector<128x576xf32> to vector<1x128x576xf32>
    %19 = vector.broadcast %17 : vector<4x1x576xf32> to vector<4x128x576xf32>
    %20 = vector.broadcast %18 : vector<1x128x576xf32> to vector<4x128x576xf32>
    %21 = arith.addf %19, %20 : vector<4x128x576xf32>
    %cst_13 = arith.constant dense<0xFF800000> : vector<4x128xf32>
    %22 = vector.multi_reduction <maximumf>, %21, %cst_13 [2] : vector<4x128x576xf32> to vector<4x128xf32>
    %23 = tpu.iota {dimensions = array<i32: 0>} : vector<128x1xi32>
    %c110_i32 = arith.constant 110 : i32
    %24 = vector.broadcast %c110_i32 : i32 to vector<128x1xi32>
    %25 = arith.cmpi slt, %23, %24 : vector<128x1xi32>
    %26 = tpu.iota {dimensions = array<i32: 1>} : vector<1x128xi32>
    %c110_i32_14 = arith.constant 110 : i32
    %27 = vector.broadcast %c110_i32_14 : i32 to vector<1x128xi32>
    %28 = arith.cmpi slt, %26, %27 : vector<1x128xi32>
    %cst_15 = arith.constant 0.000000e+00 : f32
    %29 = vector.shape_cast %25 : vector<128x1xi1> to vector<128x1xi1>
    %30 = vector.broadcast %29 : vector<128x1xi1> to vector<128x4xi1>
    %31 = vector.broadcast %cst_15 : f32 to vector<128x4xf32>
    %32 = arith.select %30, %16, %31 : vector<128x4xi1>, vector<128x4xf32>
    %cst_16 = arith.constant 0.000000e+00 : f32
    %33 = vector.shape_cast %28 : vector<1x128xi1> to vector<1x128xi1>
    %34 = vector.broadcast %33 : vector<1x128xi1> to vector<4x128xi1>
    %35 = vector.broadcast %cst_16 : f32 to vector<4x128xf32>
    %36 = arith.select %34, %22, %35 : vector<4x128xi1>, vector<4x128xf32>
    %cst_17 = arith.constant dense<0.000000e+00> : vector<128x256xf32>
    %37 = tpu.matmul %32, %10, %cst_17 {dimension_numbers = #tpu.dot_dimension_numbers<[1], [0], [0], [1], [0, 0, 1, 1], [], []>} : vector<128x4xf32>, vector<4x256xf32>, vector<128x256xf32> -> vector<128x256xf32>
    %cst_18 = arith.constant dense<0xFF800000> : vector<128xf32>
    %38 = vector.multi_reduction <maximumf>, %37, %cst_18 [1] : vector<128x256xf32> to vector<128xf32>
    %39 = vector.shape_cast %38 : vector<128xf32> to vector<128x1xf32>
    %40 = vector.broadcast %39 : vector<128x1xf32> to vector<128x256xf32>
    %41 = arith.subf %37, %40 : vector<128x256xf32>
    %42 = math.exp %41 : vector<128x256xf32>
    %cst_19 = arith.constant dense<0.000000e+00> : vector<128xf32>
    %43 = vector.multi_reduction <add>, %42, %cst_19 [1] : vector<128x256xf32> to vector<128xf32>
    %44 = vector.shape_cast %43 : vector<128xf32> to vector<128x1xf32>
    %45 = tpu.reciprocal %44 {approx = true} : vector<128x1xf32> -> vector<128x1xf32>
    %46 = vector.broadcast %45 : vector<128x1xf32> to vector<128x256xf32>
    %47 = arith.mulf %42, %46 : vector<128x256xf32>
    %cst_20 = arith.constant dense<0.000000e+00> : vector<4x256xf32>
    %48 = tpu.matmul %36, %47, %cst_20 {dimension_numbers = #tpu.dot_dimension_numbers<[1], [0], [0], [1], [0, 0, 1, 1], [], []>} : vector<4x128xf32>, vector<128x256xf32>, vector<4x256xf32> -> vector<4x256xf32>
    %c0_21 = arith.constant 0 : index
    %c0_22 = arith.constant 0 : index
    %49 = vector.load %arg6[%c0_21, %c0_22] : memref<8x4xf32, #tpu.memory_space<vmem>>, vector<8x4xf32>
    %cst_23 = arith.constant dense<0.000000e+00> : vector<8x256xf32>
    %50 = tpu.matmul %49, %48, %cst_23 {dimension_numbers = #tpu.dot_dimension_numbers<[1], [0], [0], [1], [0, 0, 1, 1], [], []>} : vector<8x4xf32>, vector<4x256xf32>, vector<8x256xf32> -> vector<8x256xf32>
    %51 = arith.addf %50, %1 : vector<8x256xf32>
    %c0_24 = arith.constant 0 : index
    %c0_25 = arith.constant 0 : index
    %c0_26 = arith.constant 0 : index
    %52 = vector.load %arg7[%c0_24, %c0_25, %c0_26] : memref<1x8x256xf32, #tpu.memory_space<vmem>>, vector<1x8x256xf32>
    %53 = vector.shape_cast %52 : vector<1x8x256xf32> to vector<8x256xf32>
    %54 = vector.shape_cast %51 : vector<8x256xf32> to vector<1x8x256xf32>
    tpu.vector_store %arg7[%c0_24, %c0_25, %c0_26], %54 {strides = array<i32>} : memref<1x8x256xf32, #tpu.memory_space<vmem>>, vector<1x8x256xf32>,
    return
  }
  func.func @transform_0(%arg0: i32) -> (i32, i32, i32) {
    %c0_i32 = arith.constant 0 : i32
    %c0_i32_0 = arith.constant 0 : i32
    %c0_i32_1 = arith.constant 0 : i32
    return %arg0, %c0_i32, %c0_i32_0 : i32, i32, i32
  }
  func.func @transform_1(%arg0: i32) -> (i32, i32, i32) {
    %c0_i32 = arith.constant 0 : i32
    %c0_i32_0 = arith.constant 0 : i32
    %c0_i32_1 = arith.constant 0 : i32
    return %arg0, %c0_i32, %c0_i32_0 : i32, i32, i32
  }
  func.func @transform_2(%arg0: i32) -> (i32, i32) {
    %c0_i32 = arith.constant 0 : i32
    %c0_i32_0 = arith.constant 0 : i32
    %c0_i32_1 = arith.constant 0 : i32
    return %c0_i32, %c0_i32_0 : i32, i32
  }
  func.func @transform_3(%arg0: i32) -> (i32, i32) {
    %c0_i32 = arith.constant 0 : i32
    %c0_i32_0 = arith.constant 0 : i32
    %c0_i32_1 = arith.constant 0 : i32
    return %c0_i32, %c0_i32_0 : i32, i32
  }
  func.func @transform_4(%arg0: i32) -> (i32, i32) {
    %c0_i32 = arith.constant 0 : i32
    %c0_i32_0 = arith.constant 0 : i32
    %c0_i32_1 = arith.constant 0 : i32
    return %c0_i32, %c0_i32_0 : i32, i32
  }
  func.func @transform_5(%arg0: i32) -> (i32, i32) {
    %c0_i32 = arith.constant 0 : i32
    %c0_i32_0 = arith.constant 0 : i32
    %c0_i32_1 = arith.constant 0 : i32
    return %c0_i32, %c0_i32_0 : i32, i32
  }
  func.func @transform_6(%arg0: i32) -> (i32, i32, i32) {
    %c0_i32 = arith.constant 0 : i32
    %c0_i32_0 = arith.constant 0 : i32
    %c0_i32_1 = arith.constant 0 : i32
    return %arg0, %c0_i32, %c0_i32_0 : i32, i32, i32
  }
}

</mosaic_0001>

<bundles_post_ra>
// kernel: tpu_custom_call.1
= control target key start
LH: loop header
LB: loop body
LE: loop exit
PB: predicated region body
PF: predicated region fallthrough
CT: control target
= control target key end

     0   :  { %11 = vsyncpa [#allocation3], 0  ;;  %s12298_s0 = inlined_call_operand.vmem [shape: f32[2,8,256], index: 0, kind: input, shape index: {}]   ;;  %s12299_s1 = inlined_call_operand.vmem [shape: f32[2,8,576], index: 1, kind: input, shape index: {}]   ;;  %s12300_s2 = inlined_call_operand.vmem [shape: f32[128,576], index: 2, kind: input, shape index: {}]   ;;  %s12301_s3 = inlined_call_operand.vmem [shape: f32[4,8], index: 3, kind: input, shape index: {}]   ;;  %s12302_s4 = inlined_call_operand.vmem [shape: f32[8,8], index: 4, kind: input, shape index: {}]   ;;  %s12303_s5 = inlined_call_operand.vmem [shape: f32[8,4], index: 5, kind: input, shape index: {}]   ;;  %s12304_s6 = inlined_call_operand.hbm [shape: f32[2,8,256], index: 6, kind: output, shape index: {}]  }
   0x1   :  { %13 = vsyncpa [#allocation3 + $0x1], 0  ;;  %s7149_s21 = smov 0   ;;  %s7151_s22 = smov 0  }
   0x2   :  { %s7153_s23 = smov 0   ;;  %s7155_s24 = smov 0  }
   0x3 LB: > { %s7170_s25 = sadd.s32 4294967295, %s7111_s24   ;;  %s6754_s26 = sadd.s32 4294967294, %s7111_s24   ;;  %s7111_s24 = sphi %s7155_s24, %s12909_s24   ;;  %s7107_s23 = sphi %s7153_s23, %s12908_s23   ;;  %s7103_s22 = sphi %s7151_s22, %s12907_s22   ;;  %s7099_s21 = sphi %s7149_s21, %s12906_s21  }
   0x4   : > { %s7174_s27 = sadd.s32 1, %s7111_s24   ;;  %s162_s28 = sadd.s32 1, %s7107_s23 }
   0x5   : > { %s159_s29 = ssub.s32 %s7111_s24, %s7174_s27  ;;  %p172_p0 = scmp.ne.s32.totalorder %s7107_s23, %s7103_s22 }
   0x6   : > { %p160_p1 = scmp.eq.s32.totalorder %s159_s29, 0  ;;  %p173_p2 = scmp.eq.s32.totalorder %s7170_s25, 1 }
   0x7   : > { %p178_p3 = scmp.ne.s32.totalorder %s7103_s22, %s7099_s21  ;;  %p179_p4 = scmp.eq.s32.totalorder %s6754_s26, 1 }
   0x8   : > { %s7185_s30 = scalar_select %p160_p1, %s7107_s23, %s162_s28  }
   0x9   : > { %p7187_p5 = por %p173_p2, %p172_p0  ;;  %p7191_p6 = por %p179_p4, %p178_p3 }
   0xa   : > { %p6757_p7 = scmp.ge.s32.totalorder %s7111_s24, 1  ;;  %p225_p8 = scmp.lt.s32.totalorder %s7111_s24, 3 }
   0xc   : > { %p226_p9 = pnand %p6757_p7, %p225_p8 }
   0xe   : > { %229 = sbr.rel (%p226_p9) target bundleno = 1754 (0x6da), region = 44 }
  0x13   : > { %p260_p10 = scmp.lt.s32.totalorder %s7170_s25, 1  ;;  %v357_v0 = vld [vmem:[%s12302_s4] sm:$0xff]  ;;  %vm12309_vm0 = vcmask 64512   ;;  %v308_v6 = vld [vmem:[%s12300_s2 + $0xf8] sm:$0xff]  ;;  %v310_v8 = vld [vmem:[%s12300_s2 + $0x108] sm:$0xff]  ;;  %vm12312_vm1 = vcmask 1044484  }
  0x14   : > { %v309_v7 = vld [vmem:[%s12300_s2 + $0x100] sm:$0xff]  ;;  %v311_v9 = vld [vmem:[%s12300_s2 + $0x110] sm:$0xff]  ;;  %v7225_v10 = vrot.slane %v308_v6, 7  ;;  %vm667_vm2 = vcmask 1042434   ;;  %v7234_v13 = vrot.slane %v310_v8, 5  ;;  %vm12305_vm3 = vcmask 1045508  }
  0x15   : > { %s7199_s9 = scalar_select %p260_p10, %s7170_s25, 1  ;;  %v7230_v11 = vld [vmem:[%s12300_s2 + $0xf0] sm:$0xff]  ;;  %v7232_v12 = vrot.slane %v309_v7, 6  ;;  %v7236_v14 = vrot.slane %v311_v9, 4  ;;  %vm687_vm4 = vcmask 1046528   ;;  %vm12320_vm5 = vcmask 1043458  }
  0x16   : > { %v927_v15 = vsel %vm12312_vm1, %v7230_v11, %v7225_v10  ;;  %v917_v16 = vsel %vm667_vm2, %v7230_v11, %v7225_v10  ;;  %vm671_vm6 = vcmask 1045509   ;;  %vm12306_vm7 = vcmask 1046532   ;;  %v313_v40 = vld [vmem:[%s12300_s2 + $0x120] sm:$0xff]  ;;  %v314_v43 = vld [vmem:[%s12300_s2 + $0x128] sm:$0xff]  ;;  %v315_v48 = vld [vmem:[%s12300_s2 + $0x130] sm:$0xff]  ;;  %s257_s17 = sand.u32 1, %s7103_s22  }
  0x17   : > { %s6814_s10 = smul.u32 40, %s7199_s9  ;;  %vm12311_vm8 = vcmask 1040384   ;;  %v928_v17 = vsel %vm12305_vm3, %v927_v15, %v7232_v12  ;;  %v929_v18 = vsel %vm687_vm4, %v7236_v14, %v7234_v13  ;;  %vm12317_vm9 = vcmask 1044482   ;;  %v316_v52 = vld [vmem:[%s12300_s2 + $0x138] sm:$0xff]  ;;  %s6810_s28 = sshll.u32 %s7199_s9, 4 }
  0x18   : > { %v918_v19 = vsel %vm12320_vm5, %v917_v16, %v7232_v12  ;;  %v919_v20 = vsel %vm671_vm6, %v7234_v13, %v7236_v14  ;;  %vm12322_vm10 = vcmask 1043459   ;;  %vm12307_vm11 = vcmask 1046533   ;;  %v7328_v57 = vld [vmem:[%s12300_s2 + $0x118] sm:$0xff]  ;;  %s6758_s18 = sshll.u32 %s257_s17, 4  ;;  %s6811_s20 = sshll.u32 %s7170_s25, 4 }
  0x19   : > { %s269_s13 = scalar_lea.vmem %s12299_s1, %s6814_s10  ;;  %v932_v21 = vsel %vm671_vm6, %v7230_v11, %v7225_v10  ;;  %vm12308_vm12 = vcmask 1044480   ;;  %v934_v23 = vsel %vm12311_vm8, %v7234_v13, %v7236_v14  ;;  %v930_v24 = vsel %vm12306_vm7, %v928_v17, %v929_v18  ;;  %s7403_s10 = scalar_lea.vmem %s12298_s0, %s6810_s28 }
  0x1a   : > { %v272_v1 = vld [vmem:[%s269_s13] sm:$0xff]  ;;  %v274_v2 = vld [vmem:[%s269_s13 + $0x10] sm:$0xff]  ;;  %v275_v3 = vld [vmem:[%s269_s13 + $0x18] sm:$0xff]  ;;  %v933_v22 = vsel %vm12307_vm11, %v932_v21, %v7232_v12  ;;  %vm12313_vm13 = vcmask 1041408   ;;  %v908_v25 = vsel %vm12311_vm8, %v7230_v11, %v7225_v10  ;;  %vm12316_vm14 = vcmask 1044483   ;;  %s259_s19 = scalar_lea.vmem [#allocation2], %s6758_s18  ;;  %s6678_s9 = scalar_lea.hbm %s12304_s6, %s6811_s20 }
  0x1b   : > { %377 = vmatpush.msra.mxu1 %v272_v1  ;;  %417 = vmatpush.msra.mxu2 %v274_v2  ;;  %v273_v4 = vld [vmem:[%s269_s13 + $0x8] sm:$0xff]  ;;  %v276_v5 = vld [vmem:[%s269_s13 + $0x20] sm:$0xff]  ;;  %v920_v26 = vsel %vm12317_vm9, %v918_v19, %v919_v20  ;;  %vm679_vm15 = vcmask 1046534   ;;  %vm12315_vm3 = vcmask 1045507   ;;  %v922_v27 = vsel %vm12322_vm10, %v7230_v11, %v7225_v10  ;;  %s6680_s29 = sshll.u32 %s259_s19, 4  ;;  %s6682_s11 = sshll.u32 %s6678_s9, 4  ;;  %s6681_s29 = int_to_ptr.vmem [resolvable:$true] %s6680_s29  ;;  %s6683_s11 = int_to_ptr.hbm [resolvable:$true] %s6682_s11 }
  0x1c   : > { %6762 = vmatmul.msk.f32.vlgmr.msra.gmra.mxu1 %vm12309_vm0, %v357_v0  ;;  %437 = vmatpush.msra.mxu3 %v275_v3  ;;  %v935_v28 = vsel %vm12308_vm12, %v934_v23, %v933_v22  ;;  %v923_v29 = vsel %vm12316_vm14, %v922_v27, %v7232_v12  ;;  %v924_v30 = vsel %vm679_vm15, %v7234_v13, %v7236_v14  ;;  %vm658_vm7 = vcmask 1041409   ;;  %s6667_s12 = scalar_lea.sflag [#allocation3], %s257_s17  ;;  %s7063_s13 = sshra.s32 %s6683_s11, 4  ;;  %s7064_s13 = int_to_ptr.hbm [resolvable:$true] %s7063_s13 }
  0x1d   : > { %6764 = vmatmul.msk.f32.vlgmr.msra.gmra.mxu2 %vm12309_vm0, %v357_v0  ;;  %6765 = vmatmul.msk.f32.vlgmr.msra.gmra.mxu3 %vm12309_vm0, %v357_v0  ;;  %vm12321_vm11 = vcmask 1042432   ;;  %v909_v31 = vsel %vm12313_vm13, %v908_v25, %v7232_v12  ;;  %v910_v32 = vsel %vm12322_vm10, %v7234_v13, %v7236_v14  ;;  %v7281_v33 = vrot.slane %v930_v24, 4  ;;  %s7065_s14 = scalar_lea.hbm %s7064_s13, 16  ;;  %s7069_s16 = scalar_lea.hbm %s12304_s6, 32 }
  0x1e   : > { %397 = vmatpush.msrb.mxu1 %v273_v4  ;;  %457 = vmatpush.msra.mxu0 %v276_v5  ;;  %v925_v34 = vsel %vm12315_vm3, %v923_v29, %v924_v30  ;;  %v7284_v35 = vrot.slane %v920_v26, 2  ;;  %v7286_v36 = vrot.slane %v935_v28, 5  ;;  %vm12323_vm12 = vcmask 1042433   ;;  %p7066_p11 = scmp.ne.s32.totalorder %s7064_s13, %s7065_s14  ;;  %p7070_p0 = scmp.lt.s32.totalorder %s7064_s13, %s12304_s6 }
  0x1f   : > { %6766 = vmatmul.msk.f32.vlgmr.msra.gmra.mxu0 %vm12309_vm0, %v357_v0  ;;  %v912_v37 = vsel %vm658_vm7, %v7230_v11, %v7225_v10  ;;  %v7292_v38 = vsel %vm12321_vm11, %v909_v31, %v910_v32  ;;  %v7294_v39 = vrot.slane %v925_v34, 3  ;;  %v914_v42 = vsel %vm12312_vm1, %v7234_v13, %v7236_v14  ;;  %p7071_p1 = scmp.lt.s32.totalorder %s7069_s16, %s7065_s14 }
  0x20   : > { %v913_v41 = vsel %vm12323_vm12, %v912_v37, %v7232_v12  ;;  %v1558_v44 = vperm.slane %v7281_v33, 0  ;;  %v1548_v45 = vperm.slane %v7284_v35, 0  ;;  %v1538_v46 = vperm.slane %v7292_v38, 0  ;;  %p7067_p12 = pnand %p7066_p11, %p7187_p5 }
  0x21   : > { %v1563_v47 = vperm.slane %v7286_v36, 0  ;;  %v1559_v49 = vperm.slane %v7281_v33, 1  ;;  %v1549_v50 = vperm.slane %v7284_v35, 1  ;;  %v1539_v51 = vperm.slane %v7292_v38, 1  ;;  %p7072_p2 = por %p7071_p1, %p7070_p0 }
  0x22   : > { %v7320_v53 = vrot.slane %v313_v40, 7  ;;  %v1564_v54 = vperm.slane %v7286_v36, 1  ;;  %v1553_v55 = vperm.slane %v7294_v39, 0  ;;  %v7330_v58 = vrot.slane %v314_v43, 6  ;;  %p7068_p13 = pneg %p7067_p12 }
  0x23   : > { %v1560_v59 = vperm.slane %v7281_v33, 2  ;;  %v1561_v60 = vperm.slane %v7281_v33, 3  ;;  %v7334_v61 = vrot.slane %v315_v48, 5  ;;  %v1562_v63 = vperm.slane %v7281_v33, 4 }
  0x24   : > { %6763 = vmatmul.msk.f32.vlgmr.msrb.gmra.mxu1 %vm12309_vm0, %v357_v0  ;;  %vm12310_vm0 = vcmask 1043457   ;;  %v947_v62 = vsel %vm12311_vm8, %v7328_v57, %v7320_v53  ;;  %v7340_v0 = vrot.slane %v316_v52, 4  ;;  %v942_v1 = vsel %vm687_vm4, %v7225_v10, %v7230_v11  ;;  %p7073_p3 = pnand %p7072_p2, %p7068_p13 }
  0x25   : > { %v915_v56 = vsel %vm12310_vm0, %v913_v41, %v914_v42  ;;  %vm12314_vm0 = vcmask 1046529   ;;  %v1550_v2 = vperm.slane %v7284_v35, 2  ;;  %v1540_v3 = vperm.slane %v7292_v38, 2 }
  0x26   : > { %v1565_v4 = vperm.slane %v7286_v36, 2  ;;  %v1554_v5 = vperm.slane %v7294_v39, 1  ;;  %v7349_v6 = vrot.slane %v915_v56, 1  ;;  %v948_v7 = vsel %vm12313_vm13, %v947_v62, %v7330_v58 }
  0x27   : > { %v949_v8 = vsel %vm12322_vm10, %v7334_v61, %v7340_v0  ;;  %vm12319_vm8 = vcmask 1045504   ;;  %vm710_vm1 = vcmask 1046530   ;;  %v943_v9 = vsel %vm12314_vm0, %v7232_v12, %v942_v1 }
  0x28   : > { %v944_v15 = vsel %vm667_vm2, %v7234_v13, %v7236_v14  ;;  %v937_v16 = vsel %vm679_vm15, %v7230_v11, %v7225_v10  ;;  %v1551_v17 = vperm.slane %v7284_v35, 3  ;;  %v1541_v18 = vperm.slane %v7292_v38, 3 }
  0x29   : > { %v1566_v19 = vperm.slane %v7286_v36, 3  ;;  %v1555_v20 = vperm.slane %v7294_v39, 2  ;;  %vm12318_vm13 = vcmask 1045505   ;;  %v938_v21 = vsel %vm12319_vm8, %v7232_v12, %v937_v16  ;;  %v462_v16 = vld [vmem:[%s12301_s3] sm:$0xf] }
  0x2a   : > { %v939_v22 = vsel %vm658_vm7, %v7234_v13, %v7236_v14  ;;  %v961_v10 = vsel %vm12322_vm10, %v7328_v57, %v7320_v53  ;;  %v1552_v11 = vperm.slane %v7284_v35, 4  ;;  %v1542_v23 = vperm.slane %v7292_v38, 4 }
  0x2b   : > { %v7379_v24 = vsel %vm12321_vm11, %v948_v7, %v949_v8  ;;  %v945_v25 = vsel %vm710_vm1, %v944_v15, %v943_v9  ;;  %v1567_v26 = vperm.slane %v7286_v36, 4  ;;  %v1543_v12 = vperm.slane %v7349_v6, 0  ;;  %v270_v15 = vld [vmem:[%s7403_s10] sm:$0xff] }
  0x2c   : > { %v962_v13 = vsel %vm12316_vm14, %v961_v10, %v7330_v58  ;;  %v963_v14 = vsel %vm679_vm15, %v7334_v61, %v7340_v0  ;;  %vm3218_vm0 = vcmask 1043456   ;;  %v1556_v27 = vperm.slane %v7294_v39, 3  ;;  %481 = vmatpush.msra.mxu1 %v270_v15 }
  0x2d   : > { %v1544_v28 = vperm.slane %v7349_v6, 1  ;;  %v940_v29 = vsel %vm12318_vm13, %v939_v22, %v938_v21  ;;  %v964_v30 = vsel %vm12315_vm3, %v962_v13, %v963_v14  ;;  %v1557_v31 = vperm.slane %v7294_v39, 4 }
  0x2e   : > { %v1545_v32 = vperm.slane %v7349_v6, 2  ;;  %v1578_v34 = vperm.slane %v7379_v24, 0  ;;  %v7397_v37 = vrot.slane %v945_v25, 7  ;;  %v1546_v40 = vperm.slane %v7349_v6, 3 }
  0x2f   : > { %v956_v43 = vsel %vm667_vm2, %v7328_v57, %v7320_v53  ;;  %vm3226_vm3 = vcmask 519168   ;;  %v7410_v48 = vrot.slane %v940_v29, 6  ;;  %v7412_v52 = vrot.slane %v964_v30, 3 }
  0x30   : > { %v957_v56 = vsel %vm12320_vm5, %v956_v43, %v7330_v58  ;;  %v958_v62 = vsel %vm671_vm6, %v7334_v61, %v7340_v0  ;;  %v1547_v1 = vperm.slane %v7349_v6, 4  ;;  %v1582_v8 = vperm.slane %v7379_v24, 4 }
  0x31   : > { %v959_v9 = vsel %vm12317_vm9, %v957_v56, %v958_v62  ;;  %v1573_v21 = vperm.slane %v7397_v37, 0  ;;  %v951_v29 = vsel %vm658_vm7, %v7328_v57, %v7320_v53  ;;  %vm12437_vm14 = vcmask 64512  }
  0x32   : > { %v7429_v10 = vrot.slane %v959_v9, 2  ;;  %6767 = vmatmul.msk.f32.vlgmr.msra.gmra.mxu1 %vm12437_vm14, %v462_v16  ;;  %v952_v56 = vsel %vm12323_vm12, %v951_v29, %v7330_v58  ;;  %vm12438_vm9 = vcmask 1044484   ;;  %vm12439_vm14 = vcmask 1043457  }
  0x33   : > { %v953_v62 = vsel %vm12438_vm9, %v7334_v61, %v7340_v0  ;;  %vm12452_vm9 = vcmask 1040384  }
  0x34   : > { %v7451_v16 = vsel %vm12439_vm14, %v952_v56, %v953_v62  ;;  %vm12453_vm14 = vcmask 1046533  }
  0x99   : > { %v7445_v9 = vpop.f32.mrf.mxu1 }
  0x9a   : > { %4633 = vst [vmem:[#allocation1] sm:$0xff] %v7445_v9  ;;  %v2838_v29 = vadd.f32 %v1558_v44, %v7445_v9  ;;  %v2828_v43 = vadd.f32 %v1548_v45, %v7445_v9  ;;  %v2818_v15 = vadd.f32 %v1538_v46, %v7445_v9  ;;  %v2843_v13 = vadd.f32 %v1563_v47, %v7445_v9 }
  0x9b   : > { %v2833_v56 = vadd.f32 %v1553_v55, %v7445_v9  ;;  %v2823_v62 = vadd.f32 %v1543_v12, %v7445_v9  ;;  %v2858_v44 = vadd.f32 %v1578_v34, %v7445_v9  ;;  %v7472_v14 = vadd.f32 %v1573_v21, %v7445_v9 }
  0x9c   : > { %v7474_v45 = vpop.f32.mrf.mxu0  ;;  %v3792_v30 = vsel %vm3218_vm0, %v2838_v29, -inf  ;;  %v3770_v46 = vsel %vm3218_vm0, %v2828_v43, -inf  ;;  %v3748_v25 = vsel %vm3218_vm0, %v2818_v15, -inf  ;;  %v7480_v47 = vsel %vm3218_vm0, %v2843_v13, -inf }
  0x9d   : > { %4637 = vst [vmem:[#allocation1 + $0x24] sm:$0xff] %v7474_v45  ;;  %v2842_v55 = vadd.f32 %v1562_v63, %v7474_v45  ;;  %v2832_v12 = vadd.f32 %v1552_v11, %v7474_v45  ;;  %v2822_v34 = vadd.f32 %v1542_v23, %v7474_v45  ;;  %v2847_v21 = vadd.f32 %v1567_v26, %v7474_v45 }
  0x9e   : > { %v2837_v13 = vadd.f32 %v1557_v31, %v7474_v45  ;;  %v7497_v43 = vsel %vm3218_vm0, %v2833_v56, -inf  ;;  %v2827_v15 = vadd.f32 %v1547_v1, %v7474_v45  ;;  %v7501_v63 = vsel %vm3218_vm0, %v2823_v62, -inf }
  0x9f   : > { %v3799_v11 = vsel %vm3226_vm3, %v2842_v55, -inf  ;;  %v3777_v29 = vsel %vm3226_vm3, %v2832_v12, -inf  ;;  %v3755_v23 = vsel %vm3226_vm3, %v2822_v34, -inf  ;;  %v7507_v22 = vsel %vm3226_vm3, %v2847_v21, -inf }
  0xa0   : > { %v7509_v26 = vpop.f32.mrf.mxu2  ;;  %v7511_v31 = vpop.f32.mrf.mxu3  ;;  %v7514_v56 = vsel %vm3226_vm3, %v2837_v13, -inf  ;;  %v7517_v1 = vsel %vm3226_vm3, %v2827_v15, -inf  ;;  %v7520_v62 = vadd.f32 %v1582_v8, %v7474_v45  ;;  %v7523_v55 = vsel %vm3218_vm0, %v2858_v44, -inf }
  0xa1   : > { %v7525_v12 = vpop.f32.mrf.mxu1  ;;  %4635 = vst [vmem:[#allocation1 + $0x12] sm:$0xff] %v7509_v26  ;;  %v2840_v34 = vadd.f32 %v1560_v59, %v7509_v26  ;;  %v2841_v21 = vadd.f32 %v1561_v60, %v7511_v31  ;;  %v2830_v8 = vadd.f32 %v1550_v2, %v7509_v26  ;;  %v2831_v44 = vadd.f32 %v1551_v17, %v7511_v31 }
  0xa2   : > { %4634 = vst [vmem:[#allocation1 + $0x9] sm:$0xff] %v7525_v12  ;;  %v2839_v13 = vadd.f32 %v1559_v49, %v7525_v12  ;;  %v2829_v59 = vadd.f32 %v1549_v50, %v7525_v12  ;;  %v2819_v60 = vadd.f32 %v1539_v51, %v7525_v12  ;;  %v2820_v2 = vadd.f32 %v1540_v3, %v7509_v26 }
  0xa3   : > { %4636 = vst [vmem:[#allocation1 + $0x1b] sm:$0xff] %v7511_v31  ;;  %v3795_v17 = vsel %vm3218_vm0, %v2840_v34, -inf  ;;  %v3797_v15 = vsel %vm3218_vm0, %v2841_v21, -inf  ;;  %v3773_v33 = vsel %vm3218_vm0, %v2830_v8, -inf  ;;  %v3775_v49 = vsel %vm3218_vm0, %v2831_v44, -inf }
  0xa4   : > { %v3793_v35 = vsel %vm3218_vm0, %v2839_v13, -inf  ;;  %v3771_v50 = vsel %vm3218_vm0, %v2829_v59, -inf  ;;  %v2821_v51 = vadd.f32 %v1541_v18, %v7511_v31  ;;  %v3749_v3 = vsel %vm3218_vm0, %v2819_v60, -inf }
  0xa5   : > { %v3794_v7 = vmax.f32 %v3792_v30, %v3793_v35  ;;  %v3772_v42 = vmax.f32 %v3770_v46, %v3771_v50  ;;  %v3750_v41 = vmax.f32 %v3748_v25, %v3749_v3  ;;  %v3751_v34 = vsel %vm3218_vm0, %v2820_v2, -inf }
  0xa6   : > { %v3753_v21 = vsel %vm3218_vm0, %v2821_v51, -inf  ;;  %v2844_v8 = vadd.f32 %v1564_v54, %v7525_v12  ;;  %v2845_v44 = vadd.f32 %v1565_v4, %v7509_v26  ;;  %v2846_v38 = vadd.f32 %v1566_v19, %v7511_v31 }
  0xa7   : > { %v3796_v18 = vmax.f32 %v3794_v7, %v3795_v17  ;;  %v3774_v30 = vmax.f32 %v3772_v42, %v3773_v33  ;;  %v3752_v46 = vmax.f32 %v3750_v41, %v3751_v34  ;;  %v2834_v25 = vadd.f32 %v1554_v5, %v7525_v12 }
  0xa8   : > { %v3804_v13 = vsel %vm3218_vm0, %v2844_v8, -inf  ;;  %v3806_v59 = vsel %vm3218_vm0, %v2845_v44, -inf  ;;  %v3808_v54 = vsel %vm3218_vm0, %v2846_v38, -inf  ;;  %v2835_v4 = vadd.f32 %v1555_v20, %v7509_v26 }
  0xa9   : > { %v3798_v60 = vmax.f32 %v3796_v18, %v3797_v15  ;;  %v3776_v36 = vmax.f32 %v3774_v30, %v3775_v49  ;;  %v3754_v19 = vmax.f32 %v3752_v46, %v3753_v21  ;;  %v3805_v42 = vmax.f32 %v7480_v47, %v3804_v13 }
  0xaa   : > { %v2836_v41 = vadd.f32 %v1556_v27, %v7511_v31  ;;  %v3782_v5 = vsel %vm3218_vm0, %v2834_v25, -inf  ;;  %v3784_v7 = vsel %vm3218_vm0, %v2835_v4, -inf  ;;  %v2824_v2 = vadd.f32 %v1544_v28, %v7525_v12 }
  0xab   : > { %v3800_v17 = vmax.f32 %v3798_v60, %v3799_v11  ;;  %v3778_v33 = vmax.f32 %v3776_v36, %v3777_v29  ;;  %v3756_v20 = vmax.f32 %v3754_v19, %v3755_v23  ;;  %v3807_v15 = vmax.f32 %v3805_v42, %v3806_v59 }
  0xac   : > { %v3783_v49 = vmax.f32 %v7497_v43, %v3782_v5  ;;  %v3786_v47 = vsel %vm3218_vm0, %v2836_v41, -inf  ;;  %v2825_v39 = vadd.f32 %v1545_v32, %v7509_v26  ;;  %v2826_v27 = vadd.f32 %v1546_v40, %v7511_v31 }
  0xad   : > { %3801 = vmax.xlane.f32.xlu2 %v3800_v17  ;;  %3779 = vmax.xlane.f32.xlu1 %v3778_v33  ;;  %v3809_v35 = vmax.f32 %v3807_v15, %v3808_v54  ;;  %v3760_v28 = vsel %vm3218_vm0, %v2824_v2, -inf  ;;  %v12440_v11 = vperm.slane %v7379_v24, 1  ;;  %v12441_v43 = vperm.slane %v7379_v24, 2 }
  0xae   : > { %3757 = vmax.xlane.f32.xlu0 %v3756_v20  ;;  %v3785_v50 = vmax.f32 %v3783_v49, %v3784_v7  ;;  %v3761_v32 = vmax.f32 %v7501_v63, %v3760_v28  ;;  %v3762_v6 = vsel %vm3218_vm0, %v2825_v39, -inf  ;;  %v3764_v40 = vsel %vm3218_vm0, %v2826_v27, -inf }
  0xaf   : > { %v2859_v29 = vadd.f32 %v12440_v11, %v7525_v12  ;;  %v2860_v23 = vadd.f32 %v12441_v43, %v7509_v26  ;;  %v3811_v51 = vmax.f32 %v3809_v35, %v7507_v22  ;;  %v12442_v3 = vperm.slane %v7379_v24, 3 }
  0xb0   : > { %v3787_v44 = vmax.f32 %v3785_v50, %v3786_v47  ;;  %v3763_v38 = vmax.f32 %v3761_v32, %v3762_v6  ;;  %v3843_v63 = vsel %vm3226_vm3, %v7520_v62, -inf  ;;  %v12443_v22 = vperm.slane %v7397_v37, 1 }
  0xb1   : > { %v2861_v34 = vadd.f32 %v12442_v3, %v7511_v31  ;;  %v3837_v21 = vsel %vm3218_vm0, %v2859_v29, -inf  ;;  %v3839_v8 = vsel %vm3218_vm0, %v2860_v23, -inf  ;;  %v12444_v24 = vperm.slane %v7397_v37, 2 }
  0xb2   : > { %v3838_v18 = vmax.f32 %v7523_v55, %v3837_v21  ;;  %v2854_v46 = vadd.f32 %v12443_v22, %v7525_v12  ;;  %v12445_v13 = vperm.slane %v7397_v37, 3  ;;  %v3789_v54 = vmax.f32 %v3787_v44, %v7514_v56 }
  0xb3   : > { %v3841_v30 = vsel %vm3218_vm0, %v2861_v34, -inf  ;;  %v2855_v25 = vadd.f32 %v12444_v24, %v7509_v26  ;;  %v3765_v55 = vmax.f32 %v3763_v38, %v3764_v40  ;;  %v12446_v62 = vperm.slane %v7397_v37, 4 }
  0xb4   : > { %v2856_v59 = vadd.f32 %v12445_v13, %v7511_v31  ;;  %v3840_v4 = vmax.f32 %v3838_v18, %v3839_v8  ;;  %v3825_v36 = vsel %vm3218_vm0, %v7472_v14, -inf  ;;  %v3826_v19 = vsel %vm3218_vm0, %v2854_v46, -inf }
  0xb5   : > { %v2857_v60 = vadd.f32 %v12446_v62, %v7474_v45  ;;  %v3828_v42 = vsel %vm3218_vm0, %v2855_v25, -inf  ;;  %v3767_v5 = vmax.f32 %v3765_v55, %v7517_v1  ;;  %v3827_v2 = vmax.f32 %v3825_v36, %v3826_v19  ;;  %3812 = vmax.xlane.f32.xlu2 %v3811_v51  ;;  %3790 = vmax.xlane.f32.xlu1 %v3789_v54 }
  0xb6   : > { %v3830_v41 = vsel %vm3218_vm0, %v2856_v59, -inf  ;;  %v3842_v7 = vmax.f32 %v3840_v4, %v3841_v30  ;;  %v1571_v37 = vperm.slane %v7410_v48, 3  ;;  %v1572_v17 = vperm.slane %v7410_v48, 4 }
  0xb7   : > { %v3832_v56 = vsel %vm3226_vm3, %v2857_v60, -inf  ;;  %v12447_v14 = vperm.slane %v7410_v48, 0  ;;  %v12448_v20 = vperm.slane %v7410_v48, 1  ;;  %3768 = vmax.xlane.f32.xlu0 %v3767_v5  ;;  %v3829_v49 = vmax.f32 %v3827_v2, %v3828_v42 }
  0xb8   : > { %v3844_v1 = vmax.f32 %v3842_v7, %v3843_v63  ;;  %v12449_v47 = vperm.slane %v7410_v48, 2  ;;  %v1594_v27 = vperm.slane %v7412_v52, 1  ;;  %v2851_v35 = vadd.f32 %v1571_v37, %v7511_v31 }
  0xb9   : > { %v2848_v33 = vadd.f32 %v12447_v14, %v7445_v9  ;;  %v2849_v15 = vadd.f32 %v12448_v20, %v7525_v12  ;;  %v2852_v28 = vadd.f32 %v1572_v17, %v7474_v45  ;;  %v3831_v43 = vmax.f32 %v3829_v49, %v3830_v41 }
  0xba   : > { %v2850_v39 = vadd.f32 %v12449_v47, %v7509_v26  ;;  %v1595_v32 = vperm.slane %v7412_v52, 2  ;;  %v3819_v6 = vsel %vm3218_vm0, %v2851_v35, -inf  ;;  %v1596_v40 = vperm.slane %v7412_v52, 3 }
  0xbb   : > { %v3814_v11 = vsel %vm3218_vm0, %v2848_v33, -inf  ;;  %v3815_v29 = vsel %vm3218_vm0, %v2849_v15, -inf  ;;  %v3821_v48 = vsel %vm3226_vm3, %v2852_v28, -inf  ;;  %v1597_v51 = vperm.slane %v7412_v52, 4 }
  0xbc   : > { %v3816_v23 = vmax.f32 %v3814_v11, %v3815_v29  ;;  %v3817_v50 = vsel %vm3218_vm0, %v2850_v39, -inf  ;;  %v3833_v3 = vmax.f32 %v3831_v43, %v3832_v56  ;;  %v12450_v21 = vperm.slane %v7412_v52, 0 }
  0xbd   : > { %v2874_v44 = vadd.f32 %v1594_v27, %v7525_v12  ;;  %v2875_v38 = vadd.f32 %v1595_v32, %v7509_v26  ;;  %v2876_v18 = vadd.f32 %v1596_v40, %v7511_v31  ;;  %v2877_v63 = vadd.f32 %v1597_v51, %v7474_v45  ;;  %3845 = vmax.xlane.f32.xlu2 %v3844_v1 }
  0xbe   : > { %v3818_v34 = vmax.f32 %v3816_v23, %v3817_v50  ;;  %v2873_v8 = vadd.f32 %v12450_v21, %v7445_v9  ;;  %v1589_v30 = vperm.slane %v7429_v10, 1  ;;  %v1590_v25 = vperm.slane %v7429_v10, 2  ;;  %3834 = vmax.xlane.f32.xlu1 %v3833_v3 }
  0xbf   : > { %v3870_v24 = vsel %vm3218_vm0, %v2874_v44, -inf  ;;  %v3872_v13 = vsel %vm3218_vm0, %v2875_v38, -inf  ;;  %v3874_v59 = vsel %vm3218_vm0, %v2876_v18, -inf  ;;  %v3876_v54 = vsel %vm3226_vm3, %v2877_v63, -inf }
  0xc0   : > { %v3820_v22 = vmax.f32 %v3818_v34, %v3819_v6  ;;  %v3869_v46 = vsel %vm3218_vm0, %v2873_v8, -inf  ;;  %v1591_v4 = vperm.slane %v7429_v10, 3  ;;  %v1592_v62 = vperm.slane %v7429_v10, 4 }
  0xc1   : > { %v3871_v52 = vmax.f32 %v3869_v46, %v3870_v24  ;;  %v12451_v60 = vperm.slane %v7429_v10, 0  ;;  %v2869_v42 = vadd.f32 %v1589_v30, %v7525_v12  ;;  %v2870_v41 = vadd.f32 %v1590_v25, %v7509_v26 }
  0xc2   : > { %v3822_v55 = vmax.f32 %v3820_v22, %v3821_v48  ;;  %v955_v5 = vrot.slane %v7451_v16, 1  ;;  %v2871_v7 = vadd.f32 %v1591_v4, %v7511_v31  ;;  %v2872_v2 = vadd.f32 %v1592_v62, %v7474_v45 }
  0xc3   : > { %v2868_v36 = vadd.f32 %v12451_v60, %v7445_v9  ;;  %v3873_v19 = vmax.f32 %v3871_v52, %v3872_v13  ;;  %v976_v37 = vsel %vm679_vm15, %v7328_v57, %v7320_v53  ;;  %v3859_v17 = vsel %vm3218_vm0, %v2869_v42, -inf }
  0xc4   : > { %3823 = vmax.xlane.f32.xlu0 %v3822_v55  ;;  %v3861_v14 = vsel %vm3218_vm0, %v2870_v41, -inf  ;;  %v1583_v33 = vperm.slane %v955_v5, 0  ;;  %v3863_v16 = vsel %vm3218_vm0, %v2871_v7, -inf  ;;  %v3865_v15 = vsel %vm3226_vm3, %v2872_v2, -inf }
  0xc5   : > { %v3858_v56 = vsel %vm3218_vm0, %v2868_v36, -inf  ;;  %v3875_v10 = vmax.f32 %v3873_v19, %v3874_v59  ;;  %v1584_v1 = vperm.slane %v955_v5, 1  ;;  %v1585_v47 = vperm.slane %v955_v5, 2 }
  0xc6   : > { %v3860_v20 = vmax.f32 %v3858_v56, %v3859_v17  ;;  %v1586_v39 = vperm.slane %v955_v5, 3  ;;  %v1587_v27 = vperm.slane %v955_v5, 4  ;;  %v2863_v28 = vadd.f32 %v1583_v33, %v7445_v9 }
  0xc7   : > { %v3877_v49 = vmax.f32 %v3875_v10, %v3876_v54  ;;  %v2864_v11 = vadd.f32 %v1584_v1, %v7525_v12  ;;  %v977_v29 = vsel %vm12319_vm8, %v7330_v58, %v976_v37  ;;  %v2865_v43 = vadd.f32 %v1585_v47, %v7509_v26 }
  0xc8   : > { %v3862_v35 = vmax.f32 %v3860_v20, %v3861_v14  ;;  %v2866_v23 = vadd.f32 %v1586_v39, %v7511_v31  ;;  %v2867_v50 = vadd.f32 %v1587_v27, %v7474_v45  ;;  %v978_v32 = vsel %vm658_vm7, %v7334_v61, %v7340_v0  ;;  %v318_v14 = vld [vmem:[%s12300_s2 + $0x148] sm:$0xff] }
  0xc9   : > { %3878 = vmax.xlane.f32.xlu2 %v3877_v49  ;;  %v3847_v48 = vsel %vm3218_vm0, %v2863_v28, -inf  ;;  %v3848_v40 = vsel %vm3218_vm0, %v2864_v11, -inf  ;;  %v979_v51 = vsel %vm12318_vm13, %v978_v32, %v977_v29  ;;  %v3850_v34 = vsel %vm3218_vm0, %v2865_v43, -inf }
  0xca   : > { %v3864_v6 = vmax.f32 %v3862_v35, %v3863_v16  ;;  %v3849_v3 = vmax.f32 %v3847_v48, %v3848_v40  ;;  %v3852_v21 = vsel %vm3218_vm0, %v2866_v23, -inf  ;;  %v3854_v8 = vsel %vm3226_vm3, %v2867_v50, -inf }
  0xcb   : > { %v980_v38 = vrot.slane %v979_v51, 6  ;;  %v971_v18 = vsel %vm671_vm6, %v7328_v57, %v7320_v53  ;;  %v973_v63 = vsel %vm12452_vm9, %v7334_v61, %v7340_v0  ;;  %vm12454_vm13 = vcmask 1044484   ;;  %v319_v51 = vld [vmem:[%s12300_s2 + $0x150] sm:$0xff] }
  0xcc   : > { %v3866_v44 = vmax.f32 %v3864_v6, %v3865_v15  ;;  %v3851_v30 = vmax.f32 %v3849_v3, %v3850_v34  ;;  %v972_v22 = vsel %vm12453_vm14, %v971_v18, %v7330_v58  ;;  %v966_v46 = vsel %vm12454_vm13, %v7328_v57, %v7320_v53 }
  0xcd   : > { %v968_v24 = vsel %vm687_vm4, %v7340_v0, %v7334_v61  ;;  %v1608_v25 = vperm.slane %v980_v38, 0  ;;  %v1609_v52 = vperm.slane %v980_v38, 1  ;;  %v1610_v13 = vperm.slane %v980_v38, 2 }
  0xce   : > { %3867 = vmax.xlane.f32.xlu1 %v3866_v44  ;;  %v1611_v59 = vperm.slane %v980_v38, 3  ;;  %v3853_v54 = vmax.f32 %v3851_v30, %v3852_v21  ;;  %v1612_v55 = vperm.slane %v980_v38, 4  ;;  %vm12455_vm9 = vcmask 1044480   ;;  %v320_v44 = vld [vmem:[%s12300_s2 + $0x158] sm:$0xff] }
  0xcf   : > { %v974_v4 = vsel %vm12455_vm9, %v973_v63, %v972_v22  ;;  %vm12456_vm8 = vcmask 1045508   ;;  %v2888_v60 = vadd.f32 %v1608_v25, %v7445_v9  ;;  %v2889_v36 = vadd.f32 %v1609_v52, %v7525_v12  ;;  %v321_v22 = vld [vmem:[%s12300_s2 + $0x160] sm:$0xff] }
  0xd0   : > { %v967_v62 = vsel %vm12456_vm8, %v966_v46, %v7330_v58  ;;  %v2890_v19 = vadd.f32 %v1610_v13, %v7509_v26  ;;  %v2891_v42 = vadd.f32 %v1611_v59, %v7511_v31  ;;  %v3855_v41 = vmax.f32 %v3853_v54, %v3854_v8 }
  0xd1   : > { %v2892_v5 = vadd.f32 %v1612_v55, %v7474_v45  ;;  %v975_v7 = vrot.slane %v974_v4, 5  ;;  %vm12457_vm13 = vcmask 1046532   ;;  %v3902_v56 = vsel %vm3218_vm0, %v2888_v60, -inf  ;;  %v7773_v55 = vld [vmem:[%s12300_s2 + $0x140] sm:$0xff] }
  0xd2   : > { %v969_v2 = vsel %vm12457_vm13, %v967_v62, %v968_v24  ;;  %v3903_v37 = vsel %vm3218_vm0, %v2889_v36, -inf  ;;  %v3905_v10 = vsel %vm3218_vm0, %v2890_v19, -inf  ;;  %v3907_v17 = vsel %vm3218_vm0, %v2891_v42, -inf  ;;  %3856 = vmax.xlane.f32.xlu0 %v3855_v41 }
  0xd3   : > { %v3904_v33 = vmax.f32 %v3902_v56, %v3903_v37  ;;  %v3909_v20 = vsel %vm3226_vm3, %v2892_v5, -inf  ;;  %v1603_v16 = vperm.slane %v975_v7, 0  ;;  %v1604_v15 = vperm.slane %v975_v7, 1 }
  0xd4   : > { %v1605_v1 = vperm.slane %v975_v7, 2  ;;  %v1606_v49 = vperm.slane %v975_v7, 3  ;;  %v1607_v47 = vperm.slane %v975_v7, 4  ;;  %v970_v39 = vrot.slane %v969_v2, 4 }
  0xd5   : > { %v3906_v27 = vmax.f32 %v3904_v33, %v3905_v10  ;;  %v2883_v35 = vadd.f32 %v1603_v16, %v7445_v9  ;;  %v2884_v28 = vadd.f32 %v1604_v15, %v7525_v12  ;;  %v7744_v11 = vrot.slane %v318_v14, 7 }
  0xd6   : > { %v2885_v29 = vadd.f32 %v1605_v1, %v7509_v26  ;;  %v2886_v43 = vadd.f32 %v1606_v49, %v7511_v31  ;;  %v2887_v23 = vadd.f32 %v1607_v47, %v7474_v45  ;;  %v1598_v50 = vperm.slane %v970_v39, 0 }
  0xd7   : > { %v3908_v32 = vmax.f32 %v3906_v27, %v3907_v17  ;;  %v3891_v6 = vsel %vm3218_vm0, %v2883_v35, -inf  ;;  %v3892_v48 = vsel %vm3218_vm0, %v2884_v28, -inf  ;;  %v1599_v40 = vperm.slane %v970_v39, 1 }
  0xd8   : > { %v3893_v3 = vmax.f32 %v3891_v6, %v3892_v48  ;;  %v3894_v34 = vsel %vm3218_vm0, %v2885_v29, -inf  ;;  %v3896_v21 = vsel %vm3218_vm0, %v2886_v43, -inf  ;;  %v3898_v8 = vsel %vm3226_vm3, %v2887_v23, -inf }
  0xd9   : > { %v3910_v38 = vmax.f32 %v3908_v32, %v3909_v20  ;;  %v1600_v18 = vperm.slane %v970_v39, 2  ;;  %v1601_v63 = vperm.slane %v970_v39, 3  ;;  %v1602_v30 = vperm.slane %v970_v39, 4 }
  0xda   : > { %v3895_v46 = vmax.f32 %v3893_v3, %v3894_v34  ;;  %v2878_v24 = vadd.f32 %v1598_v50, %v7445_v9  ;;  %v2879_v25 = vadd.f32 %v1599_v40, %v7525_v12  ;;  %v7765_v52 = vrot.slane %v319_v51, 6 }
  0xdb   : > { %3911 = vmax.xlane.f32.xlu2 %v3910_v38  ;;  %v2880_v13 = vadd.f32 %v1600_v18, %v7509_v26  ;;  %v2881_v59 = vadd.f32 %v1601_v63, %v7511_v31  ;;  %v2882_v54 = vadd.f32 %v1602_v30, %v7474_v45  ;;  %v7775_v4 = vrot.slane %v320_v44, 5 }
  0xdc   : > { %v3897_v62 = vmax.f32 %v3895_v46, %v3896_v21  ;;  %v3880_v60 = vsel %vm3218_vm0, %v2878_v24, -inf  ;;  %v3881_v36 = vsel %vm3218_vm0, %v2879_v25, -inf  ;;  %v7779_v19 = vrot.slane %v321_v22, 4 }
  0xdd   : > { %v3882_v42 = vmax.f32 %v3880_v60, %v3881_v36  ;;  %v3883_v41 = vsel %vm3218_vm0, %v2880_v13, -inf  ;;  %v3885_v5 = vsel %vm3218_vm0, %v2881_v59, -inf  ;;  %v3887_v7 = vsel %vm3226_vm3, %v2882_v54, -inf  ;;  %v278_v13 = vld [vmem:[%s12300_s2 + $0x8] sm:$0xff]  ;;  %v279_v36 = vld [vmem:[%s12300_s2 + $0x10] sm:$0xff] }
  0xde   : > { %v3899_v2 = vmax.f32 %v3897_v62, %v3898_v8  ;;  %v990_v56 = vsel %vm658_vm7, %v7773_v55, %v7744_v11  ;;  %vm12458_vm8 = vcmask 1044484   ;;  %vm12459_vm14 = vcmask 1040384  }
  0xdf   : > { %v992_v37 = vsel %vm12458_vm8, %v7775_v4, %v7779_v19  ;;  %v986_v10 = vsel %vm12459_vm14, %v7773_v55, %v7744_v11  ;;  %v3884_v17 = vmax.f32 %v3882_v42, %v3883_v41  ;;  %v991_v14 = vsel %vm12323_vm12, %v990_v56, %v7765_v52  ;;  %v280_v42 = vld [vmem:[%s12300_s2 + $0x18] sm:$0xff] }
  0xe0   : > { %vm12460_vm9 = vcmask 1041408   ;;  %v988_v20 = vsel %vm12322_vm10, %v7775_v4, %v7779_v19  ;;  %3900 = vmax.xlane.f32.xlu1 %v3899_v2  ;;  %vm12461_vm13 = vcmask 1043457   ;;  %v981_v1 = vsel %vm687_vm4, %v7320_v53, %v7328_v57 }
  0xe1   : > { %v987_v33 = vsel %vm12460_vm9, %v986_v10, %v7765_v52  ;;  %v993_v16 = vsel %vm12461_vm13, %v991_v14, %v992_v37  ;;  %v983_v49 = vsel %vm667_vm2, %v7334_v61, %v7340_v0  ;;  %v3886_v47 = vmax.f32 %v3884_v17, %v3885_v5 }
  0xe2   : > { %v989_v15 = vsel %vm12321_vm11, %v987_v33, %v988_v20  ;;  %v994_v39 = vrot.slane %v993_v16, 1  ;;  %vm12462_vm8 = vcmask 1046529   ;;  %v997_v2 = vsel %vm671_vm6, %v7775_v4, %v7779_v19 }
  0xe3   : > { %v1618_v27 = vperm.slane %v989_v15, 0  ;;  %v1619_v35 = vperm.slane %v989_v15, 1  ;;  %v1620_v28 = vperm.slane %v989_v15, 2  ;;  %v1621_v29 = vperm.slane %v989_v15, 3 }
  0xe4   : > { %v1622_v43 = vperm.slane %v989_v15, 4  ;;  %v982_v23 = vsel %vm12462_vm8, %v7330_v58, %v981_v1  ;;  %v3888_v50 = vmax.f32 %v3886_v47, %v3887_v7  ;;  %v1623_v32 = vperm.slane %v994_v39, 0 }
  0xe5   : > { %v1624_v6 = vperm.slane %v994_v39, 1  ;;  %v1625_v48 = vperm.slane %v994_v39, 2  ;;  %v1626_v40 = vperm.slane %v994_v39, 3  ;;  %v1627_v53 = vperm.slane %v994_v39, 4 }
  0xe6   : > { %v2898_v57 = vadd.f32 %v1618_v27, %v7445_v9  ;;  %v2899_v61 = vadd.f32 %v1619_v35, %v7525_v12  ;;  %3889 = vmax.xlane.f32.xlu0 %v3888_v50  ;;  %v2903_v0 = vadd.f32 %v1623_v32, %v7445_v9  ;;  %v2900_v34 = vadd.f32 %v1620_v28, %v7509_v26 }
  0xe7   : > { %v2904_v51 = vadd.f32 %v1624_v6, %v7525_v12  ;;  %v2905_v3 = vadd.f32 %v1625_v48, %v7509_v26  ;;  %v2906_v58 = vadd.f32 %v1626_v40, %v7511_v31  ;;  %v2907_v21 = vadd.f32 %v1627_v53, %v7474_v45 }
  0xe8   : > { %v2901_v8 = vadd.f32 %v1621_v29, %v7511_v31  ;;  %v2902_v44 = vadd.f32 %v1622_v43, %v7474_v45  ;;  %v3935_v38 = vsel %vm3218_vm0, %v2903_v0, -inf  ;;  %v3924_v30 = vsel %vm3218_vm0, %v2898_v57, -inf }
  0xe9   : > { %v3936_v18 = vsel %vm3218_vm0, %v2904_v51, -inf  ;;  %v3938_v63 = vsel %vm3218_vm0, %v2905_v3, -inf  ;;  %v3940_v46 = vsel %vm3218_vm0, %v2906_v58, -inf  ;;  %v3942_v24 = vsel %vm3226_vm3, %v2907_v21, -inf  ;;  %v7866_v51 = vld [vmem:[%s12300_s2] sm:$0xff] }
  0xea   : > { %v3937_v22 = vmax.f32 %v3935_v38, %v3936_v18  ;;  %v3925_v25 = vsel %vm3218_vm0, %v2899_v61, -inf  ;;  %v3927_v54 = vsel %vm3218_vm0, %v2900_v34, -inf  ;;  %v3929_v62 = vsel %vm3218_vm0, %v2901_v8, -inf  ;;  %v281_v3 = vld [vmem:[%s12300_s2 + $0x20] sm:$0xff] }
  0xeb   : > { %v3926_v59 = vmax.f32 %v3924_v30, %v3925_v25  ;;  %v3931_v60 = vsel %vm3226_vm3, %v2902_v44, -inf  ;;  %v984_v5 = vsel %vm710_vm1, %v983_v49, %v982_v23  ;;  %v995_v7 = vsel %vm667_vm2, %v7773_v55, %v7744_v11 }
  0xec   : > { %v3939_v41 = vmax.f32 %v3937_v22, %v3938_v63  ;;  %v985_v37 = vrot.slane %v984_v5, 7  ;;  %v996_v10 = vsel %vm12320_vm5, %v995_v7, %v7765_v52  ;;  %v7848_v17 = vrot.slane %v278_v13, 7 }
  0xed   : > { %v3928_v56 = vmax.f32 %v3926_v59, %v3927_v54  ;;  %vm12463_vm14 = vcmask 1044482   ;;  %v7851_v20 = vrot.slane %v279_v36, 6  ;;  %v7853_v16 = vrot.slane %v280_v42, 5 }
  0xee   : > { %v3941_v14 = vmax.f32 %v3939_v41, %v3940_v46  ;;  %v998_v33 = vsel %vm12463_vm14, %v996_v10, %v997_v2  ;;  %v1613_v1 = vperm.slane %v985_v37, 0  ;;  %v1614_v49 = vperm.slane %v985_v37, 1 }
  0xef   : > { %v3930_v15 = vmax.f32 %v3928_v56, %v3929_v62  ;;  %v1615_v47 = vperm.slane %v985_v37, 2  ;;  %v1616_v27 = vperm.slane %v985_v37, 3  ;;  %v1617_v35 = vperm.slane %v985_v37, 4 }
  0xf0   : > { %v3943_v39 = vmax.f32 %v3941_v14, %v3942_v24  ;;  %v999_v28 = vrot.slane %v998_v33, 2  ;;  %v2893_v43 = vadd.f32 %v1613_v1, %v7445_v9  ;;  %v2894_v23 = vadd.f32 %v1614_v49, %v7525_v12 }
  0xf1   : > { %v3932_v29 = vmax.f32 %v3930_v15, %v3931_v60  ;;  %v2895_v50 = vadd.f32 %v1615_v47, %v7509_v26  ;;  %v2896_v32 = vadd.f32 %v1616_v27, %v7511_v31  ;;  %v2897_v6 = vadd.f32 %v1617_v35, %v7474_v45 }
  0xf2   : > { %3944 = vmax.xlane.f32.xlu2 %v3943_v39  ;;  %v1628_v48 = vperm.slane %v999_v28, 0  ;;  %v1629_v40 = vperm.slane %v999_v28, 1  ;;  %v3913_v53 = vsel %vm3218_vm0, %v2893_v43, -inf  ;;  %v3914_v57 = vsel %vm3218_vm0, %v2894_v23, -inf }
  0xf3   : > { %3933 = vmax.xlane.f32.xlu1 %v3932_v29  ;;  %v3916_v61 = vsel %vm3218_vm0, %v2895_v50, -inf  ;;  %v1630_v0 = vperm.slane %v999_v28, 2  ;;  %v3915_v34 = vmax.f32 %v3913_v53, %v3914_v57  ;;  %v3918_v58 = vsel %vm3218_vm0, %v2896_v32, -inf }
  0xf4   : > { %v3920_v21 = vsel %vm3226_vm3, %v2897_v6, -inf  ;;  %v1631_v8 = vperm.slane %v999_v28, 3  ;;  %v1632_v44 = vperm.slane %v999_v28, 4  ;;  %v2908_v38 = vadd.f32 %v1628_v48, %v7445_v9 }
  0xf5   : > { %v2909_v18 = vadd.f32 %v1629_v40, %v7525_v12  ;;  %v2910_v63 = vadd.f32 %v1630_v0, %v7509_v26  ;;  %v3917_v30 = vmax.f32 %v3915_v34, %v3916_v61  ;;  %v7877_v46 = vrot.slane %v281_v3, 4 }
  0xf6   : > { %v2911_v22 = vadd.f32 %v1631_v8, %v7511_v31  ;;  %v659_v24 = vsel %vm658_vm7, %v7866_v51, %v7848_v17  ;;  %v2912_v25 = vadd.f32 %v1632_v44, %v7474_v45  ;;  %v3946_v13 = vsel %vm3218_vm0, %v2908_v38, -inf }
  0xf7   : > { %v3947_v59 = vsel %vm3218_vm0, %v2909_v18, -inf  ;;  %v3949_v54 = vsel %vm3218_vm0, %v2910_v63, -inf  ;;  %v3919_v62 = vmax.f32 %v3917_v30, %v3918_v58  ;;  %v661_v42 = vsel %vm12323_vm12, %v659_v24, %v7851_v20 }
  0xf8   : > { %v3948_v60 = vmax.f32 %v3946_v13, %v3947_v59  ;;  %v3951_v36 = vsel %vm3218_vm0, %v2911_v22, -inf  ;;  %v3953_v41 = vsel %vm3226_vm3, %v2912_v25, -inf  ;;  %vm12464_vm9 = vcmask 1044484  }
  0xf9   : > { %v663_v5 = vsel %vm12464_vm9, %v7853_v16, %v7877_v46  ;;  %vm12465_vm13 = vcmask 1040384   ;;  %v655_v2 = vsel %vm12322_vm10, %v7853_v16, %v7877_v46  ;;  %v3921_v56 = vmax.f32 %v3919_v62, %v3920_v21 }
  0xfa   : > { %v651_v7 = vsel %vm12465_vm13, %v7866_v51, %v7848_v17  ;;  %v3950_v37 = vmax.f32 %v3948_v60, %v3949_v54  ;;  %vm12466_vm8 = vcmask 1043457   ;;  %vm12467_vm14 = vcmask 1041408  }
  0xfb   : > { %v665_v10 = vsel %vm12466_vm8, %v661_v42, %v663_v5  ;;  %v653_v14 = vsel %vm12467_vm14, %v651_v7, %v7851_v20  ;;  %v1000_v1 = vsel %vm12322_vm10, %v7773_v55, %v7744_v11  ;;  %v1002_v49 = vsel %vm679_vm15, %v7775_v4, %v7779_v19  ;;  %3922 = vmax.xlane.f32.xlu0 %v3921_v56 }
  0xfc   : > { %v666_v33 = vrot.slane %v665_v10, 1  ;;  %v657_v15 = vsel %vm12321_vm11, %v653_v14, %v655_v2  ;;  %v3952_v47 = vmax.f32 %v3950_v37, %v3951_v36  ;;  %vm12468_vm9 = vcmask 1044483  }
  0xfd   : > { %v1298_v39 = vperm.slane %v657_v15, 0  ;;  %v1299_v27 = vperm.slane %v657_v15, 1  ;;  %v1300_v35 = vperm.slane %v657_v15, 2  ;;  %v1301_v6 = vperm.slane %v657_v15, 3 }
  0xfe   : > { %v1303_v28 = vperm.slane %v666_v33, 0  ;;  %v1304_v29 = vperm.slane %v666_v33, 1  ;;  %v1305_v43 = vperm.slane %v666_v33, 2  ;;  %v1306_v23 = vperm.slane %v666_v33, 3 }
  0xff   : > { %v3954_v50 = vmax.f32 %v3952_v47, %v3953_v41  ;;  %v1307_v32 = vperm.slane %v666_v33, 4  ;;  %v1302_v48 = vperm.slane %v657_v15, 4  ;;  %v2578_v3 = vadd.f32 %v1298_v39, %v7445_v9 }
 0x100   : > { %v2583_v40 = vadd.f32 %v1303_v28, %v7445_v9  ;;  %v2584_v53 = vadd.f32 %v1304_v29, %v7525_v12  ;;  %v2585_v57 = vadd.f32 %v1305_v43, %v7509_v26  ;;  %v2586_v61 = vadd.f32 %v1306_v23, %v7511_v31 }
 0x101   : > { %v2587_v0 = vadd.f32 %v1307_v32, %v7474_v45  ;;  %v2579_v34 = vadd.f32 %v1299_v27, %v7525_v12  ;;  %v2580_v58 = vadd.f32 %v1300_v35, %v7509_v26  ;;  %v2581_v30 = vadd.f32 %v1301_v6, %v7511_v31 }
 0x102   : > { %v3231_v21 = vsel %vm3218_vm0, %v2583_v40, -inf  ;;  %v3232_v8 = vsel %vm3218_vm0, %v2584_v53, -inf  ;;  %v3234_v44 = vsel %vm3218_vm0, %v2585_v57, -inf  ;;  %v3236_v38 = vsel %vm3218_vm0, %v2586_v61, -inf }
 0x103   : > { %v3233_v18 = vmax.f32 %v3231_v21, %v3232_v8  ;;  %v3238_v63 = vsel %vm3226_vm3, %v2587_v0, -inf  ;;  %v2582_v22 = vadd.f32 %v1302_v48, %v7474_v45  ;;  %v3219_v24 = vsel %vm3218_vm0, %v2578_v3, -inf  ;;  %3955 = vmax.xlane.f32.xlu0 %v3954_v50 }
 0x104   : > { %v3220_v25 = vsel %vm3218_vm0, %v2579_v34, -inf  ;;  %v3222_v13 = vsel %vm3218_vm0, %v2580_v58, -inf  ;;  %v1001_v59 = vsel %vm12468_vm9, %v1000_v1, %v7765_v52  ;;  %v3224_v60 = vsel %vm3218_vm0, %v2581_v30, -inf }
 0x105   : > { %v3235_v54 = vmax.f32 %v3233_v18, %v3234_v44  ;;  %v3221_v62 = vmax.f32 %v3219_v24, %v3220_v25  ;;  %v3227_v36 = vsel %vm3226_vm3, %v2582_v22, -inf  ;;  %vm12469_vm13 = vcmask 1045507  }
 0x106   : > { %v1003_v42 = vsel %vm12469_vm13, %v1001_v59, %v1002_v49  ;;  %vm12470_vm8 = vcmask 1044484   ;;  %v1007_v5 = vsel %vm687_vm4, %v7779_v19, %v7775_v4  ;;  %v668_v7 = vsel %vm667_vm2, %v7866_v51, %v7848_v17 }
 0x107   : > { %v1005_v41 = vsel %vm12470_vm8, %v7773_v55, %v7744_v11  ;;  %v3237_v2 = vmax.f32 %v3235_v54, %v3236_v38  ;;  %v3223_v56 = vmax.f32 %v3221_v62, %v3222_v13  ;;  %v1004_v37 = vrot.slane %v1003_v42, 3 }
 0x108   : > { %vm12471_vm14 = vcmask 1045508   ;;  %vm12472_vm9 = vcmask 1046532   ;;  %v670_v33 = vsel %vm12320_vm5, %v668_v7, %v7851_v20  ;;  %v672_v15 = vsel %vm671_vm6, %v7853_v16, %v7877_v46  ;;  %v271_v7 = vld [vmem:[%s7403_s10 + $0x8] sm:$0xff] }
 0x109   : > { %v1006_v10 = vsel %vm12471_vm14, %v1005_v41, %v7765_v52  ;;  %v676_v1 = vsel %vm12322_vm10, %v7866_v51, %v7848_v17  ;;  %v3239_v49 = vmax.f32 %v3237_v2, %v3238_v63  ;;  %v3225_v47 = vmax.f32 %v3223_v56, %v3224_v60  ;;  %501 = vmatpush.msrb.mxu2 %v271_v7 }
 0x10a   : > { %v1008_v14 = vsel %vm12472_vm9, %v1006_v10, %v1007_v5  ;;  %v1633_v39 = vperm.slane %v1004_v37, 0  ;;  %v1634_v27 = vperm.slane %v1004_v37, 1  ;;  %v1635_v35 = vperm.slane %v1004_v37, 2 }
 0x10b   : > { %v1636_v28 = vperm.slane %v1004_v37, 3  ;;  %v1637_v29 = vperm.slane %v1004_v37, 4  ;;  %v1009_v43 = vrot.slane %v1008_v14, 4  ;;  %3240 = vmax.xlane.f32.xlu2 %v3239_v49  ;;  %v3228_v23 = vmax.f32 %v3225_v47, %v3227_v36  ;;  %v6951_v49 = vld [vmem:[%s12301_s3] sm:$0xf] }
 0x10c   : > { %v2913_v50 = vadd.f32 %v1633_v39, %v7445_v9  ;;  %v2914_v32 = vadd.f32 %v1634_v27, %v7525_v12  ;;  %vm12473_vm13 = vcmask 1044482   ;;  %v2915_v48 = vadd.f32 %v1635_v35, %v7509_v26 }
 0x10d   : > { %v674_v6 = vsel %vm12473_vm13, %v670_v33, %v672_v15  ;;  %v2916_v40 = vadd.f32 %v1636_v28, %v7511_v31  ;;  %v2917_v53 = vadd.f32 %v1637_v29, %v7474_v45  ;;  %v1638_v57 = vperm.slane %v1009_v43, 0  ;;  %3229 = vmax.xlane.f32.xlu1 %v3228_v23 }
 0x10e   : > { %v3957_v61 = vsel %vm3218_vm0, %v2913_v50, -inf  ;;  %v3958_v0 = vsel %vm3218_vm0, %v2914_v32, -inf  ;;  %v1639_v3 = vperm.slane %v1009_v43, 1  ;;  %v1640_v34 = vperm.slane %v1009_v43, 2 }
 0x10f   : > { %v3959_v58 = vmax.f32 %v3957_v61, %v3958_v0  ;;  %v3960_v21 = vsel %vm3218_vm0, %v2915_v48, -inf  ;;  %v3962_v8 = vsel %vm3218_vm0, %v2916_v40, -inf  ;;  %v3964_v44 = vsel %vm3226_vm3, %v2917_v53, -inf }
 0x110   : > { %v1641_v38 = vperm.slane %v1009_v43, 3  ;;  %v1642_v18 = vperm.slane %v1009_v43, 4  ;;  %v2918_v63 = vadd.f32 %v1638_v57, %v7445_v9  ;;  %v2919_v30 = vadd.f32 %v1639_v3, %v7525_v12 }
 0x111   : > { %v3961_v22 = vmax.f32 %v3959_v58, %v3960_v21  ;;  %v2920_v24 = vadd.f32 %v1640_v34, %v7509_v26  ;;  %v675_v25 = vrot.slane %v674_v6, 2  ;;  %vm12474_vm8 = vcmask 1044483  }
 0x112   : > { %v678_v13 = vsel %vm12474_vm8, %v676_v1, %v7851_v20  ;;  %v2921_v59 = vadd.f32 %v1641_v38, %v7511_v31  ;;  %v2922_v54 = vadd.f32 %v1642_v18, %v7474_v45  ;;  %v3968_v62 = vsel %vm3218_vm0, %v2918_v63, -inf }
 0x113   : > { %v3969_v60 = vsel %vm3218_vm0, %v2919_v30, -inf  ;;  %v3963_v36 = vmax.f32 %v3961_v22, %v3962_v8  ;;  %v3971_v41 = vsel %vm3218_vm0, %v2920_v24, -inf  ;;  %v1308_v5 = vperm.slane %v675_v25, 0  ;;  %v8006_v24 = vld [vmem:[#allocation1 + $0x24] sm:$0xff] }
 0x114   : > { %v3970_v42 = vmax.f32 %v3968_v62, %v3969_v60  ;;  %v3973_v2 = vsel %vm3218_vm0, %v2921_v59, -inf  ;;  %v3975_v56 = vsel %vm3226_vm3, %v2922_v54, -inf  ;;  %v1309_v37 = vperm.slane %v675_v25, 1 }
 0x115   : > { %v1310_v10 = vperm.slane %v675_v25, 2  ;;  %v3965_v14 = vmax.f32 %v3963_v36, %v3964_v44  ;;  %v1311_v15 = vperm.slane %v675_v25, 3  ;;  %v1312_v1 = vperm.slane %v675_v25, 4  ;;  %v8000_v44 = vld [vmem:[#allocation1] sm:$0xff] }
 0x116   : > { %v3972_v33 = vmax.f32 %v3970_v42, %v3971_v41  ;;  %vm12475_vm14 = vcmask 64512   ;;  %v2588_v47 = vadd.f32 %v1308_v5, %v7445_v9  ;;  %v2589_v39 = vadd.f32 %v1309_v37, %v7525_v12 }
 0x117   : > { %6768 = vmatmul.msk.f32.vlgmr.msrb.gmra.mxu2 %vm12475_vm14, %v6951_v49  ;;  %v2590_v27 = vadd.f32 %v1310_v10, %v7509_v26  ;;  %v680_v35 = vsel %vm679_vm15, %v7853_v16, %v7877_v46  ;;  %3966 = vmax.xlane.f32.xlu0 %v3965_v14  ;;  %v2591_v29 = vadd.f32 %v1311_v15, %v7511_v31  ;;  %vm12476_vm9 = vcmask 1045507  }
 0x118   : > { %v3974_v28 = vmax.f32 %v3972_v33, %v3973_v2  ;;  %v2592_v43 = vadd.f32 %v1312_v1, %v7474_v45  ;;  %v682_v23 = vsel %vm12476_vm9, %v678_v13, %v680_v35  ;;  %v3242_v50 = vsel %vm3218_vm0, %v2588_v47, -inf }
 0x119   : > { %v3243_v9 = vsel %vm3218_vm0, %v2589_v39, -inf  ;;  %v3245_v32 = vsel %vm3218_vm0, %v2590_v27, -inf  ;;  %v683_v6 = vrot.slane %v682_v23, 3  ;;  %v3247_v53 = vsel %vm3218_vm0, %v2591_v29, -inf  ;;  %v8036_v29 = vld [vmem:[#allocation1 + $0x9] sm:$0xff]  ;;  %v8039_v23 = vld [vmem:[#allocation1 + $0x12] sm:$0xff] }
 0x11a   : > { %v3976_v48 = vmax.f32 %v3974_v28, %v3975_v56  ;;  %v3244_v40 = vmax.f32 %v3242_v50, %v3243_v9  ;;  %v3249_v57 = vsel %vm3226_vm3, %v2592_v43, -inf  ;;  %vm12477_vm13 = vcmask 1044484   ;;  %v8042_v9 = vld [vmem:[#allocation1 + $0x1b] sm:$0xff] }
 0x11b   : > { %v1313_v61 = vperm.slane %v683_v6, 0  ;;  %v1314_v0 = vperm.slane %v683_v6, 1  ;;  %v1315_v3 = vperm.slane %v683_v6, 2  ;;  %v1316_v34 = vperm.slane %v683_v6, 3 }
 0x11c   : > { %3977 = vmax.xlane.f32.xlu2 %v3976_v48  ;;  %v3246_v45 = vmax.f32 %v3244_v40, %v3245_v32  ;;  %v1317_v58 = vperm.slane %v683_v6, 4  ;;  %v684_v21 = vsel %vm12477_vm13, %v7866_v51, %v7848_v17  ;;  %v688_v8 = vsel %vm687_vm4, %v7877_v46, %v7853_v16 }
 0x11d   : > { %v2593_v38 = vadd.f32 %v8000_v44, %v1313_v61  ;;  %v2594_v18 = vadd.f32 %v1314_v0, %v7525_v12  ;;  %v2595_v63 = vadd.f32 %v1315_v3, %v7509_v26  ;;  %v2596_v30 = vadd.f32 %v1316_v34, %v7511_v31 }
 0x11e   : > { %v3248_v22 = vmax.f32 %v3246_v45, %v3247_v53  ;;  %v2597_v25 = vadd.f32 %v8006_v24, %v1317_v58  ;;  %vm12478_vm8 = vcmask 1045508   ;;  %v1010_v59 = vsel %vm671_vm6, %v7773_v55, %v7744_v11 }
 0x11f   : > { %v686_v13 = vsel %vm12478_vm8, %v684_v21, %v7851_v20  ;;  %v3253_v54 = vsel %vm3218_vm0, %v2593_v38, -inf  ;;  %v3254_v12 = vsel %vm3218_vm0, %v2594_v18, -inf  ;;  %v3256_v26 = vsel %vm3218_vm0, %v2595_v63, -inf }
 0x120   : > { %v3258_v31 = vsel %vm3218_vm0, %v2596_v30, -inf  ;;  %v3250_v62 = vmax.f32 %v3248_v22, %v3249_v57  ;;  %v3255_v60 = vmax.f32 %v3253_v54, %v3254_v12  ;;  %v3260_v36 = vsel %vm3226_vm3, %v2597_v25, -inf }
 0x121   : > { %vm12479_vm14 = vcmask 1046532   ;;  %vm12480_vm9 = vcmask 1046533   ;;  %vm12481_vm13 = vcmask 1040384   ;;  %v1015_v2 = vsel %vm679_vm15, %v7773_v55, %v7744_v11 }
 0x122   : > { %v690_v42 = vsel %vm12479_vm14, %v686_v13, %v688_v8  ;;  %v1011_v5 = vsel %vm12480_vm9, %v1010_v59, %v7765_v52  ;;  %v1012_v7 = vsel %vm12481_vm13, %v7775_v4, %v7779_v19  ;;  %3251 = vmax.xlane.f32.xlu1 %v3250_v62  ;;  %v3257_v56 = vmax.f32 %v3255_v60, %v3256_v26  ;;  %vm12486_vm9 = vmmov %vm12481_vm13 }
 0x123   : > { %v691_v41 = vrot.slane %v690_v42, 4  ;;  %vm12482_vm8 = vcmask 1044480   ;;  %vm12483_vm5 = vcmask 1045504   ;;  %v1017_v14 = vsel %vm658_vm7, %v7775_v4, %v7779_v19 }
 0x124   : > { %v1013_v37 = vsel %vm12482_vm8, %v1012_v7, %v1011_v5  ;;  %v1016_v10 = vsel %vm12483_vm5, %v7765_v52, %v1015_v2  ;;  %v3259_v47 = vmax.f32 %v3257_v56, %v3258_v31  ;;  %vm12484_vm14 = vcmask 1045505  }
 0x125   : > { %v1318_v33 = vperm.slane %v691_v41, 0  ;;  %v1319_v15 = vperm.slane %v691_v41, 1  ;;  %v1320_v1 = vperm.slane %v691_v41, 2  ;;  %v1321_v49 = vperm.slane %v691_v41, 3 }
 0x126   : > { %v1322_v39 = vperm.slane %v691_v41, 4  ;;  %v1014_v27 = vrot.slane %v1013_v37, 5  ;;  %v1018_v35 = vsel %vm12484_vm14, %v1017_v14, %v1016_v10  ;;  %v3261_v6 = vmax.f32 %v3259_v47, %v3260_v36 }
 0x127   : > { %v2598_v28 = vadd.f32 %v8000_v44, %v1318_v33  ;;  %v2599_v43 = vadd.f32 %v8036_v29, %v1319_v15  ;;  %v2600_v50 = vadd.f32 %v8039_v23, %v1320_v1  ;;  %v2601_v32 = vadd.f32 %v8042_v9, %v1321_v49 }
 0x128   : > { %v2602_v48 = vadd.f32 %v8006_v24, %v1322_v39  ;;  %v1643_v40 = vperm.slane %v1014_v27, 0  ;;  %v1644_v53 = vperm.slane %v1014_v27, 1  ;;  %3262 = vmax.xlane.f32.xlu0 %v3261_v6  ;;  %v1645_v58 = vperm.slane %v1014_v27, 2 }
 0x129   : > { %v3264_v57 = vsel %vm3218_vm0, %v2598_v28, -inf  ;;  %v3265_v61 = vsel %vm3218_vm0, %v2599_v43, -inf  ;;  %v3267_v0 = vsel %vm3218_vm0, %v2600_v50, -inf  ;;  %v3269_v3 = vsel %vm3218_vm0, %v2601_v32, -inf }
 0x12a   : > { %v3266_v34 = vmax.f32 %v3264_v57, %v3265_v61  ;;  %v3271_v45 = vsel %vm3226_vm3, %v2602_v48, -inf  ;;  %v1646_v21 = vperm.slane %v1014_v27, 3  ;;  %v1647_v8 = vperm.slane %v1014_v27, 4 }
 0x12b   : > { %v2923_v38 = vadd.f32 %v8000_v44, %v1643_v40  ;;  %v2924_v18 = vadd.f32 %v8036_v29, %v1644_v53  ;;  %v1019_v63 = vrot.slane %v1018_v35, 6  ;;  %v2925_v22 = vadd.f32 %v8039_v23, %v1645_v58 }
 0x12c   : > { %v3268_v30 = vmax.f32 %v3266_v34, %v3267_v0  ;;  %v2926_v25 = vadd.f32 %v8042_v9, %v1646_v21  ;;  %v1020_v13 = vsel %vm687_vm4, %v7744_v11, %v7773_v55  ;;  %v2927_v59 = vadd.f32 %v8006_v24, %v1647_v8 }
 0x12d   : > { %v3979_v54 = vsel %vm3218_vm0, %v2923_v38, -inf  ;;  %v3980_v12 = vsel %vm3218_vm0, %v2924_v18, -inf  ;;  %v1648_v26 = vperm.slane %v1019_v63, 0  ;;  %v3982_v60 = vsel %vm3218_vm0, %v2925_v22, -inf }
 0x12e   : > { %v3270_v31 = vmax.f32 %v3268_v30, %v3269_v3  ;;  %v3981_v62 = vmax.f32 %v3979_v54, %v3980_v12  ;;  %v3984_v36 = vsel %vm3218_vm0, %v2926_v25, -inf  ;;  %v3986_v42 = vsel %vm3226_vm3, %v2927_v59, -inf  ;;  %v323_v25 = vld [vmem:[%s12300_s2 + $0x170] sm:$0xff]  ;;  %v325_v59 = vld [vmem:[%s12300_s2 + $0x180] sm:$0xff] }
 0x12f   : > { %v1649_v41 = vperm.slane %v1019_v63, 1  ;;  %v1650_v5 = vperm.slane %v1019_v63, 2  ;;  %v1651_v7 = vperm.slane %v1019_v63, 3  ;;  %v1652_v55 = vperm.slane %v1019_v63, 4 }
 0x130   : > { %v3272_v2 = vmax.f32 %v3270_v31, %v3271_v45  ;;  %v3983_v11 = vmax.f32 %v3981_v62, %v3982_v60  ;;  %v2928_v56 = vadd.f32 %v8000_v44, %v1648_v26  ;;  %vm12485_vm5 = vcmask 1046529  }
 0x131   : > { %v2929_v37 = vadd.f32 %v8036_v29, %v1649_v41  ;;  %v2930_v10 = vadd.f32 %v8039_v23, %v1650_v5  ;;  %v2931_v14 = vadd.f32 %v8042_v9, %v1651_v7  ;;  %v1021_v33 = vsel %vm12485_vm5, %v7765_v52, %v1020_v13  ;;  %v324_v13 = vld [vmem:[%s12300_s2 + $0x178] sm:$0xff] }
 0x132   : > { %3273 = vmax.xlane.f32.xlu2 %v3272_v2  ;;  %v3985_v15 = vmax.f32 %v3983_v11, %v3984_v36  ;;  %v2932_v1 = vadd.f32 %v8006_v24, %v1652_v55  ;;  %v3990_v49 = vsel %vm3218_vm0, %v2928_v56, -inf  ;;  %v1022_v47 = vsel %vm667_vm2, %v7775_v4, %v7779_v19 }
 0x133   : > { %v3991_v39 = vsel %vm3218_vm0, %v2929_v37, -inf  ;;  %v3993_v27 = vsel %vm3218_vm0, %v2930_v10, -inf  ;;  %v3995_v35 = vsel %vm3218_vm0, %v2931_v14, -inf  ;;  %v1023_v28 = vsel %vm710_vm1, %v1022_v47, %v1021_v33 }
 0x134   : > { %v3987_v43 = vmax.f32 %v3985_v15, %v3986_v42  ;;  %v3992_v52 = vmax.f32 %v3990_v49, %v3991_v39  ;;  %v3997_v50 = vsel %vm3226_vm3, %v2932_v1, -inf  ;;  %v1024_v32 = vrot.slane %v1023_v28, 7 }
 0x135   : > { %v692_v6 = vsel %vm671_vm6, %v7866_v51, %v7848_v17  ;;  %v695_v4 = vsel %vm12486_vm9, %v7853_v16, %v7877_v46  ;;  %v699_v19 = vsel %vm679_vm15, %v7866_v51, %v7848_v17  ;;  %v702_v48 = vsel %vm658_vm7, %v7853_v16, %v7877_v46 }
 0x136   : > { %3988 = vmax.xlane.f32.xlu1 %v3987_v43  ;;  %v3994_v40 = vmax.f32 %v3992_v52, %v3993_v27  ;;  %v1653_v53 = vperm.slane %v1024_v32, 0  ;;  %v1654_v57 = vperm.slane %v1024_v32, 1  ;;  %v1655_v61 = vperm.slane %v1024_v32, 2 }
 0x137   : > { %v1656_v0 = vperm.slane %v1024_v32, 3  ;;  %v1657_v3 = vperm.slane %v1024_v32, 4  ;;  %vm12487_vm13 = vcmask 1046533   ;;  %vm12488_vm8 = vcmask 1045504  }
 0x138   : > { %v694_v34 = vsel %vm12487_vm13, %v692_v6, %v7851_v20  ;;  %v701_v45 = vsel %vm12488_vm8, %v7851_v20, %v699_v19  ;;  %v3996_v58 = vmax.f32 %v3994_v40, %v3995_v35  ;;  %v2933_v21 = vadd.f32 %v8000_v44, %v1653_v53 }
 0x139   : > { %v2934_v8 = vadd.f32 %v8036_v29, %v1654_v57  ;;  %v2935_v38 = vadd.f32 %v8039_v23, %v1655_v61  ;;  %v2936_v18 = vadd.f32 %v8042_v9, %v1656_v0  ;;  %v2937_v63 = vadd.f32 %v8006_v24, %v1657_v3 }
 0x13a   : > { %vm12489_vm14 = vcmask 1044480   ;;  %vm12490_vm5 = vcmask 1045505   ;;  %v3998_v54 = vmax.f32 %v3996_v58, %v3997_v50  ;;  %v4001_v12 = vsel %vm3218_vm0, %v2933_v21, -inf }
 0x13b   : > { %v697_v30 = vsel %vm12489_vm14, %v695_v4, %v694_v34  ;;  %v704_v22 = vsel %vm12490_vm5, %v702_v48, %v701_v45  ;;  %v4002_v26 = vsel %vm3218_vm0, %v2934_v8, -inf  ;;  %v4004_v31 = vsel %vm3218_vm0, %v2935_v38, -inf  ;;  %v326_v4 = vld [vmem:[%s12300_s2 + $0x188] sm:$0xff] }
 0x13c   : > { %v4003_v62 = vmax.f32 %v4001_v12, %v4002_v26  ;;  %v4006_v60 = vsel %vm3218_vm0, %v2936_v18, -inf  ;;  %v4008_v36 = vsel %vm3226_vm3, %v2937_v63, -inf  ;;  %v698_v42 = vrot.slane %v697_v30, 5  ;;  %3999 = vmax.xlane.f32.xlu0 %v3998_v54  ;;  %v8143_v34 = vld [vmem:[%s12300_s2 + $0x168] sm:$0xff] }
 0x13d   : > { %v705_v41 = vrot.slane %v704_v22, 6  ;;  %v8117_v5 = vrot.slane %v323_v25, 7  ;;  %v8119_v7 = vrot.slane %v324_v13, 6  ;;  %v8121_v2 = vrot.slane %v325_v59, 5 }
 0x13e   : > { %v4005_v11 = vmax.f32 %v4003_v62, %v4004_v31  ;;  %v1323_v55 = vperm.slane %v698_v42, 0  ;;  %v1324_v56 = vperm.slane %v698_v42, 1  ;;  %v1325_v37 = vperm.slane %v698_v42, 2 }
 0x13f   : > { %v1326_v10 = vperm.slane %v698_v42, 3  ;;  %v1327_v14 = vperm.slane %v698_v42, 4  ;;  %v1328_v33 = vperm.slane %v705_v41, 0  ;;  %v1329_v15 = vperm.slane %v705_v41, 1 }
 0x140   : > { %v4007_v1 = vmax.f32 %v4005_v11, %v4006_v60  ;;  %v2603_v49 = vadd.f32 %v8000_v44, %v1323_v55  ;;  %v2604_v47 = vadd.f32 %v8036_v29, %v1324_v56  ;;  %v2605_v39 = vadd.f32 %v8039_v23, %v1325_v37 }
 0x141   : > { %v2606_v27 = vadd.f32 %v8042_v9, %v1326_v10  ;;  %v2607_v35 = vadd.f32 %v8006_v24, %v1327_v14  ;;  %v1330_v28 = vperm.slane %v705_v41, 2  ;;  %v1331_v43 = vperm.slane %v705_v41, 3 }
 0x142   : > { %v4009_v52 = vmax.f32 %v4007_v1, %v4008_v36  ;;  %v3275_v50 = vsel %vm3218_vm0, %v2603_v49, -inf  ;;  %v3276_v32 = vsel %vm3218_vm0, %v2604_v47, -inf  ;;  %v3278_v6 = vsel %vm3218_vm0, %v2605_v39, -inf }
 0x143   : > { %v3277_v19 = vmax.f32 %v3275_v50, %v3276_v32  ;;  %v3280_v48 = vsel %vm3218_vm0, %v2606_v27, -inf  ;;  %v3282_v40 = vsel %vm3226_vm3, %v2607_v35, -inf  ;;  %v1332_v53 = vperm.slane %v705_v41, 4  ;;  %v283_v32 = vld [vmem:[%s12300_s2 + $0x30] sm:$0xff] }
 0x144   : > { %4010 = vmax.xlane.f32.xlu2 %v4009_v52  ;;  %v2608_v57 = vadd.f32 %v8000_v44, %v1328_v33  ;;  %v2609_v61 = vadd.f32 %v8036_v29, %v1329_v15  ;;  %v2610_v0 = vadd.f32 %v8039_v23, %v1330_v28  ;;  %v2611_v3 = vadd.f32 %v8042_v9, %v1331_v43 }
 0x145   : > { %v3279_v45 = vmax.f32 %v3277_v19, %v3278_v6  ;;  %v2612_v58 = vadd.f32 %v8006_v24, %v1332_v53  ;;  %v8146_v21 = vrot.slane %v326_v4, 4  ;;  %v1025_v8 = vsel %vm12486_vm9, %v8143_v34, %v8117_v5 }
 0x146   : > { %v3286_v38 = vsel %vm3218_vm0, %v2608_v57, -inf  ;;  %v3287_v18 = vsel %vm3218_vm0, %v2609_v61, -inf  ;;  %v3289_v63 = vsel %vm3218_vm0, %v2610_v0, -inf  ;;  %v3291_v30 = vsel %vm3218_vm0, %v2611_v3, -inf }
 0x147   : > { %v3281_v22 = vmax.f32 %v3279_v45, %v3280_v48  ;;  %v3288_v25 = vmax.f32 %v3286_v38, %v3287_v18  ;;  %v3293_v13 = vsel %vm3226_vm3, %v2612_v58, -inf  ;;  %vm12491_vm13 = vcmask 1041408  }
 0x148   : > { %v1026_v59 = vsel %vm12491_vm13, %v1025_v8, %v8119_v7  ;;  %v1027_v54 = vsel %vm12322_vm10, %v8121_v2, %v8146_v21  ;;  %v706_v12 = vsel %vm687_vm4, %v7848_v17, %v7866_v51  ;;  %v709_v26 = vsel %vm667_vm2, %v7853_v16, %v7877_v46 }
 0x149   : > { %v1029_v31 = vsel %vm658_vm7, %v8143_v34, %v8117_v5  ;;  %v3283_v62 = vmax.f32 %v3281_v22, %v3282_v40  ;;  %v3290_v60 = vmax.f32 %v3288_v25, %v3289_v63  ;;  %v1028_v36 = vsel %vm12321_vm11, %v1026_v59, %v1027_v54  ;;  %v285_v54 = vld [vmem:[%s12300_s2 + $0x40] sm:$0xff] }
 0x14a   : > { %vm12492_vm8 = vcmask 1046529   ;;  %v1658_v41 = vperm.slane %v1028_v36, 0  ;;  %v1659_v11 = vperm.slane %v1028_v36, 1  ;;  %v1660_v55 = vperm.slane %v1028_v36, 2 }
 0x14b   : > { %v708_v42 = vsel %vm12492_vm8, %v7851_v20, %v706_v12  ;;  %v1661_v56 = vperm.slane %v1028_v36, 3  ;;  %3284 = vmax.xlane.f32.xlu1 %v3283_v62  ;;  %v3292_v17 = vmax.f32 %v3290_v60, %v3291_v30  ;;  %v1662_v51 = vperm.slane %v1028_v36, 4  ;;  %v284_v30 = vld [vmem:[%s12300_s2 + $0x38] sm:$0xff]  ;;  %v286_v60 = vld [vmem:[%s12300_s2 + $0x48] sm:$0xff] }
 0x14c   : > { %v711_v16 = vsel %vm710_vm1, %v709_v26, %v708_v42  ;;  %v1030_v46 = vsel %vm12323_vm12, %v1029_v31, %v8119_v7  ;;  %v2938_v37 = vadd.f32 %v8000_v44, %v1658_v41  ;;  %v2939_v10 = vadd.f32 %v8036_v29, %v1659_v11 }
 0x14d   : > { %v2940_v14 = vadd.f32 %v8039_v23, %v1660_v55  ;;  %v2941_v20 = vadd.f32 %v8042_v9, %v1661_v56  ;;  %v3294_v33 = vmax.f32 %v3292_v17, %v3293_v13  ;;  %v2942_v15 = vadd.f32 %v8006_v24, %v1662_v51 }
 0x14e   : > { %v712_v1 = vrot.slane %v711_v16, 7  ;;  %vm12493_vm14 = vcmask 1044484   ;;  %v4012_v47 = vsel %vm3218_vm0, %v2938_v37, -inf  ;;  %v4013_v39 = vsel %vm3218_vm0, %v2939_v10, -inf  ;;  %v8227_v10 = vld [vmem:[%s12300_s2 + $0x28] sm:$0xff] }
 0x14f   : > { %v1031_v49 = vsel %vm12493_vm14, %v8121_v2, %v8146_v21  ;;  %v4015_v27 = vsel %vm3218_vm0, %v2940_v14, -inf  ;;  %v4017_v35 = vsel %vm3218_vm0, %v2941_v20, -inf  ;;  %3295 = vmax.xlane.f32.xlu0 %v3294_v33  ;;  %v4014_v28 = vmax.f32 %v4012_v47, %v4013_v39 }
 0x150   : > { %v4019_v43 = vsel %vm3226_vm3, %v2942_v15, -inf  ;;  %v1333_v52 = vperm.slane %v712_v1, 0  ;;  %v1334_v50 = vperm.slane %v712_v1, 1  ;;  %v1335_v6 = vperm.slane %v712_v1, 2 }
 0x151   : > { %v1336_v4 = vperm.slane %v712_v1, 3  ;;  %v1337_v19 = vperm.slane %v712_v1, 4  ;;  %vm12494_vm5 = vcmask 1043457   ;;  %v4016_v40 = vmax.f32 %v4014_v28, %v4015_v27 }
 0x152   : > { %v1032_v48 = vsel %vm12494_vm5, %v1030_v46, %v1031_v49  ;;  %v2613_v53 = vadd.f32 %v8000_v44, %v1333_v52  ;;  %v2614_v57 = vadd.f32 %v8036_v29, %v1334_v50  ;;  %v2615_v0 = vadd.f32 %v8039_v23, %v1335_v6 }
 0x153   : > { %v1033_v61 = vrot.slane %v1032_v48, 1  ;;  %v2616_v3 = vadd.f32 %v8042_v9, %v1336_v4  ;;  %v2617_v45 = vadd.f32 %v8006_v24, %v1337_v19  ;;  %v8198_v58 = vrot.slane %v283_v32, 7 }
 0x154   : > { %v4018_v8 = vmax.f32 %v4016_v40, %v4017_v35  ;;  %v3297_v38 = vsel %vm3218_vm0, %v2613_v53, -inf  ;;  %v3298_v18 = vsel %vm3218_vm0, %v2614_v57, -inf  ;;  %v3300_v25 = vsel %vm3218_vm0, %v2615_v0, -inf }
 0x155   : > { %v1663_v63 = vperm.slane %v1033_v61, 0  ;;  %v3299_v22 = vmax.f32 %v3297_v38, %v3298_v18  ;;  %v3302_v13 = vsel %vm3218_vm0, %v2616_v3, -inf  ;;  %v3304_v59 = vsel %vm3226_vm3, %v2617_v45, -inf }
 0x156   : > { %v4020_v12 = vmax.f32 %v4018_v8, %v4019_v43  ;;  %v1664_v26 = vperm.slane %v1033_v61, 1  ;;  %v1665_v31 = vperm.slane %v1033_v61, 2  ;;  %v1666_v62 = vperm.slane %v1033_v61, 3 }
 0x157   : > { %v3301_v36 = vmax.f32 %v3299_v22, %v3300_v25  ;;  %v1667_v42 = vperm.slane %v1033_v61, 4  ;;  %v2943_v41 = vadd.f32 %v8000_v44, %v1663_v63  ;;  %v8215_v11 = vrot.slane %v284_v30, 6 }
 0x158   : > { %4021 = vmax.xlane.f32.xlu2 %v4020_v12  ;;  %v2944_v55 = vadd.f32 %v8036_v29, %v1664_v26  ;;  %v2945_v56 = vadd.f32 %v8039_v23, %v1665_v31  ;;  %v2946_v17 = vadd.f32 %v8042_v9, %v1666_v62  ;;  %v8220_v51 = vrot.slane %v285_v54, 5 }
 0x159   : > { %v3303_v16 = vmax.f32 %v3301_v36, %v3302_v13  ;;  %v2947_v46 = vadd.f32 %v8006_v24, %v1667_v42  ;;  %v4023_v37 = vsel %vm3218_vm0, %v2943_v41, -inf  ;;  %v8229_v14 = vrot.slane %v286_v60, 4 }
 0x15a   : > { %v4024_v20 = vsel %vm3218_vm0, %v2944_v55, -inf  ;;  %v4026_v33 = vsel %vm3218_vm0, %v2945_v56, -inf  ;;  %v4028_v15 = vsel %vm3218_vm0, %v2946_v17, -inf  ;;  %v713_v1 = vsel %vm12486_vm9, %v8227_v10, %v8198_v58 }
 0x15b   : > { %v3305_v49 = vmax.f32 %v3303_v16, %v3304_v59  ;;  %v4025_v47 = vmax.f32 %v4023_v37, %v4024_v20  ;;  %v4030_v39 = vsel %vm3226_vm3, %v2947_v46, -inf  ;;  %v714_v27 = vsel %vm12491_vm13, %v713_v1, %v8215_v11 }
 0x15c   : > { %v715_v35 = vsel %vm12322_vm10, %v8220_v51, %v8229_v14  ;;  %v1034_v28 = vsel %vm667_vm2, %v8143_v34, %v8117_v5  ;;  %v1036_v43 = vsel %vm671_vm6, %v8121_v2, %v8146_v21  ;;  %v717_v52 = vsel %vm658_vm7, %v8227_v10, %v8198_v58 }
 0x15d   : > { %3306 = vmax.xlane.f32.xlu1 %v3305_v49  ;;  %v4027_v50 = vmax.f32 %v4025_v47, %v4026_v33  ;;  %v716_v32 = vsel %vm12321_vm11, %v714_v27, %v715_v35  ;;  %vm12495_vm8 = vcmask 1043458   ;;  %v718_v4 = vsel %vm12323_vm12, %v717_v52, %v8215_v11 }
 0x15e   : > { %v1035_v6 = vsel %vm12495_vm8, %v1034_v28, %v8119_v7  ;;  %v1338_v19 = vperm.slane %v716_v32, 0  ;;  %v1339_v48 = vperm.slane %v716_v32, 1  ;;  %v1340_v40 = vperm.slane %v716_v32, 2  ;;  %vm12499_vm13 = vmmov %vm12495_vm8 }
 0x15f   : > { %v1341_v53 = vperm.slane %v716_v32, 3  ;;  %v4029_v57 = vmax.f32 %v4027_v50, %v4028_v15  ;;  %v1342_v61 = vperm.slane %v716_v32, 4  ;;  %vm12496_vm14 = vcmask 1044482  }
 0x160   : > { %v1037_v0 = vsel %vm12496_vm14, %v1035_v6, %v1036_v43  ;;  %vm12497_vm5 = vcmask 1044484   ;;  %v2618_v45 = vadd.f32 %v8000_v44, %v1338_v19  ;;  %v2619_v8 = vadd.f32 %v8036_v29, %v1339_v48  ;;  %vm12500_vm8 = vmmov %vm12496_vm14 }
 0x161   : > { %v719_v3 = vsel %vm12497_vm5, %v8220_v51, %v8229_v14  ;;  %v2620_v38 = vadd.f32 %v8039_v23, %v1340_v40  ;;  %v2621_v18 = vadd.f32 %v8042_v9, %v1341_v53  ;;  %v4031_v63 = vmax.f32 %v4029_v57, %v4030_v39 }
 0x162   : > { %v2622_v30 = vadd.f32 %v8006_v24, %v1342_v61  ;;  %v1038_v22 = vrot.slane %v1037_v0, 2  ;;  %vm12498_vm9 = vcmask 1043457   ;;  %v3308_v13 = vsel %vm3218_vm0, %v2618_v45, -inf }
 0x163   : > { %v720_v25 = vsel %vm12498_vm9, %v718_v4, %v719_v3  ;;  %v3309_v59 = vsel %vm3218_vm0, %v2619_v8, -inf  ;;  %v3311_v54 = vsel %vm3218_vm0, %v2620_v38, -inf  ;;  %v3313_v12 = vsel %vm3218_vm0, %v2621_v18, -inf  ;;  %4032 = vmax.xlane.f32.xlu0 %v4031_v63 }
 0x164   : > { %v3310_v26 = vmax.f32 %v3308_v13, %v3309_v59  ;;  %v3315_v31 = vsel %vm3226_vm3, %v2622_v30, -inf  ;;  %v1668_v62 = vperm.slane %v1038_v22, 0  ;;  %v1669_v60 = vperm.slane %v1038_v22, 1 }
 0x165   : > { %v1670_v36 = vperm.slane %v1038_v22, 2  ;;  %v1671_v42 = vperm.slane %v1038_v22, 3  ;;  %v1672_v41 = vperm.slane %v1038_v22, 4  ;;  %v721_v55 = vrot.slane %v720_v25, 1 }
 0x166   : > { %v3312_v56 = vmax.f32 %v3310_v26, %v3311_v54  ;;  %v2948_v17 = vadd.f32 %v8000_v44, %v1668_v62  ;;  %v2949_v16 = vadd.f32 %v8036_v29, %v1669_v60  ;;  %v722_v46 = vsel %vm667_vm2, %v8227_v10, %v8198_v58 }
 0x167   : > { %v2950_v37 = vadd.f32 %v8039_v23, %v1670_v36  ;;  %v2951_v20 = vadd.f32 %v8042_v9, %v1671_v42  ;;  %v2952_v33 = vadd.f32 %v8006_v24, %v1672_v41  ;;  %v1343_v15 = vperm.slane %v721_v55, 0 }
 0x168   : > { %v3314_v1 = vmax.f32 %v3312_v56, %v3313_v12  ;;  %v4034_v49 = vsel %vm3218_vm0, %v2948_v17, -inf  ;;  %v4035_v47 = vsel %vm3218_vm0, %v2949_v16, -inf  ;;  %v1344_v39 = vperm.slane %v721_v55, 1 }
 0x169   : > { %v4036_v27 = vmax.f32 %v4034_v49, %v4035_v47  ;;  %v4037_v35 = vsel %vm3218_vm0, %v2950_v37, -inf  ;;  %v4039_v28 = vsel %vm3218_vm0, %v2951_v20, -inf  ;;  %v4041_v43 = vsel %vm3226_vm3, %v2952_v33, -inf }
 0x16a   : > { %v3316_v52 = vmax.f32 %v3314_v1, %v3315_v31  ;;  %v1345_v50 = vperm.slane %v721_v55, 2  ;;  %v1346_v32 = vperm.slane %v721_v55, 3  ;;  %v1347_v6 = vperm.slane %v721_v55, 4 }
 0x16b   : > { %v4038_v4 = vmax.f32 %v4036_v27, %v4037_v35  ;;  %v2623_v19 = vadd.f32 %v8000_v44, %v1343_v15  ;;  %v2624_v48 = vadd.f32 %v8036_v29, %v1344_v39  ;;  %v723_v40 = vsel %vm12499_vm13, %v722_v46, %v8215_v11 }
 0x16c   : > { %3317 = vmax.xlane.f32.xlu2 %v3316_v52  ;;  %v2625_v53 = vadd.f32 %v8039_v23, %v1345_v50  ;;  %v2626_v57 = vadd.f32 %v8042_v9, %v1346_v32  ;;  %v2627_v61 = vadd.f32 %v8006_v24, %v1347_v6  ;;  %v724_v0 = vsel %vm671_vm6, %v8220_v51, %v8229_v14 }
 0x16d   : > { %v4040_v3 = vmax.f32 %v4038_v4, %v4039_v28  ;;  %v3319_v45 = vsel %vm3218_vm0, %v2623_v19, -inf  ;;  %v3320_v8 = vsel %vm3218_vm0, %v2624_v48, -inf  ;;  %v725_v38 = vsel %vm12500_vm8, %v723_v40, %v724_v0 }
 0x16e   : > { %v3321_v18 = vmax.f32 %v3319_v45, %v3320_v8  ;;  %v3322_v63 = vsel %vm3218_vm0, %v2625_v53, -inf  ;;  %v3324_v30 = vsel %vm3218_vm0, %v2626_v57, -inf  ;;  %v3326_v22 = vsel %vm3226_vm3, %v2627_v61, -inf }
 0x16f   : > { %v4042_v25 = vmax.f32 %v4040_v3, %v4041_v43  ;;  %v726_v13 = vrot.slane %v725_v38, 2  ;;  %v1039_v59 = vsel %vm12322_vm10, %v8143_v34, %v8117_v5  ;;  %v1041_v54 = vsel %vm679_vm15, %v8121_v2, %v8146_v21 }
 0x170   : > { %v3323_v12 = vmax.f32 %v3321_v18, %v3322_v63  ;;  %vm12501_vm14 = vcmask 1044483   ;;  %v1044_v31 = vsel %vm12497_vm5, %v8143_v34, %v8117_v5  ;;  %v1046_v62 = vsel %vm687_vm4, %v8146_v21, %v8121_v2 }
 0x171   : > { %v1040_v26 = vsel %vm12501_vm14, %v1039_v59, %v8119_v7  ;;  %4043 = vmax.xlane.f32.xlu1 %v4042_v25  ;;  %v1348_v60 = vperm.slane %v726_v13, 0  ;;  %v1349_v36 = vperm.slane %v726_v13, 1  ;;  %v1350_v42 = vperm.slane %v726_v13, 2 }
 0x172   : > { %v1351_v41 = vperm.slane %v726_v13, 3  ;;  %v3325_v55 = vmax.f32 %v3323_v12, %v3324_v30  ;;  %v1352_v56 = vperm.slane %v726_v13, 4  ;;  %vm12502_vm9 = vcmask 1045507  }
 0x173   : > { %v1042_v17 = vsel %vm12502_vm9, %v1040_v26, %v1041_v54  ;;  %vm12503_vm13 = vcmask 1045508   ;;  %v2628_v46 = vadd.f32 %v8000_v44, %v1348_v60  ;;  %v2629_v37 = vadd.f32 %v8036_v29, %v1349_v36 }
 0x174   : > { %v1045_v16 = vsel %vm12503_vm13, %v1044_v31, %v8119_v7  ;;  %v2630_v20 = vadd.f32 %v8039_v23, %v1350_v42  ;;  %v2631_v33 = vadd.f32 %v8042_v9, %v1351_v41  ;;  %v3327_v15 = vmax.f32 %v3325_v55, %v3326_v22 }
 0x175   : > { %v2632_v1 = vadd.f32 %v8006_v24, %v1352_v56  ;;  %v1043_v49 = vrot.slane %v1042_v17, 3  ;;  %vm12504_vm8 = vcmask 1046532   ;;  %v3330_v39 = vsel %vm3218_vm0, %v2628_v46, -inf }
 0x176   : > { %v1047_v47 = vsel %vm12504_vm8, %v1045_v16, %v1046_v62  ;;  %v3331_v27 = vsel %vm3218_vm0, %v2629_v37, -inf  ;;  %v3333_v35 = vsel %vm3218_vm0, %v2630_v20, -inf  ;;  %v3335_v28 = vsel %vm3218_vm0, %v2631_v33, -inf  ;;  %3328 = vmax.xlane.f32.xlu0 %v3327_v15 }
 0x177   : > { %v3332_v43 = vmax.f32 %v3330_v39, %v3331_v27  ;;  %v3337_v52 = vsel %vm3226_vm3, %v2632_v1, -inf  ;;  %v1673_v50 = vperm.slane %v1043_v49, 0  ;;  %v1674_v32 = vperm.slane %v1043_v49, 1 }
 0x178   : > { %v1675_v6 = vperm.slane %v1043_v49, 2  ;;  %v1676_v4 = vperm.slane %v1043_v49, 3  ;;  %v1677_v19 = vperm.slane %v1043_v49, 4  ;;  %v1048_v48 = vrot.slane %v1047_v47, 4 }
 0x179   : > { %v3334_v40 = vmax.f32 %v3332_v43, %v3333_v35  ;;  %v2953_v53 = vadd.f32 %v8000_v44, %v1673_v50  ;;  %v2954_v57 = vadd.f32 %v8036_v29, %v1674_v32  ;;  %v1049_v61 = vsel %vm671_vm6, %v8143_v34, %v8117_v5 }
 0x17a   : > { %v2955_v0 = vadd.f32 %v8039_v23, %v1675_v6  ;;  %v2956_v3 = vadd.f32 %v8042_v9, %v1676_v4  ;;  %v2957_v45 = vadd.f32 %v8006_v24, %v1677_v19  ;;  %v1678_v8 = vperm.slane %v1048_v48, 0 }
 0x17b   : > { %v3336_v38 = vmax.f32 %v3334_v40, %v3335_v28  ;;  %v4045_v18 = vsel %vm3218_vm0, %v2953_v53, -inf  ;;  %v4046_v63 = vsel %vm3218_vm0, %v2954_v57, -inf  ;;  %v1679_v30 = vperm.slane %v1048_v48, 1 }
 0x17c   : > { %v4047_v22 = vmax.f32 %v4045_v18, %v4046_v63  ;;  %v4048_v25 = vsel %vm3218_vm0, %v2955_v0, -inf  ;;  %v4050_v13 = vsel %vm3218_vm0, %v2956_v3, -inf  ;;  %v4052_v59 = vsel %vm3226_vm3, %v2957_v45, -inf }
 0x17d   : > { %v3338_v54 = vmax.f32 %v3336_v38, %v3337_v52  ;;  %v1680_v12 = vperm.slane %v1048_v48, 2  ;;  %v1681_v26 = vperm.slane %v1048_v48, 3  ;;  %v1682_v31 = vperm.slane %v1048_v48, 4 }
 0x17e   : > { %v4049_v62 = vmax.f32 %v4047_v22, %v4048_v25  ;;  %v2958_v60 = vadd.f32 %v8000_v44, %v1678_v8  ;;  %v2959_v36 = vadd.f32 %v8036_v29, %v1679_v30  ;;  %vm12505_vm14 = vcmask 1046533  }
 0x17f   : > { %v1050_v42 = vsel %vm12505_vm14, %v1049_v61, %v8119_v7  ;;  %3339 = vmax.xlane.f32.xlu2 %v3338_v54  ;;  %v2960_v41 = vadd.f32 %v8039_v23, %v1680_v12  ;;  %v2961_v55 = vadd.f32 %v8042_v9, %v1681_v26  ;;  %v2962_v56 = vadd.f32 %v8006_v24, %v1682_v31 }
 0x180   : > { %vm12506_vm5 = vcmask 1040384   ;;  %v4051_v16 = vmax.f32 %v4049_v62, %v4050_v13  ;;  %v4056_v46 = vsel %vm3218_vm0, %v2958_v60, -inf  ;;  %v4057_v37 = vsel %vm3218_vm0, %v2959_v36, -inf }
 0x181   : > { %v1051_v17 = vsel %vm12506_vm5, %v8121_v2, %v8146_v21  ;;  %vm12507_vm9 = vcmask 1044480   ;;  %v4058_v33 = vmax.f32 %v4056_v46, %v4057_v37  ;;  %v4059_v15 = vsel %vm3218_vm0, %v2960_v41, -inf }
 0x182   : > { %v1052_v20 = vsel %vm12507_vm9, %v1051_v17, %v1050_v42  ;;  %v4061_v1 = vsel %vm3218_vm0, %v2961_v55, -inf  ;;  %v4063_v49 = vsel %vm3226_vm3, %v2962_v56, -inf  ;;  %v4053_v47 = vmax.f32 %v4051_v16, %v4052_v59 }
 0x183   : > { %v1053_v39 = vrot.slane %v1052_v20, 5  ;;  %v727_v27 = vsel %vm12322_vm10, %v8227_v10, %v8198_v58  ;;  %v729_v35 = vsel %vm679_vm15, %v8220_v51, %v8229_v14  ;;  %v4060_v28 = vmax.f32 %v4058_v33, %v4059_v15 }
 0x184   : > { %vm12508_vm13 = vcmask 1044483   ;;  %vm12509_vm8 = vcmask 1044484   ;;  %v734_v50 = vsel %vm687_vm4, %v8229_v14, %v8220_v51  ;;  %4054 = vmax.xlane.f32.xlu1 %v4053_v47  ;;  %vm12510_vm14 = vcmask 1045507  }
 0x185   : > { %v728_v43 = vsel %vm12508_vm13, %v727_v27, %v8215_v11  ;;  %v732_v52 = vsel %vm12509_vm8, %v8227_v10, %v8198_v58  ;;  %v1683_v32 = vperm.slane %v1053_v39, 0  ;;  %v1684_v6 = vperm.slane %v1053_v39, 1 }
 0x186   : > { %v1685_v4 = vperm.slane %v1053_v39, 2  ;;  %v1686_v19 = vperm.slane %v1053_v39, 3  ;;  %v4062_v48 = vmax.f32 %v4060_v28, %v4061_v1  ;;  %v1687_v40 = vperm.slane %v1053_v39, 4 }
 0x187   : > { %v730_v53 = vsel %vm12510_vm14, %v728_v43, %v729_v35  ;;  %vm12511_vm5 = vcmask 1045508   ;;  %v2963_v61 = vadd.f32 %v8000_v44, %v1683_v32  ;;  %v2964_v0 = vadd.f32 %v8036_v29, %v1684_v6 }
 0x188   : > { %v733_v57 = vsel %vm12511_vm5, %v732_v52, %v8215_v11  ;;  %v2965_v3 = vadd.f32 %v8039_v23, %v1685_v4  ;;  %v2966_v45 = vadd.f32 %v8042_v9, %v1686_v19  ;;  %v4064_v8 = vmax.f32 %v4062_v48, %v4063_v49 }
 0x189   : > { %v2967_v38 = vadd.f32 %v8006_v24, %v1687_v40  ;;  %v731_v18 = vrot.slane %v730_v53, 3  ;;  %vm12512_vm9 = vcmask 1046532   ;;  %v4067_v30 = vsel %vm3218_vm0, %v2963_v61, -inf }
 0x18a   : > { %v735_v63 = vsel %vm12512_vm9, %v733_v57, %v734_v50  ;;  %v4068_v22 = vsel %vm3218_vm0, %v2964_v0, -inf  ;;  %v4070_v25 = vsel %vm3218_vm0, %v2965_v3, -inf  ;;  %v4072_v13 = vsel %vm3218_vm0, %v2966_v45, -inf  ;;  %4065 = vmax.xlane.f32.xlu0 %v4064_v8 }
 0x18b   : > { %v4069_v59 = vmax.f32 %v4067_v30, %v4068_v22  ;;  %v4074_v54 = vsel %vm3226_vm3, %v2967_v38, -inf  ;;  %v1353_v12 = vperm.slane %v731_v18, 0  ;;  %v1354_v26 = vperm.slane %v731_v18, 1 }
 0x18c   : > { %v1355_v31 = vperm.slane %v731_v18, 2  ;;  %v1356_v62 = vperm.slane %v731_v18, 3  ;;  %v1357_v60 = vperm.slane %v731_v18, 4  ;;  %v736_v36 = vrot.slane %v735_v63, 4 }
 0x18d   : > { %v4071_v42 = vmax.f32 %v4069_v59, %v4070_v25  ;;  %v2633_v41 = vadd.f32 %v8000_v44, %v1353_v12  ;;  %v2634_v55 = vadd.f32 %v8036_v29, %v1354_v26  ;;  %v737_v56 = vsel %vm671_vm6, %v8227_v10, %v8198_v58 }
 0x18e   : > { %v2635_v17 = vadd.f32 %v8039_v23, %v1355_v31  ;;  %v2636_v16 = vadd.f32 %v8042_v9, %v1356_v62  ;;  %v2637_v46 = vadd.f32 %v8006_v24, %v1357_v60  ;;  %v1358_v37 = vperm.slane %v736_v36, 0 }
 0x18f   : > { %v4073_v20 = vmax.f32 %v4071_v42, %v4072_v13  ;;  %v3341_v33 = vsel %vm3218_vm0, %v2633_v41, -inf  ;;  %v3342_v15 = vsel %vm3218_vm0, %v2634_v55, -inf  ;;  %v1359_v1 = vperm.slane %v736_v36, 1  ;;  %v8427_v55 = vpop.xlane.xlu2 %3801 }
 0x190   : > { %v3343_v49 = vmax.f32 %v3341_v33, %v3342_v15  ;;  %v3344_v47 = vsel %vm3218_vm0, %v2635_v17, -inf  ;;  %v3346_v39 = vsel %vm3218_vm0, %v2636_v16, -inf  ;;  %v3348_v27 = vsel %vm3226_vm3, %v2637_v46, -inf }
 0x191   : > { %v4075_v35 = vmax.f32 %v4073_v20, %v4074_v54  ;;  %v1360_v28 = vperm.slane %v736_v36, 2  ;;  %v1361_v43 = vperm.slane %v736_v36, 3  ;;  %v1362_v52 = vperm.slane %v736_v36, 4 }
 0x192   : > { %v3345_v50 = vmax.f32 %v3343_v49, %v3344_v47  ;;  %v2638_v32 = vadd.f32 %v8000_v44, %v1358_v37  ;;  %v2639_v6 = vadd.f32 %v8036_v29, %v1359_v1  ;;  %vm12513_vm13 = vcmask 1046533  }
 0x193   : > { %v738_v4 = vsel %vm12513_vm13, %v737_v56, %v8215_v11  ;;  %4076 = vmax.xlane.f32.xlu2 %v4075_v35  ;;  %v2640_v19 = vadd.f32 %v8039_v23, %v1360_v28  ;;  %v2641_v48 = vadd.f32 %v8042_v9, %v1361_v43  ;;  %v2642_v40 = vadd.f32 %v8006_v24, %v1362_v52 }
 0x194   : > { %vm12514_vm8 = vcmask 1040384   ;;  %v3347_v57 = vmax.f32 %v3345_v50, %v3346_v39  ;;  %v3352_v61 = vsel %vm3218_vm0, %v2638_v32, -inf  ;;  %v3353_v0 = vsel %vm3218_vm0, %v2639_v6, -inf  ;;  %v8442_v39 = vpop.xlane.xlu1 %3779  ;;  %v8446_v32 = vld [vmem:[#allocation1] sm:$0xff] }
 0x195   : > { %v739_v53 = vsel %vm12514_vm8, %v8220_v51, %v8229_v14  ;;  %vm12515_vm14 = vcmask 1044480   ;;  %v3354_v45 = vmax.f32 %v3352_v61, %v3353_v0  ;;  %v3355_v8 = vsel %vm3218_vm0, %v2640_v19, -inf }
 0x196   : > { %v740_v3 = vsel %vm12515_vm14, %v739_v53, %v738_v4  ;;  %v3357_v38 = vsel %vm3218_vm0, %v2641_v48, -inf  ;;  %v3349_v18 = vmax.f32 %v3347_v57, %v3348_v27  ;;  %v1054_v30 = vsel %vm679_vm15, %v8143_v34, %v8117_v5  ;;  %v8452_v48 = vpop.xlane.xlu0 %3757  ;;  %v8456_v57 = vld [vmem:[#allocation1 + $0x24] sm:$0xff] }
 0x197   : > { %v741_v63 = vrot.slane %v740_v3, 5  ;;  %v1056_v22 = vsel %vm658_vm7, %v8121_v2, %v8146_v21  ;;  %v3356_v25 = vmax.f32 %v3354_v45, %v3355_v8  ;;  %v3359_v13 = vsel %vm3226_vm3, %v2642_v40, -inf }
 0x198   : > { %vm12516_vm5 = vcmask 1045504   ;;  %v12324_v54 = vlaneseq  ;;  %3350 = vmax.xlane.f32.xlu1 %v3349_v18  ;;  %vm12517_vm9 = vcmask 1045505   ;;  %v1059_v15 = vsel %vm687_vm4, %v8117_v5, %v8143_v34 }
 0x199   : > { %v1055_v59 = vsel %vm12516_vm5, %v8119_v7, %v1054_v30  ;;  %v1363_v12 = vperm.slane %v741_v63, 0  ;;  %v1364_v26 = vperm.slane %v741_v63, 1  ;;  %v1365_v31 = vperm.slane %v741_v63, 2  ;;  %vm12521_vm14 = vmmov %vm12516_vm5 }
 0x19a   : > { %v1366_v62 = vperm.slane %v741_v63, 3  ;;  %v3358_v60 = vmax.f32 %v3356_v25, %v3357_v38  ;;  %v1367_v36 = vperm.slane %v741_v63, 4  ;;  %v1057_v42 = vsel %vm12517_vm9, %v1056_v22, %v1055_v59  ;;  %vm12522_vm5 = vmmov %vm12517_vm9 }
 0x19b   : > { %v8425_v41 = vand.u32 127, %v12324_v54  ;;  %v2643_v56 = vadd.f32 %v8000_v44, %v1363_v12  ;;  %v2644_v17 = vadd.f32 %v8036_v29, %v1364_v26  ;;  %v2645_v16 = vadd.f32 %v8039_v23, %v1365_v31 }
 0x19c   : > { %v2646_v46 = vadd.f32 %v8042_v9, %v1366_v62  ;;  %v3360_v37 = vmax.f32 %v3358_v60, %v3359_v13  ;;  %v2647_v20 = vadd.f32 %v8006_v24, %v1367_v36  ;;  %v1058_v33 = vrot.slane %v1057_v42, 6 }
 0x19d   : > { %12518 = vst [vmem:[#allocation5_spill] sm:$0xff] %v8425_v41  ;;  %v3363_v1 = vsel %vm3218_vm0, %v2643_v56, -inf  ;;  %v3364_v49 = vsel %vm3218_vm0, %v2644_v17, -inf  ;;  %v3366_v44 = vsel %vm3218_vm0, %v2645_v16, -inf  ;;  %v5703_v47 = vperm.slane %v8427_v55, %v8425_v41 }
 0x19e   : > { %3361 = vmax.xlane.f32.xlu0 %v3360_v37  ;;  %v3365_v27 = vmax.f32 %v3363_v1, %v3364_v49  ;;  %v3368_v24 = vsel %vm3218_vm0, %v2646_v46, -inf  ;;  %v1688_v35 = vperm.slane %v1058_v33, 0  ;;  %v1689_v28 = vperm.slane %v1058_v33, 1  ;;  %v8491_v37 = vld [vmem:[#allocation1 + $0x9] sm:$0xff] }
 0x19f   : > { %v3370_v43 = vsel %vm3226_vm3, %v2647_v20, -inf  ;;  %v1690_v5 = vperm.slane %v1058_v33, 2  ;;  %v1691_v34 = vperm.slane %v1058_v33, 3  ;;  %v1692_v52 = vperm.slane %v1058_v33, 4  ;;  %v8494_v20 = vld [vmem:[#allocation1 + $0x12] sm:$0xff]  ;;  %v8499_v33 = vld [vmem:[#allocation1 + $0x1b] sm:$0xff] }
 0x1a0   : > { %v3367_v50 = vmax.f32 %v3365_v27, %v3366_v44  ;;  %v2968_v6 = vadd.f32 %v8446_v32, %v1688_v35  ;;  %v2969_v4 = vadd.f32 %v8036_v29, %v1689_v28  ;;  %v5701_v19 = vperm.slane %v8442_v39, %v8425_v41 }
 0x1a1   : > { %v2970_v40 = vadd.f32 %v8039_v23, %v1690_v5  ;;  %v2971_v53 = vadd.f32 %v8042_v9, %v1691_v34  ;;  %v2972_v61 = vadd.f32 %v8456_v57, %v1692_v52  ;;  %vm12519_vm13 = vcmask 1046529  }
 0x1a2   : > { %v1060_v0 = vsel %vm12519_vm13, %v8119_v7, %v1059_v15  ;;  %v3369_v3 = vmax.f32 %v3367_v50, %v3368_v24  ;;  %v4078_v45 = vsel %vm3218_vm0, %v2968_v6, -inf  ;;  %v4079_v29 = vsel %vm3218_vm0, %v2969_v4, -inf  ;;  %vm12520_vm8 = vmmov %vm12519_vm13 }
 0x1a3   : > { %v1061_v8 = vsel %vm667_vm2, %v8121_v2, %v8146_v21  ;;  %v4080_v38 = vmax.f32 %v4078_v45, %v4079_v29  ;;  %v4081_v23 = vsel %vm3218_vm0, %v2970_v40, -inf  ;;  %v4083_v9 = vsel %vm3218_vm0, %v2971_v53, -inf }
 0x1a4   : > { %v5699_v18 = vperm.slane %v8452_v48, %v8425_v41  ;;  %v3371_v63 = vmax.f32 %v3369_v3, %v3370_v43  ;;  %v1062_v7 = vsel %vm710_vm1, %v1061_v8, %v1060_v0  ;;  %v747_v30 = vsel %vm687_vm4, %v8198_v58, %v8227_v10 }
 0x1a5   : > { %v749_v22 = vsel %vm667_vm2, %v8220_v51, %v8229_v14  ;;  %v4082_v2 = vmax.f32 %v4080_v38, %v4081_v23  ;;  %v1063_v21 = vrot.slane %v1062_v7, 7  ;;  %v748_v25 = vsel %vm12520_vm8, %v8215_v11, %v747_v30  ;;  %v3769_v30 = vpop.xlane.xlu0 %3768 }
 0x1a6   : > { %v742_v13 = vsel %vm679_vm15, %v8227_v10, %v8198_v58  ;;  %3372 = vmax.xlane.f32.xlu2 %v3371_v63  ;;  %v4085_v59 = vsel %vm3226_vm3, %v2972_v61, -inf  ;;  %v750_v12 = vsel %vm710_vm1, %v749_v22, %v748_v25  ;;  %v744_v31 = vsel %vm658_vm7, %v8220_v51, %v8229_v14  ;;  %v8497_v14 = vpop.xlane.xlu2 %3812 }
 0x1a7   : > { %v743_v26 = vsel %vm12521_vm14, %v8215_v11, %v742_v13  ;;  %v4084_v62 = vmax.f32 %v4082_v2, %v4083_v9  ;;  %v1693_v60 = vperm.slane %v1063_v21, 0  ;;  %v1694_v36 = vperm.slane %v1063_v21, 1  ;;  %v3791_v13 = vpop.xlane.xlu1 %3790 }
 0x1a8   : > { %v1695_v42 = vperm.slane %v1063_v21, 2  ;;  %v1696_v56 = vperm.slane %v1063_v21, 3  ;;  %v1697_v17 = vperm.slane %v1063_v21, 4  ;;  %v751_v16 = vrot.slane %v750_v12, 7 }
 0x1a9   : > { %v745_v58 = vsel %vm12522_vm5, %v744_v31, %v743_v26  ;;  %v4086_v10 = vmax.f32 %v4084_v62, %v4085_v59  ;;  %v2973_v46 = vadd.f32 %v8446_v32, %v1693_v60  ;;  %v2974_v11 = vadd.f32 %v8491_v37, %v1694_v36  ;;  %v328_v59 = vld [vmem:[%s12300_s2 + $0x198] sm:$0xff] }
 0x1aa   : > { %v2975_v51 = vadd.f32 %v8494_v20, %v1695_v42  ;;  %v2976_v15 = vadd.f32 %v8499_v33, %v1696_v56  ;;  %v2977_v1 = vadd.f32 %v8456_v57, %v1697_v17  ;;  %v1373_v49 = vperm.slane %v751_v16, 0  ;;  %v483_v17 = vpop.f32.mrf.mxu1 }
 0x1ab   : > { %v1374_v44 = vperm.slane %v751_v16, 1  ;;  %4087 = vmax.xlane.f32.xlu1 %v4086_v10  ;;  %v4089_v27 = vsel %vm3218_vm0, %v2973_v46, -inf  ;;  %v4090_v24 = vsel %vm3218_vm0, %v2974_v11, -inf  ;;  %v1375_v28 = vperm.slane %v751_v16, 2  ;;  %v329_v46 = vld [vmem:[%s12300_s2 + $0x1a0] sm:$0xff]  ;;  %v330_v11 = vld [vmem:[%s12300_s2 + $0x1a8] sm:$0xff]  ;;  %6812 = vmatpush.msk.msrb.mxu3 %vm3218_vm0, %v483_v17 }
 0x1ac   : > { %v4092_v35 = vsel %vm3218_vm0, %v2975_v51, -inf  ;;  %v4091_v43 = vmax.f32 %v4089_v27, %v4090_v24  ;;  %v4094_v5 = vsel %vm3218_vm0, %v2976_v15, -inf  ;;  %v1376_v34 = vperm.slane %v751_v16, 3  ;;  %v331_v51 = vld [vmem:[%s12300_s2 + $0x1b0] sm:$0xff]  ;;  %6769 = vmatpush.msk.msra.mxu2 %vm3218_vm0, %v483_v17 }
 0x1ad   : > { %v5704_v52 = vperm.slane %v8497_v14, %v8425_v41  ;;  %v1377_v50 = vperm.slane %v751_v16, 4  ;;  %v2653_v6 = vadd.f32 %v8446_v32, %v1373_v49  ;;  %v2654_v4 = vadd.f32 %v8491_v37, %v1374_v44  ;;  %v8552_v24 = vld [vmem:[%s12300_s2 + $0x190] sm:$0xff] }
 0x1ae   : > { %v2655_v40 = vadd.f32 %v8494_v20, %v1375_v28  ;;  %v4093_v53 = vmax.f32 %v4091_v43, %v4092_v35  ;;  %v4096_v61 = vsel %vm3226_vm3, %v2977_v1, -inf  ;;  %v2656_v0 = vadd.f32 %v8499_v33, %v1376_v34 }
 0x1af   : > { %v746_v3 = vrot.slane %v745_v58, 6  ;;  %v2657_v45 = vadd.f32 %v8456_v57, %v1377_v50  ;;  %v3385_v29 = vsel %vm3218_vm0, %v2653_v6, -inf  ;;  %v3386_v8 = vsel %vm3218_vm0, %v2654_v4, -inf }
 0x1b0   : > { %v3388_v38 = vsel %vm3218_vm0, %v2655_v40, -inf  ;;  %v4095_v23 = vmax.f32 %v4093_v53, %v4094_v5  ;;  %v3387_v9 = vmax.f32 %v3385_v29, %v3386_v8  ;;  %v3390_v63 = vsel %vm3218_vm0, %v2656_v0, -inf }
 0x1b1   : > { %v1368_v7 = vperm.slane %v746_v3, 0  ;;  %v3392_v22 = vsel %vm3226_vm3, %v2657_v45, -inf  ;;  %v1369_v2 = vperm.slane %v746_v3, 1  ;;  %v1370_v21 = vperm.slane %v746_v3, 2 }
 0x1b2   : > { %v1371_v25 = vperm.slane %v746_v3, 3  ;;  %v4097_v12 = vmax.f32 %v4095_v23, %v4096_v61  ;;  %v3389_v26 = vmax.f32 %v3387_v9, %v3388_v38  ;;  %v1372_v31 = vperm.slane %v746_v3, 4 }
 0x1b3   : > { %v2648_v62 = vadd.f32 %v8446_v32, %v1368_v7  ;;  %v2649_v60 = vadd.f32 %v8491_v37, %v1369_v2  ;;  %v2650_v36 = vadd.f32 %v8494_v20, %v1370_v21  ;;  %v5700_v56 = vperm.slane %v3769_v30, %v8425_v41 }
 0x1b4   : > { %v2651_v42 = vadd.f32 %v8499_v33, %v1371_v25  ;;  %4098 = vmax.xlane.f32.xlu0 %v4097_v12  ;;  %v3391_v16 = vmax.f32 %v3389_v26, %v3390_v63  ;;  %v2652_v58 = vadd.f32 %v8456_v57, %v1372_v31  ;;  %v5702_v10 = vperm.slane %v3791_v13, %v8425_v41 }
 0x1b5   : > { %v8539_v15 = vrot.slane %v328_v59, 7  ;;  %v3374_v1 = vsel %vm3218_vm0, %v2648_v62, -inf  ;;  %v3375_v49 = vsel %vm3218_vm0, %v2649_v60, -inf  ;;  %v3377_v44 = vsel %vm3218_vm0, %v2650_v36, -inf }
 0x1b6   : > { %v5822_v27 = vsel %vm658_vm7, %v5700_v56, %v5699_v18  ;;  %v3393_v35 = vmax.f32 %v3391_v16, %v3392_v22  ;;  %v3376_v28 = vmax.f32 %v3374_v1, %v3375_v49  ;;  %v3379_v43 = vsel %vm3218_vm0, %v2651_v42, -inf  ;;  %v8609_v49 = vpop.xlane.xlu2 %3845 }
 0x1b7   : > { %v3381_v5 = vsel %vm3226_vm3, %v2652_v58, -inf  ;;  %v5823_v48 = vsel %vm667_vm2, %v5701_v19, %v5822_v27  ;;  %v8561_v34 = vrot.slane %v329_v46, 6  ;;  %v8563_v18 = vrot.slane %v330_v11, 5 }
 0x1b8   : > { %v8565_v50 = vrot.slane %v331_v51, 4  ;;  %3394 = vmax.xlane.f32.xlu2 %v3393_v35  ;;  %v3378_v6 = vmax.f32 %v3376_v28, %v3377_v44  ;;  %vm12523_vm9 = vcmask 1040384   ;;  %v1073_v40 = vsel %vm667_vm2, %v8552_v24, %v8539_v15 }
 0x1b9   : > { %v1064_v4 = vsel %vm12523_vm9, %v8552_v24, %v8539_v15  ;;  %v1068_v39 = vsel %vm658_vm7, %v8552_v24, %v8539_v15  ;;  %vm12524_vm13 = vcmask 1041408   ;;  %vm12525_vm8 = vcmask 1043458  }
 0x1ba   : > { %v1065_v19 = vsel %vm12524_vm13, %v1064_v4, %v8561_v34  ;;  %v1066_v53 = vsel %vm12322_vm10, %v8563_v18, %v8565_v50  ;;  %v1074_v61 = vsel %vm12525_vm8, %v1073_v40, %v8561_v34  ;;  %v1075_v0 = vsel %vm671_vm6, %v8563_v18, %v8565_v50 }
 0x1bb   : > { %v3380_v3 = vmax.f32 %v3378_v6, %v3379_v43  ;;  %v8587_v45 = vsel %vm12322_vm10, %v5702_v10, %v5823_v48  ;;  %v1067_v29 = vsel %vm12321_vm11, %v1065_v19, %v1066_v53  ;;  %vm12526_vm14 = vcmask 1044482  }
 0x1bc   : > { %v1076_v8 = vsel %vm12526_vm14, %v1074_v61, %v1075_v0  ;;  %v1698_v38 = vperm.slane %v1067_v29, 0  ;;  %v1699_v23 = vperm.slane %v1067_v29, 1  ;;  %v1700_v9 = vperm.slane %v1067_v29, 2 }
 0x1bd   : > { %v1701_v63 = vperm.slane %v1067_v29, 3  ;;  %v3382_v7 = vmax.f32 %v3380_v3, %v3381_v5  ;;  %v1702_v30 = vperm.slane %v1067_v29, 4  ;;  %v1077_v22 = vrot.slane %v1076_v8, 2  ;;  %v8620_v29 = vpop.xlane.xlu1 %3834  ;;  %v8622_v8 = vpop.xlane.xlu0 %3823 }
 0x1be   : > { %v1069_v2 = vsel %vm12323_vm12, %v1068_v39, %v8561_v34  ;;  %v2978_v21 = vadd.f32 %v8446_v32, %v1698_v38  ;;  %v2979_v25 = vadd.f32 %v8491_v37, %v1699_v23  ;;  %v2980_v13 = vadd.f32 %v8494_v20, %v1700_v9  ;;  %v8741_v14 = vpop.xlane.xlu2 %3878 }
 0x1bf   : > { %v2981_v59 = vadd.f32 %v8499_v33, %v1701_v63  ;;  %3383 = vmax.xlane.f32.xlu1 %v3382_v7  ;;  %v1708_v12 = vperm.slane %v1077_v22, 0  ;;  %v1709_v26 = vperm.slane %v1077_v22, 1  ;;  %v1710_v31 = vperm.slane %v1077_v22, 2  ;;  %v288_v7 = vld [vmem:[%s12300_s2 + $0x58] sm:$0xff] }
 0x1c0   : > { %vm12527_vm5 = vcmask 1044484   ;;  %v2982_v60 = vadd.f32 %v8456_v57, %v1702_v30  ;;  %v4100_v36 = vsel %vm3218_vm0, %v2978_v21, -inf  ;;  %v4101_v42 = vsel %vm3218_vm0, %v2979_v25, -inf  ;;  %v289_v25 = vld [vmem:[%s12300_s2 + $0x60] sm:$0xff] }
 0x1c1   : > { %v1070_v62 = vsel %vm12527_vm5, %v8563_v18, %v8565_v50  ;;  %v4103_v56 = vsel %vm3218_vm0, %v2980_v13, -inf  ;;  %v4102_v17 = vmax.f32 %v4100_v36, %v4101_v42  ;;  %v4105_v16 = vsel %vm3218_vm0, %v2981_v59, -inf }
 0x1c2   : > { %v1711_v58 = vperm.slane %v1077_v22, 3  ;;  %v1712_v10 = vperm.slane %v1077_v22, 4  ;;  %v2988_v46 = vadd.f32 %v8446_v32, %v1708_v12  ;;  %v2989_v11 = vadd.f32 %v8491_v37, %v1709_v26 }
 0x1c3   : > { %v2990_v51 = vadd.f32 %v8494_v20, %v1710_v31  ;;  %vm12528_vm9 = vcmask 1043457   ;;  %v4104_v44 = vmax.f32 %v4102_v17, %v4103_v56  ;;  %v4107_v43 = vsel %vm3226_vm3, %v2982_v60, -inf  ;;  %v290_v31 = vld [vmem:[%s12300_s2 + $0x68] sm:$0xff] }
 0x1c4   : > { %v1071_v1 = vsel %vm12528_vm9, %v1069_v2, %v1070_v62  ;;  %v2991_v27 = vadd.f32 %v8499_v33, %v1711_v58  ;;  %v2992_v35 = vadd.f32 %v8456_v57, %v1712_v10  ;;  %v4122_v5 = vsel %vm3218_vm0, %v2988_v46, -inf  ;;  %v291_v62 = vld [vmem:[%s12300_s2 + $0x70] sm:$0xff] }
 0x1c5   : > { %v1072_v28 = vrot.slane %v1071_v1, 1  ;;  %v4123_v48 = vsel %vm3218_vm0, %v2989_v11, -inf  ;;  %v4125_v6 = vsel %vm3218_vm0, %v2990_v51, -inf  ;;  %v4106_v4 = vmax.f32 %v4104_v44, %v4105_v16  ;;  %v8655_v10 = vld [vmem:[%s12300_s2 + $0x50] sm:$0xff] }
 0x1c6   : > { %v4124_v40 = vmax.f32 %v4122_v5, %v4123_v48  ;;  %v4127_v39 = vsel %vm3218_vm0, %v2991_v27, -inf  ;;  %v5707_v19 = vperm.slane %v8609_v49, %v8425_v41  ;;  %v4129_v9 = vsel %vm3226_vm3, %v2992_v35, -inf }
 0x1c7   : > { %v1703_v53 = vperm.slane %v1072_v28, 0  ;;  %v1704_v61 = vperm.slane %v1072_v28, 1  ;;  %v1705_v0 = vperm.slane %v1072_v28, 2  ;;  %v1706_v3 = vperm.slane %v1072_v28, 3 }
 0x1c8   : > { %v4108_v38 = vmax.f32 %v4106_v4, %v4107_v43  ;;  %v4126_v23 = vmax.f32 %v4124_v40, %v4125_v6  ;;  %v1707_v63 = vperm.slane %v1072_v28, 4  ;;  %v5706_v12 = vperm.slane %v8620_v29, %v8425_v41 }
 0x1c9   : > { %v2983_v30 = vadd.f32 %v8446_v32, %v1703_v53  ;;  %v2984_v22 = vadd.f32 %v8491_v37, %v1704_v61  ;;  %v2985_v2 = vadd.f32 %v8494_v20, %v1705_v0  ;;  %v2986_v21 = vadd.f32 %v8499_v33, %v1706_v3 }
 0x1ca   : > { %4109 = vmax.xlane.f32.xlu0 %v4108_v38  ;;  %v4128_v13 = vmax.f32 %v4126_v23, %v4127_v39  ;;  %v2987_v59 = vadd.f32 %v8456_v57, %v1707_v63  ;;  %v5705_v26 = vperm.slane %v8622_v8, %v8425_v41  ;;  %v8649_v56 = vrot.slane %v288_v7, 7 }
 0x1cb   : > { %v4111_v60 = vsel %vm3218_vm0, %v2983_v30, -inf  ;;  %v4112_v36 = vsel %vm3218_vm0, %v2984_v22, -inf  ;;  %v4114_v42 = vsel %vm3218_vm0, %v2985_v2, -inf  ;;  %v4116_v58 = vsel %vm3218_vm0, %v2986_v21, -inf }
 0x1cc   : > { %v4130_v17 = vmax.f32 %v4128_v13, %v4129_v9  ;;  %v4113_v16 = vmax.f32 %v4111_v60, %v4112_v36  ;;  %v8657_v46 = vrot.slane %v289_v25, 6  ;;  %v8659_v11 = vrot.slane %v290_v31, 5 }
 0x1cd   : > { %v8661_v51 = vrot.slane %v291_v62, 4  ;;  %vm12529_vm13 = vcmask 1040384   ;;  %v1078_v44 = vsel %vm12322_vm10, %v8552_v24, %v8539_v15  ;;  %vm12530_vm8 = vcmask 1041408  }
 0x1ce   : > { %v752_v1 = vsel %vm12529_vm13, %v8655_v10, %v8649_v56  ;;  %4131 = vmax.xlane.f32.xlu2 %v4130_v17  ;;  %v4115_v27 = vmax.f32 %v4113_v16, %v4114_v42  ;;  %vm12531_vm14 = vcmask 1044483   ;;  %v1080_v43 = vsel %vm679_vm15, %v8563_v18, %v8565_v50 }
 0x1cf   : > { %v753_v35 = vsel %vm12530_vm8, %v752_v1, %v8657_v46  ;;  %v1079_v28 = vsel %vm12531_vm14, %v1078_v44, %v8561_v34  ;;  %v4118_v5 = vsel %vm3226_vm3, %v2987_v59, -inf  ;;  %v754_v48 = vsel %vm12322_vm10, %v8659_v11, %v8661_v51 }
 0x1d0   : > { %vm12532_vm5 = vcmask 1045507   ;;  %v756_v4 = vsel %vm658_vm7, %v8655_v10, %v8649_v56  ;;  %v4117_v40 = vmax.f32 %v4115_v27, %v4116_v58  ;;  %v755_v39 = vsel %vm12321_vm11, %v753_v35, %v754_v48 }
 0x1d1   : > { %v1081_v6 = vsel %vm12532_vm5, %v1079_v28, %v1080_v43  ;;  %vm12533_vm9 = vcmask 1044484   ;;  %v1378_v0 = vperm.slane %v755_v39, 0  ;;  %v1379_v3 = vperm.slane %v755_v39, 1 }
 0x1d2   : > { %v1082_v53 = vrot.slane %v1081_v6, 3  ;;  %v758_v61 = vsel %vm12533_vm9, %v8659_v11, %v8661_v51  ;;  %v1380_v38 = vperm.slane %v755_v39, 2  ;;  %v1381_v23 = vperm.slane %v755_v39, 3  ;;  %vm12535_vm8 = vmmov %vm12533_vm9 }
 0x1d3   : > { %v4119_v9 = vmax.f32 %v4117_v40, %v4118_v5  ;;  %v1382_v63 = vperm.slane %v755_v39, 4  ;;  %v2658_v22 = vadd.f32 %v8446_v32, %v1378_v0  ;;  %v2659_v2 = vadd.f32 %v8491_v37, %v1379_v3 }
 0x1d4   : > { %v1713_v7 = vperm.slane %v1082_v53, 0  ;;  %v1714_v30 = vperm.slane %v1082_v53, 1  ;;  %v2660_v21 = vadd.f32 %v8494_v20, %v1380_v38  ;;  %v2661_v25 = vadd.f32 %v8499_v33, %v1381_v23 }
 0x1d5   : > { %4120 = vmax.xlane.f32.xlu1 %v4119_v9  ;;  %v1715_v13 = vperm.slane %v1082_v53, 2  ;;  %v1716_v59 = vperm.slane %v1082_v53, 3  ;;  %v1717_v31 = vperm.slane %v1082_v53, 4  ;;  %v757_v62 = vsel %vm12323_vm12, %v756_v4, %v8657_v46 }
 0x1d6   : > { %v2662_v60 = vadd.f32 %v8456_v57, %v1382_v63  ;;  %v3396_v36 = vsel %vm3218_vm0, %v2658_v22, -inf  ;;  %v3397_v42 = vsel %vm3218_vm0, %v2659_v2, -inf  ;;  %v3399_v17 = vsel %vm3218_vm0, %v2660_v21, -inf }
 0x1d7   : > { %v3398_v16 = vmax.f32 %v3396_v36, %v3397_v42  ;;  %v3401_v58 = vsel %vm3218_vm0, %v2661_v25, -inf  ;;  %v2993_v1 = vadd.f32 %v8446_v32, %v1713_v7  ;;  %v2994_v44 = vadd.f32 %v8491_v37, %v1714_v30 }
 0x1d8   : > { %v2995_v27 = vadd.f32 %v8494_v20, %v1715_v13  ;;  %v2996_v35 = vadd.f32 %v8499_v33, %v1716_v59  ;;  %v2997_v28 = vadd.f32 %v8456_v57, %v1717_v31  ;;  %vm12534_vm13 = vcmask 1043457  }
 0x1d9   : > { %v759_v43 = vsel %vm12534_vm13, %v757_v62, %v758_v61  ;;  %v3400_v5 = vmax.f32 %v3398_v16, %v3399_v17  ;;  %v4133_v48 = vsel %vm3218_vm0, %v2993_v1, -inf  ;;  %v4134_v6 = vsel %vm3218_vm0, %v2994_v44, -inf  ;;  %v3857_v16 = vpop.xlane.xlu0 %3856 }
 0x1da   : > { %v760_v4 = vrot.slane %v759_v43, 1  ;;  %v3403_v40 = vsel %vm3226_vm3, %v2662_v60, -inf  ;;  %v4135_v39 = vmax.f32 %v4133_v48, %v4134_v6  ;;  %v4136_v53 = vsel %vm3218_vm0, %v2995_v27, -inf  ;;  %v3868_v60 = vpop.xlane.xlu1 %3867 }
 0x1db   : > { %v4138_v0 = vsel %vm3218_vm0, %v2996_v35, -inf  ;;  %v3402_v3 = vmax.f32 %v3400_v5, %v3401_v58  ;;  %v4140_v61 = vsel %vm3226_vm3, %v2997_v28, -inf  ;;  %v5825_v62 = vsel %vm12535_vm8, %v5703_v47, %v8587_v45 }
 0x1dc   : > { %v1383_v38 = vperm.slane %v760_v4, 0  ;;  %v1384_v23 = vperm.slane %v760_v4, 1  ;;  %v1385_v9 = vperm.slane %v760_v4, 2  ;;  %v4137_v63 = vmax.f32 %v4135_v39, %v4136_v53 }
 0x1dd   : > { %v1386_v7 = vperm.slane %v760_v4, 3  ;;  %v1387_v30 = vperm.slane %v760_v4, 4  ;;  %v3404_v22 = vmax.f32 %v3402_v3, %v3403_v40  ;;  %vm5785_vm14 = vcmask 1047559  }
 0x1de   : > { %v2663_v2 = vadd.f32 %v8446_v32, %v1383_v38  ;;  %v2664_v21 = vadd.f32 %v8491_v37, %v1384_v23  ;;  %v2665_v25 = vadd.f32 %v8494_v20, %v1385_v9  ;;  %v4139_v13 = vmax.f32 %v4137_v63, %v4138_v0 }
 0x1df   : > { %v2666_v59 = vadd.f32 %v8499_v33, %v1386_v7  ;;  %v2667_v31 = vadd.f32 %v8456_v57, %v1387_v30  ;;  %3405 = vmax.xlane.f32.xlu0 %v3404_v22  ;;  %v5826_v55 = vsel %vm671_vm6, %v5704_v52, %v5825_v62  ;;  %vm6149_vm5 = vcmask 31744  }
 0x1e0   : > { %v3407_v36 = vsel %vm3218_vm0, %v2663_v2, -inf  ;;  %v3408_v42 = vsel %vm3218_vm0, %v2664_v21, -inf  ;;  %v3410_v17 = vsel %vm3218_vm0, %v2665_v25, -inf  ;;  %v4141_v58 = vmax.f32 %v4139_v13, %v4140_v61 }
 0x1e1   : > { %v3409_v1 = vmax.f32 %v3407_v36, %v3408_v42  ;;  %v3412_v44 = vsel %vm3218_vm0, %v2666_v59, -inf  ;;  %v3414_v47 = vsel %vm3226_vm3, %v2667_v31, -inf  ;;  %v5827_v45 = vsel %vm679_vm15, %v5705_v26, %v5826_v55 }
 0x1e2   : > { %v5709_v27 = vperm.slane %v3868_v60, %v8425_v41  ;;  %4142 = vmax.xlane.f32.xlu2 %v4141_v58  ;;  %v8739_v28 = vsel %vm5785_vm14, %v5706_v12, %v5827_v45  ;;  %v5708_v52 = vperm.slane %v3857_v16, %v8425_v41  ;;  %v761_v8 = vsel %vm667_vm2, %v8655_v10, %v8649_v56 }
 0x1e3   : > { %v3411_v35 = vmax.f32 %v3409_v1, %v3410_v17  ;;  %12536 = vst [vmem:[#allocation6_spill] sm:$0xff] %v8739_v28  ;;  %6776 = vmatmul.msk.f32.vlgmr.msrb.gmra.mxu3 %vm6149_vm5, %v8739_v28  ;;  %vm12537_vm9 = vcmask 1043458   ;;  %v763_v29 = vsel %vm671_vm6, %v8659_v11, %v8661_v51  ;;  %v766_v12 = vsel %vm12322_vm10, %v8655_v10, %v8649_v56 }
 0x1e4   : > { %v762_v26 = vsel %vm12537_vm9, %v761_v8, %v8657_v46  ;;  %v768_v43 = vsel %vm679_vm15, %v8659_v11, %v8661_v51  ;;  %v5829_v48 = vsel %vm658_vm7, %v5708_v52, %v5707_v19  ;;  %vm12538_vm13 = vcmask 1044482   ;;  %v8797_v8 = vpop.xlane.xlu2 %3911 }
 0x1e5   : > { %v3413_v5 = vmax.f32 %v3411_v35, %v3412_v44  ;;  %v764_v6 = vsel %vm12538_vm13, %v762_v26, %v763_v29  ;;  %vm12539_vm8 = vcmask 1044483   ;;  %v5710_v40 = vperm.slane %v8741_v14, %v8425_v41  ;;  %v8799_v26 = vpop.xlane.xlu1 %3900 }
 0x1e6   : > { %v767_v4 = vsel %vm12539_vm8, %v766_v12, %v8657_v46  ;;  %v765_v39 = vrot.slane %v764_v6, 2  ;;  %vm12540_vm9 = vcmask 1045507   ;;  %vm12541_vm11 = vcmask 1044484  }
 0x1e7   : > { %v769_v53 = vsel %vm12540_vm9, %v767_v4, %v768_v43  ;;  %v1083_v0 = vsel %vm12541_vm11, %v8552_v24, %v8539_v15  ;;  %v3415_v3 = vmax.f32 %v3413_v5, %v3414_v47  ;;  %v8774_v49 = vsel %vm667_vm2, %v5709_v27, %v5829_v48 }
 0x1e8   : > { %v770_v19 = vrot.slane %v769_v53, 3  ;;  %vm12542_vm13 = vcmask 1045508   ;;  %v1388_v23 = vperm.slane %v765_v39, 0  ;;  %v1389_v9 = vperm.slane %v765_v39, 1 }
 0x1e9   : > { %v1084_v38 = vsel %vm12542_vm13, %v1083_v0, %v8561_v34  ;;  %v1390_v63 = vperm.slane %v765_v39, 2  ;;  %v1391_v61 = vperm.slane %v765_v39, 3  ;;  %3416 = vmax.xlane.f32.xlu1 %v3415_v3  ;;  %v1392_v7 = vperm.slane %v765_v39, 4 }
 0x1ea   : > { %v1393_v30 = vperm.slane %v770_v19, 0  ;;  %v1394_v22 = vperm.slane %v770_v19, 1  ;;  %v1395_v2 = vperm.slane %v770_v19, 2  ;;  %v2668_v21 = vadd.f32 %v8446_v32, %v1388_v23 }
 0x1eb   : > { %v2669_v25 = vadd.f32 %v8491_v37, %v1389_v9  ;;  %v2670_v13 = vadd.f32 %v8494_v20, %v1390_v63  ;;  %v2671_v59 = vadd.f32 %v8499_v33, %v1391_v61  ;;  %v1396_v31 = vperm.slane %v770_v19, 3 }
 0x1ec   : > { %v1397_v62 = vperm.slane %v770_v19, 4  ;;  %v2673_v60 = vadd.f32 %v8446_v32, %v1393_v30  ;;  %v1085_v36 = vsel %vm687_vm4, %v8565_v50, %v8563_v18  ;;  %v2672_v42 = vadd.f32 %v8456_v57, %v1392_v7 }
 0x1ed   : > { %v3418_v17 = vsel %vm3218_vm0, %v2668_v21, -inf  ;;  %v3419_v16 = vsel %vm3218_vm0, %v2669_v25, -inf  ;;  %v3421_v58 = vsel %vm3218_vm0, %v2670_v13, -inf  ;;  %v3423_v44 = vsel %vm3218_vm0, %v2671_v59, -inf }
 0x1ee   : > { %v3420_v1 = vmax.f32 %v3418_v17, %v3419_v16  ;;  %v2674_v55 = vadd.f32 %v8491_v37, %v1394_v22  ;;  %v2675_v47 = vadd.f32 %v8494_v20, %v1395_v2  ;;  %v2676_v45 = vadd.f32 %v8499_v33, %v1396_v31  ;;  %v3890_v2 = vpop.xlane.xlu0 %3889 }
 0x1ef   : > { %v2677_v27 = vadd.f32 %v8456_v57, %v1397_v62  ;;  %v3429_v35 = vsel %vm3218_vm0, %v2673_v60, -inf  ;;  %vm12543_vm11 = vcmask 1046532   ;;  %v3425_v48 = vsel %vm3226_vm3, %v2672_v42, -inf }
 0x1f0   : > { %v1086_v52 = vsel %vm12543_vm11, %v1084_v38, %v1085_v36  ;;  %v3422_v29 = vmax.f32 %v3420_v1, %v3421_v58  ;;  %v3430_v12 = vsel %vm3218_vm0, %v2674_v55, -inf  ;;  %v3432_v43 = vsel %vm3218_vm0, %v2675_v47, -inf }
 0x1f1   : > { %v1087_v5 = vrot.slane %v1086_v52, 4  ;;  %v3431_v6 = vmax.f32 %v3429_v35, %v3430_v12  ;;  %v3434_v4 = vsel %vm3218_vm0, %v2676_v45, -inf  ;;  %v3436_v39 = vsel %vm3226_vm3, %v2677_v27, -inf  ;;  %v8842_v27 = vpop.xlane.xlu2 %3944  ;;  %v8844_v35 = vpop.xlane.xlu1 %3933 }
 0x1f2   : > { %v3424_v53 = vmax.f32 %v3422_v29, %v3423_v44  ;;  %v5713_v63 = vperm.slane %v8797_v8, %v8425_v41  ;;  %v5712_v59 = vperm.slane %v8799_v26, %v8425_v41  ;;  %v5831_v36 = vsel %vm12322_vm10, %v5710_v40, %v8774_v49 }
 0x1f3   : > { %v1718_v0 = vperm.slane %v1087_v5, 0  ;;  %v1719_v3 = vperm.slane %v1087_v5, 1  ;;  %v1720_v19 = vperm.slane %v1087_v5, 2  ;;  %v3433_v38 = vmax.f32 %v3431_v6, %v3432_v43 }
 0x1f4   : > { %v1721_v23 = vperm.slane %v1087_v5, 3  ;;  %v1722_v9 = vperm.slane %v1087_v5, 4  ;;  %v3426_v61 = vmax.f32 %v3424_v53, %v3425_v48  ;;  %v5711_v58 = vperm.slane %v3890_v2, %v8425_v41 }
 0x1f5   : > { %v2998_v7 = vadd.f32 %v8446_v32, %v1718_v0  ;;  %v2999_v30 = vadd.f32 %v8491_v37, %v1719_v3  ;;  %v3000_v22 = vadd.f32 %v8494_v20, %v1720_v19  ;;  %v3435_v21 = vmax.f32 %v3433_v38, %v3434_v4 }
 0x1f6   : > { %v3001_v25 = vadd.f32 %v8499_v33, %v1721_v23  ;;  %v3002_v13 = vadd.f32 %v8456_v57, %v1722_v9  ;;  %3427 = vmax.xlane.f32.xlu0 %v3426_v61  ;;  %v1088_v44 = vsel %vm671_vm6, %v8552_v24, %v8539_v15  ;;  %vm12544_vm8 = vcmask 1040384  }
 0x1f7   : > { %v4144_v31 = vsel %vm3218_vm0, %v2998_v7, -inf  ;;  %v4145_v62 = vsel %vm3218_vm0, %v2999_v30, -inf  ;;  %v4147_v60 = vsel %vm3218_vm0, %v3000_v22, -inf  ;;  %v3437_v42 = vmax.f32 %v3435_v21, %v3436_v39 }
 0x1f8   : > { %v4146_v17 = vmax.f32 %v4144_v31, %v4145_v62  ;;  %v4149_v16 = vsel %vm3218_vm0, %v3001_v25, -inf  ;;  %v4151_v1 = vsel %vm3226_vm3, %v3002_v13, -inf  ;;  %v1090_v55 = vsel %vm12544_vm8, %v8563_v18, %v8565_v50  ;;  %v3923_v31 = vpop.xlane.xlu0 %3922 }
 0x1f9   : > { %v1093_v14 = vsel %vm679_vm15, %v8552_v24, %v8539_v15  ;;  %3438 = vmax.xlane.f32.xlu2 %v3437_v42  ;;  %vm12545_vm9 = vcmask 1046533   ;;  %vm12546_vm13 = vcmask 1045504   ;;  %v1095_v45 = vsel %vm658_vm7, %v8563_v18, %v8565_v50 }
 0x1fa   : > { %v4148_v40 = vmax.f32 %v4146_v17, %v4147_v60  ;;  %v1089_v49 = vsel %vm12545_vm9, %v1088_v44, %v8561_v34  ;;  %v1094_v47 = vsel %vm12546_vm13, %v8561_v34, %v1093_v14  ;;  %vm12547_vm11 = vcmask 1044480  }
 0x1fb   : > { %v1091_v52 = vsel %vm12547_vm11, %v1090_v55, %v1089_v49  ;;  %vm12548_vm8 = vcmask 1045505   ;;  %vm12549_vm10 = vcmask 1044484   ;;  %v773_v43 = vsel %vm687_vm4, %v8661_v51, %v8659_v11 }
 0x1fc   : > { %v1096_v29 = vsel %vm12548_vm8, %v1095_v45, %v1094_v47  ;;  %v771_v12 = vsel %vm12549_vm10, %v8655_v10, %v8649_v56  ;;  %v4150_v5 = vmax.f32 %v4148_v40, %v4149_v16  ;;  %v1092_v48 = vrot.slane %v1091_v52, 5  ;;  %vm12551_vm13 = vmmov %vm12549_vm10 }
 0x1fd   : > { %v1097_v6 = vrot.slane %v1096_v29, 6  ;;  %vm12550_vm9 = vcmask 1045508   ;;  %v5832_v39 = vsel %vm12551_vm13, %v5711_v58, %v5831_v36  ;;  %vm12552_vm12 = vcmask 1046532  }
 0x1fe   : > { %v772_v4 = vsel %vm12550_vm9, %v771_v12, %v8657_v46  ;;  %v5716_v0 = vperm.slane %v8842_v27, %v8425_v41  ;;  %v5715_v3 = vperm.slane %v8844_v35, %v8425_v41  ;;  %v4152_v19 = vmax.f32 %v4150_v5, %v4151_v1 }
 0x1ff   : > { %v774_v53 = vsel %vm12552_vm12, %v772_v4, %v773_v43  ;;  %v1723_v38 = vperm.slane %v1092_v48, 0  ;;  %v1724_v23 = vperm.slane %v1092_v48, 1  ;;  %v1725_v9 = vperm.slane %v1092_v48, 2 }
 0x200   : > { %v1726_v61 = vperm.slane %v1092_v48, 3  ;;  %v1727_v7 = vperm.slane %v1092_v48, 4  ;;  %v1728_v30 = vperm.slane %v1097_v6, 0  ;;  %v1729_v22 = vperm.slane %v1097_v6, 1  ;;  %4153 = vmax.xlane.f32.xlu1 %v4152_v19 }
 0x201   : > { %v3003_v2 = vadd.f32 %v8446_v32, %v1723_v38  ;;  %v3004_v21 = vadd.f32 %v8491_v37, %v1724_v23  ;;  %v3005_v25 = vadd.f32 %v8494_v20, %v1725_v9  ;;  %v1730_v13 = vperm.slane %v1097_v6, 2 }
 0x202   : > { %v3006_v62 = vadd.f32 %v8499_v33, %v1726_v61  ;;  %v3007_v60 = vadd.f32 %v8456_v57, %v1727_v7  ;;  %v1731_v36 = vperm.slane %v1097_v6, 3  ;;  %v1732_v42 = vperm.slane %v1097_v6, 4 }
 0x203   : > { %v4155_v17 = vsel %vm3218_vm0, %v3003_v2, -inf  ;;  %v4156_v16 = vsel %vm3218_vm0, %v3004_v21, -inf  ;;  %v4158_v58 = vsel %vm3218_vm0, %v3005_v25, -inf  ;;  %v3008_v1 = vadd.f32 %v8446_v32, %v1728_v30 }
 0x204   : > { %v4157_v44 = vmax.f32 %v4155_v17, %v4156_v16  ;;  %v4160_v55 = vsel %vm3218_vm0, %v3006_v62, -inf  ;;  %v3009_v14 = vadd.f32 %v8491_v37, %v1729_v22  ;;  %v5714_v40 = vperm.slane %v3923_v31, %v8425_v41 }
 0x205   : > { %v4162_v49 = vsel %vm3226_vm3, %v3007_v60, -inf  ;;  %v3010_v47 = vadd.f32 %v8494_v20, %v1730_v13  ;;  %v3011_v45 = vadd.f32 %v8499_v33, %v1731_v36  ;;  %v3012_v52 = vadd.f32 %v8456_v57, %v1732_v42 }
 0x206   : > { %v4159_v29 = vmax.f32 %v4157_v44, %v4158_v58  ;;  %v4166_v12 = vsel %vm3218_vm0, %v3008_v1, -inf  ;;  %v4167_v43 = vsel %vm3218_vm0, %v3009_v14, -inf  ;;  %v775_v5 = vrot.slane %v774_v53, 4 }
 0x207   : > { %v4168_v48 = vmax.f32 %v4166_v12, %v4167_v43  ;;  %v4169_v6 = vsel %vm3218_vm0, %v3010_v47, -inf  ;;  %v4171_v4 = vsel %vm3218_vm0, %v3011_v45, -inf  ;;  %v4173_v19 = vsel %vm3226_vm3, %v3012_v52, -inf  ;;  %v8925_v45 = vpop.xlane.xlu0 %3955  ;;  %v8927_v52 = vpop.xlane.xlu2 %3240 }
 0x208   : > { %v4161_v38 = vmax.f32 %v4159_v29, %v4160_v55  ;;  %v1398_v23 = vperm.slane %v775_v5, 0  ;;  %v1399_v9 = vperm.slane %v775_v5, 1  ;;  %v1400_v61 = vperm.slane %v775_v5, 2 }
 0x209   : > { %v4170_v7 = vmax.f32 %v4168_v48, %v4169_v6  ;;  %v1401_v30 = vperm.slane %v775_v5, 3  ;;  %v1402_v22 = vperm.slane %v775_v5, 4  ;;  %v5833_v2 = vsel %vm671_vm6, %v5712_v59, %v5832_v39 }
 0x20a   : > { %v4163_v53 = vmax.f32 %v4161_v38, %v4162_v49  ;;  %v2678_v21 = vadd.f32 %v8446_v32, %v1398_v23  ;;  %v2679_v25 = vadd.f32 %v8491_v37, %v1399_v9  ;;  %v2680_v13 = vadd.f32 %v8494_v20, %v1400_v61 }
 0x20b   : > { %v4172_v31 = vmax.f32 %v4170_v7, %v4171_v4  ;;  %v2681_v62 = vadd.f32 %v8499_v33, %v1401_v30  ;;  %v2682_v60 = vadd.f32 %v8456_v57, %v1402_v22  ;;  %v5834_v36 = vsel %vm679_vm15, %v5713_v63, %v5833_v2  ;;  %v8951_v2 = vpop.xlane.xlu1 %3229 }
 0x20c   : > { %4164 = vmax.xlane.f32.xlu0 %v4163_v53  ;;  %v3440_v26 = vsel %vm3218_vm0, %v2678_v21, -inf  ;;  %v3441_v59 = vsel %vm3218_vm0, %v2679_v25, -inf  ;;  %v3443_v39 = vsel %vm3218_vm0, %v2680_v13, -inf  ;;  %v8900_v42 = vsel %vm5785_vm14, %v5714_v40, %v5834_v36 }
 0x20d   : > { %12553 = vst [vmem:[#allocation7_spill] sm:$0xff] %v8900_v42  ;;  %v4174_v17 = vmax.f32 %v4172_v31, %v4173_v19  ;;  %v3442_v16 = vmax.f32 %v3440_v26, %v3441_v59  ;;  %v3445_v58 = vsel %vm3218_vm0, %v2681_v62, -inf  ;;  %v3447_v1 = vsel %vm3226_vm3, %v2682_v60, -inf  ;;  %6777 = vmatmul.msk.f32.gmra.mxu3 %vm6149_vm5, %v8900_v42 }
 0x20e   : > { %v776_v8 = vsel %vm671_vm6, %v8655_v10, %v8649_v56  ;;  %vm12554_vm10 = vcmask 1040384   ;;  %v781_v44 = vsel %vm679_vm15, %v8655_v10, %v8649_v56  ;;  %v783_v55 = vsel %vm658_vm7, %v8659_v11, %v8661_v51 }
 0x20f   : > { %v778_v63 = vsel %vm12554_vm10, %v8659_v11, %v8661_v51  ;;  %4175 = vmax.xlane.f32.xlu2 %v4174_v17  ;;  %v3444_v14 = vmax.f32 %v3442_v16, %v3443_v39  ;;  %vm12555_vm12 = vcmask 1046533   ;;  %vm12556_vm11 = vcmask 1045504  }
 0x210   : > { %v777_v40 = vsel %vm12555_vm12, %v776_v8, %v8657_v46  ;;  %v782_v49 = vsel %vm12556_vm11, %v8657_v46, %v781_v44  ;;  %v1098_v47 = vsel %vm687_vm4, %v8539_v15, %v8552_v24  ;;  %vm12557_vm8 = vcmask 1044480  }
 0x211   : > { %v779_v29 = vsel %vm12557_vm8, %v778_v63, %v777_v40  ;;  %vm12558_vm9 = vcmask 1045505   ;;  %vm12559_vm13 = vcmask 1046529   ;;  %v1100_v5 = vsel %vm667_vm2, %v8563_v18, %v8565_v50 }
 0x212   : > { %v784_v12 = vsel %vm12558_vm9, %v783_v55, %v782_v49  ;;  %v1099_v43 = vsel %vm12559_vm13, %v8561_v34, %v1098_v47  ;;  %v3446_v48 = vmax.f32 %v3444_v14, %v3445_v58  ;;  %v780_v6 = vrot.slane %v779_v29, 5  ;;  %vm12560_vm10 = vmmov %vm12559_vm13 }
 0x213   : > { %v785_v4 = vrot.slane %v784_v12, 6  ;;  %v1101_v15 = vsel %vm710_vm1, %v1100_v5, %v1099_v43  ;;  %v5836_v24 = vsel %vm658_vm7, %v5716_v0, %v5715_v3  ;;  %v5717_v34 = vperm.slane %v8925_v45, %v8425_v41 }
 0x214   : > { %v1102_v19 = vrot.slane %v1101_v15, 7  ;;  %v5652_v18 = vperm.slane %v8927_v52, %v8425_v41  ;;  %v3448_v50 = vmax.f32 %v3446_v48, %v3447_v1  ;;  %v1403_v38 = vperm.slane %v780_v6, 0  ;;  %v8972_v48 = vld [vmem:[#allocation1] sm:$0xff] }
 0x215   : > { %v1404_v23 = vperm.slane %v780_v6, 1  ;;  %v1405_v9 = vperm.slane %v780_v6, 2  ;;  %v1406_v61 = vperm.slane %v780_v6, 3  ;;  %v1407_v7 = vperm.slane %v780_v6, 4 }
 0x216   : > { %v1408_v30 = vperm.slane %v785_v4, 0  ;;  %v1409_v35 = vperm.slane %v785_v4, 1  ;;  %3449 = vmax.xlane.f32.xlu1 %v3448_v50  ;;  %v2683_v27 = vadd.f32 %v8446_v32, %v1403_v38  ;;  %v1410_v22 = vperm.slane %v785_v4, 2 }
 0x217   : > { %v2684_v0 = vadd.f32 %v8491_v37, %v1404_v23  ;;  %v2685_v3 = vadd.f32 %v8494_v20, %v1405_v9  ;;  %v2686_v53 = vadd.f32 %v8499_v33, %v1406_v61  ;;  %v2687_v21 = vadd.f32 %v8456_v57, %v1407_v7  ;;  %v8978_v23 = vld [vmem:[#allocation1 + $0x24] sm:$0xff] }
 0x218   : > { %v1411_v25 = vperm.slane %v785_v4, 3  ;;  %v1412_v13 = vperm.slane %v785_v4, 4  ;;  %v3451_v31 = vsel %vm3218_vm0, %v2683_v27, -inf  ;;  %v2688_v36 = vadd.f32 %v8446_v32, %v1408_v30 }
 0x219   : > { %v3452_v62 = vsel %vm3218_vm0, %v2684_v0, -inf  ;;  %v3454_v60 = vsel %vm3218_vm0, %v2685_v3, -inf  ;;  %v3456_v59 = vsel %vm3218_vm0, %v2686_v53, -inf  ;;  %v2689_v39 = vadd.f32 %v8491_v37, %v1409_v35 }
 0x21a   : > { %v3453_v26 = vmax.f32 %v3451_v31, %v3452_v62  ;;  %v5651_v17 = vperm.slane %v8951_v2, %v8425_v41  ;;  %v2690_v16 = vadd.f32 %v8494_v20, %v1410_v22  ;;  %v2691_v58 = vadd.f32 %v8499_v33, %v1411_v25 }
 0x21b   : > { %v2692_v1 = vadd.f32 %v8456_v57, %v1412_v13  ;;  %v3462_v8 = vsel %vm3218_vm0, %v2688_v36, -inf  ;;  %v3463_v44 = vsel %vm3218_vm0, %v2689_v39, -inf  ;;  %v1733_v32 = vperm.slane %v1102_v19, 0 }
 0x21c   : > { %v3455_v63 = vmax.f32 %v3453_v26, %v3454_v60  ;;  %v1734_v55 = vperm.slane %v1102_v19, 1  ;;  %v3458_v14 = vsel %vm3226_vm3, %v2687_v21, -inf  ;;  %v3464_v40 = vmax.f32 %v3462_v8, %v3463_v44  ;;  %v9020_v60 = vpop.xlane.xlu0 %3966 }
 0x21d   : > { %v3465_v49 = vsel %vm3218_vm0, %v2690_v16, -inf  ;;  %v3467_v47 = vsel %vm3218_vm0, %v2691_v58, -inf  ;;  %v1735_v29 = vperm.slane %v1102_v19, 2  ;;  %v1736_v12 = vperm.slane %v1102_v19, 3 }
 0x21e   : > { %v3457_v45 = vmax.f32 %v3455_v63, %v3456_v59  ;;  %v1737_v43 = vperm.slane %v1102_v19, 4  ;;  %v3466_v5 = vmax.f32 %v3464_v40, %v3465_v49  ;;  %v3469_v57 = vsel %vm3226_vm3, %v2692_v1, -inf  ;;  %v333_v19 = vld [vmem:[%s12300_s2 + $0x1c0] sm:$0xff]  ;;  %v9052_v40 = vld [vmem:[#allocation1 + $0x9] sm:$0xff] }
 0x21f   : > { %v3013_v6 = vadd.f32 %v8972_v48, %v1733_v32  ;;  %v3014_v4 = vadd.f32 %v8491_v37, %v1734_v55  ;;  %v3015_v50 = vadd.f32 %v8494_v20, %v1735_v29  ;;  %v3016_v38 = vadd.f32 %v8499_v33, %v1736_v12  ;;  %v334_v20 = vld [vmem:[%s12300_s2 + $0x1c8] sm:$0xff]  ;;  %v335_v33 = vld [vmem:[%s12300_s2 + $0x1d0] sm:$0xff]  ;;  %v9058_v12 = vld [vmem:[#allocation1 + $0x1b] sm:$0xff] }
 0x220   : > { %v3459_v15 = vmax.f32 %v3457_v45, %v3458_v14  ;;  %v3017_v9 = vadd.f32 %v8978_v23, %v1737_v43  ;;  %v3468_v61 = vmax.f32 %v3466_v5, %v3467_v47  ;;  %v8987_v37 = vsel %vm667_vm2, %v5717_v34, %v5836_v24  ;;  %v9001_v24 = vld [vmem:[%s12300_s2 + $0x1b8] sm:$0xff] }
 0x221   : > { %v4177_v7 = vsel %vm3218_vm0, %v3013_v6, -inf  ;;  %v4178_v30 = vsel %vm3218_vm0, %v3014_v4, -inf  ;;  %v4180_v27 = vsel %vm3218_vm0, %v3015_v50, -inf  ;;  %v4182_v0 = vsel %vm3218_vm0, %v3016_v38, -inf  ;;  %v336_v34 = vld [vmem:[%s12300_s2 + $0x1d8] sm:$0xff] }
 0x222   : > { %3460 = vmax.xlane.f32.xlu0 %v3459_v15  ;;  %v4179_v35 = vmax.f32 %v4177_v7, %v4178_v30  ;;  %v4184_v3 = vsel %vm3226_vm3, %v3017_v9, -inf  ;;  %v3470_v22 = vmax.f32 %v3468_v61, %v3469_v57  ;;  %v786_v2 = vsel %vm687_vm4, %v8649_v56, %v8655_v10  ;;  %v9055_v47 = vld [vmem:[#allocation1 + $0x12] sm:$0xff] }
 0x223   : > { %v788_v53 = vsel %vm667_vm2, %v8659_v11, %v8661_v51  ;;  %v9012_v21 = vrot.slane %v333_v19, 7  ;;  %v787_v13 = vsel %vm12560_vm10, %v8657_v46, %v786_v2  ;;  %v9016_v31 = vrot.slane %v334_v20, 6 }
 0x224   : > { %v4181_v25 = vmax.f32 %v4179_v35, %v4180_v27  ;;  %v9018_v62 = vrot.slane %v335_v33, 5  ;;  %3471 = vmax.xlane.f32.xlu2 %v3470_v22  ;;  %v789_v36 = vsel %vm710_vm1, %v788_v53, %v787_v13  ;;  %v9023_v56 = vrot.slane %v336_v34, 4  ;;  %v3978_v22 = vpop.xlane.xlu2 %3977 }
 0x225   : > { %v1107_v10 = vsel %vm658_vm7, %v9001_v24, %v9012_v21  ;;  %vm12561_vm12 = vcmask 1040384   ;;  %v790_v51 = vrot.slane %v789_v36, 7  ;;  %vm12562_vm11 = vcmask 1042433  }
 0x226   : > { %v1103_v11 = vsel %vm12561_vm12, %v9001_v24, %v9012_v21  ;;  %v4183_v46 = vmax.f32 %v4181_v25, %v4182_v0  ;;  %v1108_v26 = vsel %vm12562_vm11, %v1107_v10, %v9016_v31  ;;  %vm12563_vm8 = vcmask 1041408  }
 0x227   : > { %v1104_v59 = vsel %vm12563_vm8, %v1103_v11, %v9016_v31  ;;  %v9039_v39 = vsel %vm658_vm7, %v5652_v18, %v5651_v17  ;;  %vm12564_vm9 = vcmask 1044484   ;;  %vm12565_vm13 = vcmask 1043459  }
 0x228   : > { %v1109_v16 = vsel %vm12564_vm9, %v9018_v62, %v9023_v56  ;;  %v1105_v58 = vsel %vm12565_vm13, %v9018_v62, %v9023_v56  ;;  %v5718_v1 = vperm.slane %v9020_v60, %v8425_v41  ;;  %v4185_v8 = vmax.f32 %v4183_v46, %v4184_v3  ;;  %vm12568_vm11 = vmmov %vm12565_vm13 }
 0x229   : > { %v1413_v63 = vperm.slane %v790_v51, 0  ;;  %v1414_v44 = vperm.slane %v790_v51, 1  ;;  %v1415_v32 = vperm.slane %v790_v51, 2  ;;  %v1416_v55 = vperm.slane %v790_v51, 3  ;;  %vm12569_vm8 = vmmov %vm12564_vm9 }
 0x22a   : > { %v1417_v52 = vperm.slane %v790_v51, 4  ;;  %vm12566_vm10 = vcmask 1043457   ;;  %vm12567_vm12 = vcmask 1042432   ;;  %4186 = vmax.xlane.f32.xlu1 %v4185_v8  ;;  %vm12570_vm9 = vcmask 1043458  }
 0x22b   : > { %v1110_v18 = vsel %vm12566_vm10, %v1108_v26, %v1109_v16  ;;  %v1106_v17 = vsel %vm12567_vm12, %v1104_v59, %v1105_v58  ;;  %v2693_v14 = vadd.f32 %v8972_v48, %v1413_v63  ;;  %v2694_v49 = vadd.f32 %v9052_v40, %v1414_v44 }
 0x22c   : > { %v2695_v45 = vadd.f32 %v9055_v47, %v1415_v32  ;;  %v1111_v29 = vrot.slane %v1110_v18, 1  ;;  %v2696_v43 = vadd.f32 %v9058_v12, %v1416_v55  ;;  %v2697_v5 = vadd.f32 %v8978_v23, %v1417_v52  ;;  %v293_v18 = vld [vmem:[%s12300_s2 + $0x80] sm:$0xff] }
 0x22d   : > { %v1738_v57 = vperm.slane %v1106_v17, 0  ;;  %v1739_v6 = vperm.slane %v1106_v17, 1  ;;  %v3473_v4 = vsel %vm3218_vm0, %v2693_v14, -inf  ;;  %v3474_v15 = vsel %vm3218_vm0, %v2694_v49, -inf }
 0x22e   : > { %v3476_v50 = vsel %vm3218_vm0, %v2695_v45, -inf  ;;  %v1743_v38 = vperm.slane %v1111_v29, 0  ;;  %v3475_v9 = vmax.f32 %v3473_v4, %v3474_v15  ;;  %v3478_v19 = vsel %vm3218_vm0, %v2696_v43, -inf  ;;  %v9095_v43 = vpop.xlane.xlu1 %3251  ;;  %v295_v4 = vld [vmem:[%s12300_s2 + $0x90] sm:$0xff]  ;;  %v296_v15 = vld [vmem:[%s12300_s2 + $0x98] sm:$0xff] }
 0x22f   : > { %v3480_v61 = vsel %vm3226_vm3, %v2697_v5, -inf  ;;  %v1744_v7 = vperm.slane %v1111_v29, 1  ;;  %v1745_v30 = vperm.slane %v1111_v29, 2  ;;  %v1746_v20 = vperm.slane %v1111_v29, 3 }
 0x230   : > { %v1747_v33 = vperm.slane %v1111_v29, 4  ;;  %v3023_v35 = vadd.f32 %v8972_v48, %v1743_v38  ;;  %v3477_v27 = vmax.f32 %v3475_v9, %v3476_v50  ;;  %v1740_v3 = vperm.slane %v1106_v17, 2 }
 0x231   : > { %v3024_v0 = vadd.f32 %v9052_v40, %v1744_v7  ;;  %v1741_v34 = vperm.slane %v1106_v17, 3  ;;  %v3025_v2 = vadd.f32 %v9055_v47, %v1745_v30  ;;  %v3026_v53 = vadd.f32 %v9058_v12, %v1746_v20 }
 0x232   : > { %v3027_v25 = vadd.f32 %v8978_v23, %v1747_v33  ;;  %v4199_v13 = vsel %vm3218_vm0, %v3023_v35, -inf  ;;  %v3479_v60 = vmax.f32 %v3477_v27, %v3478_v19  ;;  %v1742_v10 = vperm.slane %v1106_v17, 4  ;;  %v294_v17 = vld [vmem:[%s12300_s2 + $0x88] sm:$0xff]  ;;  %v9126_v33 = vpop.xlane.xlu0 %3262 }
 0x233   : > { %v4200_v36 = vsel %vm3218_vm0, %v3024_v0, -inf  ;;  %v3018_v11 = vadd.f32 %v8972_v48, %v1738_v57  ;;  %v4202_v51 = vsel %vm3218_vm0, %v3025_v2, -inf  ;;  %v4204_v26 = vsel %vm3218_vm0, %v3026_v53, -inf }
 0x234   : > { %v4201_v46 = vmax.f32 %v4199_v13, %v4200_v36  ;;  %v5719_v59 = vperm.slane %v3978_v22, %v8425_v41  ;;  %v3481_v16 = vmax.f32 %v3479_v60, %v3480_v61  ;;  %v3019_v58 = vadd.f32 %v9052_v40, %v1739_v6  ;;  %v9104_v6 = vld [vmem:[%s12300_s2 + $0x78] sm:$0xff] }
 0x235   : > { %v3020_v8 = vadd.f32 %v9055_v47, %v1740_v3  ;;  %v3021_v63 = vadd.f32 %v9058_v12, %v1741_v34  ;;  %v4206_v32 = vsel %vm3226_vm3, %v3027_v25, -inf  ;;  %v3022_v55 = vadd.f32 %v8978_v23, %v1742_v10 }
 0x236   : > { %v4203_v44 = vmax.f32 %v4201_v46, %v4202_v51  ;;  %v5838_v52 = vsel %vm12568_vm11, %v5718_v1, %v8987_v37  ;;  %3482 = vmax.xlane.f32.xlu0 %v3481_v16  ;;  %v4188_v14 = vsel %vm3218_vm0, %v3018_v11, -inf  ;;  %v4189_v49 = vsel %vm3218_vm0, %v3019_v58, -inf  ;;  %vm12574_vm11 = vmmov %vm12569_vm8 }
 0x237   : > { %v4191_v45 = vsel %vm3218_vm0, %v3020_v8, -inf  ;;  %v4193_v29 = vsel %vm3218_vm0, %v3021_v63, -inf  ;;  %v4190_v1 = vmax.f32 %v4188_v14, %v4189_v49  ;;  %v4195_v5 = vsel %vm3226_vm3, %v3022_v55, -inf }
 0x238   : > { %v4205_v37 = vmax.f32 %v4203_v44, %v4204_v26  ;;  %v9099_v57 = vsel %vm12569_vm8, %v5719_v59, %v5838_v52  ;;  %v1112_v50 = vsel %vm667_vm2, %v9001_v24, %v9012_v21  ;;  %v1114_v38 = vsel %vm671_vm6, %v9018_v62, %v9023_v56 }
 0x239   : > { %v9118_v9 = vrot.slane %v293_v18, 7  ;;  %v9120_v19 = vrot.slane %v294_v17, 6  ;;  %v4192_v7 = vmax.f32 %v4190_v1, %v4191_v45  ;;  %v5653_v30 = vperm.slane %v9095_v43, %v8425_v41 }
 0x23a   : > { %v4207_v61 = vmax.f32 %v4205_v37, %v4206_v32  ;;  %v1113_v20 = vsel %vm12570_vm9, %v1112_v50, %v9016_v31  ;;  %vm12571_vm13 = vcmask 1044482   ;;  %v9129_v27 = vrot.slane %v295_v4, 5 }
 0x23b   : > { %v1115_v35 = vsel %vm12571_vm13, %v1113_v20, %v1114_v38  ;;  %v9131_v0 = vrot.slane %v296_v15, 4  ;;  %v795_v3 = vsel %vm658_vm7, %v9104_v6, %v9118_v9  ;;  %v4194_v34 = vmax.f32 %v4192_v7, %v4193_v29 }
 0x23c   : > { %4208 = vmax.xlane.f32.xlu2 %v4207_v61  ;;  %v1116_v22 = vrot.slane %v1115_v35, 2  ;;  %vm12572_vm10 = vcmask 1042433   ;;  %vm12573_vm12 = vcmask 1040384   ;;  %vm12575_vm8 = vcmask 1041408  }
 0x23d   : > { %v796_v2 = vsel %vm12572_vm10, %v795_v3, %v9120_v19  ;;  %v791_v53 = vsel %vm12573_vm12, %v9104_v6, %v9118_v9  ;;  %v797_v25 = vsel %vm12574_vm11, %v9129_v27, %v9131_v0  ;;  %vm12576_vm9 = vcmask 1043459  }
 0x23e   : > { %v792_v13 = vsel %vm12575_vm8, %v791_v53, %v9120_v19  ;;  %v793_v60 = vsel %vm12576_vm9, %v9129_v27, %v9131_v0  ;;  %v5654_v36 = vperm.slane %v9126_v33, %v8425_v41  ;;  %v4196_v10 = vmax.f32 %v4194_v34, %v4195_v5  ;;  %vm12579_vm12 = vmmov %vm12576_vm9 }
 0x23f   : > { %v1748_v11 = vperm.slane %v1116_v22, 0  ;;  %v1749_v46 = vperm.slane %v1116_v22, 1  ;;  %v1750_v51 = vperm.slane %v1116_v22, 2  ;;  %v1751_v26 = vperm.slane %v1116_v22, 3  ;;  %vm12580_vm11 = vmmov %vm12576_vm9 }
 0x240   : > { %v1752_v59 = vperm.slane %v1116_v22, 4  ;;  %vm12577_vm13 = vcmask 1043457   ;;  %vm12578_vm10 = vcmask 1042432   ;;  %4197 = vmax.xlane.f32.xlu1 %v4196_v10  ;;  %vm12581_vm8 = vcmask 1044484  }
 0x241   : > { %v798_v16 = vsel %vm12577_vm13, %v796_v2, %v797_v25  ;;  %v794_v58 = vsel %vm12578_vm10, %v792_v13, %v793_v60  ;;  %v3028_v8 = vadd.f32 %v8972_v48, %v1748_v11  ;;  %v3029_v63 = vadd.f32 %v9052_v40, %v1749_v46 }
 0x242   : > { %v3030_v44 = vadd.f32 %v9055_v47, %v1750_v51  ;;  %v799_v32 = vrot.slane %v798_v16, 1  ;;  %v3031_v55 = vadd.f32 %v9058_v12, %v1751_v26  ;;  %v3032_v52 = vadd.f32 %v8978_v23, %v1752_v59 }
 0x243   : > { %v1418_v18 = vperm.slane %v794_v58, 0  ;;  %v1419_v17 = vperm.slane %v794_v58, 1  ;;  %v4210_v14 = vsel %vm3218_vm0, %v3028_v8, -inf  ;;  %v4211_v49 = vsel %vm3218_vm0, %v3029_v63, -inf  ;;  %v3274_v8 = vpop.xlane.xlu2 %3273 }
 0x244   : > { %v4213_v45 = vsel %vm3218_vm0, %v3030_v44, -inf  ;;  %v1423_v29 = vperm.slane %v799_v32, 0  ;;  %v4212_v43 = vmax.f32 %v4210_v14, %v4211_v49  ;;  %v4215_v37 = vsel %vm3218_vm0, %v3031_v55, -inf }
 0x245   : > { %v4217_v1 = vsel %vm3226_vm3, %v3032_v52, -inf  ;;  %v1424_v5 = vperm.slane %v799_v32, 1  ;;  %v1425_v4 = vperm.slane %v799_v32, 2  ;;  %v1426_v15 = vperm.slane %v799_v32, 3 }
 0x246   : > { %v1427_v50 = vperm.slane %v799_v32, 4  ;;  %v2703_v38 = vadd.f32 %v8972_v48, %v1423_v29  ;;  %v4214_v61 = vmax.f32 %v4212_v43, %v4213_v45  ;;  %v1420_v20 = vperm.slane %v794_v58, 2 }
 0x247   : > { %v2704_v7 = vadd.f32 %v9052_v40, %v1424_v5  ;;  %v1421_v33 = vperm.slane %v794_v58, 3  ;;  %v2705_v35 = vadd.f32 %v9055_v47, %v1425_v4  ;;  %v2706_v3 = vadd.f32 %v9058_v12, %v1426_v15 }
 0x248   : > { %v2707_v34 = vadd.f32 %v8978_v23, %v1427_v50  ;;  %v3495_v22 = vsel %vm3218_vm0, %v2703_v38, -inf  ;;  %v4216_v2 = vmax.f32 %v4214_v61, %v4215_v37  ;;  %v1422_v25 = vperm.slane %v794_v58, 4  ;;  %v9204_v50 = vpop.xlane.xlu0 %3999 }
 0x249   : > { %v3496_v53 = vsel %vm3218_vm0, %v2704_v7, -inf  ;;  %v2698_v13 = vadd.f32 %v8972_v48, %v1418_v18  ;;  %v5780_v60 = vsel %vm667_vm2, %v5653_v30, %v9039_v39  ;;  %v3498_v11 = vsel %vm3218_vm0, %v2705_v35, -inf  ;;  %v9181_v30 = vpop.xlane.xlu1 %3988 }
 0x24a   : > { %v3497_v10 = vmax.f32 %v3495_v22, %v3496_v53  ;;  %v3500_v46 = vsel %vm3218_vm0, %v2706_v3, -inf  ;;  %v4218_v51 = vmax.f32 %v4216_v2, %v4217_v1  ;;  %v2699_v26 = vadd.f32 %v9052_v40, %v1419_v17 }
 0x24b   : > { %v2700_v59 = vadd.f32 %v9055_v47, %v1420_v20  ;;  %v2701_v16 = vadd.f32 %v9058_v12, %v1421_v33  ;;  %v3502_v58 = vsel %vm3226_vm3, %v2707_v34, -inf  ;;  %v2702_v44 = vadd.f32 %v8978_v23, %v1422_v25 }
 0x24c   : > { %v3499_v63 = vmax.f32 %v3497_v10, %v3498_v11  ;;  %v3484_v39 = vsel %vm3218_vm0, %v2698_v13, -inf  ;;  %4219 = vmax.xlane.f32.xlu0 %v4218_v51  ;;  %v3485_v32 = vsel %vm3218_vm0, %v2699_v26, -inf  ;;  %v5781_v18 = vsel %vm12579_vm12, %v5654_v36, %v5780_v60 }
 0x24d   : > { %v3487_v55 = vsel %vm3218_vm0, %v2700_v59, -inf  ;;  %v3489_v52 = vsel %vm3218_vm0, %v2701_v16, -inf  ;;  %v3486_v14 = vmax.f32 %v3484_v39, %v3485_v32  ;;  %v3491_v49 = vsel %vm3226_vm3, %v2702_v44, -inf  ;;  %v9228_v44 = vpop.xlane.xlu2 %4010 }
 0x24e   : > { %v3501_v17 = vmax.f32 %v3499_v63, %v3500_v46  ;;  %v5655_v45 = vperm.slane %v3274_v8, %v8425_v41  ;;  %v5720_v29 = vperm.slane %v9181_v30, %v8425_v41  ;;  %v1117_v43 = vsel %vm12580_vm11, %v9001_v24, %v9012_v21 }
 0x24f   : > { %v1119_v37 = vsel %vm679_vm15, %v9018_v62, %v9023_v56  ;;  %v1122_v36 = vsel %vm12581_vm8, %v9001_v24, %v9012_v21  ;;  %v3488_v5 = vmax.f32 %v3486_v14, %v3487_v55  ;;  %vm12582_vm9 = vcmask 1044483  }
 0x250   : > { %v3503_v1 = vmax.f32 %v3501_v17, %v3502_v58  ;;  %v1118_v4 = vsel %vm12582_vm9, %v1117_v43, %v9016_v31  ;;  %vm12583_vm13 = vcmask 1045508   ;;  %vm12584_vm10 = vcmask 1045507  }
 0x251   : > { %v1123_v15 = vsel %vm12583_vm13, %v1122_v36, %v9016_v31  ;;  %v1120_v38 = vsel %vm12584_vm10, %v1118_v4, %v1119_v37  ;;  %v1124_v61 = vsel %vm687_vm4, %v9023_v56, %v9018_v62  ;;  %v800_v7 = vsel %vm667_vm2, %v9104_v6, %v9118_v9 }
 0x252   : > { %v802_v20 = vsel %vm671_vm6, %v9129_v27, %v9131_v0  ;;  %3504 = vmax.xlane.f32.xlu2 %v3503_v1  ;;  %v3490_v33 = vmax.f32 %v3488_v5, %v3489_v52  ;;  %v1121_v35 = vrot.slane %v1120_v38, 3  ;;  %vm12585_vm12 = vcmask 1046532   ;;  %v9240_v1 = vpop.xlane.xlu1 %3284 }
 0x253   : > { %v1125_v3 = vsel %vm12585_vm12, %v1123_v15, %v1124_v61  ;;  %vm12586_vm11 = vcmask 1043458   ;;  %v9220_v22 = vsel %vm12581_vm8, %v5655_v45, %v5781_v18  ;;  %vm12587_vm9 = vcmask 1044482   ;;  %vm12590_vm12 = vmmov %vm12581_vm8 }
 0x254   : > { %v801_v34 = vsel %vm12586_vm11, %v800_v7, %v9120_v19  ;;  %v1126_v2 = vrot.slane %v1125_v3, 4  ;;  %v5721_v25 = vperm.slane %v9204_v50, %v8425_v41  ;;  %v3492_v13 = vmax.f32 %v3490_v33, %v3491_v49 }
 0x255   : > { %v803_v53 = vsel %vm12587_vm9, %v801_v34, %v802_v20  ;;  %v1753_v60 = vperm.slane %v1121_v35, 0  ;;  %v1754_v10 = vperm.slane %v1121_v35, 1  ;;  %v1755_v11 = vperm.slane %v1121_v35, 2 }
 0x256   : > { %v1756_v46 = vperm.slane %v1121_v35, 3  ;;  %v1757_v51 = vperm.slane %v1121_v35, 4  ;;  %v1758_v26 = vperm.slane %v1126_v2, 0  ;;  %v1759_v59 = vperm.slane %v1126_v2, 1  ;;  %3493 = vmax.xlane.f32.xlu1 %v3492_v13 }
 0x257   : > { %v3033_v16 = vadd.f32 %v8972_v48, %v1753_v60  ;;  %v3034_v8 = vadd.f32 %v9052_v40, %v1754_v10  ;;  %v3035_v63 = vadd.f32 %v9055_v47, %v1755_v11  ;;  %v1760_v58 = vperm.slane %v1126_v2, 2 }
 0x258   : > { %v3036_v39 = vadd.f32 %v9058_v12, %v1756_v46  ;;  %v3037_v32 = vadd.f32 %v8978_v23, %v1757_v51  ;;  %v1761_v55 = vperm.slane %v1126_v2, 3  ;;  %v1762_v52 = vperm.slane %v1126_v2, 4 }
 0x259   : > { %v4221_v18 = vsel %vm3218_vm0, %v3033_v16, -inf  ;;  %v4222_v17 = vsel %vm3218_vm0, %v3034_v8, -inf  ;;  %v4224_v14 = vsel %vm3218_vm0, %v3035_v63, -inf  ;;  %v3038_v49 = vadd.f32 %v8972_v48, %v1758_v26  ;;  %v503_v16 = vpop.f32.mrf.mxu2 }
 0x25a   : > { %v4223_v45 = vmax.f32 %v4221_v18, %v4222_v17  ;;  %v4226_v43 = vsel %vm3218_vm0, %v3036_v39, -inf  ;;  %v3039_v37 = vadd.f32 %v9052_v40, %v1759_v59  ;;  %v5722_v36 = vperm.slane %v9228_v44, %v8425_v41  ;;  %6784 = vmatpush.msk.msrb.mxu0 %vm3218_vm0, %v503_v16  ;;  %6813 = vmatpush.msk.msrb.mxu1 %vm3218_vm0, %v503_v16 }
 0x25b   : > { %v4228_v5 = vsel %vm3226_vm3, %v3037_v32, -inf  ;;  %v3040_v4 = vadd.f32 %v9055_v47, %v1760_v58  ;;  %v3041_v15 = vadd.f32 %v9058_v12, %v1761_v55  ;;  %v3042_v38 = vadd.f32 %v8978_v23, %v1762_v52 }
 0x25c   : > { %v4225_v61 = vmax.f32 %v4223_v45, %v4224_v14  ;;  %v4232_v7 = vsel %vm3218_vm0, %v3038_v49, -inf  ;;  %v4233_v20 = vsel %vm3218_vm0, %v3039_v37, -inf  ;;  %v804_v33 = vrot.slane %v803_v53, 2 }
 0x25d   : > { %v4234_v35 = vmax.f32 %v4232_v7, %v4233_v20  ;;  %v4235_v3 = vsel %vm3218_vm0, %v3040_v4, -inf  ;;  %v4237_v34 = vsel %vm3218_vm0, %v3041_v15, -inf  ;;  %v5656_v2 = vperm.slane %v9240_v1, %v8425_v41 }
 0x25e   : > { %v4227_v13 = vmax.f32 %v4225_v61, %v4226_v43  ;;  %v1428_v60 = vperm.slane %v804_v33, 0  ;;  %v1429_v10 = vperm.slane %v804_v33, 1  ;;  %v1430_v11 = vperm.slane %v804_v33, 2 }
 0x25f   : > { %v4236_v46 = vmax.f32 %v4234_v35, %v4235_v3  ;;  %v4239_v51 = vsel %vm3226_vm3, %v3042_v38, -inf  ;;  %v1431_v26 = vperm.slane %v804_v33, 3  ;;  %v1432_v59 = vperm.slane %v804_v33, 4 }
 0x260   : > { %v4229_v8 = vmax.f32 %v4227_v13, %v4228_v5  ;;  %v2708_v53 = vadd.f32 %v8972_v48, %v1428_v60  ;;  %v2709_v63 = vadd.f32 %v9052_v40, %v1429_v10  ;;  %v2710_v58 = vadd.f32 %v9055_v47, %v1430_v11 }
 0x261   : > { %v4238_v39 = vmax.f32 %v4236_v46, %v4237_v34  ;;  %v2711_v32 = vadd.f32 %v9058_v12, %v1431_v26  ;;  %v2712_v55 = vadd.f32 %v8978_v23, %v1432_v59  ;;  %vm12588_vm13 = vcmask 1043459  }
 0x262   : > { %v805_v52 = vsel %vm12588_vm13, %v9104_v6, %v9118_v9  ;;  %4230 = vmax.xlane.f32.xlu0 %v4229_v8  ;;  %v3506_v18 = vsel %vm3218_vm0, %v2708_v53, -inf  ;;  %v3507_v17 = vsel %vm3218_vm0, %v2709_v63, -inf  ;;  %v3509_v14 = vsel %vm3218_vm0, %v2710_v58, -inf }
 0x263   : > { %vm12589_vm10 = vcmask 1044483   ;;  %v4240_v45 = vmax.f32 %v4238_v39, %v4239_v51  ;;  %v3508_v43 = vmax.f32 %v3506_v18, %v3507_v17  ;;  %v3511_v37 = vsel %vm3218_vm0, %v2711_v32, -inf }
 0x264   : > { %v806_v49 = vsel %vm12589_vm10, %v805_v52, %v9120_v19  ;;  %v3513_v5 = vsel %vm3226_vm3, %v2712_v55, -inf  ;;  %v807_v4 = vsel %vm679_vm15, %v9129_v27, %v9131_v0  ;;  %v810_v15 = vsel %vm12590_vm12, %v9104_v6, %v9118_v9 }
 0x265   : > { %v812_v38 = vsel %vm687_vm4, %v9131_v0, %v9129_v27  ;;  %v1127_v61 = vsel %vm671_vm6, %v9001_v24, %v9012_v21  ;;  %4241 = vmax.xlane.f32.xlu2 %v4240_v45  ;;  %v3510_v7 = vmax.f32 %v3508_v43, %v3509_v14  ;;  %vm12591_vm11 = vcmask 1045507  }
 0x266   : > { %v808_v20 = vsel %vm12591_vm11, %v806_v49, %v807_v4  ;;  %vm12592_vm8 = vcmask 1045508   ;;  %vm12593_vm9 = vcmask 1046533   ;;  %vm12594_vm13 = vcmask 1046532  }
 0x267   : > { %v811_v33 = vsel %vm12592_vm8, %v810_v15, %v9120_v19  ;;  %v1128_v35 = vsel %vm12593_vm9, %v1127_v61, %v9016_v31  ;;  %v809_v3 = vrot.slane %v808_v20, 3  ;;  %vm12595_vm10 = vcmask 1040384  }
 0x268   : > { %v813_v34 = vsel %vm12594_vm13, %v811_v33, %v812_v38  ;;  %v1129_v13 = vsel %vm12595_vm10, %v9018_v62, %v9023_v56  ;;  %v5840_v60 = vsel %vm671_vm6, %v5720_v29, %v9099_v57  ;;  %v3512_v10 = vmax.f32 %v3510_v7, %v3511_v37  ;;  %v3296_v7 = vpop.xlane.xlu0 %3295  ;;  %vm12601_vm13 = vmmov %vm12595_vm10 }
 0x269   : > { %v814_v11 = vrot.slane %v813_v34, 4  ;;  %vm12596_vm12 = vcmask 1044480   ;;  %v5841_v51 = vsel %vm679_vm15, %v5721_v25, %v5840_v60  ;;  %v1433_v26 = vperm.slane %v809_v3, 0 }
 0x26a   : > { %v1130_v46 = vsel %vm12596_vm12, %v1129_v13, %v1128_v35  ;;  %v1434_v59 = vperm.slane %v809_v3, 1  ;;  %v1435_v16 = vperm.slane %v809_v3, 2  ;;  %v1436_v8 = vperm.slane %v809_v3, 3 }
 0x26b   : > { %v3514_v53 = vmax.f32 %v3512_v10, %v3513_v5  ;;  %v1437_v63 = vperm.slane %v809_v3, 4  ;;  %v1438_v58 = vperm.slane %v814_v11, 0  ;;  %v1439_v39 = vperm.slane %v814_v11, 1 }
 0x26c   : > { %v2713_v30 = vadd.f32 %v8972_v48, %v1433_v26  ;;  %v2714_v57 = vadd.f32 %v9052_v40, %v1434_v59  ;;  %v2715_v29 = vadd.f32 %v9055_v47, %v1435_v16  ;;  %v2716_v32 = vadd.f32 %v9058_v12, %v1436_v8 }
 0x26d   : > { %3515 = vmax.xlane.f32.xlu1 %v3514_v53  ;;  %v2717_v50 = vadd.f32 %v8978_v23, %v1437_v63  ;;  %v1440_v25 = vperm.slane %v814_v11, 2  ;;  %v1441_v55 = vperm.slane %v814_v11, 3  ;;  %v1442_v52 = vperm.slane %v814_v11, 4 }
 0x26e   : > { %v3517_v18 = vsel %vm3218_vm0, %v2713_v30, -inf  ;;  %v3518_v17 = vsel %vm3218_vm0, %v2714_v57, -inf  ;;  %v3520_v14 = vsel %vm3218_vm0, %v2715_v29, -inf  ;;  %v3522_v49 = vsel %vm3218_vm0, %v2716_v32, -inf  ;;  %v9340_v32 = vpop.xlane.xlu2 %4021 }
 0x26f   : > { %v3519_v45 = vmax.f32 %v3517_v18, %v3518_v17  ;;  %v3524_v43 = vsel %vm3226_vm3, %v2717_v50, -inf  ;;  %v2718_v37 = vadd.f32 %v8972_v48, %v1438_v58  ;;  %v2719_v5 = vadd.f32 %v9052_v40, %v1439_v39  ;;  %v3307_v50 = vpop.xlane.xlu1 %3306 }
 0x270   : > { %v2720_v4 = vadd.f32 %v9055_v47, %v1440_v25  ;;  %v2721_v15 = vadd.f32 %v9058_v12, %v1441_v55  ;;  %v2722_v38 = vadd.f32 %v8978_v23, %v1442_v52  ;;  %v1131_v61 = vrot.slane %v1130_v46, 5 }
 0x271   : > { %v3521_v20 = vmax.f32 %v3519_v45, %v3520_v14  ;;  %v3528_v33 = vsel %vm3218_vm0, %v2718_v37, -inf  ;;  %v3529_v35 = vsel %vm3218_vm0, %v2719_v5, -inf  ;;  %v9322_v3 = vsel %vm5785_vm14, %v5722_v36, %v5841_v51 }
 0x272   : > { %12597 = vst [vmem:[#allocation8_spill] sm:$0xff] %v9322_v3  ;;  %v3530_v34 = vmax.f32 %v3528_v33, %v3529_v35  ;;  %v3531_v13 = vsel %vm3218_vm0, %v2720_v4, -inf  ;;  %v3533_v60 = vsel %vm3218_vm0, %v2721_v15, -inf  ;;  %v3535_v10 = vsel %vm3226_vm3, %v2722_v38, -inf  ;;  %6778 = vmatmul.msk.f32.gmra.mxu3 %vm6149_vm5, %v9322_v3  ;;  %v4033_v38 = vpop.xlane.xlu0 %4032  ;;  %v4645_v3 = vld [vmem:[#allocation1 + $0x7] ss:$9 sm:$0xff] }
 0x273   : > { %v3523_v11 = vmax.f32 %v3521_v20, %v3522_v49  ;;  %v1763_v46 = vperm.slane %v1131_v61, 0  ;;  %v1764_v26 = vperm.slane %v1131_v61, 1  ;;  %v1765_v59 = vperm.slane %v1131_v61, 2 }
 0x274   : > { %v3532_v16 = vmax.f32 %v3530_v34, %v3531_v13  ;;  %v1766_v8 = vperm.slane %v1131_v61, 3  ;;  %v1767_v44 = vperm.slane %v1131_v61, 4  ;;  %v5657_v36 = vperm.slane %v3296_v7, %v8425_v41 }
 0x275   : > { %v3525_v51 = vmax.f32 %v3523_v11, %v3524_v43  ;;  %v3043_v53 = vadd.f32 %v8972_v48, %v1763_v46  ;;  %v3044_v63 = vadd.f32 %v9052_v40, %v1764_v26  ;;  %v3045_v58 = vadd.f32 %v9055_v47, %v1765_v59 }
 0x276   : > { %v5783_v39 = vsel %vm671_vm6, %v5656_v2, %v9220_v22  ;;  %v3534_v30 = vmax.f32 %v3532_v16, %v3533_v60  ;;  %v3046_v57 = vadd.f32 %v9058_v12, %v1766_v8  ;;  %v3047_v29 = vadd.f32 %v8978_v23, %v1767_v44 }
 0x277   : > { %3526 = vmax.xlane.f32.xlu0 %v3525_v51  ;;  %v4243_v25 = vsel %vm3218_vm0, %v3043_v53, -inf  ;;  %v4244_v55 = vsel %vm3218_vm0, %v3044_v63, -inf  ;;  %v4246_v52 = vsel %vm3218_vm0, %v3045_v58, -inf  ;;  %v5784_v18 = vsel %vm679_vm15, %v5657_v36, %v5783_v39  ;;  %v9385_v63 = vpop.xlane.xlu2 %3317 }
 0x278   : > { %v3536_v1 = vmax.f32 %v3534_v30, %v3535_v10  ;;  %v4245_v17 = vmax.f32 %v4243_v25, %v4244_v55  ;;  %v4248_v22 = vsel %vm3218_vm0, %v3046_v57, -inf  ;;  %v4250_v2 = vsel %vm3226_vm3, %v3047_v29, -inf }
 0x279   : > { %v5658_v14 = vperm.slane %v3307_v50, %v8425_v41  ;;  %v1132_v49 = vsel %vm679_vm15, %v9001_v24, %v9012_v21  ;;  %v1134_v45 = vsel %vm658_vm7, %v9018_v62, %v9023_v56  ;;  %v1137_v43 = vsel %vm687_vm4, %v9012_v21, %v9001_v24 }
 0x27a   : > { %3537 = vmax.xlane.f32.xlu2 %v3536_v1  ;;  %v4247_v37 = vmax.f32 %v4245_v17, %v4246_v52  ;;  %vm12598_vm11 = vcmask 1045504   ;;  %vm12599_vm8 = vcmask 1046529   ;;  %v1139_v15 = vsel %vm667_vm2, %v9018_v62, %v9023_v56 }
 0x27b   : > { %v1133_v5 = vsel %vm12598_vm11, %v9016_v31, %v1132_v49  ;;  %v1138_v4 = vsel %vm12599_vm8, %v9016_v31, %v1137_v43  ;;  %vm12600_vm9 = vcmask 1045505   ;;  %v815_v24 = vsel %vm671_vm6, %v9104_v6, %v9118_v9 }
 0x27c   : > { %v1135_v61 = vsel %vm12600_vm9, %v1134_v45, %v1133_v5  ;;  %v1140_v7 = vsel %vm710_vm1, %v1139_v15, %v1138_v4  ;;  %v817_v21 = vsel %vm12601_vm13, %v9129_v27, %v9131_v0  ;;  %v4249_v20 = vmax.f32 %v4247_v37, %v4248_v22  ;;  %vm12603_vm8 = vmmov %vm12600_vm9 }
 0x27d   : > { %v1136_v33 = vrot.slane %v1135_v61, 6  ;;  %v1141_v31 = vrot.slane %v1140_v7, 7  ;;  %vm12602_vm10 = vcmask 1046533   ;;  %v5723_v62 = vperm.slane %v9340_v32, %v8425_v41  ;;  %vm12604_vm9 = vmmov %vm12601_vm13 }
 0x27e   : > { %v816_v35 = vsel %vm12602_vm10, %v815_v24, %v9120_v19  ;;  %v5786_v34 = vsel %vm5785_vm14, %v5658_v14, %v5784_v18  ;;  %v5724_v13 = vperm.slane %v4033_v38, %v8425_v41  ;;  %v4251_v60 = vmax.f32 %v4249_v20, %v4250_v2  ;;  %v9408_v20 = vpop.xlane.xlu1 %4043 }
 0x27f   : > { %v818_v56 = vsel %vm12596_vm12, %v817_v21, %v816_v35  ;;  %v1768_v10 = vperm.slane %v1136_v33, 0  ;;  %v1769_v11 = vperm.slane %v1136_v33, 1  ;;  %v1770_v46 = vperm.slane %v1136_v33, 2  ;;  %6770 = vmatmul.msk.f32.vlgmr.msra.gmra.mxu2 %vm6149_vm5, %v5786_v34  ;;  %6785 = vmatmul.msk.f32.vlgmr.msrb.gmra.mxu0 %vm6149_vm5, %v5786_v34 }
 0x280   : > { %v1771_v26 = vperm.slane %v1136_v33, 3  ;;  %v1772_v59 = vperm.slane %v1136_v33, 4  ;;  %v1773_v16 = vperm.slane %v1141_v31, 0  ;;  %v1774_v8 = vperm.slane %v1141_v31, 1  ;;  %4252 = vmax.xlane.f32.xlu1 %v4251_v60 }
 0x281   : > { %v3048_v44 = vadd.f32 %v8972_v48, %v1768_v10  ;;  %v3049_v36 = vadd.f32 %v9052_v40, %v1769_v11  ;;  %v3050_v51 = vadd.f32 %v9055_v47, %v1770_v46  ;;  %v1775_v53 = vperm.slane %v1141_v31, 2 }
 0x282   : > { %v3051_v58 = vadd.f32 %v9058_v12, %v1771_v26  ;;  %v3052_v39 = vadd.f32 %v8978_v23, %v1772_v59  ;;  %v1776_v30 = vperm.slane %v1141_v31, 3  ;;  %v1777_v57 = vperm.slane %v1141_v31, 4  ;;  %v338_v59 = vld [vmem:[%s12300_s2 + $0x1e8] sm:$0xff] }
 0x283   : > { %v4254_v29 = vsel %vm3218_vm0, %v3048_v44, -inf  ;;  %v4255_v32 = vsel %vm3218_vm0, %v3049_v36, -inf  ;;  %v4257_v50 = vsel %vm3218_vm0, %v3050_v51, -inf  ;;  %v3053_v25 = vadd.f32 %v8972_v48, %v1773_v16  ;;  %v339_v16 = vld [vmem:[%s12300_s2 + $0x1f0] sm:$0xff] }
 0x284   : > { %v4256_v55 = vmax.f32 %v4254_v29, %v4255_v32  ;;  %v4259_v52 = vsel %vm3218_vm0, %v3051_v58, -inf  ;;  %v3054_v18 = vadd.f32 %v9052_v40, %v1774_v8  ;;  %v5659_v1 = vperm.slane %v9385_v63, %v8425_v41  ;;  %v341_v58 = vld [vmem:[%s12300_s2 + $0x200] sm:$0xff] }
 0x285   : > { %v4261_v17 = vsel %vm3226_vm3, %v3052_v39, -inf  ;;  %v3055_v22 = vadd.f32 %v9055_v47, %v1775_v53  ;;  %v3056_v2 = vadd.f32 %v9058_v12, %v1776_v30  ;;  %v3057_v14 = vadd.f32 %v8978_v23, %v1777_v57  ;;  %v340_v53 = vld [vmem:[%s12300_s2 + $0x1f8] sm:$0xff] }
 0x286   : > { %v4258_v49 = vmax.f32 %v4256_v55, %v4257_v50  ;;  %v4265_v45 = vsel %vm3218_vm0, %v3053_v25, -inf  ;;  %v4266_v43 = vsel %vm3218_vm0, %v3054_v18, -inf  ;;  %v819_v37 = vrot.slane %v818_v56, 5 }
 0x287   : > { %v4267_v5 = vmax.f32 %v4265_v45, %v4266_v43  ;;  %v4268_v4 = vsel %vm3218_vm0, %v3055_v22, -inf  ;;  %v4270_v15 = vsel %vm3218_vm0, %v3056_v2, -inf  ;;  %v9406_v38 = vsel %vm658_vm7, %v5724_v13, %v5723_v62 }
 0x288   : > { %v4260_v61 = vmax.f32 %v4258_v49, %v4259_v52  ;;  %v1443_v7 = vperm.slane %v819_v37, 0  ;;  %v1444_v24 = vperm.slane %v819_v37, 1  ;;  %v1445_v21 = vperm.slane %v819_v37, 2 }
 0x289   : > { %v4269_v33 = vmax.f32 %v4267_v5, %v4268_v4  ;;  %v4272_v31 = vsel %vm3226_vm3, %v3057_v14, -inf  ;;  %v1446_v35 = vperm.slane %v819_v37, 3  ;;  %v1447_v34 = vperm.slane %v819_v37, 4 }
 0x28a   : > { %v4262_v56 = vmax.f32 %v4260_v61, %v4261_v17  ;;  %v2723_v60 = vadd.f32 %v8972_v48, %v1443_v7  ;;  %v2724_v10 = vadd.f32 %v9052_v40, %v1444_v24  ;;  %v2725_v11 = vadd.f32 %v9055_v47, %v1445_v21  ;;  %v9451_v17 = vld [vmem:[%s12300_s2 + $0x1e0] sm:$0xff] }
 0x28b   : > { %v4271_v62 = vmax.f32 %v4269_v33, %v4270_v15  ;;  %v2726_v13 = vadd.f32 %v9058_v12, %v1446_v35  ;;  %v2727_v46 = vadd.f32 %v8978_v23, %v1447_v34  ;;  %v5725_v26 = vperm.slane %v9408_v20, %v8425_v41 }
 0x28c   : > { %4263 = vmax.xlane.f32.xlu0 %v4262_v56  ;;  %v3539_v8 = vsel %vm3218_vm0, %v2723_v60, -inf  ;;  %v3540_v44 = vsel %vm3218_vm0, %v2724_v10, -inf  ;;  %v3542_v36 = vsel %vm3218_vm0, %v2725_v11, -inf  ;;  %v820_v51 = vsel %vm679_vm15, %v9104_v6, %v9118_v9 }
 0x28d   : > { %v4273_v39 = vmax.f32 %v4271_v62, %v4272_v31  ;;  %v3541_v30 = vmax.f32 %v3539_v8, %v3540_v44  ;;  %v3544_v57 = vsel %vm3218_vm0, %v2726_v13, -inf  ;;  %v3546_v29 = vsel %vm3226_vm3, %v2727_v46, -inf }
 0x28e   : > { %v821_v32 = vsel %vm12598_vm11, %v9120_v19, %v820_v51  ;;  %v822_v50 = vsel %vm658_vm7, %v9129_v27, %v9131_v0  ;;  %v9443_v25 = vrot.slane %v338_v59, 7  ;;  %v9445_v55 = vrot.slane %v339_v16, 6  ;;  %v3329_v59 = vpop.xlane.xlu0 %3328 }
 0x28f   : > { %4274 = vmax.xlane.f32.xlu2 %v4273_v39  ;;  %v3543_v52 = vmax.f32 %v3541_v30, %v3542_v36  ;;  %v823_v18 = vsel %vm12603_vm8, %v822_v50, %v821_v32  ;;  %v9453_v22 = vrot.slane %v340_v53, 5  ;;  %v9455_v2 = vrot.slane %v341_v58, 4 }
 0x290   : > { %v824_v14 = vrot.slane %v823_v18, 6  ;;  %v1142_v49 = vsel %vm12604_vm9, %v9451_v17, %v9443_v25  ;;  %v825_v45 = vsel %vm687_vm4, %v9118_v9, %v9104_v6  ;;  %v827_v43 = vsel %vm667_vm2, %v9129_v27, %v9131_v0 }
 0x291   : > { %v3545_v37 = vmax.f32 %v3543_v52, %v3544_v57  ;;  %vm12605_vm13 = vcmask 1041408   ;;  %vm12606_vm10 = vcmask 1043459   ;;  %vm12607_vm12 = vcmask 1046529  }
 0x292   : > { %v1143_v5 = vsel %vm12605_vm13, %v1142_v49, %v9445_v55  ;;  %v1144_v4 = vsel %vm12606_vm10, %v9453_v22, %v9455_v2  ;;  %v826_v15 = vsel %vm12607_vm12, %v9120_v19, %v825_v45  ;;  %v1448_v61 = vperm.slane %v824_v14, 0  ;;  %vm12611_vm13 = vmmov %vm12606_vm10 }
 0x293   : > { %v1449_v7 = vperm.slane %v824_v14, 1  ;;  %v1450_v24 = vperm.slane %v824_v14, 2  ;;  %v1451_v21 = vperm.slane %v824_v14, 3  ;;  %v3547_v6 = vmax.f32 %v3545_v37, %v3546_v29 }
 0x294   : > { %v1452_v9 = vperm.slane %v824_v14, 4  ;;  %vm12608_vm11 = vcmask 1042432   ;;  %v828_v27 = vsel %vm710_vm1, %v827_v43, %v826_v15  ;;  %v2728_v0 = vadd.f32 %v8972_v48, %v1448_v61 }
 0x295   : > { %v1145_v33 = vsel %vm12608_vm11, %v1143_v5, %v1144_v4  ;;  %v2729_v31 = vadd.f32 %v9052_v40, %v1449_v7  ;;  %v2730_v35 = vadd.f32 %v9055_v47, %v1450_v24  ;;  %v2731_v34 = vadd.f32 %v9058_v12, %v1451_v21  ;;  %3548 = vmax.xlane.f32.xlu1 %v3547_v6  ;;  %v9496_v24 = vld [vmem:[#allocation1] sm:$0xff] }
 0x296   : > { %v2732_v19 = vadd.f32 %v8978_v23, %v1452_v9  ;;  %v1778_v56 = vperm.slane %v1145_v33, 0  ;;  %v1779_v60 = vperm.slane %v1145_v33, 1  ;;  %v1780_v10 = vperm.slane %v1145_v33, 2  ;;  %v4055_v9 = vpop.xlane.xlu1 %4054 }
 0x297   : > { %v3550_v11 = vsel %vm3218_vm0, %v2728_v0, -inf  ;;  %v3551_v62 = vsel %vm3218_vm0, %v2729_v31, -inf  ;;  %v3553_v13 = vsel %vm3218_vm0, %v2730_v35, -inf  ;;  %v3555_v46 = vsel %vm3218_vm0, %v2731_v34, -inf  ;;  %v9506_v31 = vld [vmem:[#allocation1 + $0x24] sm:$0xff] }
 0x298   : > { %v3552_v16 = vmax.f32 %v3550_v11, %v3551_v62  ;;  %v3557_v8 = vsel %vm3226_vm3, %v2732_v19, -inf  ;;  %v1781_v44 = vperm.slane %v1145_v33, 3  ;;  %v1782_v36 = vperm.slane %v1145_v33, 4 }
 0x299   : > { %v3058_v51 = vadd.f32 %v8972_v48, %v1778_v56  ;;  %v3059_v53 = vadd.f32 %v9052_v40, %v1779_v60  ;;  %v3060_v58 = vadd.f32 %v9055_v47, %v1780_v10  ;;  %v829_v39 = vrot.slane %v828_v27, 7  ;;  %v300_v56 = vld [vmem:[%s12300_s2 + $0xb8] sm:$0xff]  ;;  %v301_v60 = vld [vmem:[%s12300_s2 + $0xc0] sm:$0xff] }
 0x29a   : > { %v3554_v30 = vmax.f32 %v3552_v16, %v3553_v13  ;;  %v3061_v57 = vadd.f32 %v9058_v12, %v1781_v44  ;;  %v3062_v29 = vadd.f32 %v8978_v23, %v1782_v36  ;;  %v5660_v32 = vperm.slane %v3329_v59, %v8425_v41  ;;  %v3340_v23 = vpop.xlane.xlu2 %3339 }
 0x29b   : > { %v4276_v50 = vsel %vm3218_vm0, %v3058_v51, -inf  ;;  %v4277_v52 = vsel %vm3218_vm0, %v3059_v53, -inf  ;;  %v4279_v18 = vsel %vm3218_vm0, %v3060_v58, -inf  ;;  %v1453_v14 = vperm.slane %v829_v39, 0  ;;  %v9551_v51 = vld [vmem:[%s12300_s2 + $0xa0] sm:$0xff] }
 0x29c   : > { %v3556_v48 = vmax.f32 %v3554_v30, %v3555_v46  ;;  %v4278_v49 = vmax.f32 %v4276_v50, %v4277_v52  ;;  %v4281_v45 = vsel %vm3218_vm0, %v3061_v57, -inf  ;;  %v4283_v43 = vsel %vm3226_vm3, %v3062_v29, -inf }
 0x29d   : > { %v1454_v37 = vperm.slane %v829_v39, 1  ;;  %v1455_v5 = vperm.slane %v829_v39, 2  ;;  %v1456_v4 = vperm.slane %v829_v39, 3  ;;  %v1457_v15 = vperm.slane %v829_v39, 4  ;;  %v4066_v39 = vpop.xlane.xlu0 %4065 }
 0x29e   : > { %v3558_v61 = vmax.f32 %v3556_v48, %v3557_v8  ;;  %v4280_v7 = vmax.f32 %v4278_v49, %v4279_v18  ;;  %v2733_v21 = vadd.f32 %v9496_v24, %v1453_v14  ;;  %v5787_v6 = vsel %vm658_vm7, %v5660_v32, %v5659_v1 }
 0x29f   : > { %v2734_v33 = vadd.f32 %v9052_v40, %v1454_v37  ;;  %v2735_v27 = vadd.f32 %v9055_v47, %v1455_v5  ;;  %v2736_v0 = vadd.f32 %v9058_v12, %v1456_v4  ;;  %v2737_v35 = vadd.f32 %v9506_v31, %v1457_v15  ;;  %v298_v47 = vld [vmem:[%s12300_s2 + $0xa8] sm:$0xff]  ;;  %v299_v12 = vld [vmem:[%s12300_s2 + $0xb0] sm:$0xff] }
 0x2a0   : > { %v5844_v34 = vsel %vm667_vm2, %v5725_v26, %v9406_v38  ;;  %3559 = vmax.xlane.f32.xlu0 %v3558_v61  ;;  %v4282_v63 = vmax.f32 %v4280_v7, %v4281_v45  ;;  %v3561_v1 = vsel %vm3218_vm0, %v2733_v21, -inf  ;;  %v5661_v40 = vperm.slane %v3340_v23, %v8425_v41 }
 0x2a1   : > { %v3562_v19 = vsel %vm3218_vm0, %v2734_v33, -inf  ;;  %v3564_v20 = vsel %vm3218_vm0, %v2735_v27, -inf  ;;  %v3566_v38 = vsel %vm3218_vm0, %v2736_v0, -inf  ;;  %v5726_v26 = vperm.slane %v4055_v9, %v8425_v41  ;;  %v9578_v9 = vld [vmem:[#allocation1 + $0x9] sm:$0xff]  ;;  %v9581_v27 = vld [vmem:[#allocation1 + $0x12] sm:$0xff] }
 0x2a2   : > { %v4284_v10 = vmax.f32 %v4282_v63, %v4283_v43  ;;  %v3563_v11 = vmax.f32 %v3561_v1, %v3562_v19  ;;  %v3568_v62 = vsel %vm3226_vm3, %v2737_v35, -inf  ;;  %v9534_v13 = vsel %vm667_vm2, %v5661_v40, %v5787_v6  ;;  %v9586_v63 = vld [vmem:[#allocation1 + $0x1b] sm:$0xff] }
 0x2a3   : > { %v1146_v46 = vsel %vm658_vm7, %v9451_v17, %v9443_v25  ;;  %vm12609_vm8 = vcmask 1044484   ;;  %v9542_v16 = vrot.slane %v298_v47, 7  ;;  %v9544_v8 = vrot.slane %v299_v12, 6 }
 0x2a4   : > { %v1148_v59 = vsel %vm12609_vm8, %v9453_v22, %v9455_v2  ;;  %4285 = vmax.xlane.f32.xlu2 %v4284_v10  ;;  %v3565_v44 = vmax.f32 %v3563_v11, %v3564_v20  ;;  %vm12610_vm9 = vcmask 1042433   ;;  %v9553_v53 = vrot.slane %v300_v56, 5  ;;  %vm12615_vm8 = vmmov %vm12611_vm13 }
 0x2a5   : > { %v1147_v36 = vsel %vm12610_vm9, %v1146_v46, %v9445_v55  ;;  %v9555_v58 = vrot.slane %v301_v60, 4  ;;  %v5845_v30 = vsel %vm12611_vm13, %v5726_v26, %v5844_v34  ;;  %vm12612_vm10 = vcmask 1043457   ;;  %v9584_v34 = vpop.xlane.xlu2 %4076 }
 0x2a6   : > { %v1149_v57 = vsel %vm12612_vm10, %v1147_v36, %v1148_v59  ;;  %vm12613_vm12 = vcmask 1040384   ;;  %v1151_v32 = vsel %vm667_vm2, %v9451_v17, %v9443_v25  ;;  %v3567_v50 = vmax.f32 %v3565_v44, %v3566_v38 }
 0x2a7   : > { %v830_v29 = vsel %vm12613_vm12, %v9551_v51, %v9542_v16  ;;  %v1150_v52 = vrot.slane %v1149_v57, 1  ;;  %vm12614_vm11 = vcmask 1041408   ;;  %v832_v14 = vsel %vm12615_vm8, %v9553_v53, %v9555_v58 }
 0x2a8   : > { %v831_v18 = vsel %vm12614_vm11, %v830_v29, %v9544_v8  ;;  %vm12616_vm9 = vcmask 1042432   ;;  %vm12617_vm13 = vcmask 1043458   ;;  %v1153_v45 = vsel %vm671_vm6, %v9453_v22, %v9455_v2 }
 0x2a9   : > { %v833_v48 = vsel %vm12616_vm9, %v831_v18, %v832_v14  ;;  %v1152_v49 = vsel %vm12617_vm13, %v1151_v32, %v9445_v55  ;;  %v5727_v43 = vperm.slane %v4066_v39, %v8425_v41  ;;  %v3569_v37 = vmax.f32 %v3567_v50, %v3568_v62  ;;  %v3351_v32 = vpop.xlane.xlu1 %3350 }
 0x2aa   : > { %v1783_v5 = vperm.slane %v1150_v52, 0  ;;  %v1784_v4 = vperm.slane %v1150_v52, 1  ;;  %v1785_v15 = vperm.slane %v1150_v52, 2  ;;  %v1786_v23 = vperm.slane %v1150_v52, 3 }
 0x2ab   : > { %v1787_v61 = vperm.slane %v1150_v52, 4  ;;  %v1458_v7 = vperm.slane %v833_v48, 0  ;;  %v1459_v21 = vperm.slane %v833_v48, 1  ;;  %3570 = vmax.xlane.f32.xlu1 %v3569_v37  ;;  %v1460_v35 = vperm.slane %v833_v48, 2 }
 0x2ac   : > { %v3063_v6 = vadd.f32 %v9496_v24, %v1783_v5  ;;  %v3064_v33 = vadd.f32 %v9578_v9, %v1784_v4  ;;  %v3065_v0 = vadd.f32 %v9581_v27, %v1785_v15  ;;  %v3066_v1 = vadd.f32 %v9586_v63, %v1786_v23 }
 0x2ad   : > { %v3067_v40 = vadd.f32 %v9506_v31, %v1787_v61  ;;  %v1461_v47 = vperm.slane %v833_v48, 3  ;;  %v1462_v12 = vperm.slane %v833_v48, 4  ;;  %v2738_v26 = vadd.f32 %v9496_v24, %v1458_v7 }
 0x2ae   : > { %v4287_v19 = vsel %vm3218_vm0, %v3063_v6, -inf  ;;  %v4288_v20 = vsel %vm3218_vm0, %v3064_v33, -inf  ;;  %v4290_v38 = vsel %vm3218_vm0, %v3065_v0, -inf  ;;  %v4292_v60 = vsel %vm3218_vm0, %v3066_v1, -inf }
 0x2af   : > { %v4289_v56 = vmax.f32 %v4287_v19, %v4288_v20  ;;  %v2739_v10 = vadd.f32 %v9578_v9, %v1459_v21  ;;  %v5728_v11 = vperm.slane %v9584_v34, %v8425_v41  ;;  %v4294_v62 = vsel %vm3226_vm3, %v3067_v40, -inf }
 0x2b0   : > { %v2740_v46 = vadd.f32 %v9581_v27, %v1460_v35  ;;  %v2741_v59 = vadd.f32 %v9586_v63, %v1461_v47  ;;  %v2742_v44 = vadd.f32 %v9506_v31, %v1462_v12  ;;  %v3572_v39 = vsel %vm3218_vm0, %v2738_v26, -inf }
 0x2b1   : > { %v4291_v36 = vmax.f32 %v4289_v56, %v4290_v38  ;;  %v3573_v57 = vsel %vm3218_vm0, %v2739_v10, -inf  ;;  %vm12618_vm10 = vcmask 1044482   ;;  %vm12619_vm12 = vcmask 1044484  }
 0x2b2   : > { %v1154_v29 = vsel %vm12618_vm10, %v1152_v49, %v1153_v45  ;;  %v3574_v50 = vmax.f32 %v3572_v39, %v3573_v57  ;;  %v3575_v52 = vsel %vm3218_vm0, %v2740_v46, -inf  ;;  %v3577_v18 = vsel %vm3218_vm0, %v2741_v59, -inf  ;;  %vm12621_vm8 = vmmov %vm12619_vm12 }
 0x2b3   : > { %v9608_v14 = vsel %vm12619_vm12, %v5727_v43, %v5845_v30  ;;  %v4293_v48 = vmax.f32 %v4291_v36, %v4292_v60  ;;  %v3579_v37 = vsel %vm3226_vm3, %v2742_v44, -inf  ;;  %v1155_v5 = vrot.slane %v1154_v29, 2 }
 0x2b4   : > { %v834_v4 = vsel %vm658_vm7, %v9551_v51, %v9542_v16  ;;  %v3576_v15 = vmax.f32 %v3574_v50, %v3575_v52  ;;  %v5662_v49 = vperm.slane %v3351_v32, %v8425_v41  ;;  %vm12620_vm11 = vcmask 1042433  }
 0x2b5   : > { %v835_v45 = vsel %vm12620_vm11, %v834_v4, %v9544_v8  ;;  %v836_v23 = vsel %vm12621_vm8, %v9553_v53, %v9555_v58  ;;  %v4295_v30 = vmax.f32 %v4293_v48, %v4294_v62  ;;  %v1788_v43 = vperm.slane %v1155_v5, 0 }
 0x2b6   : > { %v1789_v61 = vperm.slane %v1155_v5, 1  ;;  %v1790_v7 = vperm.slane %v1155_v5, 2  ;;  %v3578_v21 = vmax.f32 %v3576_v15, %v3577_v18  ;;  %v1791_v6 = vperm.slane %v1155_v5, 3 }
 0x2b7   : > { %v1792_v33 = vperm.slane %v1155_v5, 4  ;;  %v839_v0 = vsel %vm667_vm2, %v9551_v51, %v9542_v16  ;;  %4296 = vmax.xlane.f32.xlu0 %v4295_v30  ;;  %v3068_v35 = vadd.f32 %v9496_v24, %v1788_v43  ;;  %vm12622_vm9 = vcmask 1043457   ;;  %v3362_v43 = vpop.xlane.xlu0 %3361 }
 0x2b8   : > { %v3069_v1 = vadd.f32 %v9578_v9, %v1789_v61  ;;  %v3070_v40 = vadd.f32 %v9581_v27, %v1790_v7  ;;  %v837_v47 = vsel %vm12622_vm9, %v835_v45, %v836_v23  ;;  %v3580_v12 = vmax.f32 %v3578_v21, %v3579_v37  ;;  %v9652_v61 = vpop.xlane.xlu2 %3372 }
 0x2b9   : > { %v3071_v19 = vadd.f32 %v9586_v63, %v1791_v6  ;;  %v3072_v20 = vadd.f32 %v9506_v31, %v1792_v33  ;;  %v838_v38 = vrot.slane %v837_v47, 1  ;;  %v4298_v26 = vsel %vm3218_vm0, %v3068_v35, -inf }
 0x2ba   : > { %v4299_v56 = vsel %vm3218_vm0, %v3069_v1, -inf  ;;  %v4301_v60 = vsel %vm3218_vm0, %v3070_v40, -inf  ;;  %v840_v10 = vsel %vm12617_vm13, %v839_v0, %v9544_v8  ;;  %3581 = vmax.xlane.f32.xlu2 %v3580_v12  ;;  %v841_v52 = vsel %vm671_vm6, %v9553_v53, %v9555_v58 }
 0x2bb   : > { %v4300_v62 = vmax.f32 %v4298_v26, %v4299_v56  ;;  %v4303_v46 = vsel %vm3218_vm0, %v3071_v19, -inf  ;;  %v4305_v59 = vsel %vm3226_vm3, %v3072_v20, -inf  ;;  %v1463_v44 = vperm.slane %v838_v38, 0 }
 0x2bc   : > { %v1464_v36 = vperm.slane %v838_v38, 1  ;;  %v1465_v39 = vperm.slane %v838_v38, 2  ;;  %v1466_v57 = vperm.slane %v838_v38, 3  ;;  %v1467_v29 = vperm.slane %v838_v38, 4 }
 0x2bd   : > { %v4302_v32 = vmax.f32 %v4300_v62, %v4301_v60  ;;  %v2743_v50 = vadd.f32 %v9496_v24, %v1463_v44  ;;  %vm12623_vm10 = vcmask 1043459   ;;  %vm12625_vm11 = vcmask 1044482  }
 0x2be   : > { %v1156_v18 = vsel %vm12623_vm10, %v9451_v17, %v9443_v25  ;;  %v2744_v48 = vadd.f32 %v9578_v9, %v1464_v36  ;;  %v2745_v37 = vadd.f32 %v9581_v27, %v1465_v39  ;;  %v2746_v5 = vadd.f32 %v9586_v63, %v1466_v57  ;;  %vm12624_vm12 = vmmov %vm12623_vm10 }
 0x2bf   : > { %v2747_v4 = vadd.f32 %v9506_v31, %v1467_v29  ;;  %v4304_v15 = vmax.f32 %v4302_v32, %v4303_v46  ;;  %v5789_v45 = vsel %vm12624_vm12, %v5662_v49, %v9534_v13  ;;  %v842_v23 = vsel %vm12625_vm11, %v840_v10, %v841_v52  ;;  %v9661_v49 = vpop.xlane.xlu1 %4087 }
 0x2c0   : > { %vm12626_vm8 = vcmask 1044483   ;;  %v3583_v7 = vsel %vm3218_vm0, %v2743_v50, -inf  ;;  %v3584_v21 = vsel %vm3218_vm0, %v2744_v48, -inf  ;;  %v3586_v6 = vsel %vm3218_vm0, %v2745_v37, -inf }
 0x2c1   : > { %v1157_v30 = vsel %vm12626_vm8, %v1156_v18, %v9445_v55  ;;  %v3588_v33 = vsel %vm3218_vm0, %v2746_v5, -inf  ;;  %v4306_v0 = vmax.f32 %v4304_v15, %v4305_v59  ;;  %v3585_v35 = vmax.f32 %v3583_v7, %v3584_v21 }
 0x2c2   : > { %v843_v1 = vrot.slane %v842_v23, 2  ;;  %v1158_v13 = vsel %vm679_vm15, %v9453_v22, %v9455_v2  ;;  %v3590_v40 = vsel %vm3226_vm3, %v2747_v4, -inf  ;;  %vm12627_vm9 = vcmask 1045507  }
 0x2c3   : > { %v1159_v47 = vsel %vm12627_vm9, %v1157_v30, %v1158_v13  ;;  %v5663_v12 = vperm.slane %v3362_v43, %v8425_v41  ;;  %v5664_v19 = vperm.slane %v9652_v61, %v8425_v41  ;;  %4307 = vmax.xlane.f32.xlu1 %v4306_v0  ;;  %v3587_v20 = vmax.f32 %v3585_v35, %v3586_v6 }
 0x2c4   : > { %v1468_v38 = vperm.slane %v843_v1, 0  ;;  %v1469_v26 = vperm.slane %v843_v1, 1  ;;  %v1470_v56 = vperm.slane %v843_v1, 2  ;;  %v1471_v60 = vperm.slane %v843_v1, 3 }
 0x2c5   : > { %v1472_v10 = vperm.slane %v843_v1, 4  ;;  %v1160_v62 = vrot.slane %v1159_v47, 3  ;;  %v5729_v46 = vperm.slane %v9661_v49, %v8425_v41  ;;  %v3589_v59 = vmax.f32 %v3587_v20, %v3588_v33 }
 0x2c6   : > { %v2748_v44 = vadd.f32 %v9496_v24, %v1468_v38  ;;  %v2749_v36 = vadd.f32 %v9578_v9, %v1469_v26  ;;  %v2750_v39 = vadd.f32 %v9581_v27, %v1470_v56  ;;  %v2751_v57 = vadd.f32 %v9586_v63, %v1471_v60 }
 0x2c7   : > { %v2752_v29 = vadd.f32 %v9506_v31, %v1472_v10  ;;  %v1793_v32 = vperm.slane %v1160_v62, 0  ;;  %v1794_v50 = vperm.slane %v1160_v62, 1  ;;  %v3591_v52 = vmax.f32 %v3589_v59, %v3590_v40  ;;  %v3384_v49 = vpop.xlane.xlu1 %3383 }
 0x2c8   : > { %v3594_v18 = vsel %vm3218_vm0, %v2748_v44, -inf  ;;  %v3595_v48 = vsel %vm3218_vm0, %v2749_v36, -inf  ;;  %v3597_v37 = vsel %vm3218_vm0, %v2750_v39, -inf  ;;  %v3599_v4 = vsel %vm3218_vm0, %v2751_v57, -inf }
 0x2c9   : > { %v3596_v5 = vmax.f32 %v3594_v18, %v3595_v48  ;;  %v3601_v15 = vsel %vm3226_vm3, %v2752_v29, -inf  ;;  %v1795_v23 = vperm.slane %v1160_v62, 2  ;;  %3592 = vmax.xlane.f32.xlu0 %v3591_v52  ;;  %v1796_v30 = vperm.slane %v1160_v62, 3 }
 0x2ca   : > { %v1797_v43 = vperm.slane %v1160_v62, 4  ;;  %v3073_v7 = vadd.f32 %v9496_v24, %v1793_v32  ;;  %v3074_v21 = vadd.f32 %v9578_v9, %v1794_v50  ;;  %vm12628_vm13 = vcmask 1044484  }
 0x2cb   : > { %v3598_v6 = vmax.f32 %v3596_v5, %v3597_v37  ;;  %v3075_v33 = vadd.f32 %v9581_v27, %v1795_v23  ;;  %v1161_v0 = vsel %vm12628_vm13, %v9451_v17, %v9443_v25  ;;  %v1163_v35 = vsel %vm687_vm4, %v9455_v2, %v9453_v22  ;;  %vm12630_vm12 = vmmov %vm12628_vm13 }
 0x2cc   : > { %v3076_v1 = vadd.f32 %v9586_v63, %v1796_v30  ;;  %v3077_v13 = vadd.f32 %v9506_v31, %v1797_v43  ;;  %v4309_v40 = vsel %vm3218_vm0, %v3073_v7, -inf  ;;  %v4310_v47 = vsel %vm3218_vm0, %v3074_v21, -inf }
 0x2cd   : > { %v3600_v20 = vmax.f32 %v3598_v6, %v3599_v4  ;;  %v4311_v38 = vmax.f32 %v4309_v40, %v4310_v47  ;;  %v4312_v26 = vsel %vm3218_vm0, %v3075_v33, -inf  ;;  %vm12629_vm10 = vcmask 1045508  }
 0x2ce   : > { %v1162_v56 = vsel %vm12629_vm10, %v1161_v0, %v9445_v55  ;;  %v4314_v60 = vsel %vm3218_vm0, %v3076_v1, -inf  ;;  %v9698_v10 = vsel %vm12630_vm12, %v5663_v12, %v5789_v45  ;;  %vm12631_vm11 = vcmask 1046532  }
 0x2cf   : > { %v1164_v62 = vsel %vm12631_vm11, %v1162_v56, %v1163_v35  ;;  %v1166_v59 = vsel %vm671_vm6, %v9451_v17, %v9443_v25  ;;  %v3602_v44 = vmax.f32 %v3600_v20, %v3601_v15  ;;  %v4313_v36 = vmax.f32 %v4311_v38, %v4312_v26 }
 0x2d0   : > { %v1165_v39 = vrot.slane %v1164_v62, 4  ;;  %vm12632_vm8 = vcmask 1046533   ;;  %v4316_v29 = vsel %vm3226_vm3, %v3077_v13, -inf  ;;  %vm12633_vm9 = vcmask 1040384  }
 0x2d1   : > { %v1167_v57 = vsel %vm12632_vm8, %v1166_v59, %v9445_v55  ;;  %v1168_v32 = vsel %vm12633_vm9, %v9453_v22, %v9455_v2  ;;  %vm12634_vm13 = vcmask 1043459   ;;  %v846_v12 = vsel %vm679_vm15, %v9553_v53, %v9555_v58  ;;  %3603 = vmax.xlane.f32.xlu2 %v3602_v44  ;;  %v4099_v44 = vpop.xlane.xlu0 %4098 }
 0x2d2   : > { %v844_v45 = vsel %vm12634_vm13, %v9551_v51, %v9542_v16  ;;  %v4315_v50 = vmax.f32 %v4313_v36, %v4314_v60  ;;  %v1798_v52 = vperm.slane %v1165_v39, 0  ;;  %v1799_v18 = vperm.slane %v1165_v39, 1 }
 0x2d3   : > { %v1800_v48 = vperm.slane %v1165_v39, 2  ;;  %v1801_v37 = vperm.slane %v1165_v39, 3  ;;  %v1802_v5 = vperm.slane %v1165_v39, 4  ;;  %vm12635_vm10 = vcmask 1044480  }
 0x2d4   : > { %v1169_v4 = vsel %vm12635_vm10, %v1168_v32, %v1167_v57  ;;  %vm12636_vm12 = vcmask 1044483   ;;  %v4317_v23 = vmax.f32 %v4315_v50, %v4316_v29  ;;  %v3078_v30 = vadd.f32 %v9496_v24, %v1798_v52 }
 0x2d5   : > { %v845_v15 = vsel %vm12636_vm12, %v844_v45, %v9544_v8  ;;  %v3079_v43 = vadd.f32 %v9578_v9, %v1799_v18  ;;  %v3080_v7 = vadd.f32 %v9581_v27, %v1800_v48  ;;  %v3081_v21 = vadd.f32 %v9586_v63, %v1801_v37 }
 0x2d6   : > { %v3082_v6 = vadd.f32 %v9506_v31, %v1802_v5  ;;  %v1170_v33 = vrot.slane %v1169_v4, 5  ;;  %vm12637_vm11 = vcmask 1045507   ;;  %4318 = vmax.xlane.f32.xlu1 %v4317_v23  ;;  %v4320_v35 = vsel %vm3218_vm0, %v3078_v30, -inf  ;;  %v9740_v30 = vpop.xlane.xlu2 %3394 }
 0x2d7   : > { %v847_v0 = vsel %vm12637_vm11, %v845_v15, %v846_v12  ;;  %v4321_v1 = vsel %vm3218_vm0, %v3079_v43, -inf  ;;  %v4323_v13 = vsel %vm3218_vm0, %v3080_v7, -inf  ;;  %v4325_v20 = vsel %vm3218_vm0, %v3081_v21, -inf }
 0x2d8   : > { %v848_v40 = vrot.slane %v847_v0, 3  ;;  %v4322_v47 = vmax.f32 %v4320_v35, %v4321_v1  ;;  %v4327_v38 = vsel %vm3226_vm3, %v3082_v6, -inf  ;;  %v1803_v26 = vperm.slane %v1170_v33, 0 }
 0x2d9   : > { %v1804_v56 = vperm.slane %v1170_v33, 1  ;;  %v1805_v60 = vperm.slane %v1170_v33, 2  ;;  %v1806_v62 = vperm.slane %v1170_v33, 3  ;;  %v1807_v59 = vperm.slane %v1170_v33, 4 }
 0x2da   : > { %v4324_v36 = vmax.f32 %v4322_v47, %v4323_v13  ;;  %v3083_v39 = vadd.f32 %v9496_v24, %v1803_v26  ;;  %v1473_v57 = vperm.slane %v848_v40, 0  ;;  %v1474_v29 = vperm.slane %v848_v40, 1 }
 0x2db   : > { %v3084_v32 = vadd.f32 %v9578_v9, %v1804_v56  ;;  %v3085_v45 = vadd.f32 %v9581_v27, %v1805_v60  ;;  %v3086_v12 = vadd.f32 %v9586_v63, %v1806_v62  ;;  %v3087_v50 = vadd.f32 %v9506_v31, %v1807_v59 }
 0x2dc   : > { %v4326_v52 = vmax.f32 %v4324_v36, %v4325_v20  ;;  %v1475_v18 = vperm.slane %v848_v40, 2  ;;  %v1476_v48 = vperm.slane %v848_v40, 3  ;;  %v5730_v37 = vperm.slane %v4099_v44, %v8425_v41 }
 0x2dd   : > { %v4331_v5 = vsel %vm3218_vm0, %v3083_v39, -inf  ;;  %v4332_v4 = vsel %vm3218_vm0, %v3084_v32, -inf  ;;  %v4334_v15 = vsel %vm3218_vm0, %v3085_v45, -inf  ;;  %v4336_v23 = vsel %vm3218_vm0, %v3086_v12, -inf }
 0x2de   : > { %v4328_v43 = vmax.f32 %v4326_v52, %v4327_v38  ;;  %v4333_v7 = vmax.f32 %v4331_v5, %v4332_v4  ;;  %v1477_v21 = vperm.slane %v848_v40, 4  ;;  %v2753_v6 = vadd.f32 %v9496_v24, %v1473_v57 }
 0x2df   : > { %v4338_v33 = vsel %vm3226_vm3, %v3087_v50, -inf  ;;  %v2754_v0 = vadd.f32 %v9578_v9, %v1474_v29  ;;  %v2755_v35 = vadd.f32 %v9581_v27, %v1475_v18  ;;  %v2756_v1 = vadd.f32 %v9586_v63, %v1476_v48 }
 0x2e0   : > { %4329 = vmax.xlane.f32.xlu0 %v4328_v43  ;;  %v4335_v13 = vmax.f32 %v4333_v7, %v4334_v15  ;;  %v2757_v47 = vadd.f32 %v9506_v31, %v1477_v21  ;;  %v3605_v20 = vsel %vm3218_vm0, %v2753_v6, -inf  ;;  %v5666_v38 = vperm.slane %v9740_v30, %v8425_v41  ;;  %v343_v30 = vld [vmem:[%s12300_s2 + $0x210] sm:$0xff] }
 0x2e1   : > { %v3606_v40 = vsel %vm3218_vm0, %v2754_v0, -inf  ;;  %v3608_v26 = vsel %vm3218_vm0, %v2755_v35, -inf  ;;  %v3610_v56 = vsel %vm3218_vm0, %v2756_v1, -inf  ;;  %v5847_v60 = vsel %vm671_vm6, %v5728_v11, %v9608_v14 }
 0x2e2   : > { %v4337_v62 = vmax.f32 %v4335_v13, %v4336_v23  ;;  %v3607_v59 = vmax.f32 %v3605_v20, %v3606_v40  ;;  %v3612_v44 = vsel %vm3226_vm3, %v2757_v47, -inf  ;;  %v5848_v36 = vsel %vm679_vm15, %v5729_v46, %v5847_v60 }
 0x2e3   : > { %v9765_v39 = vsel %vm5785_vm14, %v5730_v37, %v5848_v36  ;;  %vm12639_vm8 = vcmask 1044484   ;;  %v851_v34 = vsel %vm687_vm4, %v9555_v58, %v9553_v53  ;;  %v854_v11 = vsel %vm671_vm6, %v9551_v51, %v9542_v16 }
 0x2e4   : > { %12638 = vst [vmem:[#allocation9_spill] sm:$0xff] %v9765_v39  ;;  %v849_v57 = vsel %vm12639_vm8, %v9551_v51, %v9542_v16  ;;  %v4339_v14 = vmax.f32 %v4337_v62, %v4338_v33  ;;  %v3609_v29 = vmax.f32 %v3607_v59, %v3608_v26  ;;  %6779 = vmatmul.msk.f32.gmra.mxu3 %vm6149_vm5, %v9765_v39  ;;  %vm12640_vm9 = vcmask 1045508  }
 0x2e5   : > { %v850_v46 = vsel %vm12640_vm9, %v849_v57, %v9544_v8  ;;  %vm12641_vm13 = vcmask 1046533   ;;  %vm12642_vm10 = vcmask 1046532   ;;  %vm12643_vm12 = vcmask 1040384  }
 0x2e6   : > { %v855_v32 = vsel %vm12641_vm13, %v854_v11, %v9544_v8  ;;  %v852_v45 = vsel %vm12642_vm10, %v850_v46, %v851_v34  ;;  %v856_v12 = vsel %vm12643_vm12, %v9553_v53, %v9555_v58  ;;  %v1171_v50 = vsel %vm679_vm15, %v9451_v17, %v9443_v25  ;;  %4340 = vmax.xlane.f32.xlu2 %v4339_v14  ;;  %vm12648_vm10 = vmmov %vm12643_vm12 }
 0x2e7   : > { %v1173_v52 = vsel %vm658_vm7, %v9453_v22, %v9455_v2  ;;  %v3611_v18 = vmax.f32 %v3609_v29, %v3610_v56  ;;  %v853_v48 = vrot.slane %v852_v45, 4  ;;  %vm12644_vm11 = vcmask 1044480  }
 0x2e8   : > { %v857_v37 = vsel %vm12644_vm11, %v856_v12, %v855_v32  ;;  %vm12645_vm8 = vcmask 1045504   ;;  %v5665_v4 = vperm.slane %v3384_v49, %v8425_v41  ;;  %vm12646_vm9 = vcmask 1045505  }
 0x2e9   : > { %v1172_v5 = vsel %vm12645_vm8, %v9445_v55, %v1171_v50  ;;  %v858_v15 = vrot.slane %v857_v37, 5  ;;  %v5791_v43 = vsel %vm671_vm6, %v5664_v19, %v9698_v10  ;;  %v3613_v7 = vmax.f32 %v3611_v18, %v3612_v44  ;;  %vm12650_vm11 = vmmov %vm12645_vm8 }
 0x2ea   : > { %v1174_v23 = vsel %vm12646_vm9, %v1173_v52, %v1172_v5  ;;  %v1478_v21 = vperm.slane %v853_v48, 0  ;;  %v1479_v6 = vperm.slane %v853_v48, 1  ;;  %v1480_v33 = vperm.slane %v853_v48, 2 }
 0x2eb   : > { %v1481_v0 = vperm.slane %v853_v48, 3  ;;  %v1482_v35 = vperm.slane %v853_v48, 4  ;;  %v1483_v1 = vperm.slane %v858_v15, 0  ;;  %v1484_v13 = vperm.slane %v858_v15, 1  ;;  %3614 = vmax.xlane.f32.xlu1 %v3613_v7 }
 0x2ec   : > { %v2758_v47 = vadd.f32 %v9496_v24, %v1478_v21  ;;  %v2759_v20 = vadd.f32 %v9578_v9, %v1479_v6  ;;  %v2760_v40 = vadd.f32 %v9581_v27, %v1480_v33  ;;  %v1485_v26 = vperm.slane %v858_v15, 2 }
 0x2ed   : > { %v2761_v61 = vadd.f32 %v9586_v63, %v1481_v0  ;;  %v2762_v19 = vadd.f32 %v9506_v31, %v1482_v35  ;;  %v1486_v10 = vperm.slane %v858_v15, 3  ;;  %v1487_v56 = vperm.slane %v858_v15, 4 }
 0x2ee   : > { %v3616_v60 = vsel %vm3218_vm0, %v2758_v47, -inf  ;;  %v3617_v62 = vsel %vm3218_vm0, %v2759_v20, -inf  ;;  %v3619_v59 = vsel %vm3218_vm0, %v2760_v40, -inf  ;;  %v2763_v44 = vadd.f32 %v9496_v24, %v1483_v1 }
 0x2ef   : > { %v3618_v36 = vmax.f32 %v3616_v60, %v3617_v62  ;;  %v3621_v57 = vsel %vm3218_vm0, %v2761_v61, -inf  ;;  %v3623_v34 = vsel %vm3226_vm3, %v2762_v19, -inf  ;;  %v2764_v11 = vadd.f32 %v9578_v9, %v1484_v13  ;;  %v344_v61 = vld [vmem:[%s12300_s2 + $0x218] sm:$0xff]  ;;  %v345_v19 = vld [vmem:[%s12300_s2 + $0x220] sm:$0xff]  ;;  %v346_v62 = vld [vmem:[%s12300_s2 + $0x228] sm:$0xff] }
 0x2f0   : > { %v2765_v14 = vadd.f32 %v9581_v27, %v1485_v26  ;;  %v2766_v29 = vadd.f32 %v9586_v63, %v1486_v10  ;;  %v2767_v49 = vadd.f32 %v9506_v31, %v1487_v56  ;;  %v3627_v46 = vsel %vm3218_vm0, %v2763_v44, -inf }
 0x2f1   : > { %v3620_v32 = vmax.f32 %v3618_v36, %v3619_v59  ;;  %v3628_v45 = vsel %vm3218_vm0, %v2764_v11, -inf  ;;  %v1175_v12 = vrot.slane %v1174_v23, 6  ;;  %v5792_v50 = vsel %vm679_vm15, %v5665_v4, %v5791_v43  ;;  %v4110_v11 = vpop.xlane.xlu0 %4109 }
 0x2f2   : > { %v3629_v52 = vmax.f32 %v3627_v46, %v3628_v45  ;;  %v3630_v18 = vsel %vm3218_vm0, %v2765_v14, -inf  ;;  %v3632_v48 = vsel %vm3218_vm0, %v2766_v29, -inf  ;;  %v3634_v37 = vsel %vm3226_vm3, %v2767_v49, -inf  ;;  %v4121_v14 = vpop.xlane.xlu1 %4120  ;;  %v9864_v49 = vld [vmem:[%s12300_s2 + $0x208] sm:$0xff] }
 0x2f3   : > { %v3622_v5 = vmax.f32 %v3620_v32, %v3621_v57  ;;  %v1808_v15 = vperm.slane %v1175_v12, 0  ;;  %v1809_v7 = vperm.slane %v1175_v12, 1  ;;  %v1810_v21 = vperm.slane %v1175_v12, 2 }
 0x2f4   : > { %v3631_v6 = vmax.f32 %v3629_v52, %v3630_v18  ;;  %v1811_v33 = vperm.slane %v1175_v12, 3  ;;  %v1812_v0 = vperm.slane %v1175_v12, 4  ;;  %v5793_v23 = vsel %vm5785_vm14, %v5666_v38, %v5792_v50 }
 0x2f5   : > { %v3624_v4 = vmax.f32 %v3622_v5, %v3623_v34  ;;  %v3088_v43 = vadd.f32 %v9496_v24, %v1808_v15  ;;  %v3089_v35 = vadd.f32 %v9578_v9, %v1809_v7  ;;  %v3090_v1 = vadd.f32 %v9581_v27, %v1810_v21  ;;  %6771 = vmatmul.msk.f32.gmra.mxu2 %vm6149_vm5, %v5793_v23  ;;  %v4132_v15 = vpop.xlane.xlu2 %4131 }
 0x2f6   : > { %v3633_v13 = vmax.f32 %v3631_v6, %v3632_v48  ;;  %v3091_v47 = vadd.f32 %v9586_v63, %v1811_v33  ;;  %v3092_v20 = vadd.f32 %v9506_v31, %v1812_v0  ;;  %6786 = vmatmul.msk.f32.gmra.mxu0 %vm6149_vm5, %v5793_v23  ;;  %v1176_v44 = vsel %vm687_vm4, %v9443_v25, %v9451_v17 }
 0x2f7   : > { %3625 = vmax.xlane.f32.xlu0 %v3624_v4  ;;  %v4342_v38 = vsel %vm3218_vm0, %v3088_v43, -inf  ;;  %v4343_v40 = vsel %vm3218_vm0, %v3089_v35, -inf  ;;  %v4345_v26 = vsel %vm3218_vm0, %v3090_v1, -inf  ;;  %v1178_v36 = vsel %vm667_vm2, %v9453_v22, %v9455_v2 }
 0x2f8   : > { %v3635_v10 = vmax.f32 %v3633_v13, %v3634_v37  ;;  %v4344_v56 = vmax.f32 %v4342_v38, %v4343_v40  ;;  %v4347_v60 = vsel %vm3218_vm0, %v3091_v47, -inf  ;;  %v4349_v59 = vsel %vm3226_vm3, %v3092_v20, -inf }
 0x2f9   : > { %v9857_v57 = vrot.slane %v343_v30, 7  ;;  %vm12647_vm13 = vcmask 1046529   ;;  %v9866_v46 = vrot.slane %v344_v61, 6  ;;  %v9868_v25 = vrot.slane %v345_v19, 5 }
 0x2fa   : > { %3636 = vmax.xlane.f32.xlu2 %v3635_v10  ;;  %v4346_v34 = vmax.f32 %v4344_v56, %v4345_v26  ;;  %v1177_v29 = vsel %vm12647_vm13, %v9445_v55, %v1176_v44  ;;  %v9871_v22 = vrot.slane %v346_v62, 4  ;;  %v859_v55 = vsel %vm679_vm15, %v9551_v51, %v9542_v16 }
 0x2fb   : > { %v1179_v17 = vsel %vm710_vm1, %v1178_v36, %v1177_v29  ;;  %v1181_v2 = vsel %vm12648_vm10, %v9864_v49, %v9857_v57  ;;  %vm12649_vm12 = vcmask 1041408   ;;  %v860_v50 = vsel %vm12650_vm11, %v9544_v8, %v859_v55 }
 0x2fc   : > { %v4348_v32 = vmax.f32 %v4346_v34, %v4347_v60  ;;  %v1180_v45 = vrot.slane %v1179_v17, 7  ;;  %v1182_v12 = vsel %vm12649_vm12, %v1181_v2, %v9866_v46  ;;  %v5731_v52 = vperm.slane %v4110_v11, %v8425_v41 }
 0x2fd   : > { %v5732_v18 = vperm.slane %v4121_v14, %v8425_v41  ;;  %vm12651_vm8 = vcmask 1043459   ;;  %v861_v37 = vsel %vm658_vm7, %v9553_v53, %v9555_v58  ;;  %vm12652_vm9 = vcmask 1042432  }
 0x2fe   : > { %v1183_v48 = vsel %vm12651_vm8, %v9868_v25, %v9871_v22  ;;  %v4350_v5 = vmax.f32 %v4348_v32, %v4349_v59  ;;  %v1813_v7 = vperm.slane %v1180_v45, 0  ;;  %v1814_v21 = vperm.slane %v1180_v45, 1  ;;  %vm12656_vm11 = vmmov %vm12651_vm8 }
 0x2ff   : > { %v1815_v6 = vperm.slane %v1180_v45, 2  ;;  %v1816_v33 = vperm.slane %v1180_v45, 3  ;;  %v1817_v0 = vperm.slane %v1180_v45, 4  ;;  %v1184_v23 = vsel %vm12652_vm9, %v1182_v12, %v1183_v48  ;;  %v9913_v12 = vpop.xlane.xlu0 %3405 }
 0x300   : > { %vm12653_vm13 = vcmask 1045505   ;;  %4351 = vmax.xlane.f32.xlu1 %v4350_v5  ;;  %v3093_v43 = vadd.f32 %v9496_v24, %v1813_v7  ;;  %v3094_v35 = vadd.f32 %v9578_v9, %v1814_v21  ;;  %v1818_v13 = vperm.slane %v1184_v23, 0  ;;  %v4143_v21 = vpop.xlane.xlu2 %4142 }
 0x301   : > { %v862_v4 = vsel %vm12653_vm13, %v861_v37, %v860_v50  ;;  %v3095_v1 = vadd.f32 %v9581_v27, %v1815_v6  ;;  %v3096_v47 = vadd.f32 %v9586_v63, %v1816_v33  ;;  %v3097_v20 = vadd.f32 %v9506_v31, %v1817_v0 }
 0x302   : > { %v1819_v30 = vperm.slane %v1184_v23, 1  ;;  %v1820_v38 = vperm.slane %v1184_v23, 2  ;;  %v4353_v40 = vsel %vm3218_vm0, %v3093_v43, -inf  ;;  %v4354_v26 = vsel %vm3218_vm0, %v3094_v35, -inf }
 0x303   : > { %v4356_v61 = vsel %vm3218_vm0, %v3095_v1, -inf  ;;  %v1821_v19 = vperm.slane %v1184_v23, 3  ;;  %v5733_v10 = vperm.slane %v4132_v15, %v8425_v41  ;;  %v4355_v56 = vmax.f32 %v4353_v40, %v4354_v26 }
 0x304   : > { %v4358_v60 = vsel %vm3218_vm0, %v3096_v47, -inf  ;;  %v1822_v62 = vperm.slane %v1184_v23, 4  ;;  %v3098_v59 = vadd.f32 %v9496_v24, %v1818_v13  ;;  %v3099_v44 = vadd.f32 %v9578_v9, %v1819_v30 }
 0x305   : > { %v3100_v36 = vadd.f32 %v9581_v27, %v1820_v38  ;;  %v3101_v34 = vadd.f32 %v9586_v63, %v1821_v19  ;;  %v5850_v11 = vsel %vm658_vm7, %v5732_v18, %v5731_v52  ;;  %v4357_v14 = vmax.f32 %v4355_v56, %v4356_v61 }
 0x306   : > { %v4360_v29 = vsel %vm3226_vm3, %v3097_v20, -inf  ;;  %v863_v17 = vrot.slane %v862_v4, 6  ;;  %v3102_v2 = vadd.f32 %v9506_v31, %v1822_v62  ;;  %v4364_v55 = vsel %vm3218_vm0, %v3098_v59, -inf  ;;  %v3417_v62 = vpop.xlane.xlu1 %3416 }
 0x307   : > { %v4365_v32 = vsel %vm3218_vm0, %v3099_v44, -inf  ;;  %v4367_v45 = vsel %vm3218_vm0, %v3100_v36, -inf  ;;  %v4359_v50 = vmax.f32 %v4357_v14, %v4358_v60  ;;  %v4369_v37 = vsel %vm3218_vm0, %v3101_v34, -inf }
 0x308   : > { %v4366_v48 = vmax.f32 %v4364_v55, %v4365_v32  ;;  %v1488_v5 = vperm.slane %v863_v17, 0  ;;  %v1489_v52 = vperm.slane %v863_v17, 1  ;;  %v1490_v18 = vperm.slane %v863_v17, 2 }
 0x309   : > { %v1491_v15 = vperm.slane %v863_v17, 3  ;;  %v1492_v7 = vperm.slane %v863_v17, 4  ;;  %v4361_v6 = vmax.f32 %v4359_v50, %v4360_v29  ;;  %v5667_v23 = vperm.slane %v9913_v12, %v8425_v41 }
 0x30a   : > { %v4368_v33 = vmax.f32 %v4366_v48, %v4367_v45  ;;  %v2768_v0 = vadd.f32 %v9496_v24, %v1488_v5  ;;  %v4371_v4 = vsel %vm3226_vm3, %v3102_v2, -inf  ;;  %v2769_v43 = vadd.f32 %v9578_v9, %v1489_v52 }
 0x30b   : > { %v2770_v35 = vadd.f32 %v9581_v27, %v1490_v18  ;;  %v2771_v1 = vadd.f32 %v9586_v63, %v1491_v15  ;;  %4362 = vmax.xlane.f32.xlu0 %v4361_v6  ;;  %v5734_v47 = vperm.slane %v4143_v21, %v8425_v41  ;;  %v5851_v20 = vsel %vm667_vm2, %v5733_v10, %v5850_v11 }
 0x30c   : > { %v4370_v13 = vmax.f32 %v4368_v33, %v4369_v37  ;;  %v1185_v30 = vsel %vm658_vm7, %v9864_v49, %v9857_v57  ;;  %v2772_v38 = vadd.f32 %v9506_v31, %v1492_v7  ;;  %v3638_v40 = vsel %vm3218_vm0, %v2768_v0, -inf }
 0x30d   : > { %v3639_v26 = vsel %vm3218_vm0, %v2769_v43, -inf  ;;  %v3641_v61 = vsel %vm3218_vm0, %v2770_v35, -inf  ;;  %v3643_v60 = vsel %vm3218_vm0, %v2771_v1, -inf  ;;  %vm12654_vm10 = vcmask 1042433  }
 0x30e   : > { %v4372_v19 = vmax.f32 %v4370_v13, %v4371_v4  ;;  %v3640_v56 = vmax.f32 %v3638_v40, %v3639_v26  ;;  %v1186_v10 = vsel %vm12654_vm10, %v1185_v30, %v9866_v46  ;;  %vm12655_vm12 = vcmask 1044484  }
 0x30f   : > { %v1187_v59 = vsel %vm12655_vm12, %v9868_v25, %v9871_v22  ;;  %v1190_v44 = vsel %vm667_vm2, %v9864_v49, %v9857_v57  ;;  %v1192_v36 = vsel %vm671_vm6, %v9868_v25, %v9871_v22  ;;  %v864_v34 = vsel %vm687_vm4, %v9542_v16, %v9551_v51  ;;  %vm12661_vm12 = vmmov %vm12656_vm11 }
 0x310   : > { %4373 = vmax.xlane.f32.xlu2 %v4372_v19  ;;  %v3642_v11 = vmax.f32 %v3640_v56, %v3641_v61  ;;  %v9948_v14 = vsel %vm12656_vm11, %v5734_v47, %v5851_v20  ;;  %vm12657_vm8 = vcmask 1043457   ;;  %vm12658_vm9 = vcmask 1043458  }
 0x311   : > { %v1188_v29 = vsel %vm12657_vm8, %v1186_v10, %v1187_v59  ;;  %v1191_v17 = vsel %vm12658_vm9, %v1190_v44, %v9866_v46  ;;  %v3645_v2 = vsel %vm3226_vm3, %v2772_v38, -inf  ;;  %v5668_v55 = vperm.slane %v3417_v62, %v8425_v41 }
 0x312   : > { %v1189_v32 = vrot.slane %v1188_v29, 1  ;;  %vm12659_vm13 = vcmask 1044482   ;;  %v3644_v50 = vmax.f32 %v3642_v11, %v3643_v60  ;;  %vm12660_vm10 = vcmask 1046529  }
 0x313   : > { %v1193_v45 = vsel %vm12659_vm13, %v1191_v17, %v1192_v36  ;;  %v865_v16 = vsel %vm12660_vm10, %v9544_v8, %v864_v34  ;;  %v866_v51 = vsel %vm667_vm2, %v9553_v53, %v9555_v58  ;;  %v5794_v62 = vsel %vm658_vm7, %v5668_v55, %v5667_v23 }
 0x314   : > { %v1194_v48 = vrot.slane %v1193_v45, 2  ;;  %v1823_v37 = vperm.slane %v1189_v32, 0  ;;  %v1824_v5 = vperm.slane %v1189_v32, 1  ;;  %v1825_v52 = vperm.slane %v1189_v32, 2 }
 0x315   : > { %v1826_v18 = vperm.slane %v1189_v32, 3  ;;  %v3646_v15 = vmax.f32 %v3644_v50, %v3645_v2  ;;  %v1827_v7 = vperm.slane %v1189_v32, 4  ;;  %v867_v58 = vsel %vm710_vm1, %v866_v51, %v865_v16  ;;  %v3428_v32 = vpop.xlane.xlu0 %3427 }
 0x316   : > { %v1828_v21 = vperm.slane %v1194_v48, 0  ;;  %v1829_v6 = vperm.slane %v1194_v48, 1  ;;  %v3103_v33 = vadd.f32 %v9496_v24, %v1823_v37  ;;  %v3104_v0 = vadd.f32 %v9578_v9, %v1824_v5  ;;  %v9991_v5 = vpop.xlane.xlu2 %3438 }
 0x317   : > { %v3105_v4 = vadd.f32 %v9581_v27, %v1825_v52  ;;  %v3106_v8 = vadd.f32 %v9586_v63, %v1826_v18  ;;  %3647 = vmax.xlane.f32.xlu1 %v3646_v15  ;;  %v1830_v43 = vperm.slane %v1194_v48, 2  ;;  %v1831_v35 = vperm.slane %v1194_v48, 3  ;;  %v9994_v15 = vld [vmem:[#allocation1 + $0x24] sm:$0xff] }
 0x318   : > { %v1832_v53 = vperm.slane %v1194_v48, 4  ;;  %v3107_v1 = vadd.f32 %v9506_v31, %v1827_v7  ;;  %v4375_v13 = vsel %vm3218_vm0, %v3103_v33, -inf  ;;  %v4376_v47 = vsel %vm3218_vm0, %v3104_v0, -inf  ;;  %v9986_v48 = vld [vmem:[#allocation1] sm:$0xff] }
 0x319   : > { %v4378_v20 = vsel %vm3218_vm0, %v3105_v4, -inf  ;;  %v4377_v30 = vmax.f32 %v4375_v13, %v4376_v47  ;;  %v4380_v38 = vsel %vm3218_vm0, %v3106_v8, -inf  ;;  %v3108_v40 = vadd.f32 %v9496_v24, %v1828_v21  ;;  %v304_v4 = vld [vmem:[%s12300_s2 + $0xd8] sm:$0xff]  ;;  %v305_v8 = vld [vmem:[%s12300_s2 + $0xe0] sm:$0xff]  ;;  %v306_v13 = vld [vmem:[%s12300_s2 + $0xe8] sm:$0xff] }
 0x31a   : > { %v3109_v26 = vadd.f32 %v9578_v9, %v1829_v6  ;;  %v3110_v61 = vadd.f32 %v9581_v27, %v1830_v43  ;;  %v3111_v19 = vadd.f32 %v9586_v63, %v1831_v35  ;;  %v3112_v56 = vadd.f32 %v9506_v31, %v1832_v53  ;;  %v303_v6 = vld [vmem:[%s12300_s2 + $0xd0] sm:$0xff] }
 0x31b   : > { %v868_v60 = vrot.slane %v867_v58, 7  ;;  %v4379_v10 = vmax.f32 %v4377_v30, %v4378_v20  ;;  %v4386_v59 = vsel %vm3218_vm0, %v3108_v40, -inf  ;;  %v4382_v24 = vsel %vm3226_vm3, %v3107_v1, -inf  ;;  %v10019_v1 = vld [vmem:[%s12300_s2 + $0xc8] sm:$0xff] }
 0x31c   : > { %v4387_v44 = vsel %vm3218_vm0, %v3109_v26, -inf  ;;  %v4389_v34 = vsel %vm3218_vm0, %v3110_v61, -inf  ;;  %v4391_v11 = vsel %vm3218_vm0, %v3111_v19, -inf  ;;  %v4393_v23 = vsel %vm3226_vm3, %v3112_v56, -inf }
 0x31d   : > { %v4388_v36 = vmax.f32 %v4386_v59, %v4387_v44  ;;  %v4381_v29 = vmax.f32 %v4379_v10, %v4380_v38  ;;  %v1493_v31 = vperm.slane %v868_v60, 0  ;;  %v1494_v17 = vperm.slane %v868_v60, 1 }
 0x31e   : > { %v1495_v2 = vperm.slane %v868_v60, 2  ;;  %v1496_v55 = vperm.slane %v868_v60, 3  ;;  %v1497_v45 = vperm.slane %v868_v60, 4  ;;  %v5669_v21 = vperm.slane %v3428_v32, %v8425_v41 }
 0x31f   : > { %v4390_v12 = vmax.f32 %v4388_v36, %v4389_v34  ;;  %v4383_v50 = vmax.f32 %v4381_v29, %v4382_v24  ;;  %v2773_v16 = vadd.f32 %v9986_v48, %v1493_v31  ;;  %v2774_v51 = vadd.f32 %v9578_v9, %v1494_v17 }
 0x320   : > { %v2775_v37 = vadd.f32 %v9581_v27, %v1495_v2  ;;  %v2776_v18 = vadd.f32 %v9586_v63, %v1496_v55  ;;  %v2777_v7 = vadd.f32 %v9994_v15, %v1497_v45  ;;  %v1195_v0 = vsel %vm12661_vm12, %v9864_v49, %v9857_v57  ;;  %v10059_v45 = vld [vmem:[#allocation1 + $0x9] sm:$0xff] }
 0x321   : > { %v4392_v52 = vmax.f32 %v4390_v12, %v4391_v11  ;;  %4384 = vmax.xlane.f32.xlu0 %v4383_v50  ;;  %v3649_v9 = vsel %vm3218_vm0, %v2773_v16, -inf  ;;  %v3650_v27 = vsel %vm3218_vm0, %v2774_v51, -inf  ;;  %v5670_v58 = vperm.slane %v9991_v5, %v8425_v41  ;;  %v4154_v11 = vpop.xlane.xlu1 %4153  ;;  %v10062_v16 = vld [vmem:[#allocation1 + $0x12] sm:$0xff] }
 0x322   : > { %v3652_v33 = vsel %vm3218_vm0, %v2775_v37, -inf  ;;  %v3651_v35 = vmax.f32 %v3649_v9, %v3650_v27  ;;  %v3654_v53 = vsel %vm3218_vm0, %v2776_v18, -inf  ;;  %v3656_v47 = vsel %vm3226_vm3, %v2777_v7, -inf }
 0x323   : > { %v4394_v43 = vmax.f32 %v4392_v52, %v4393_v23  ;;  %vm12662_vm11 = vcmask 1044483   ;;  %v1197_v30 = vsel %vm679_vm15, %v9868_v25, %v9871_v22  ;;  %v10030_v38 = vrot.slane %v303_v6, 7 }
 0x324   : > { %v1196_v20 = vsel %vm12662_vm11, %v1195_v0, %v9866_v46  ;;  %v3653_v40 = vmax.f32 %v3651_v35, %v3652_v33  ;;  %vm12663_vm8 = vcmask 1045507   ;;  %v10033_v61 = vrot.slane %v304_v4, 6 }
 0x325   : > { %4395 = vmax.xlane.f32.xlu2 %v4394_v43  ;;  %v1198_v26 = vsel %vm12663_vm8, %v1196_v20, %v1197_v30  ;;  %v10035_v19 = vrot.slane %v305_v8, 5  ;;  %v10037_v60 = vrot.slane %v306_v13, 4  ;;  %v873_v10 = vsel %vm658_vm7, %v10019_v1, %v10030_v38 }
 0x326   : > { %v1199_v56 = vrot.slane %v1198_v26, 3  ;;  %vm12664_vm9 = vcmask 1040384   ;;  %v3655_v44 = vmax.f32 %v3653_v40, %v3654_v53  ;;  %v10046_v24 = vsel %vm667_vm2, %v5669_v21, %v5794_v62 }
 0x327   : > { %v869_v59 = vsel %vm12664_vm9, %v10019_v1, %v10030_v38  ;;  %vm12665_vm13 = vcmask 1042433   ;;  %vm12666_vm10 = vcmask 1041408   ;;  %vm12667_vm12 = vcmask 1044484  }
 0x328   : > { %v874_v36 = vsel %vm12665_vm13, %v873_v10, %v10033_v61  ;;  %v870_v34 = vsel %vm12666_vm10, %v869_v59, %v10033_v61  ;;  %v1833_v29 = vperm.slane %v1199_v56, 0  ;;  %v1834_v31 = vperm.slane %v1199_v56, 1  ;;  %vm12671_vm13 = vmmov %vm12667_vm12 }
 0x329   : > { %v1835_v17 = vperm.slane %v1199_v56, 2  ;;  %v1836_v2 = vperm.slane %v1199_v56, 3  ;;  %v3657_v32 = vmax.f32 %v3655_v44, %v3656_v47  ;;  %v1837_v12 = vperm.slane %v1199_v56, 4  ;;  %vm12672_vm10 = vmmov %vm12667_vm12 }
 0x32a   : > { %v875_v23 = vsel %vm12667_vm12, %v10035_v19, %v10037_v60  ;;  %vm12668_vm11 = vcmask 1043459   ;;  %v3113_v55 = vadd.f32 %v9986_v48, %v1833_v29  ;;  %v3114_v50 = vadd.f32 %v10059_v45, %v1834_v31  ;;  %v10080_v29 = vpop.xlane.xlu0 %4164  ;;  %v10082_v31 = vld [vmem:[#allocation1 + $0x1b] sm:$0xff] }
 0x32b   : > { %v871_v62 = vsel %vm12668_vm11, %v10035_v19, %v10037_v60  ;;  %v3115_v51 = vadd.f32 %v10062_v16, %v1835_v17  ;;  %v3116_v37 = vadd.f32 %v9586_v63, %v1836_v2  ;;  %3658 = vmax.xlane.f32.xlu1 %v3657_v32  ;;  %v5735_v52 = vperm.slane %v4154_v11, %v8425_v41 }
 0x32c   : > { %v3117_v18 = vadd.f32 %v9994_v15, %v1837_v12  ;;  %vm12669_vm8 = vcmask 1043457   ;;  %vm12670_vm9 = vcmask 1042432   ;;  %v4397_v6 = vsel %vm3218_vm0, %v3113_v55, -inf }
 0x32d   : > { %v876_v7 = vsel %vm12669_vm8, %v874_v36, %v875_v23  ;;  %v872_v21 = vsel %vm12670_vm9, %v870_v34, %v871_v62  ;;  %v4398_v9 = vsel %vm3218_vm0, %v3114_v50, -inf  ;;  %v4400_v27 = vsel %vm3218_vm0, %v3115_v51, -inf }
 0x32e   : > { %v4402_v33 = vsel %vm3218_vm0, %v3116_v37, -inf  ;;  %v4399_v0 = vmax.f32 %v4397_v6, %v4398_v9  ;;  %v4404_v63 = vsel %vm3226_vm3, %v3117_v18, -inf  ;;  %v877_v4 = vrot.slane %v876_v7, 1 }
 0x32f   : > { %v1498_v8 = vperm.slane %v872_v21, 0  ;;  %v1499_v43 = vperm.slane %v872_v21, 1  ;;  %v1500_v35 = vperm.slane %v872_v21, 2  ;;  %v1501_v53 = vperm.slane %v872_v21, 3 }
 0x330   : > { %v1502_v13 = vperm.slane %v872_v21, 4  ;;  %v4401_v47 = vmax.f32 %v4399_v0, %v4400_v27  ;;  %v1503_v20 = vperm.slane %v877_v4, 0  ;;  %v1504_v30 = vperm.slane %v877_v4, 1 }
 0x331   : > { %v1505_v40 = vperm.slane %v877_v4, 2  ;;  %v1506_v26 = vperm.slane %v877_v4, 3  ;;  %v1507_v56 = vperm.slane %v877_v4, 4  ;;  %v2778_v10 = vadd.f32 %v9986_v48, %v1498_v8  ;;  %v10106_v4 = vpop.xlane.xlu1 %3449 }
 0x332   : > { %v2779_v59 = vadd.f32 %v10059_v45, %v1499_v43  ;;  %v4403_v44 = vmax.f32 %v4401_v47, %v4402_v33  ;;  %v2783_v36 = vadd.f32 %v9986_v48, %v1503_v20  ;;  %v2784_v34 = vadd.f32 %v10059_v45, %v1504_v30  ;;  %v10102_v33 = vpop.xlane.xlu2 %4175 }
 0x333   : > { %v2785_v11 = vadd.f32 %v10062_v16, %v1505_v40  ;;  %v2786_v17 = vadd.f32 %v10082_v31, %v1506_v26  ;;  %v2787_v2 = vadd.f32 %v9994_v15, %v1507_v56  ;;  %v2780_v32 = vadd.f32 %v10062_v16, %v1500_v35 }
 0x334   : > { %v2781_v12 = vadd.f32 %v10082_v31, %v1501_v53  ;;  %v4405_v23 = vmax.f32 %v4403_v44, %v4404_v63  ;;  %v3671_v62 = vsel %vm3218_vm0, %v2783_v36, -inf  ;;  %v3672_v55 = vsel %vm3218_vm0, %v2784_v34, -inf }
 0x335   : > { %v3674_v50 = vsel %vm3218_vm0, %v2785_v11, -inf  ;;  %v10093_v51 = vsel %vm12671_vm13, %v5735_v52, %v9948_v14  ;;  %v3673_v37 = vmax.f32 %v3671_v62, %v3672_v55  ;;  %v3676_v18 = vsel %vm3218_vm0, %v2786_v17, -inf }
 0x336   : > { %v5736_v7 = vperm.slane %v10080_v29, %v8425_v41  ;;  %4406 = vmax.xlane.f32.xlu0 %v4405_v23  ;;  %v2782_v21 = vadd.f32 %v9994_v15, %v1502_v13  ;;  %v3660_v6 = vsel %vm3218_vm0, %v2778_v10, -inf  ;;  %v3661_v9 = vsel %vm3218_vm0, %v2779_v59, -inf }
 0x337   : > { %v3663_v27 = vsel %vm3218_vm0, %v2780_v32, -inf  ;;  %v3675_v0 = vmax.f32 %v3673_v37, %v3674_v50  ;;  %v3678_v14 = vsel %vm3226_vm3, %v2787_v2, -inf  ;;  %v3662_v52 = vmax.f32 %v3660_v6, %v3661_v9 }
 0x338   : > { %v3665_v63 = vsel %vm3218_vm0, %v2781_v12, -inf  ;;  %v1200_v8 = vsel %vm12672_vm10, %v9864_v49, %v9857_v57  ;;  %v1202_v43 = vsel %vm687_vm4, %v9871_v22, %v9868_v25  ;;  %v1205_v35 = vsel %vm671_vm6, %v9864_v49, %v9857_v57 }
 0x339   : > { %vm12673_vm12 = vcmask 1040384   ;;  %v3677_v13 = vmax.f32 %v3675_v0, %v3676_v18  ;;  %v3664_v47 = vmax.f32 %v3662_v52, %v3663_v27  ;;  %v5737_v20 = vperm.slane %v10102_v33, %v8425_v41 }
 0x33a   : > { %v1207_v53 = vsel %vm12673_vm12, %v9868_v25, %v9871_v22  ;;  %vm12674_vm11 = vcmask 1045508   ;;  %v3667_v40 = vsel %vm3226_vm3, %v2782_v21, -inf  ;;  %vm12675_vm8 = vcmask 1046532  }
 0x33b   : > { %v1201_v30 = vsel %vm12674_vm11, %v1200_v8, %v9866_v46  ;;  %vm12676_vm9 = vcmask 1046533   ;;  %v878_v10 = vsel %vm667_vm2, %v10019_v1, %v10030_v38  ;;  %v3679_v59 = vmax.f32 %v3677_v13, %v3678_v14  ;;  %v4187_v13 = vpop.xlane.xlu1 %4186 }
 0x33c   : > { %v1203_v26 = vsel %vm12675_vm8, %v1201_v30, %v1202_v43  ;;  %v1206_v56 = vsel %vm12676_vm9, %v1205_v35, %v9866_v46  ;;  %v3666_v44 = vmax.f32 %v3664_v47, %v3665_v63  ;;  %vm12677_vm13 = vcmask 1044480  }
 0x33d   : > { %v1204_v36 = vrot.slane %v1203_v26, 4  ;;  %v1208_v34 = vsel %vm12677_vm13, %v1207_v53, %v1206_v56  ;;  %v5671_v11 = vperm.slane %v10106_v4, %v8425_v41  ;;  %vm12678_vm10 = vcmask 1043458   ;;  %3680 = vmax.xlane.f32.xlu2 %v3679_v59 }
 0x33e   : > { %v1209_v17 = vrot.slane %v1208_v34, 5  ;;  %v879_v2 = vsel %vm12678_vm10, %v878_v10, %v10033_v61  ;;  %v880_v32 = vsel %vm671_vm6, %v10035_v19, %v10037_v60  ;;  %v3668_v12 = vmax.f32 %v3666_v44, %v3667_v40 }
 0x33f   : > { %v1838_v23 = vperm.slane %v1204_v36, 0  ;;  %v1839_v62 = vperm.slane %v1204_v36, 1  ;;  %v1840_v55 = vperm.slane %v1204_v36, 2  ;;  %v1841_v50 = vperm.slane %v1204_v36, 3 }
 0x340   : > { %v1842_v37 = vperm.slane %v1204_v36, 4  ;;  %v1843_v18 = vperm.slane %v1209_v17, 0  ;;  %v1844_v21 = vperm.slane %v1209_v17, 1  ;;  %3669 = vmax.xlane.f32.xlu1 %v3668_v12  ;;  %v1845_v33 = vperm.slane %v1209_v17, 2 }
 0x341   : > { %v3118_v6 = vadd.f32 %v9986_v48, %v1838_v23  ;;  %v3119_v9 = vadd.f32 %v10059_v45, %v1839_v62  ;;  %v3120_v27 = vadd.f32 %v10062_v16, %v1840_v55  ;;  %v3121_v0 = vadd.f32 %v10082_v31, %v1841_v50 }
 0x342   : > { %v3122_v14 = vadd.f32 %v9994_v15, %v1842_v37  ;;  %v1846_v52 = vperm.slane %v1209_v17, 3  ;;  %v1847_v63 = vperm.slane %v1209_v17, 4  ;;  %v3123_v53 = vadd.f32 %v9986_v48, %v1843_v18 }
 0x343   : > { %v4408_v8 = vsel %vm3218_vm0, %v3118_v6, -inf  ;;  %v4409_v43 = vsel %vm3218_vm0, %v3119_v9, -inf  ;;  %v4411_v35 = vsel %vm3218_vm0, %v3120_v27, -inf  ;;  %v4413_v30 = vsel %vm3218_vm0, %v3121_v0, -inf }
 0x344   : > { %v4410_v47 = vmax.f32 %v4408_v8, %v4409_v43  ;;  %v4415_v40 = vsel %vm3226_vm3, %v3122_v14, -inf  ;;  %v3124_v26 = vadd.f32 %v10059_v45, %v1844_v21  ;;  %v3125_v56 = vadd.f32 %v10062_v16, %v1845_v33 }
 0x345   : > { %v3126_v10 = vadd.f32 %v10082_v31, %v1846_v52  ;;  %v3127_v59 = vadd.f32 %v9994_v15, %v1847_v63  ;;  %v4419_v44 = vsel %vm3218_vm0, %v3123_v53, -inf  ;;  %vm12679_vm12 = vcmask 1044482  }
 0x346   : > { %v4412_v36 = vmax.f32 %v4410_v47, %v4411_v35  ;;  %v4420_v34 = vsel %vm3218_vm0, %v3124_v26, -inf  ;;  %v881_v17 = vsel %vm12679_vm12, %v879_v2, %v880_v32  ;;  %v5738_v12 = vperm.slane %v4187_v13, %v8425_v41 }
 0x347   : > { %v4421_v23 = vmax.f32 %v4419_v44, %v4420_v34  ;;  %v4422_v62 = vsel %vm3218_vm0, %v3125_v56, -inf  ;;  %v4424_v55 = vsel %vm3218_vm0, %v3126_v10, -inf  ;;  %v4426_v50 = vsel %vm3226_vm3, %v3127_v59, -inf  ;;  %v10187_v56 = vpop.xlane.xlu0 %3460 }
 0x348   : > { %v4414_v37 = vmax.f32 %v4412_v36, %v4413_v30  ;;  %v882_v18 = vrot.slane %v881_v17, 2  ;;  %v5854_v21 = vsel %vm671_vm6, %v5736_v7, %v10093_v51  ;;  %vm12680_vm11 = vcmask 1043459   ;;  %v10194_v17 = vpop.xlane.xlu2 %3471 }
 0x349   : > { %v883_v2 = vsel %vm12680_vm11, %v10019_v1, %v10030_v38  ;;  %v4423_v32 = vmax.f32 %v4421_v23, %v4422_v62  ;;  %v5855_v6 = vsel %vm679_vm15, %v5737_v20, %v5854_v21  ;;  %vm12681_vm8 = vcmask 1044483   ;;  %vm12685_vm12 = vmmov %vm12680_vm11 }
 0x34a   : > { %v884_v9 = vsel %vm12681_vm8, %v883_v2, %v10033_v61  ;;  %v885_v27 = vsel %vm679_vm15, %v10035_v19, %v10037_v60  ;;  %v4416_v33 = vmax.f32 %v4414_v37, %v4415_v40  ;;  %v1508_v0 = vperm.slane %v882_v18, 0 }
 0x34b   : > { %v1509_v14 = vperm.slane %v882_v18, 1  ;;  %v1510_v29 = vperm.slane %v882_v18, 2  ;;  %v4425_v52 = vmax.f32 %v4423_v32, %v4424_v55  ;;  %v1511_v51 = vperm.slane %v882_v18, 3 }
 0x34c   : > { %v1512_v7 = vperm.slane %v882_v18, 4  ;;  %v5856_v63 = vsel %vm5785_vm14, %v5738_v12, %v5855_v6  ;;  %4417 = vmax.xlane.f32.xlu0 %v4416_v33  ;;  %v2788_v8 = vadd.f32 %v9986_v48, %v1508_v0  ;;  %vm12682_vm9 = vcmask 1045507  }
 0x34d   : > { %v2789_v20 = vadd.f32 %v10059_v45, %v1509_v14  ;;  %v2790_v43 = vadd.f32 %v10062_v16, %v1510_v29  ;;  %6780 = vmatmul.msk.f32.gmra.mxu3 %vm6149_vm5, %v5856_v63  ;;  %v4427_v35 = vmax.f32 %v4425_v52, %v4426_v50  ;;  %v2791_v53 = vadd.f32 %v10082_v31, %v1511_v51 }
 0x34e   : > { %v2792_v13 = vadd.f32 %v9994_v15, %v1512_v7  ;;  %6795 = vmatmul.msk.f32.vlgmr.msrb.gmra.mxu1 %vm6149_vm5, %v5856_v63  ;;  %v886_v47 = vsel %vm12682_vm9, %v884_v9, %v885_v27  ;;  %v3682_v30 = vsel %vm3218_vm0, %v2788_v8, -inf  ;;  %vm12683_vm13 = vcmask 1044484  }
 0x34f   : > { %v3683_v40 = vsel %vm3218_vm0, %v2789_v20, -inf  ;;  %v3685_v26 = vsel %vm3218_vm0, %v2790_v43, -inf  ;;  %v887_v10 = vrot.slane %v886_v47, 3  ;;  %4428 = vmax.xlane.f32.xlu2 %v4427_v35  ;;  %v3687_v44 = vsel %vm3218_vm0, %v2791_v53, -inf  ;;  %vm12687_vm8 = vmmov %vm12683_vm13 }
 0x350   : > { %v3684_v59 = vmax.f32 %v3682_v30, %v3683_v40  ;;  %v3689_v36 = vsel %vm3226_vm3, %v2792_v13, -inf  ;;  %v888_v34 = vsel %vm12683_vm13, %v10019_v1, %v10030_v38  ;;  %vm12684_vm10 = vcmask 1045508  }
 0x351   : > { %v1513_v12 = vperm.slane %v887_v10, 0  ;;  %v1514_v23 = vperm.slane %v887_v10, 1  ;;  %v1515_v62 = vperm.slane %v887_v10, 2  ;;  %v1516_v55 = vperm.slane %v887_v10, 3 }
 0x352   : > { %v3686_v50 = vmax.f32 %v3684_v59, %v3685_v26  ;;  %v1517_v37 = vperm.slane %v887_v10, 4  ;;  %v889_v18 = vsel %vm12684_vm10, %v888_v34, %v10033_v61  ;;  %v890_v21 = vsel %vm687_vm4, %v10037_v60, %v10035_v19 }
 0x353   : > { %v2793_v2 = vadd.f32 %v9986_v48, %v1513_v12  ;;  %v2794_v32 = vadd.f32 %v10059_v45, %v1514_v23  ;;  %v2795_v6 = vadd.f32 %v10062_v16, %v1515_v62  ;;  %v2796_v9 = vadd.f32 %v10082_v31, %v1516_v55  ;;  %v10239_v55 = vpop.xlane.xlu2 %4208 }
 0x354   : > { %v5796_v27 = vsel %vm12685_vm12, %v5670_v58, %v10046_v24  ;;  %v3688_v33 = vmax.f32 %v3686_v50, %v3687_v44  ;;  %vm12686_vm11 = vcmask 1046532   ;;  %v1210_v14 = vsel %vm679_vm15, %v9864_v49, %v9857_v57  ;;  %v10241_v50 = vpop.xlane.xlu1 %4197 }
 0x355   : > { %v891_v0 = vsel %vm12686_vm11, %v889_v18, %v890_v21  ;;  %v2797_v29 = vadd.f32 %v9994_v15, %v1517_v37  ;;  %v3693_v52 = vsel %vm3218_vm0, %v2793_v2, -inf  ;;  %v3694_v51 = vsel %vm3218_vm0, %v2794_v32, -inf }
 0x356   : > { %v3696_v7 = vsel %vm3218_vm0, %v2795_v6, -inf  ;;  %v5797_v5 = vsel %vm12687_vm8, %v5671_v11, %v5796_v27  ;;  %v3690_v58 = vmax.f32 %v3688_v33, %v3689_v36  ;;  %v3695_v24 = vmax.f32 %v3693_v52, %v3694_v51 }
 0x357   : > { %v892_v63 = vrot.slane %v891_v0, 4  ;;  %v5672_v8 = vperm.slane %v10187_v56, %v8425_v41  ;;  %v3698_v20 = vsel %vm3218_vm0, %v2796_v9, -inf  ;;  %vm12688_vm9 = vcmask 1045504   ;;  %v3483_v56 = vpop.xlane.xlu0 %3482 }
 0x358   : > { %v1211_v43 = vsel %vm12688_vm9, %v9866_v46, %v1210_v14  ;;  %v1212_v35 = vsel %vm658_vm7, %v9868_v25, %v9871_v22  ;;  %3691 = vmax.xlane.f32.xlu1 %v3690_v58  ;;  %v3697_v53 = vmax.f32 %v3695_v24, %v3696_v7  ;;  %v3700_v47 = vsel %vm3226_vm3, %v2797_v29, -inf  ;;  %vm12691_vm12 = vmmov %vm12688_vm9 }
 0x359   : > { %v1518_v4 = vperm.slane %v892_v63, 0  ;;  %v1519_v13 = vperm.slane %v892_v63, 1  ;;  %v1520_v11 = vperm.slane %v892_v63, 2  ;;  %v1521_v30 = vperm.slane %v892_v63, 3 }
 0x35a   : > { %v1522_v40 = vperm.slane %v892_v63, 4  ;;  %vm12689_vm13 = vcmask 1045505   ;;  %v3699_v10 = vmax.f32 %v3697_v53, %v3698_v20  ;;  %v5673_v34 = vperm.slane %v10194_v17, %v8425_v41 }
 0x35b   : > { %v1213_v26 = vsel %vm12689_vm13, %v1212_v35, %v1211_v43  ;;  %v2798_v59 = vadd.f32 %v9986_v48, %v1518_v4  ;;  %v2799_v44 = vadd.f32 %v10059_v45, %v1519_v13  ;;  %v2800_v36 = vadd.f32 %v10062_v16, %v1520_v11  ;;  %vm12692_vm11 = vmmov %vm12689_vm13 }
 0x35c   : > { %v2801_v12 = vadd.f32 %v10082_v31, %v1521_v30  ;;  %v2802_v23 = vadd.f32 %v9994_v15, %v1522_v40  ;;  %v1214_v62 = vrot.slane %v1213_v26, 6  ;;  %v3701_v37 = vmax.f32 %v3699_v10, %v3700_v47 }
 0x35d   : > { %v3704_v18 = vsel %vm3218_vm0, %v2798_v59, -inf  ;;  %v3705_v21 = vsel %vm3218_vm0, %v2799_v44, -inf  ;;  %v3707_v2 = vsel %vm3218_vm0, %v2800_v36, -inf  ;;  %v5674_v9 = vperm.slane %v3483_v56, %v8425_v41  ;;  %v10287_v36 = vpop.xlane.xlu2 %3504 }
 0x35e   : > { %v3706_v32 = vmax.f32 %v3704_v18, %v3705_v21  ;;  %v3709_v6 = vsel %vm3218_vm0, %v2801_v12, -inf  ;;  %v1848_v17 = vperm.slane %v1214_v62, 0  ;;  %3702 = vmax.xlane.f32.xlu0 %v3701_v37  ;;  %v1849_v27 = vperm.slane %v1214_v62, 1 }
 0x35f   : > { %v1850_v33 = vperm.slane %v1214_v62, 2  ;;  %v1851_v0 = vperm.slane %v1214_v62, 3  ;;  %v1852_v14 = vperm.slane %v1214_v62, 4  ;;  %v5798_v51 = vsel %vm671_vm6, %v5672_v8, %v5797_v5  ;;  %v10270_v40 = vpop.xlane.xlu0 %4219 }
 0x360   : > { %v3708_v29 = vmax.f32 %v3706_v32, %v3707_v2  ;;  %v3128_v52 = vadd.f32 %v9986_v48, %v1848_v17  ;;  %v1215_v7 = vsel %vm687_vm4, %v9857_v57, %v9864_v49  ;;  %v3711_v58 = vsel %vm3226_vm3, %v2802_v23, -inf }
 0x361   : > { %v3129_v24 = vadd.f32 %v10059_v45, %v1849_v27  ;;  %v3130_v63 = vadd.f32 %v10062_v16, %v1850_v33  ;;  %v3131_v20 = vadd.f32 %v10082_v31, %v1851_v0  ;;  %v3132_v35 = vadd.f32 %v9994_v15, %v1852_v14 }
 0x362   : > { %v3710_v43 = vmax.f32 %v3708_v29, %v3709_v6  ;;  %v5740_v53 = vperm.slane %v10239_v55, %v8425_v41  ;;  %vm12690_vm10 = vcmask 1046529   ;;  %v4430_v8 = vsel %vm3218_vm0, %v3128_v52, -inf }
 0x363   : > { %v1216_v5 = vsel %vm12690_vm10, %v9866_v46, %v1215_v7  ;;  %v4431_v57 = vsel %vm3218_vm0, %v3129_v24, -inf  ;;  %v4433_v49 = vsel %vm3218_vm0, %v3130_v63, -inf  ;;  %v5799_v4 = vsel %vm679_vm15, %v5673_v34, %v5798_v51  ;;  %v10289_v34 = vpop.xlane.xlu1 %3493 }
 0x364   : > { %v3712_v13 = vmax.f32 %v3710_v43, %v3711_v58  ;;  %v4432_v11 = vmax.f32 %v4430_v8, %v4431_v57  ;;  %v5800_v47 = vsel %vm5785_vm14, %v5674_v9, %v5799_v4  ;;  %v1217_v30 = vsel %vm667_vm2, %v9868_v25, %v9871_v22 }
 0x365   : > { %v4435_v46 = vsel %vm3218_vm0, %v3131_v20, -inf  ;;  %6772 = vmatmul.msk.f32.gmra.mxu2 %vm6149_vm5, %v5800_v47  ;;  %6787 = vmatmul.msk.f32.gmra.mxu0 %vm6149_vm5, %v5800_v47  ;;  %v1218_v26 = vsel %vm710_vm1, %v1217_v30, %v1216_v5  ;;  %v898_v56 = vsel %vm679_vm15, %v10019_v1, %v10030_v38  ;;  %v900_v10 = vsel %vm658_vm7, %v10035_v19, %v10037_v60 }
 0x366   : > { %3713 = vmax.xlane.f32.xlu2 %v3712_v13  ;;  %v4434_v25 = vmax.f32 %v4432_v11, %v4433_v49  ;;  %v1219_v22 = vrot.slane %v1218_v26, 7  ;;  %v899_v59 = vsel %vm12691_vm12, %v10033_v61, %v898_v56  ;;  %v893_v44 = vsel %vm671_vm6, %v10019_v1, %v10030_v38 }
 0x367   : > { %v4437_v12 = vsel %vm3226_vm3, %v3132_v35, -inf  ;;  %v901_v23 = vsel %vm12692_vm11, %v900_v10, %v899_v59  ;;  %vm12693_vm8 = vcmask 1046533   ;;  %vm12694_vm9 = vcmask 1040384   ;;  %v10313_v47 = vpop.xlane.xlu0 %4230  ;;  %v10321_v59 = vpop.xlane.xlu2 %4241 }
 0x368   : > { %v894_v62 = vsel %vm12693_vm8, %v893_v44, %v10033_v61  ;;  %v895_v37 = vsel %vm12694_vm9, %v10035_v19, %v10037_v60  ;;  %v4436_v18 = vmax.f32 %v4434_v25, %v4435_v46  ;;  %v1853_v21 = vperm.slane %v1219_v22, 0 }
 0x369   : > { %v1854_v2 = vperm.slane %v1219_v22, 1  ;;  %v1855_v32 = vperm.slane %v1219_v22, 2  ;;  %v1856_v6 = vperm.slane %v1219_v22, 3  ;;  %v1857_v17 = vperm.slane %v1219_v22, 4 }
 0x36a   : > { %v902_v9 = vrot.slane %v901_v23, 6  ;;  %vm12695_vm13 = vcmask 1044480   ;;  %v4438_v33 = vmax.f32 %v4436_v18, %v4437_v12  ;;  %v3133_v0 = vadd.f32 %v9986_v48, %v1853_v21 }
 0x36b   : > { %v896_v27 = vsel %vm12695_vm13, %v895_v37, %v894_v62  ;;  %v3134_v14 = vadd.f32 %v10059_v45, %v1854_v2  ;;  %v3135_v29 = vadd.f32 %v10062_v16, %v1855_v32  ;;  %v3136_v52 = vadd.f32 %v10082_v31, %v1856_v6  ;;  %v10323_v44 = vpop.xlane.xlu1 %3515 }
 0x36c   : > { %v3137_v51 = vadd.f32 %v9994_v15, %v1857_v17  ;;  %v1528_v7 = vperm.slane %v902_v9, 0  ;;  %v1529_v58 = vperm.slane %v902_v9, 1  ;;  %4439 = vmax.xlane.f32.xlu1 %v4438_v33  ;;  %v4441_v24 = vsel %vm3218_vm0, %v3133_v0, -inf }
 0x36d   : > { %v4442_v63 = vsel %vm3218_vm0, %v3134_v14, -inf  ;;  %v4444_v20 = vsel %vm3218_vm0, %v3135_v29, -inf  ;;  %v1530_v43 = vperm.slane %v902_v9, 2  ;;  %v5739_v35 = vperm.slane %v10241_v50, %v8425_v41 }
 0x36e   : > { %v4443_v5 = vmax.f32 %v4441_v24, %v4442_v63  ;;  %v4446_v8 = vsel %vm3218_vm0, %v3136_v52, -inf  ;;  %v1531_v57 = vperm.slane %v902_v9, 3  ;;  %v1532_v49 = vperm.slane %v902_v9, 4 }
 0x36f   : > { %v2808_v4 = vadd.f32 %v9986_v48, %v1528_v7  ;;  %v2809_v13 = vadd.f32 %v10059_v45, %v1529_v58  ;;  %v2810_v11 = vadd.f32 %v10062_v16, %v1530_v43  ;;  %v4448_v46 = vsel %vm3226_vm3, %v3137_v51, -inf  ;;  %v4641_v7 = vld [vmem:[#allocation1 + $0x5] ss:$9 sm:$0xff] }
 0x370   : > { %v4445_v30 = vmax.f32 %v4443_v5, %v4444_v20  ;;  %v2811_v26 = vadd.f32 %v10082_v31, %v1531_v57  ;;  %v897_v56 = vrot.slane %v896_v27, 5  ;;  %v2812_v50 = vadd.f32 %v9994_v15, %v1532_v49 }
 0x371   : > { %v3726_v10 = vsel %vm3218_vm0, %v2808_v4, -inf  ;;  %v3727_v25 = vsel %vm3218_vm0, %v2809_v13, -inf  ;;  %v3729_v22 = vsel %vm3218_vm0, %v2810_v11, -inf  ;;  %v10329_v12 = vsel %vm658_vm7, %v5740_v53, %v5739_v35  ;;  %v10360_v11 = vpop.xlane.xlu0 %3526 }
 0x372   : > { %v4447_v23 = vmax.f32 %v4445_v30, %v4446_v8  ;;  %v3728_v62 = vmax.f32 %v3726_v10, %v3727_v25  ;;  %v1523_v37 = vperm.slane %v897_v56, 0  ;;  %v3731_v18 = vsel %vm3218_vm0, %v2811_v26, -inf  ;;  %v10382_v10 = vpop.xlane.xlu2 %3537 }
 0x373   : > { %v1524_v21 = vperm.slane %v897_v56, 1  ;;  %v1525_v2 = vperm.slane %v897_v56, 2  ;;  %v1526_v32 = vperm.slane %v897_v56, 3  ;;  %v1527_v9 = vperm.slane %v897_v56, 4  ;;  %v10378_v56 = vld [vmem:[%s12300_s2 + $0x8] sm:$0xff]  ;;  %v10384_v25 = vpop.xlane.xlu1 %4252 }
 0x374   : > { %v4449_v6 = vmax.f32 %v4447_v23, %v4448_v46  ;;  %v3730_v17 = vmax.f32 %v3728_v62, %v3729_v22  ;;  %v2803_v27 = vadd.f32 %v9986_v48, %v1523_v37  ;;  %v3733_v33 = vsel %vm3226_vm3, %v2812_v50, -inf  ;;  %v10391_v62 = vld [vmem:[%s12300_s2 + $0x10] sm:$0xff] }
 0x375   : > { %v2804_v55 = vadd.f32 %v10059_v45, %v1524_v21  ;;  %v2805_v53 = vadd.f32 %v10062_v16, %v1525_v2  ;;  %v2806_v0 = vadd.f32 %v10082_v31, %v1526_v32  ;;  %v2807_v29 = vadd.f32 %v9994_v15, %v1527_v9 }
 0x376   : > { %4450 = vmax.xlane.f32.xlu0 %v4449_v6  ;;  %v3732_v14 = vmax.f32 %v3730_v17, %v3731_v18  ;;  %v5741_v52 = vperm.slane %v10270_v40, %v8425_v41  ;;  %v5676_v51 = vperm.slane %v10287_v36, %v8425_v41  ;;  %v3715_v58 = vsel %vm3218_vm0, %v2803_v27, -inf  ;;  %v4639_v6 = vld [vmem:[#allocation1 + $0x4] ss:$9 sm:$0xff] }
 0x377   : > { %v3716_v24 = vsel %vm3218_vm0, %v2804_v55, -inf  ;;  %v3718_v63 = vsel %vm3218_vm0, %v2805_v53, -inf  ;;  %v903_v20 = vsel %vm687_vm4, %v10030_v38, %v10019_v1  ;;  %v3720_v5 = vsel %vm3218_vm0, %v2806_v0, -inf  ;;  %v10398_v27 = vld [vmem:[%s12300_s2 + $0x20] sm:$0xff]  ;;  %v10467_v40 = vld [vmem:[%s12300_s2 + $0x48] sm:$0xff] }
 0x378   : > { %v3734_v43 = vmax.f32 %v3732_v14, %v3733_v33  ;;  %v3717_v35 = vmax.f32 %v3715_v58, %v3716_v24  ;;  %v5675_v8 = vperm.slane %v10289_v34, %v8425_v41  ;;  %v904_v57 = vsel %vm12690_vm10, %v10033_v61, %v903_v20  ;;  %v10410_v58 = vld [vmem:[%s12300_s2 + $0x18] sm:$0xff] }
 0x379   : > { %v905_v49 = vsel %vm667_vm2, %v10035_v19, %v10037_v60  ;;  %v10356_v4 = vperm.slane %v4641_v7, 0  ;;  %v10358_v13 = vperm.slane %v4641_v7, 1  ;;  %v3722_v38 = vsel %vm3226_vm3, %v2807_v29, -inf  ;;  %v10371_v19 = vld [vmem:[%s12300_s2] sm:$0xff] }
 0x37a   : > { %3735 = vmax.xlane.f32.xlu2 %v3734_v43  ;;  %v3719_v1 = vmax.f32 %v3717_v35, %v3718_v63  ;;  %v906_v30 = vsel %vm710_vm1, %v905_v49, %v904_v57  ;;  %v10364_v46 = vperm.slane %v4641_v7, 2  ;;  %v10366_v61 = vperm.slane %v4641_v7, 4 }
 0x37b   : > { %12696 = vst [vmem:[#allocation10_spill] sm:$0xff] %v10356_v4  ;;  %v907_v26 = vrot.slane %v906_v30, 7  ;;  %v4766_v60 = vadd.f32 %v10371_v19, %v10356_v4  ;;  %v4767_v50 = vadd.f32 %v10378_v56, %v10358_v13  ;;  %v10386_v23 = vperm.slane %v4641_v7, 3 }
 0x37c   : > { %12697 = vst [vmem:[#allocation11_spill] sm:$0xff] %v10358_v13  ;;  %v3721_v22 = vmax.f32 %v3719_v1, %v3720_v5  ;;  %v4768_v37 = vadd.f32 %v10391_v62, %v10364_v46  ;;  %vm5009_vm1 = vcmask 523264   ;;  %v4770_v33 = vadd.f32 %v10398_v27, %v10366_v61 }
 0x37d   : > { %12698 = vst [vmem:[#allocation12_spill] sm:$0xff] %v10364_v46  ;;  %v1533_v18 = vperm.slane %v907_v26, 0  ;;  %v1534_v21 = vperm.slane %v907_v26, 1  ;;  %v1535_v2 = vperm.slane %v907_v26, 2  ;;  %v1536_v32 = vperm.slane %v907_v26, 3 }
 0x37e   : > { %12699 = vst [vmem:[#allocation13_spill] sm:$0xff] %v10366_v61  ;;  %v3723_v17 = vmax.f32 %v3721_v22, %v3722_v38  ;;  %v1537_v9 = vperm.slane %v907_v26, 4  ;;  %v5119_v55 = vmax.f32 %v4766_v60, %v4767_v50  ;;  %v4769_v24 = vadd.f32 %v10410_v58, %v10386_v23  ;;  %v10432_v38 = vld [vmem:[%s12300_s2 + $0x28] sm:$0xff]  ;;  %v10436_v26 = vpop.xlane.xlu0 %4263  ;;  %v10441_v22 = vld [vmem:[%s12300_s2 + $0x30] sm:$0xff] }
 0x37f   : > { %12700 = vst [vmem:[#allocation14_spill] sm:$0xff] %v10386_v23  ;;  %v2813_v53 = vadd.f32 %v9986_v48, %v1533_v18  ;;  %v2814_v0 = vadd.f32 %v10059_v45, %v1534_v21  ;;  %v2815_v14 = vadd.f32 %v10062_v16, %v1535_v2  ;;  %v2816_v29 = vadd.f32 %v10082_v31, %v1536_v32  ;;  %v10453_v32 = vpop.xlane.xlu2 %4274 }
 0x380   : > { %3724 = vmax.xlane.f32.xlu1 %v3723_v17  ;;  %v2817_v7 = vadd.f32 %v9994_v15, %v1537_v9  ;;  %v5120_v63 = vmax.f32 %v5119_v55, %v4768_v37  ;;  %v10414_v20 = vperm.slane %v4639_v6, 0  ;;  %v5122_v31 = vsel %vm5009_vm1, %v4770_v33, -inf  ;;  %v10460_v9 = vld [vmem:[%s12300_s2 + $0x38] sm:$0xff]  ;;  %v10481_v55 = vld [vmem:[%s12300_s2 + $0x40] sm:$0xff] }
 0x381   : > { %v3737_v48 = vsel %vm3218_vm0, %v2813_v53, -inf  ;;  %v3738_v45 = vsel %vm3218_vm0, %v2814_v0, -inf  ;;  %v3740_v16 = vsel %vm3218_vm0, %v2815_v14, -inf  ;;  %v3742_v43 = vsel %vm3218_vm0, %v2816_v29, -inf }
 0x382   : > { %12701 = vst [vmem:[#allocation15_spill] sm:$0xff] %v10414_v20  ;;  %v3739_v15 = vmax.f32 %v3737_v48, %v3738_v45  ;;  %v5121_v35 = vmax.f32 %v5120_v63, %v4769_v24  ;;  %v10421_v5 = vperm.slane %v4639_v6, 1  ;;  %v10423_v57 = vperm.slane %v4639_v6, 2  ;;  %v10499_v48 = vld [vmem:[%s12300_s2 + $0x50] sm:$0xff] }
 0x383   : > { %v10425_v49 = vperm.slane %v4639_v6, 3  ;;  %v10427_v1 = vperm.slane %v4639_v6, 4  ;;  %v4691_v30 = vadd.f32 %v10432_v38, %v10414_v20  ;;  %v5742_v18 = vperm.slane %v10313_v47, %v8425_v41  ;;  %v10455_v6 = vpop.xlane.xlu1 %3548  ;;  %12705 = vst [vmem:[#allocation18_spill] sm:$0xff] %v10499_v48 }
 0x384   : > { %12702 = vst [vmem:[#allocation16_spill] sm:$0xff] %v10421_v5  ;;  %v3741_v60 = vmax.f32 %v3739_v15, %v3740_v16  ;;  %v5123_v50 = vmax.f32 %v5121_v35, %v5122_v31  ;;  %v4692_v37 = vadd.f32 %v10441_v22, %v10421_v5  ;;  %v5858_v21 = vsel %vm667_vm2, %v5741_v52, %v10329_v12 }
 0x385   : > { %12703 = vst [vmem:[#allocation17_spill] sm:$0xff] %v10423_v57  ;;  %v3744_v2 = vsel %vm3226_vm3, %v2817_v7, -inf  ;;  %v4693_v47 = vadd.f32 %v10460_v9, %v10423_v57  ;;  %v4695_v12 = vadd.f32 %v10467_v40, %v10427_v1  ;;  %v5801_v33 = vsel %vm658_vm7, %v5676_v51, %v5675_v8  ;;  %v4643_v8 = vld [vmem:[#allocation1 + $0x6] ss:$9 sm:$0xff] }
 0x386   : > { %v3743_v17 = vmax.f32 %v3741_v60, %v3742_v43  ;;  %5124 = vmax.xlane.f32.xlu2 %v5123_v50  ;;  %v5014_v52 = vmax.f32 %v4691_v30, %v4692_v37  ;;  %v4694_v53 = vadd.f32 %v10481_v55, %v10425_v49  ;;  %v4686_v0 = vadd.f32 %v10371_v19, %v10414_v20  ;;  %v10518_v30 = vld [vmem:[%s12300_s2 + $0x60] sm:$0xff] }
 0x387   : > { %v4687_v14 = vadd.f32 %v10378_v56, %v10421_v5  ;;  %vm12704_vm3 = vcmask 1043459   ;;  %v5743_v51 = vperm.slane %v10321_v59, %v8425_v41  ;;  %v5677_v7 = vperm.slane %v10323_v44, %v8425_v41  ;;  %v10509_v44 = vld [vmem:[%s12300_s2 + $0x58] sm:$0xff] }
 0x388   : > { %v3745_v34 = vmax.f32 %v3743_v17, %v3744_v2  ;;  %v5015_v29 = vmax.f32 %v5014_v52, %v4693_v47  ;;  %v5859_v36 = vsel %vm12704_vm3, %v5742_v18, %v5858_v21  ;;  %v4688_v24 = vadd.f32 %v10391_v62, %v10423_v57  ;;  %v10531_v47 = vld [vmem:[%s12300_s2 + $0x68] sm:$0xff]  ;;  %v10538_v52 = vld [vmem:[%s12300_s2 + $0x70] sm:$0xff]  ;;  %vm12714_vm12 = vmmov %vm12704_vm3 }
 0x389   : > { %v5006_v63 = vmax.f32 %v4686_v0, %v4687_v14  ;;  %v4696_v45 = vadd.f32 %v10499_v48, %v10414_v20  ;;  %v5017_v59 = vsel %vm5009_vm1, %v4695_v12, -inf  ;;  %v4689_v31 = vadd.f32 %v10410_v58, %v10425_v49  ;;  %12709 = vst [vmem:[#allocation22_spill] sm:$0xff] %v10531_v47  ;;  %v10544_v14 = vpop.xlane.xlu0 %3559  ;;  %vm12725_vm8 = vmmov %vm12704_vm3 }
 0x38a   : > { %3746 = vmax.xlane.f32.xlu0 %v3745_v34  ;;  %v5016_v16 = vmax.f32 %v5015_v29, %v4694_v53  ;;  %v4697_v15 = vadd.f32 %v10509_v44, %v10421_v5  ;;  %v4690_v43 = vadd.f32 %v10398_v27, %v10427_v1  ;;  %v4698_v60 = vadd.f32 %v10518_v30, %v10423_v57  ;;  %vm12738_vm13 = vmmov %vm12704_vm3 }
 0x38b   : > { %v5007_v35 = vmax.f32 %v5006_v63, %v4688_v24  ;;  %v10522_v50 = vperm.slane %v4643_v8, 0  ;;  %v10524_v21 = vperm.slane %v4643_v8, 1  ;;  %v10526_v2 = vperm.slane %v4643_v8, 2  ;;  %12710 = vst [vmem:[#allocation23_spill] sm:$0xff] %v10538_v52 }
 0x38c   : > { %v5018_v37 = vmax.f32 %v5016_v16, %v5017_v59  ;;  %v5021_v18 = vmax.f32 %v4696_v45, %v4697_v15  ;;  %v4699_v12 = vadd.f32 %v10531_v47, %v10425_v49  ;;  %v4700_v53 = vadd.f32 %v10538_v52, %v10427_v1  ;;  %v10557_v15 = vpop.xlane.xlu2 %4285 }
 0x38d   : > { %12706 = vst [vmem:[#allocation19_spill] sm:$0xff] %v10522_v50  ;;  %v5008_v17 = vmax.f32 %v5007_v35, %v4689_v31  ;;  %v10542_v0 = vperm.slane %v4643_v8, 4  ;;  %v10546_v29 = vperm.slane %v4643_v8, 3  ;;  %v4846_v24 = vadd.f32 %v10371_v19, %v10522_v50  ;;  %v10559_v35 = vpop.xlane.xlu1 %3570 }
 0x38e   : > { %12707 = vst [vmem:[#allocation20_spill] sm:$0xff] %v10524_v21  ;;  %5019 = vmax.xlane.f32.xlu1 %v5018_v37  ;;  %v5022_v34 = vmax.f32 %v5021_v18, %v4698_v60  ;;  %v4847_v63 = vadd.f32 %v10378_v56, %v10524_v21  ;;  %vm12713_vm4 = vcmask 1044484   ;;  %v5802_v16 = vsel %vm667_vm2, %v5677_v7, %v5801_v33 }
 0x38f   : > { %12708 = vst [vmem:[#allocation21_spill] sm:$0xff] %v10526_v2  ;;  %v5860_v45 = vsel %vm12713_vm4, %v5743_v51, %v5859_v36  ;;  %v5010_v59 = vsel %vm5009_vm1, %v4690_v43, -inf  ;;  %v4848_v31 = vadd.f32 %v10391_v62, %v10526_v2  ;;  %v5678_v18 = vperm.slane %v10360_v11, %v8425_v41  ;;  %vm12715_vm11 = vmmov %vm12713_vm4 }
 0x390   : > { %12711 = vst [vmem:[#allocation24_spill] sm:$0xff] %v10542_v0  ;;  %v5011_v8 = vmax.f32 %v5008_v17, %v5010_v59  ;;  %v5023_v60 = vmax.f32 %v5022_v34, %v4699_v12  ;;  %v5231_v37 = vmax.f32 %v4846_v24, %v4847_v63  ;;  %v5024_v54 = vsel %vm5009_vm1, %v4700_v53, -inf  ;;  %vm12732_vm9 = vmmov %vm12713_vm4 }
 0x391   : > { %12712 = vst [vmem:[#allocation25_spill] sm:$0xff] %v10546_v29  ;;  %v4850_v33 = vadd.f32 %v10398_v27, %v10542_v0  ;;  %v4771_v36 = vadd.f32 %v10432_v38, %v10356_v4  ;;  %v4772_v51 = vadd.f32 %v10441_v22, %v10358_v13  ;;  %v4849_v43 = vadd.f32 %v10410_v58, %v10546_v29  ;;  %vm12739_vm10 = vmmov %vm12713_vm4 }
 0x392   : > { %5012 = vmax.xlane.f32.xlu0 %v5011_v8  ;;  %v5025_v7 = vmax.f32 %v5023_v60, %v5024_v54  ;;  %v5232_v17 = vmax.f32 %v5231_v37, %v4848_v31  ;;  %v5679_v11 = vperm.slane %v10382_v10, %v8425_v41  ;;  %v5744_v12 = vperm.slane %v10384_v25, %v8425_v41 }
 0x393   : > { %v4773_v53 = vadd.f32 %v10460_v9, %v10364_v46  ;;  %v4775_v34 = vadd.f32 %v10467_v40, %v10366_v61  ;;  %v5126_v24 = vmax.f32 %v4771_v36, %v4772_v51  ;;  %v5803_v54 = vsel %vm12714_vm12, %v5678_v18, %v5802_v16  ;;  %v10593_v16 = vld [vmem:[%s12300_s2 + $0x78] sm:$0xff]  ;;  %vm12757_vm12 = vmmov %vm12704_vm3 }
 0x394   : > { %5026 = vmax.xlane.f32.xlu2 %v5025_v7  ;;  %v5233_v63 = vmax.f32 %v5232_v17, %v4849_v43  ;;  %v4851_v59 = vadd.f32 %v10432_v38, %v10522_v50  ;;  %v4852_v10 = vadd.f32 %v10441_v22, %v10524_v21  ;;  %v5234_v31 = vsel %vm5009_vm1, %v4850_v33, -inf  ;;  %v10600_v33 = vld [vmem:[%s12300_s2 + $0x80] sm:$0xff] }
 0x395   : > { %v4774_v25 = vadd.f32 %v10481_v55, %v10386_v23  ;;  %v5127_v8 = vmax.f32 %v5126_v24, %v4773_v53  ;;  %v4853_v60 = vadd.f32 %v10460_v9, %v10526_v2  ;;  %v4781_v18 = vadd.f32 %v10593_v16, %v10356_v4  ;;  %v10610_v24 = vpop.xlane.xlu0 %4296 }
 0x396   : > { %v5235_v37 = vmax.f32 %v5233_v63, %v5234_v31  ;;  %v5238_v36 = vmax.f32 %v4851_v59, %v4852_v10  ;;  %v4782_v51 = vadd.f32 %v10600_v33, %v10358_v13  ;;  %v10605_v7 = vsel %vm12715_vm11, %v5679_v11, %v5803_v54  ;;  %v10617_v10 = vld [vmem:[%s12300_s2 + $0x88] sm:$0xff]  ;;  %vm12759_vm11 = vmmov %vm12713_vm4 }
 0x397   : > { %v5128_v43 = vmax.f32 %v5127_v8, %v4774_v25  ;;  %v5129_v17 = vsel %vm5009_vm1, %v4775_v34, -inf  ;;  %v4855_v53 = vadd.f32 %v10467_v40, %v10542_v0  ;;  %v4854_v63 = vadd.f32 %v10481_v55, %v10546_v29  ;;  %v10625_v25 = vld [vmem:[%s12300_s2 + $0x98] sm:$0xff] }
 0x398   : > { %5236 = vmax.xlane.f32.xlu1 %v5235_v37  ;;  %v5239_v59 = vmax.f32 %v5238_v36, %v4853_v60  ;;  %v4783_v11 = vadd.f32 %v10617_v10, %v10364_v46  ;;  %v5140_v54 = vmax.f32 %v4781_v18, %v4782_v51  ;;  %v5861_v34 = vsel %vm671_vm6, %v5744_v12, %v5860_v45  ;;  %v10631_v37 = vpop.xlane.xlu2 %3581  ;;  %v10633_v36 = vpop.xlane.xlu1 %4307  ;;  %v10638_v45 = vld [vmem:[%s12300_s2 + $0x90] sm:$0xff] }
 0x399   : > { %v5130_v31 = vmax.f32 %v5128_v43, %v5129_v17  ;;  %v4785_v8 = vadd.f32 %v10625_v25, %v10366_v61  ;;  %v4776_v60 = vadd.f32 %v10499_v48, %v10356_v4  ;;  %12716 = vst [vmem:[#allocation26_spill] sm:$0xff] %v10631_v37  ;;  %v4784_v12 = vadd.f32 %v10638_v45, %v10386_v23 }
 0x39a   : > { %12717 = vst [vmem:[#allocation27_spill] sm:$0xff] %v10633_v36  ;;  %v5240_v39 = vmax.f32 %v5239_v59, %v4854_v63  ;;  %v5141_v18 = vmax.f32 %v5140_v54, %v4783_v11  ;;  %v4777_v51 = vadd.f32 %v10509_v44, %v10358_v13  ;;  %v5241_v43 = vsel %vm5009_vm1, %v4855_v53, -inf }
 0x39b   : > { %5131 = vmax.xlane.f32.xlu0 %v5130_v31  ;;  %v5745_v17 = vperm.slane %v10436_v26, %v8425_v41  ;;  %v5746_v63 = vperm.slane %v10453_v32, %v8425_v41  ;;  %v4778_v59 = vadd.f32 %v10518_v30, %v10364_v46  ;;  %v4856_v11 = vadd.f32 %v10499_v48, %v10522_v50 }
 0x39c   : > { %v5242_v42 = vmax.f32 %v5240_v39, %v5241_v43  ;;  %v5142_v28 = vmax.f32 %v5141_v18, %v4784_v12  ;;  %v5133_v36 = vmax.f32 %v4776_v60, %v4777_v51  ;;  %v5143_v54 = vsel %vm5009_vm1, %v4785_v8, -inf }
 0x39d   : > { %v4779_v53 = vadd.f32 %v10531_v47, %v10386_v23  ;;  %v4780_v26 = vadd.f32 %v10538_v52, %v10366_v61  ;;  %v4857_v32 = vadd.f32 %v10509_v44, %v10524_v21  ;;  %v4858_v39 = vadd.f32 %v10518_v30, %v10526_v2 }
 0x39e   : > { %5243 = vmax.xlane.f32.xlu2 %v5242_v42  ;;  %v5144_v31 = vmax.f32 %v5142_v28, %v5143_v54  ;;  %v5134_v37 = vmax.f32 %v5133_v36, %v4778_v59  ;;  %v10662_v60 = vperm.slane %v4645_v3, 0  ;;  %v4860_v8 = vadd.f32 %v10538_v52, %v10542_v0 }
 0x39f   : > { %v5245_v12 = vmax.f32 %v4856_v11, %v4857_v32  ;;  %v10666_v18 = vperm.slane %v4645_v3, 1  ;;  %v10668_v51 = vperm.slane %v4645_v3, 2  ;;  %v10670_v48 = vperm.slane %v4645_v3, 3  ;;  %v10681_v32 = vpop.xlane.xlu0 %3592 }
 0x3a0   : > { %5145 = vmax.xlane.f32.xlu1 %v5144_v31  ;;  %v5135_v43 = vmax.f32 %v5134_v37, %v4779_v53  ;;  %v10672_v42 = vperm.slane %v4645_v3, 4  ;;  %v4931_v28 = vadd.f32 %v10432_v38, %v10662_v60  ;;  %v5136_v36 = vsel %vm5009_vm1, %v4780_v26, -inf }
 0x3a1   : > { %v4859_v59 = vadd.f32 %v10531_v47, %v10546_v29  ;;  %v5246_v54 = vmax.f32 %v5245_v12, %v4858_v39  ;;  %v4932_v11 = vadd.f32 %v10441_v22, %v10666_v18  ;;  %v5680_v37 = vperm.slane %v10455_v6, %v8425_v41  ;;  %v10691_v12 = vpop.xlane.xlu2 %3603  ;;  %v10693_v22 = vpop.xlane.xlu1 %4318 }
 0x3a2   : > { %v5137_v53 = vmax.f32 %v5135_v43, %v5136_v36  ;;  %v4933_v3 = vadd.f32 %v10460_v9, %v10668_v51  ;;  %v5862_v38 = vsel %vm679_vm15, %v5745_v17, %v5861_v34  ;;  %v4935_v26 = vadd.f32 %v10467_v40, %v10672_v42 }
 0x3a3   : > { %v5247_v31 = vmax.f32 %v5246_v54, %v4859_v59  ;;  %v5350_v52 = vmax.f32 %v4931_v28, %v4932_v11  ;;  %v5863_v39 = vsel %vm5785_vm14, %v5746_v63, %v5862_v38  ;;  %v5248_v6 = vsel %vm5009_vm1, %v4860_v8, -inf }
 0x3a4   : > { %5138 = vmax.xlane.f32.xlu0 %v5137_v53  ;;  %v4934_v43 = vadd.f32 %v10481_v55, %v10670_v48  ;;  %6781 = vmatmul.msk.f32.gmra.mxu3 %vm6149_vm5, %v5863_v39  ;;  %v4701_v9 = vadd.f32 %v10593_v16, %v10414_v20  ;;  %v4702_v40 = vadd.f32 %v10600_v33, %v10421_v5  ;;  %v5353_v54 = vsel %vm5009_vm1, %v4935_v26, -inf }
 0x3a5   : > { %v5249_v34 = vmax.f32 %v5247_v31, %v5248_v6  ;;  %v5351_v17 = vmax.f32 %v5350_v52, %v4933_v3  ;;  %6796 = vmatmul.msk.f32.gmra.mxu1 %vm6149_vm5, %v5863_v39  ;;  %v5681_v63 = vperm.slane %v10544_v14, %v8425_v41  ;;  %v4703_v8 = vadd.f32 %v10617_v10, %v10423_v57  ;;  %v10724_v31 = vld [vmem:[%s12300_s2 + $0xa0] sm:$0xff] }
 0x3a6   : > { %v4705_v55 = vadd.f32 %v10625_v25, %v10427_v1  ;;  %v5028_v28 = vmax.f32 %v4701_v9, %v4702_v40  ;;  %v4861_v36 = vadd.f32 %v10593_v16, %v10522_v50  ;;  %v4862_v59 = vadd.f32 %v10600_v33, %v10524_v21 }
 0x3a7   : > { %5250 = vmax.xlane.f32.xlu2 %v5249_v34  ;;  %v5352_v52 = vmax.f32 %v5351_v17, %v4934_v43  ;;  %v5682_v14 = vperm.slane %v10559_v35, %v8425_v41  ;;  %v4704_v11 = vadd.f32 %v10638_v45, %v10425_v49  ;;  %v4863_v3 = vadd.f32 %v10617_v10, %v10526_v2  ;;  %v10735_v43 = vld [vmem:[%s12300_s2 + $0xa8] sm:$0xff] }
 0x3a8   : > { %v5029_v53 = vmax.f32 %v5028_v28, %v4703_v8  ;;  %v5252_v38 = vmax.f32 %v4861_v36, %v4862_v59  ;;  %v4786_v39 = vadd.f32 %v10724_v31, %v10356_v4  ;;  %v5805_v26 = vsel %vm671_vm6, %v5680_v37, %v10605_v7  ;;  %v10745_v7 = vld [vmem:[%s12300_s2 + $0xb0] sm:$0xff]  ;;  %v10752_v28 = vld [vmem:[%s12300_s2 + $0xc0] sm:$0xff] }
 0x3a9   : > { %v5354_v35 = vmax.f32 %v5352_v52, %v5353_v54  ;;  %v4865_v6 = vadd.f32 %v10625_v25, %v10542_v0  ;;  %v4787_v9 = vadd.f32 %v10735_v43, %v10358_v13  ;;  %v5031_v34 = vsel %vm5009_vm1, %v4705_v55, -inf  ;;  %v10757_v52 = vpop.xlane.xlu0 %4329 }
 0x3aa   : > { %v5030_v40 = vmax.f32 %v5029_v53, %v4704_v11  ;;  %v4864_v17 = vadd.f32 %v10638_v45, %v10546_v29  ;;  %v5253_v8 = vmax.f32 %v5252_v38, %v4863_v3  ;;  %v4788_v37 = vadd.f32 %v10745_v7, %v10364_v46  ;;  %v10764_v38 = vld [vmem:[%s12300_s2 + $0xb8] sm:$0xff] }
 0x3ab   : > { %5355 = vmax.xlane.f32.xlu1 %v5354_v35  ;;  %v4790_v55 = vadd.f32 %v10752_v28, %v10366_v61  ;;  %v5147_v36 = vmax.f32 %v4786_v39, %v4787_v9  ;;  %v5806_v59 = vsel %vm679_vm15, %v5681_v63, %v5805_v26  ;;  %v5255_v3 = vsel %vm5009_vm1, %v4865_v6, -inf  ;;  %12718 = vst [vmem:[#allocation28_spill] sm:$0xff] %v10764_v38  ;;  %v10770_v63 = vpop.xlane.xlu2 %4340  ;;  %v10772_v39 = vpop.xlane.xlu1 %3614 }
 0x3ac   : > { %v5032_v54 = vmax.f32 %v5030_v40, %v5031_v34  ;;  %v5254_v11 = vmax.f32 %v5253_v8, %v4864_v17  ;;  %v5807_v53 = vsel %vm5785_vm14, %v5682_v14, %v5806_v59  ;;  %v4789_v35 = vadd.f32 %v10764_v38, %v10386_v23  ;;  %12719 = vst [vmem:[#allocation29_spill] sm:$0xff] %v10772_v39 }
 0x3ad   : > { %v5148_v47 = vmax.f32 %v5147_v36, %v4788_v37  ;;  %6773 = vmatmul.msk.f32.gmra.mxu2 %vm6149_vm5, %v5807_v53  ;;  %6788 = vmatmul.msk.f32.gmra.mxu0 %vm6149_vm5, %v5807_v53  ;;  %v4926_v26 = vadd.f32 %v10371_v19, %v10662_v60  ;;  %v4927_v6 = vadd.f32 %v10378_v56, %v10666_v18  ;;  %v5150_v34 = vsel %vm5009_vm1, %v4790_v55, -inf  ;;  %v10788_v19 = vld [vmem:[%s12300_s2 + $0xc8] sm:$0xff]  ;;  %v10806_v36 = vld [vmem:[%s12300_s2 + $0xd8] sm:$0xff] }
 0x3ae   : > { %5033 = vmax.xlane.f32.xlu0 %v5032_v54  ;;  %v5256_v14 = vmax.f32 %v5254_v11, %v5255_v3  ;;  %v5747_v9 = vperm.slane %v10557_v15, %v8425_v41  ;;  %v5748_v17 = vperm.slane %v10610_v24, %v8425_v41  ;;  %v4928_v8 = vadd.f32 %v10391_v62, %v10668_v51  ;;  %v10813_v11 = vld [vmem:[%s12300_s2 + $0xe8] sm:$0xff] }
 0x3af   : > { %v5149_v40 = vmax.f32 %v5148_v47, %v4789_v35  ;;  %v5343_v37 = vmax.f32 %v4926_v26, %v4927_v6  ;;  %v4791_v56 = vadd.f32 %v10788_v19, %v10356_v4  ;;  %v10795_v47 = vld [vmem:[%s12300_s2 + $0xd0] sm:$0xff]  ;;  %v4929_v62 = vadd.f32 %v10410_v58, %v10670_v48  ;;  %12721 = vst [vmem:[#allocation31_spill] sm:$0xff] %v10806_v36 }
 0x3b0   : > { %5257 = vmax.xlane.f32.xlu2 %v5256_v14  ;;  %12720 = vst [vmem:[#allocation30_spill] sm:$0xff] %v10795_v47  ;;  %v4792_v15 = vadd.f32 %v10795_v47, %v10358_v13  ;;  %v4930_v55 = vadd.f32 %v10398_v27, %v10672_v42  ;;  %v4793_v59 = vadd.f32 %v10806_v36, %v10364_v46  ;;  %v12722_v35 = vld [vmem:[#allocation26_spill] sm:$0xff] }
 0x3b1   : > { %v5151_v24 = vmax.f32 %v5149_v40, %v5150_v34  ;;  %v5344_v54 = vmax.f32 %v5343_v37, %v4928_v8  ;;  %v4795_v58 = vadd.f32 %v10813_v11, %v10366_v61  ;;  %v4711_v27 = vadd.f32 %v10788_v19, %v10414_v20  ;;  %v10827_v40 = vld [vmem:[%s12300_s2 + $0xe0] sm:$0xff] }
 0x3b2   : > { %v5154_v53 = vmax.f32 %v4791_v56, %v4792_v15  ;;  %v5864_v3 = vsel %vm658_vm7, %v5748_v17, %v5747_v9  ;;  %v5683_v14 = vperm.slane %v12722_v35, %v8425_v41  ;;  %v4712_v26 = vadd.f32 %v10795_v47, %v10421_v5 }
 0x3b3   : > { %5152 = vmax.xlane.f32.xlu1 %v5151_v24  ;;  %v5345_v6 = vmax.f32 %v5344_v54, %v4929_v62  ;;  %v4794_v34 = vadd.f32 %v10827_v40, %v10386_v23  ;;  %v4715_v37 = vadd.f32 %v10813_v11, %v10427_v1  ;;  %v5346_v9 = vsel %vm5009_vm1, %v4930_v55, -inf  ;;  %v10838_v24 = vpop.xlane.xlu0 %3625  ;;  %v12723_v62 = vld [vmem:[#allocation27_spill] sm:$0xff] }
 0x3b4   : > { %v5155_v8 = vmax.f32 %v5154_v53, %v4793_v59  ;;  %v4713_v17 = vadd.f32 %v10806_v36, %v10423_v57  ;;  %v5042_v56 = vmax.f32 %v4711_v27, %v4712_v26  ;;  %v4706_v15 = vadd.f32 %v10724_v31, %v10414_v20  ;;  %v10849_v26 = vpop.xlane.xlu2 %3636  ;;  %v10851_v20 = vpop.xlane.xlu1 %4351 }
 0x3b5   : > { %v5749_v54 = vperm.slane %v12723_v62, %v8425_v41  ;;  %v5347_v35 = vmax.f32 %v5345_v6, %v5346_v9  ;;  %v5157_v59 = vsel %vm5009_vm1, %v4795_v58, -inf  ;;  %v4714_v53 = vadd.f32 %v10827_v40, %v10425_v49 }
 0x3b6   : > { %v5156_v23 = vmax.f32 %v5155_v8, %v4794_v34  ;;  %v5043_v55 = vmax.f32 %v5042_v56, %v4713_v17  ;;  %v5684_v39 = vperm.slane %v10681_v32, %v8425_v41  ;;  %v4707_v27 = vadd.f32 %v10735_v43, %v10421_v5 }
 0x3b7   : > { %5348 = vmax.xlane.f32.xlu0 %v5347_v35  ;;  %v5045_v6 = vsel %vm5009_vm1, %v4715_v37, -inf  ;;  %v5750_v58 = vperm.slane %v10693_v22, %v8425_v41  ;;  %v4708_v34 = vadd.f32 %v10745_v7, %v10423_v57  ;;  %v4871_v32 = vadd.f32 %v10788_v19, %v10522_v50 }
 0x3b8   : > { %v5158_v62 = vmax.f32 %v5156_v23, %v5157_v59  ;;  %v5044_v8 = vmax.f32 %v5043_v55, %v4714_v53  ;;  %v5035_v9 = vmax.f32 %v4706_v15, %v4707_v27  ;;  %v4872_v17 = vadd.f32 %v10795_v47, %v10524_v21 }
 0x3b9   : > { %v4709_v23 = vadd.f32 %v10764_v38, %v10425_v49  ;;  %v4710_v37 = vadd.f32 %v10752_v28, %v10427_v1  ;;  %v4873_v22 = vadd.f32 %v10806_v36, %v10526_v2  ;;  %v4875_v56 = vadd.f32 %v10813_v11, %v10542_v0 }
 0x3ba   : > { %5159 = vmax.xlane.f32.xlu2 %v5158_v62  ;;  %v5046_v15 = vmax.f32 %v5044_v8, %v5045_v6  ;;  %v5036_v35 = vmax.f32 %v5035_v9, %v4708_v34  ;;  %v5266_v59 = vmax.f32 %v4871_v32, %v4872_v17  ;;  %v4941_v53 = vadd.f32 %v10593_v16, %v10662_v60 }
 0x3bb   : > { %v5865_v55 = vsel %vm667_vm2, %v5749_v54, %v5864_v3  ;;  %v5808_v27 = vsel %vm658_vm7, %v5684_v39, %v5683_v14  ;;  %v5685_v62 = vperm.slane %v10691_v12, %v8425_v41  ;;  %v4942_v47 = vadd.f32 %v10600_v33, %v10666_v18  ;;  %v12724_v12 = vld [vmem:[#allocation18_spill] sm:$0xff]  ;;  %v10889_v17 = vpop.xlane.xlu0 %4362 }
 0x3bc   : > { %5047 = vmax.xlane.f32.xlu1 %v5046_v15  ;;  %v5037_v36 = vmax.f32 %v5036_v35, %v4709_v23  ;;  %v4874_v6 = vadd.f32 %v10827_v40, %v10546_v29  ;;  %v5267_v34 = vmax.f32 %v5266_v59, %v4873_v22  ;;  %v4945_v8 = vadd.f32 %v10625_v25, %v10672_v42  ;;  %v12729_v59 = vld [vmem:[#allocation22_spill] sm:$0xff] }
 0x3bd   : > { %v5038_v16 = vsel %vm5009_vm1, %v4710_v37, -inf  ;;  %v4943_v39 = vadd.f32 %v10617_v10, %v10668_v51  ;;  %v5364_v3 = vmax.f32 %v4941_v53, %v4942_v47  ;;  %v4936_v14 = vadd.f32 %v12724_v12, %v10662_v60 }
 0x3be   : > { %v5866_v33 = vsel %vm12725_vm8, %v5750_v58, %v5865_v55  ;;  %v5039_v54 = vmax.f32 %v5037_v36, %v5038_v16  ;;  %v5268_v9 = vmax.f32 %v5267_v34, %v4874_v6  ;;  %v5269_v32 = vsel %vm5009_vm1, %v4875_v56, -inf  ;;  %v10902_v56 = vpop.xlane.xlu2 %4373  ;;  %v12730_v55 = vld [vmem:[#allocation23_spill] sm:$0xff]  ;;  %v10927_v34 = vld [vmem:[%s12300_s2 + $0x128] sm:$0xff] }
 0x3bf   : > { %v4944_v25 = vadd.f32 %v10638_v45, %v10670_v48  ;;  %v5365_v23 = vmax.f32 %v5364_v3, %v4943_v39  ;;  %v5751_v37 = vperm.slane %v10757_v52, %v8425_v41  ;;  %v4937_v10 = vadd.f32 %v10509_v44, %v10666_v18  ;;  %12726 = vst [vmem:[#allocation26_spill] sm:$0xff] %v10902_v56  ;;  %v10904_v45 = vpop.xlane.xlu1 %3647  ;;  %v10909_v44 = vld [vmem:[%s12300_s2 + $0x118] sm:$0xff] }
 0x3c0   : > { %5040 = vmax.xlane.f32.xlu0 %v5039_v54  ;;  %v5270_v47 = vmax.f32 %v5268_v9, %v5269_v32  ;;  %v5367_v58 = vsel %vm5009_vm1, %v4945_v8, -inf  ;;  %v5752_v36 = vperm.slane %v10770_v63, %v8425_v41  ;;  %v4938_v22 = vadd.f32 %v10518_v30, %v10668_v51  ;;  %12727 = vst [vmem:[#allocation27_spill] sm:$0xff] %v10909_v44  ;;  %v10916_v63 = vld [vmem:[%s12300_s2 + $0x120] sm:$0xff]  ;;  %v10934_v16 = vld [vmem:[%s12300_s2 + $0x138] sm:$0xff]  ;;  %v10941_v54 = vld [vmem:[%s12300_s2 + $0xf0] sm:$0xff] }
 0x3c1   : > { %v5366_v15 = vmax.f32 %v5365_v23, %v4944_v25  ;;  %v5357_v35 = vmax.f32 %v4936_v14, %v4937_v10  ;;  %v4801_v52 = vadd.f32 %v10909_v44, %v10356_v4  ;;  %12728 = vst [vmem:[#allocation18_spill] sm:$0xff] %v10916_v63  ;;  %v4802_v30 = vadd.f32 %v10916_v63, %v10358_v13  ;;  %v12733_v23 = vld [vmem:[#allocation29_spill] sm:$0xff] }
 0x3c2   : > { %5271 = vmax.xlane.f32.xlu2 %v5270_v47  ;;  %v4939_v53 = vadd.f32 %v12729_v59, %v10670_v48  ;;  %v4940_v6 = vadd.f32 %v12730_v55, %v10672_v42  ;;  %12731 = vst [vmem:[#allocation22_spill] sm:$0xff] %v10927_v34  ;;  %v4803_v8 = vadd.f32 %v10927_v34, %v10364_v46  ;;  %v10952_v47 = vld [vmem:[%s12300_s2 + $0xf8] sm:$0xff] }
 0x3c3   : > { %v4805_v39 = vadd.f32 %v10934_v16, %v10366_v61  ;;  %v5368_v3 = vmax.f32 %v5366_v15, %v5367_v58  ;;  %v5358_v12 = vmax.f32 %v5357_v35, %v4938_v22  ;;  %v5168_v14 = vmax.f32 %v4801_v52, %v4802_v30  ;;  %v10959_v15 = vld [vmem:[%s12300_s2 + $0x130] sm:$0xff]  ;;  %v10974_v30 = vld [vmem:[%s12300_s2 + $0x100] sm:$0xff] }
 0x3c4   : > { %v4796_v9 = vadd.f32 %v10941_v54, %v10356_v4  ;;  %v5809_v32 = vsel %vm667_vm2, %v5685_v62, %v5808_v27  ;;  %v5867_v25 = vsel %vm12732_vm9, %v5751_v37, %v5866_v33  ;;  %v5686_v10 = vperm.slane %v12733_v23, %v8425_v41  ;;  %v12734_v27 = vld [vmem:[#allocation14_spill] sm:$0xff] }
 0x3c5   : > { %v4797_v58 = vadd.f32 %v10952_v47, %v10358_v13  ;;  %5369 = vmax.xlane.f32.xlu1 %v5368_v3  ;;  %v5359_v22 = vmax.f32 %v5358_v12, %v4939_v53  ;;  %v4804_v62 = vadd.f32 %v10959_v15, %v12734_v27  ;;  %v5169_v33 = vmax.f32 %v5168_v14, %v4803_v8  ;;  %v10966_v37 = vld [vmem:[%s12300_s2 + $0x110] sm:$0xff] }
 0x3c6   : > { %v4800_v35 = vadd.f32 %v10966_v37, %v10366_v61  ;;  %v5360_v52 = vsel %vm5009_vm1, %v4940_v6, -inf  ;;  %v4798_v59 = vadd.f32 %v10974_v30, %v10364_v46  ;;  %v4866_v55 = vadd.f32 %v10724_v31, %v10522_v50  ;;  %v10985_v6 = vld [vmem:[%s12300_s2 + $0x108] sm:$0xff] }
 0x3c7   : > { %v5161_v53 = vmax.f32 %v4796_v9, %v4797_v58  ;;  %v5868_v8 = vsel %vm671_vm6, %v5752_v36, %v5867_v25  ;;  %v5361_v3 = vmax.f32 %v5359_v22, %v5360_v52  ;;  %v5170_v12 = vmax.f32 %v5169_v33, %v4804_v62  ;;  %v10993_v36 = vpop.xlane.xlu0 %4384 }
 0x3c8   : > { %v5171_v14 = vsel %vm5009_vm1, %v4805_v39, -inf  ;;  %v4799_v23 = vadd.f32 %v10985_v6, %v12734_v27  ;;  %v5687_v9 = vperm.slane %v10838_v24, %v8425_v41  ;;  %v4867_v58 = vadd.f32 %v10735_v43, %v10524_v21  ;;  %12735 = vst [vmem:[#allocation23_spill] sm:$0xff] %v10993_v36 }
 0x3c9   : > { %v5162_v56 = vmax.f32 %v5161_v53, %v4798_v59  ;;  %5362 = vmax.xlane.f32.xlu0 %v5361_v3  ;;  %v5172_v25 = vmax.f32 %v5170_v12, %v5171_v14  ;;  %v5164_v39 = vsel %vm5009_vm1, %v4800_v35, -inf  ;;  %v5753_v22 = vperm.slane %v10851_v20, %v8425_v41  ;;  %v11004_v53 = vpop.xlane.xlu2 %4395  ;;  %v11006_v3 = vpop.xlane.xlu1 %3658  ;;  %v12737_v12 = vld [vmem:[#allocation15_spill] sm:$0xff] }
 0x3ca   : > { %v4881_v62 = vadd.f32 %v10909_v44, %v10522_v50  ;;  %v4868_v52 = vadd.f32 %v10745_v7, %v10526_v2  ;;  %v5259_v24 = vmax.f32 %v4866_v55, %v4867_v58  ;;  %v4882_v59 = vadd.f32 %v10916_v63, %v10524_v21  ;;  %12736 = vst [vmem:[#allocation29_spill] sm:$0xff] %v11004_v53 }
 0x3cb   : > { %v5163_v33 = vmax.f32 %v5162_v56, %v4799_v23  ;;  %5173 = vmax.xlane.f32.xlu2 %v5172_v25  ;;  %v4869_v35 = vadd.f32 %v10764_v38, %v10546_v29  ;;  %v4870_v20 = vadd.f32 %v10752_v28, %v10542_v0  ;;  %v4883_v56 = vadd.f32 %v10927_v34, %v10526_v2 }
 0x3cc   : > { %v4721_v55 = vadd.f32 %v10909_v44, %v12737_v12  ;;  %v5260_v23 = vmax.f32 %v5259_v24, %v4868_v52  ;;  %v5280_v58 = vmax.f32 %v4881_v62, %v4882_v59  ;;  %v4722_v53 = vadd.f32 %v10916_v63, %v10421_v5 }
 0x3cd   : > { %v5165_v14 = vmax.f32 %v5163_v33, %v5164_v39  ;;  %v4884_v25 = vadd.f32 %v10959_v15, %v10546_v29  ;;  %v4885_v38 = vadd.f32 %v10934_v16, %v10542_v0  ;;  %v4723_v36 = vadd.f32 %v10927_v34, %v10423_v57 }
 0x3ce   : > { %v4725_v2 = vadd.f32 %v10934_v16, %v10427_v1  ;;  %v5261_v44 = vmax.f32 %v5260_v23, %v4869_v35  ;;  %v5281_v39 = vmax.f32 %v5280_v58, %v4883_v56  ;;  %v5056_v33 = vmax.f32 %v4721_v55, %v4722_v53  ;;  %v11070_v56 = vld [vmem:[%s12300_s2 + $0x178] sm:$0xff] }
 0x3cf   : > { %5166 = vmax.xlane.f32.xlu1 %v5165_v14  ;;  %v5754_v62 = vperm.slane %v10889_v17, %v8425_v41  ;;  %v5810_v52 = vsel %vm12738_vm13, %v5686_v10, %v5809_v32  ;;  %v5262_v24 = vsel %vm5009_vm1, %v4870_v20, -inf  ;;  %v4724_v59 = vadd.f32 %v10959_v15, %v10425_v49  ;;  %12741 = vst [vmem:[#allocation32_spill] sm:$0xff] %v11070_v56 }
 0x3d0   : > { %v5869_v63 = vsel %vm679_vm15, %v5753_v22, %v5868_v8  ;;  %v5263_v34 = vmax.f32 %v5261_v44, %v5262_v24  ;;  %v5282_v29 = vmax.f32 %v5281_v39, %v4884_v25  ;;  %v5057_v0 = vmax.f32 %v5056_v33, %v4723_v36  ;;  %v11052_v22 = vld [vmem:[%s12300_s2 + $0x168] sm:$0xff] }
 0x3d1   : > { %v5870_v14 = vsel %vm5785_vm14, %v5754_v62, %v5869_v63  ;;  %v5688_v53 = vperm.slane %v10849_v26, %v8425_v41  ;;  %v5283_v35 = vsel %vm5009_vm1, %v4885_v38, -inf  ;;  %v4716_v17 = vadd.f32 %v10941_v54, %v12737_v12  ;;  %v11045_v26 = vpop.xlane.xlu0 %4406  ;;  %v11074_v23 = vpop.xlane.xlu2 %3680  ;;  %v12742_v62 = vld [vmem:[#allocation30_spill] sm:$0xff] }
 0x3d2   : > { %6782 = vmatmul.msk.f32.gmra.mxu3 %vm6149_vm5, %v5870_v14  ;;  %6797 = vmatmul.msk.f32.gmra.mxu1 %vm6149_vm5, %v5870_v14  ;;  %v4717_v32 = vadd.f32 %v10952_v47, %v10421_v5  ;;  %v5811_v44 = vsel %vm12739_vm10, %v5687_v9, %v5810_v52  ;;  %v5284_v10 = vmax.f32 %v5282_v29, %v5283_v35  ;;  %v5059_v8 = vsel %vm5009_vm1, %v4725_v2, -inf  ;;  %v11076_v58 = vpop.xlane.xlu1 %3669  ;;  %v11094_v35 = vld [vmem:[%s12300_s2 + $0x188] sm:$0xff] }
 0x3d3   : > { %5264 = vmax.xlane.f32.xlu0 %v5263_v34  ;;  %v5058_v63 = vmax.f32 %v5057_v0, %v4724_v59  ;;  %v4718_v38 = vadd.f32 %v10974_v30, %v10423_v57  ;;  %v4811_v20 = vadd.f32 %v11052_v22, %v10356_v4  ;;  %v11059_v0 = vld [vmem:[%s12300_s2 + $0x170] sm:$0xff]  ;;  %v4719_v34 = vadd.f32 %v10985_v6, %v10425_v49  ;;  %v11087_v59 = vld [vmem:[%s12300_s2 + $0x180] sm:$0xff] }
 0x3d4   : > { %v5049_v36 = vmax.f32 %v4716_v17, %v4717_v32  ;;  %12740 = vst [vmem:[#allocation15_spill] sm:$0xff] %v11059_v0  ;;  %v4812_v2 = vadd.f32 %v11059_v0, %v10358_v13  ;;  %5285 = vmax.xlane.f32.xlu2 %v5284_v10  ;;  %v4720_v9 = vadd.f32 %v10966_v37, %v10427_v1  ;;  %vm6005_vm9 = vcmask 326912  }
 0x3d5   : > { %v5060_v29 = vmax.f32 %v5058_v63, %v5059_v8  ;;  %v4813_v55 = vadd.f32 %v11070_v56, %v10364_v46  ;;  %v4951_v33 = vadd.f32 %v10788_v19, %v10662_v60  ;;  %v4952_v52 = vadd.f32 %v12742_v62, %v10666_v18  ;;  %12743 = vst [vmem:[#allocation30_spill] sm:$0xff] %v11087_v59 }
 0x3d6   : > { %v5050_v25 = vmax.f32 %v5049_v36, %v4718_v38  ;;  %v5182_v39 = vmax.f32 %v4811_v20, %v4812_v2  ;;  %v5689_v24 = vperm.slane %v10904_v45, %v8425_v41  ;;  %v4814_v14 = vadd.f32 %v11087_v59, %v12734_v27  ;;  %12744 = vst [vmem:[#allocation33_spill] sm:$0xff] %v11094_v35  ;;  %v12745_v45 = vld [vmem:[#allocation31_spill] sm:$0xff] }
 0x3d7   : > { %5061 = vmax.xlane.f32.xlu1 %v5060_v29  ;;  %v4815_v19 = vadd.f32 %v11094_v35, %v10366_v61  ;;  %v4953_v10 = vadd.f32 %v12745_v45, %v10668_v51  ;;  %v5378_v63 = vmax.f32 %v4951_v33, %v4952_v52  ;;  %v5812_v8 = vsel %vm671_vm6, %v5688_v53, %v5811_v44  ;;  %v12748_v45 = vld [vmem:[#allocation28_spill] sm:$0xff] }
 0x3d8   : > { %v5051_v17 = vmax.f32 %v5050_v25, %v4719_v34  ;;  %v5183_v32 = vmax.f32 %v5182_v39, %v4813_v55  ;;  %v5052_v38 = vsel %vm5009_vm1, %v4720_v9, -inf  ;;  %v4955_v36 = vadd.f32 %v10813_v11, %v10672_v42 }
 0x3d9   : > { %v5690_v20 = vperm.slane %v11006_v3, %v8425_v41  ;;  %v4954_v34 = vadd.f32 %v10827_v40, %v10670_v48  ;;  %v5379_v55 = vmax.f32 %v5378_v63, %v4953_v10  ;;  %v5185_v25 = vsel %vm5009_vm1, %v4815_v19, -inf  ;;  %v11122_v52 = vpop.xlane.xlu0 %4417  ;;  %v12746_v19 = vld [vmem:[#allocation26_spill] sm:$0xff]  ;;  %v11134_v63 = vpop.xlane.xlu2 %4428 }
 0x3da   : > { %v5053_v2 = vmax.f32 %v5051_v17, %v5052_v38  ;;  %v5184_v29 = vmax.f32 %v5183_v32, %v4814_v14  ;;  %v5813_v39 = vsel %vm679_vm15, %v5689_v24, %v5812_v8  ;;  %v4946_v53 = vadd.f32 %v10724_v31, %v10662_v60  ;;  %v12747_v32 = vld [vmem:[#allocation23_spill] sm:$0xff]  ;;  %v11136_v8 = vpop.xlane.xlu1 %3691  ;;  %v12749_v38 = vld [vmem:[#allocation21_spill] sm:$0xff] }
 0x3db   : > { %v4947_v44 = vadd.f32 %v10735_v43, %v10666_v18  ;;  %v5380_v9 = vmax.f32 %v5379_v55, %v4954_v34  ;;  %v5814_v3 = vsel %vm5785_vm14, %v5690_v20, %v5813_v39  ;;  %v5381_v33 = vsel %vm5009_vm1, %v4955_v36, -inf  ;;  %v11150_v34 = vld [vmem:[%s12300_s2 + $0x148] sm:$0xff] }
 0x3dc   : > { %5054 = vmax.xlane.f32.xlu0 %v5053_v2  ;;  %v5186_v11 = vmax.f32 %v5184_v29, %v5185_v25  ;;  %6774 = vmatmul.msk.f32.gmra.mxu2 %vm6149_vm5, %v5814_v3  ;;  %v4948_v40 = vadd.f32 %v10745_v7, %v10668_v51  ;;  %v4950_v31 = vadd.f32 %v10752_v28, %v10672_v42  ;;  %v11143_v2 = vld [vmem:[%s12300_s2 + $0x140] sm:$0xff]  ;;  %v12750_v25 = vld [vmem:[#allocation29_spill] sm:$0xff]  ;;  %vm6009_vm13 = vcmask 392512  }
 0x3dd   : > { %6789 = vmatmul.msk.f32.gmra.mxu0 %vm6149_vm5, %v5814_v3  ;;  %v5371_v62 = vmax.f32 %v4946_v53, %v4947_v44  ;;  %v5382_v43 = vmax.f32 %v5380_v9, %v5381_v33  ;;  %v4891_v24 = vadd.f32 %v11052_v22, %v10522_v50  ;;  %v4892_v14 = vadd.f32 %v11059_v0, %v10524_v21  ;;  %v12752_v3 = vld [vmem:[#allocation25_spill] sm:$0xff] }
 0x3de   : > { %5187 = vmax.xlane.f32.xlu2 %v5186_v11  ;;  %v5755_v17 = vperm.slane %v12746_v19, %v8425_v41  ;;  %v5756_v7 = vperm.slane %v12747_v32, %v8425_v41  ;;  %v4949_v28 = vadd.f32 %v12748_v45, %v10670_v48  ;;  %v4893_v36 = vadd.f32 %v11070_v56, %v12749_v38  ;;  %v12751_v11 = vld [vmem:[#allocation24_spill] sm:$0xff] }
 0x3df   : > { %v5372_v10 = vmax.f32 %v5371_v62, %v4948_v40  ;;  %5383 = vmax.xlane.f32.xlu1 %v5382_v43  ;;  %v5294_v20 = vmax.f32 %v4891_v24, %v4892_v14  ;;  %v4806_v29 = vadd.f32 %v11143_v2, %v10356_v4  ;;  %v4807_v55 = vadd.f32 %v11150_v34, %v10358_v13  ;;  %v11164_v62 = vld [vmem:[%s12300_s2 + $0x150] sm:$0xff] }
 0x3e0   : > { %v5757_v39 = vperm.slane %v12750_v25, %v8425_v41  ;;  %v5374_v44 = vsel %vm5009_vm1, %v4950_v31, -inf  ;;  %v4895_v9 = vadd.f32 %v11094_v35, %v12751_v11  ;;  %v4894_v33 = vadd.f32 %v11087_v59, %v12752_v3  ;;  %v11172_v31 = vld [vmem:[%s12300_s2 + $0x160] sm:$0xff] }
 0x3e1   : > { %v5373_v53 = vmax.f32 %v5372_v10, %v4949_v28  ;;  %v5295_v40 = vmax.f32 %v5294_v20, %v4893_v36  ;;  %v4808_v43 = vadd.f32 %v11164_v62, %v10364_v46  ;;  %v5175_v24 = vmax.f32 %v4806_v29, %v4807_v55  ;;  %v11181_v10 = vld [vmem:[%s12300_s2 + $0x158] sm:$0xff] }
 0x3e2   : > { %v5871_v14 = vsel %vm658_vm7, %v5756_v7, %v5755_v17  ;;  %v4810_v32 = vadd.f32 %v11172_v31, %v10366_v61  ;;  %v4876_v45 = vadd.f32 %v10941_v54, %v10522_v50  ;;  %v4809_v17 = vadd.f32 %v11181_v10, %v12734_v27 }
 0x3e3   : > { %v5375_v19 = vmax.f32 %v5373_v53, %v5374_v44  ;;  %v5296_v28 = vmax.f32 %v5295_v40, %v4894_v33  ;;  %v5176_v7 = vmax.f32 %v5175_v24, %v4808_v43  ;;  %v4877_v36 = vadd.f32 %v10952_v47, %v10524_v21 }
 0x3e4   : > { %v5297_v20 = vsel %vm5009_vm1, %v4895_v9, -inf  ;;  %v4878_v29 = vadd.f32 %v10974_v30, %v12749_v38  ;;  %v4880_v55 = vadd.f32 %v10966_v37, %v12751_v11  ;;  %v4731_v33 = vadd.f32 %v11052_v22, %v12737_v12  ;;  %v11198_v9 = vpop.xlane.xlu0 %3702 }
 0x3e5   : > { %5376 = vmax.xlane.f32.xlu0 %v5375_v19  ;;  %v5298_v25 = vmax.f32 %v5296_v28, %v5297_v20  ;;  %v5177_v53 = vmax.f32 %v5176_v7, %v4809_v17  ;;  %v5273_v44 = vmax.f32 %v4876_v45, %v4877_v36  ;;  %v5872_v40 = vsel %vm667_vm2, %v5757_v39, %v5871_v14  ;;  %v11210_v7 = vpop.xlane.xlu2 %3713  ;;  %v11212_v36 = vpop.xlane.xlu1 %4439 }
 0x3e6   : > { %v5178_v43 = vsel %vm5009_vm1, %v4810_v32, -inf  ;;  %v4732_v24 = vadd.f32 %v11059_v0, %v10421_v5  ;;  %v5758_v61 = vperm.slane %v11045_v26, %v8425_v41  ;;  %v4879_v45 = vadd.f32 %v10985_v6, %v12752_v3  ;;  %v11214_v20 = vpop.f32.mrf.mxu2 }
 0x3e7   : > { %5299 = vmax.xlane.f32.xlu2 %v5298_v25  ;;  %v5179_v19 = vmax.f32 %v5177_v53, %v5178_v43  ;;  %v5274_v28 = vmax.f32 %v5273_v44, %v4878_v29  ;;  %v5692_v17 = vperm.slane %v11074_v23, %v8425_v41  ;;  %v4733_v39 = vadd.f32 %v11070_v56, %v10423_v57  ;;  %v12753_v56 = vld [vmem:[#allocation27_spill] sm:$0xff] }
 0x3e8   : > { %v5070_v14 = vmax.f32 %v4731_v33, %v4732_v24  ;;  %v4726_v32 = vadd.f32 %v11143_v2, %v12737_v12  ;;  %v5691_v26 = vperm.slane %v11076_v58, %v8425_v41  ;;  %v5276_v23 = vsel %vm5009_vm1, %v4880_v55, -inf  ;;  %v11227_v24 = vpop.f32.mrf.mxu0 }
 0x3e9   : > { %5180 = vmax.xlane.f32.xlu1 %v5179_v19  ;;  %v5275_v29 = vmax.f32 %v5274_v28, %v4879_v45  ;;  %v4727_v25 = vadd.f32 %v11150_v34, %v10421_v5  ;;  %v4734_v53 = vadd.f32 %v11087_v59, %v10425_v49  ;;  %v4735_v44 = vadd.f32 %v11094_v35, %v10427_v1 }
 0x3ea   : > { %v5071_v33 = vmax.f32 %v5070_v14, %v4733_v39  ;;  %v5759_v43 = vperm.slane %v11122_v52, %v8425_v41  ;;  %v5873_v58 = vsel %vm12704_vm3, %v5758_v61, %v5872_v40  ;;  %v4728_v55 = vadd.f32 %v11164_v62, %v10423_v57  ;;  %v12754_v39 = vld [vmem:[#allocation18_spill] sm:$0xff] }
 0x3eb   : > { %v5277_v19 = vmax.f32 %v5275_v29, %v5276_v23  ;;  %v5063_v45 = vmax.f32 %v4726_v32, %v4727_v25  ;;  %v5760_v59 = vperm.slane %v11134_v63, %v8425_v41  ;;  %v4961_v35 = vadd.f32 %v12753_v56, %v10662_v60  ;;  %v12755_v56 = vld [vmem:[#allocation22_spill] sm:$0xff] }
 0x3ec   : > { %v5072_v28 = vmax.f32 %v5071_v33, %v4734_v53  ;;  %v4962_v14 = vadd.f32 %v12754_v39, %v10666_v18  ;;  %v5693_v52 = vperm.slane %v11136_v8, %v8425_v41  ;;  %v4729_v61 = vadd.f32 %v11181_v10, %v10425_v49 }
 0x3ed   : > { %5278 = vmax.xlane.f32.xlu0 %v5277_v19  ;;  %v4730_v40 = vadd.f32 %v11172_v31, %v10427_v1  ;;  %v5064_v32 = vmax.f32 %v5063_v45, %v4728_v55  ;;  %v5073_v29 = vsel %vm5009_vm1, %v4735_v44, -inf  ;;  %v5874_v63 = vsel %vm12713_vm4, %v5759_v43, %v5873_v58  ;;  %v4451_v58 = vpop.xlane.xlu0 %4450 }
 0x3ee   : > { %v4963_v23 = vadd.f32 %v12755_v56, %v10668_v51  ;;  %v5392_v25 = vmax.f32 %v4961_v35, %v4962_v14  ;;  %v5815_v53 = vsel %vm658_vm7, %v5692_v17, %v5691_v26  ;;  %v5074_v33 = vmax.f32 %v5072_v28, %v5073_v29  ;;  %v11257_v55 = vpop.f32.mrf.mxu2  ;;  %v3736_v28 = vpop.xlane.xlu2 %3735 }
 0x3ef   : > { %v5065_v19 = vmax.f32 %v5064_v32, %v4729_v61  ;;  %v4956_v8 = vadd.f32 %v10941_v54, %v10662_v60  ;;  %v4965_v39 = vadd.f32 %v10934_v16, %v10672_v42  ;;  %v5694_v44 = vperm.slane %v11198_v9, %v8425_v41 }
 0x3f0   : > { %v5393_v0 = vmax.f32 %v5392_v25, %v4963_v23  ;;  %v4957_v43 = vadd.f32 %v10952_v47, %v10666_v18  ;;  %v5875_v35 = vsel %vm671_vm6, %v5760_v59, %v5874_v63  ;;  %v5816_v17 = vsel %vm667_vm2, %v5693_v52, %v5815_v53  ;;  %v11268_v61 = vpop.f32.mrf.mxu0 }
 0x3f1   : > { %5075 = vmax.xlane.f32.xlu1 %v5074_v33  ;;  %v5066_v54 = vsel %vm5009_vm1, %v4730_v40, -inf  ;;  %v4964_v16 = vadd.f32 %v10959_v15, %v10670_v48  ;;  %v5761_v9 = vperm.slane %v11212_v36, %v8425_v41  ;;  %v4958_v47 = vadd.f32 %v10974_v30, %v10668_v51  ;;  %12756 = vst [vmem:[#allocation31_spill] sm:$0xff] %v11268_v61 }
 0x3f2   : > { %v5067_v26 = vmax.f32 %v5065_v19, %v5066_v54  ;;  %v5385_v45 = vmax.f32 %v4956_v8, %v4957_v43  ;;  %v5762_v52 = vperm.slane %v4451_v58, %v8425_v41  ;;  %v4886_v40 = vadd.f32 %v11143_v2, %v10522_v50  ;;  %v11289_v19 = vld [vmem:[%s12300_s2 + $0x190] sm:$0xff]  ;;  %v11301_v58 = vpop.f32.mrf.mxu3 }
 0x3f3   : > { %v3725_v14 = vpop.xlane.xlu1 %3724  ;;  %v5394_v59 = vmax.f32 %v5393_v0, %v4964_v16  ;;  %v4887_v15 = vadd.f32 %v11150_v34, %v10524_v21  ;;  %v5395_v32 = vsel %vm5009_vm1, %v4965_v39, -inf  ;;  %v5817_v36 = vsel %vm12757_vm12, %v5694_v44, %v5816_v17 }
 0x3f4   : > { %v5695_v30 = vperm.slane %v11210_v7, %v8425_v41  ;;  %v5386_v29 = vmax.f32 %v5385_v45, %v4958_v47  ;;  %v4959_v0 = vadd.f32 %v10985_v6, %v10670_v48  ;;  %v4960_v63 = vadd.f32 %v10966_v37, %v10672_v42  ;;  %v11296_v6 = vld [vmem:[%s12300_s2 + $0x198] sm:$0xff] }
 0x3f5   : > { %5068 = vmax.xlane.f32.xlu0 %v5067_v26  ;;  %v5696_v56 = vperm.slane %v3725_v14, %v8425_v41  ;;  %v12758_v23 = vlaneseq  ;;  %v5287_v53 = vmax.f32 %v4886_v40, %v4887_v15  ;;  %v5876_v33 = vsel %vm679_vm15, %v5761_v9, %v5875_v35  ;;  %v11322_v15 = vld [vmem:[%s12300_s2 + $0x1a0] sm:$0xff] }
 0x3f6   : > { %v4816_v7 = vadd.f32 %v11289_v19, %v10356_v4  ;;  %v4817_v37 = vadd.f32 %v11296_v6, %v10358_v13  ;;  %v5396_v8 = vmax.f32 %v5394_v59, %v5395_v32  ;;  %v5387_v39 = vmax.f32 %v5386_v29, %v4959_v0  ;;  %v11307_v16 = vpop.f32.mrf.mxu2 }
 0x3f7   : > { %v5456_v25 = vshrl.u32 %v12758_v23, 7  ;;  %v5877_v43 = vsel %vm5785_vm14, %v5762_v52, %v5876_v33  ;;  %v4888_v35 = vadd.f32 %v11164_v62, %v12749_v38  ;;  %v5818_v17 = vsel %vm12759_vm11, %v5695_v30, %v5817_v36  ;;  %12760 = vst [vmem:[#allocation26_spill] sm:$0xff] %v11307_v16 }
 0x3f8   : > { %v5697_v54 = vperm.slane %v3736_v28, %v8425_v41  ;;  %v5388_v26 = vsel %vm5009_vm1, %v4960_v63, -inf  ;;  %v5189_v45 = vmax.f32 %v4816_v7, %v4817_v37  ;;  %v5819_v59 = vsel %vm671_vm6, %v5696_v56, %v5818_v17  ;;  %v11313_v52 = vpop.f32.mrf.mxu0  ;;  %v11345_v37 = vld [vmem:[%s12300_s2 + $0x1c0] sm:$0xff]  ;;  %v11362_v17 = vld [vmem:[%s12300_s2 + $0x1b0] sm:$0xff] }
 0x3f9   : > { %v5469_v44 = vadd.s32 104, %v5456_v25  ;;  %5397 = vmax.xlane.f32.xlu1 %v5396_v8  ;;  %v5288_v9 = vmax.f32 %v5287_v53, %v4888_v35  ;;  %v5389_v14 = vmax.f32 %v5387_v39, %v5388_v26  ;;  %12761 = vst [vmem:[#allocation23_spill] sm:$0xff] %v11313_v52  ;;  %v4889_v28 = vadd.f32 %v11181_v10, %v12752_v3  ;;  %v11326_v30 = vpop.xlane.xlu2 %5124  ;;  %v11335_v25 = vld [vmem:[%s12300_s2 + $0x1b8] sm:$0xff] }
 0x3fa   : > { %v4890_v40 = vadd.f32 %v11172_v31, %v12751_v11  ;;  %v4818_v32 = vadd.f32 %v11322_v15, %v10364_v46  ;;  %v6340_v29 = vmax.f32 %v11307_v16, %v11313_v52  ;;  %v5820_v23 = vsel %vm679_vm15, %v5697_v54, %v5819_v59  ;;  %12762 = vst [vmem:[#allocation28_spill] sm:$0xff] %v11345_v37  ;;  %v11349_v39 = vpop.f32.mrf.mxu3  ;;  %v12764_v54 = vld [vmem:[#allocation13_spill] sm:$0xff] }
 0x3fb   : > { %vm5485_vm8 = vcmp.lt.s32.totalorder %v5469_v44, 110  ;;  %v5289_v63 = vmax.f32 %v5288_v9, %v4889_v28  ;;  %v4821_v53 = vadd.f32 %v11335_v25, %v10356_v4  ;;  %v6334_v33 = vmax.f32 %v11214_v20, %v11227_v24  ;;  %12763 = vst [vmem:[#allocation29_spill] sm:$0xff] %v11349_v39 }
 0x3fc   : > { %v5921_v47 = vsel %vm5485_vm8, %v5877_v43, 0.0  ;;  %v5190_v56 = vmax.f32 %v5189_v45, %v4818_v32  ;;  %6341 = vmax.xlane.f32.xlu2 %v6340_v29  ;;  %v4822_v8 = vadd.f32 %v11345_v37, %v10358_v13  ;;  %v5290_v44 = vsel %vm5009_vm1, %v4890_v40, -inf  ;;  %v11355_v43 = vld [vmem:[%s12300_s2 + $0x1a8] sm:$0xff] }
 0x3fd   : > { %6783 = vmatmul.msk.f32.gmra.mxu3 %vm6149_vm5, %v5921_v47  ;;  %6798 = vmatmul.msk.f32.gmra.mxu1 %vm6149_vm5, %v5921_v47  ;;  %v3747_v36 = vpop.xlane.xlu0 %3746  ;;  %v4819_v35 = vadd.f32 %v11355_v43, %v12734_v27  ;;  %v4820_v26 = vadd.f32 %v11362_v17, %v12764_v54  ;;  %v11369_v47 = vadd.s32 4294967288, %v8425_v41  ;;  %v11374_v45 = vld [vmem:[%s12300_s2 + $0x1c8] sm:$0xff]  ;;  %v5291_v28 = vmax.f32 %v5289_v63, %v5290_v44  ;;  %v11395_v63 = vld [vmem:[%s12300_s2 + $0x1d0] sm:$0xff] }
 0x3fe   : > { %5390 = vmax.xlane.f32.xlu0 %v5389_v14  ;;  %v5698_v0 = vperm.slane %v3747_v36, %v8425_v41  ;;  %12765 = vst [vmem:[#allocation27_spill] sm:$0xff] %v11374_v45  ;;  %v4823_v14 = vadd.f32 %v11374_v45, %v10364_v46  ;;  %v5196_v59 = vmax.f32 %v4821_v53, %v4822_v8  ;;  %v11383_v36 = vld [vmem:[%s12300_s2 + $0x1d8] sm:$0xff]  ;;  %vm5993_vm6 = vcmask 130112  }
 0x3ff   : > { %v5191_v40 = vmax.f32 %v5190_v56, %v4819_v35  ;;  %v4736_v32 = vadd.f32 %v11289_v19, %v12737_v12  ;;  %v4825_v29 = vadd.f32 %v11383_v36, %v12764_v54  ;;  %v4824_v56 = vadd.f32 %v11395_v63, %v12734_v27 }
 0x400   : > { %v5821_v7 = vsel %vm5785_vm14, %v5698_v0, %v5820_v23  ;;  %v11388_v0 = vadd.s32 4294967280, %v8425_v41  ;;  %v4737_v23 = vadd.f32 %v11296_v6, %v10421_v5  ;;  %v5197_v53 = vmax.f32 %v5196_v59, %v4823_v14 }
 0x401   : > { %v5020_v9 = vpop.xlane.xlu1 %5019  ;;  %6775 = vmatmul.msk.f32.gmra.mxu2 %vm6149_vm5, %v5821_v7  ;;  %6790 = vmatmul.msk.f32.gmra.mxu0 %vm6149_vm5, %v5821_v7  ;;  %v5192_v8 = vsel %vm5009_vm1, %v4820_v26, -inf  ;;  %vm5997_vm15 = vcmask 195712   ;;  %v5199_v46 = vsel %vm5009_vm1, %v4825_v29, -inf  ;;  %v6337_v29 = vmax.f32 %v11257_v55, %v11268_v61 }
 0x402   : > { %6335 = vmax.xlane.f32.xlu1 %v6334_v33  ;;  %v7113_v33 = vmov 0.0   ;;  %v5992_v44 = vperm.slane %v5020_v9, %v11369_v47  ;;  %v5198_v54 = vmax.f32 %v5197_v53, %v4824_v56  ;;  %v5193_v52 = vmax.f32 %v5191_v40, %v5192_v8  ;;  %v11405_v4 = vpop.f32.mrf.mxu3 }
 0x403   : > { %v5077_v27 = vmax.f32 %v4736_v32, %v4737_v23  ;;  %12766 = vst [vmem:[#allocation18_spill] sm:$0xff] %v11405_v4  ;;  %v4738_v9 = vadd.f32 %v11322_v15, %v10423_v57  ;;  %vm6001_vm14 = vcmask 261312   ;;  %vm6013_vm10 = vcmask 458112  }
 0x404   : > { %v5200_v13 = vmax.f32 %v5198_v54, %v5199_v46  ;;  %v4739_v46 = vadd.f32 %v11355_v43, %v10425_v49  ;;  %v4740_v54 = vadd.f32 %v11362_v17, %v10427_v1  ;;  %vm6017_vm3 = vcmask 523712  }
 0x405   : > { %6262 = vmatmul.f32.gmra.mxu3 %v7113_v33  ;;  %6327 = vmatmul.f32.gmra.mxu1 %v7113_v33  ;;  %v5013_v7 = vpop.xlane.xlu0 %5012  ;;  %v5078_v56 = vmax.f32 %v5077_v27, %v4738_v9  ;;  %vm6021_vm4 = vcmask 589312   ;;  %vm6025_vm12 = vcmask 654912   ;;  %vm6029_vm11 = vcmask 720512  }
 0x406   : > { %5292 = vmax.xlane.f32.xlu0 %v5291_v28  ;;  %v5990_v35 = vperm.slane %v5013_v7, %v8425_v41  ;;  %v12767_v28 = vld [vmem:[#allocation6_spill] sm:$0xff]  ;;  %5201 = vmax.xlane.f32.xlu2 %v5200_v13  ;;  %vm6033_vm8 = vcmask 786112  }
 0x407   : > { %v5027_v16 = vpop.xlane.xlu2 %5026  ;;  %v5079_v32 = vmax.f32 %v5078_v56, %v4739_v46  ;;  %v12770_v56 = vld [vmem:[#allocation8_spill] sm:$0xff] }
 0x408   : > { %v5994_v14 = vsel %vm5993_vm6, %v5992_v44, %v5990_v35  ;;  %v5996_v59 = vperm.slane %v5027_v16, %v11388_v0 }
 0x409   : > { %6791 = vmatmul.msk.f32.gmra.mxu0 %vm6149_vm5, %v12767_v28 }
 0x40a   : > { %5194 = vmax.xlane.f32.xlu1 %v5193_v52  ;;  %v5998_v26 = vsel %vm5997_vm15, %v5996_v59, %v5994_v14  ;;  %v6051_v52 = vperm.slane %v11326_v30, %v8425_v41  ;;  %v11421_v23 = vpop.f32.mrf.mxu3  ;;  %v5080_v30 = vsel %vm5009_vm1, %v4740_v54, -inf  ;;  %v11431_v59 = vadd.s32 4294967272, %v8425_v41 }
 0x40b   : > { %v5237_v40 = vpop.xlane.xlu1 %5236  ;;  %v5081_v44 = vmax.f32 %v5079_v32, %v5080_v30 }
 0x40c   : > { %v6082_v7 = vperm.slane %v5237_v40, %v8425_v41 }
 0x40d   : > { %6265 = vmatmul.f32.gmra.mxu3 %v7113_v33  ;;  %6330 = vmatmul.f32.gmra.mxu1 %v7113_v33  ;;  %v12768_v33 = vld [vmem:[#allocation7_spill] sm:$0xff] }
 0x40e   : > { %6338 = vmax.xlane.f32.xlu0 %v6337_v29  ;;  %v5132_v16 = vpop.xlane.xlu0 %5131 }
 0x40f   : > { %v6052_v13 = vperm.slane %v5132_v16, %v11369_v47 }
 0x411   : > { %v6053_v27 = vsel %vm5993_vm6, %v6052_v13, %v6051_v52  ;;  %v5244_v53 = vpop.xlane.xlu2 %5243  ;;  %6792 = vmatmul.msk.f32.gmra.mxu0 %vm6149_vm5, %v12768_v33  ;;  %v11440_v52 = vpop.f32.mrf.mxu1 }
 0x412   : > { %v6083_v8 = vperm.slane %v5244_v53, %v11369_v47  ;;  %v11434_v29 = vpop.f32.mrf.mxu3  ;;  %12771 = vst [vmem:[#allocation6_spill] sm:$0xff] %v11440_v52 }
 0x413   : > { %v5146_v14 = vpop.xlane.xlu1 %5145  ;;  %12769 = vst [vmem:[#allocation22_spill] sm:$0xff] %v11434_v29  ;;  %v6364_v32 = vmax.f32 %v11434_v29, %v11440_v52  ;;  %v4743_v52 = vadd.f32 %v11374_v45, %v10423_v57 }
 0x414   : > { %v6084_v35 = vsel %vm5993_vm6, %v6083_v8, %v6082_v7  ;;  %v6056_v40 = vperm.slane %v5146_v14, %v11431_v59  ;;  %v12772_v8 = vld [vmem:[#allocation9_spill] sm:$0xff] }
 0x416   : > { %5082 = vmax.xlane.f32.xlu0 %v5081_v44  ;;  %v11451_v44 = vadd.s32 4294967264, %v8425_v41 }
 0x417   : > { %v5139_v28 = vpop.xlane.xlu0 %5138 }
 0x418   : > { %v6054_v9 = vperm.slane %v5139_v28, %v11388_v0 }
 0x419   : > { %6793 = vmatmul.msk.f32.gmra.mxu0 %vm6149_vm5, %v12770_v56 }
 0x41a   : > { %v6055_v46 = vsel %vm5997_vm15, %v6054_v9, %v6053_v27  ;;  %v5251_v16 = vpop.xlane.xlu2 %5250 }
 0x41b   : > { %v6085_v54 = vperm.slane %v5251_v16, %v11388_v0  ;;  %v6057_v13 = vsel %vm6001_vm14, %v6056_v40, %v6055_v46 }
 0x41d   : > { %v6086_v53 = vsel %vm5997_vm15, %v6085_v54, %v6084_v35 }
 0x41e   : > { %6365 = vmax.xlane.f32.xlu0 %v6364_v32  ;;  %v5356_v33 = vpop.xlane.xlu1 %5355  ;;  %v4742_v32 = vadd.f32 %v11345_v37, %v10421_v5 }
 0x421   : > { %v5034_v7 = vpop.xlane.xlu0 %5033  ;;  %6794 = vmatmul.msk.f32.gmra.mxu0 %vm6149_vm5, %v12772_v8  ;;  %v6114_v8 = vperm.slane %v5356_v33, %v11369_v47 }
 0x422   : > { %v6000_v27 = vperm.slane %v5034_v7, %v11431_v59  ;;  %v11457_v56 = vpop.f32.mrf.mxu1 }
 0x423   : > { %v5258_v30 = vpop.xlane.xlu2 %5257  ;;  %12773 = vst [vmem:[#allocation7_spill] sm:$0xff] %v11457_v56 }
 0x424   : > { %v6002_v14 = vsel %vm6001_vm14, %v6000_v27, %v5998_v26  ;;  %v6087_v28 = vperm.slane %v5258_v30, %v11431_v59  ;;  %v4741_v26 = vadd.f32 %v11335_v25, %v12737_v12 }
 0x426   : > { %v6088_v9 = vsel %vm6001_vm14, %v6087_v28, %v6086_v53  ;;  %v5153_v35 = vpop.xlane.xlu1 %5152  ;;  %v11469_v53 = vadd.s32 4294967256, %v8425_v41  ;;  %v5084_v28 = vmax.f32 %v4741_v26, %v4742_v32  ;;  %v4744_v26 = vadd.f32 %v11395_v63, %v10425_v49 }
 0x427   : > { %v6058_v40 = vperm.slane %v5153_v35, %v11451_v44  ;;  %v11459_v46 = vpop.f32.mrf.mxu3 }
 0x428   : > { %12774 = vst [vmem:[#allocation8_spill] sm:$0xff] %v11459_v46  ;;  %v6367_v16 = vmax.f32 %v11459_v46, %v11457_v56  ;;  %v5085_v33 = vmax.f32 %v5084_v28, %v4743_v52  ;;  %v11495_v46 = vadd.s32 4294967240, %v8425_v41 }
 0x429   : > { %v6059_v54 = vsel %vm6005_vm9, %v6058_v40, %v6057_v13 }
 0x42a   : > { %6368 = vmax.xlane.f32.xlu2 %v6367_v16  ;;  %v5349_v7 = vpop.xlane.xlu0 %5348  ;;  %v11475_v40 = vpop.f32.mrf.mxu0 }
 0x42b   : > { %v6113_v27 = vperm.slane %v5349_v7, %v8425_v41  ;;  %12775 = vst [vmem:[#allocation9_spill] sm:$0xff] %v11475_v40  ;;  %v4745_v7 = vadd.f32 %v11383_v36, %v10427_v1 }
 0x42d   : > { %v5160_v30 = vpop.xlane.xlu2 %5159  ;;  %v6115_v13 = vsel %vm5993_vm6, %v6114_v8, %v6113_v27  ;;  %v5086_v27 = vmax.f32 %v5085_v33, %v4744_v26  ;;  %v5087_v56 = vsel %vm5009_vm1, %v4745_v7, -inf  ;;  %vm6037_vm6 = vcmask 851712  }
 0x42e   : > { %v6060_v35 = vperm.slane %v5160_v30, %v11469_v53 }
 0x42f   : > { %v5048_v16 = vpop.xlane.xlu1 %5047 }
 0x430   : > { %v6061_v29 = vsel %vm6009_vm13, %v6060_v35, %v6059_v54  ;;  %v11480_v61 = vpop.f32.mrf.mxu2  ;;  %v6008_v54 = vperm.slane %v5048_v16, %v11469_v53  ;;  %v11499_v16 = vadd.s32 4294967248, %v8425_v41 }
 0x431   : > { %12776 = vst [vmem:[#allocation34_spill] sm:$0xff] %v11480_v61  ;;  %v6343_v47 = vmax.f32 %v11480_v61, %v11475_v40 }
 0x433   : > { %6344 = vmax.xlane.f32.xlu1 %v6343_v47  ;;  %v5041_v32 = vpop.xlane.xlu0 %5040  ;;  %v5088_v47 = vmax.f32 %v5086_v27, %v5087_v56 }
 0x434   : > { %v6004_v8 = vperm.slane %v5041_v32, %v11451_v44 }
 0x435   : > { %v5272_v30 = vpop.xlane.xlu2 %5271 }
 0x436   : > { %v6006_v35 = vsel %vm6005_vm9, %v6004_v8, %v6002_v14 }
 0x437   : > { %v6010_v52 = vsel %vm6009_vm13, %v6008_v54, %v6006_v35  ;;  %v6091_v54 = vperm.slane %v5272_v30, %v11469_v53  ;;  %v4967_v30 = vadd.f32 %v11150_v34, %v10666_v18 }
 0x438   : > { %v5370_v28 = vpop.xlane.xlu1 %5369 }
 0x439   : > { %v6118_v33 = vperm.slane %v5370_v28, %v11431_v59 }
 0x43b   : > { %5089 = vmax.xlane.f32.xlu1 %v5088_v47 }
 0x43c   : > { %v5363_v40 = vpop.xlane.xlu0 %5362 }
 0x43d   : > { %v6116_v61 = vperm.slane %v5363_v40, %v11388_v0 }
 0x43e   : > { %v5174_v26 = vpop.xlane.xlu2 %5173 }
 0x43f   : > { %v6117_v14 = vsel %vm5997_vm15, %v6116_v61, %v6115_v13  ;;  %v6064_v7 = vperm.slane %v5174_v26, %v11495_v46  ;;  %vm6041_vm15 = vcmask 917312  }
 0x440   : > { %v6119_v32 = vsel %vm6001_vm14, %v6118_v33, %v6117_v14  ;;  %vm6049_vm14 = vcmask 1048512  }
 0x442   : > { %v5167_v56 = vpop.xlane.xlu1 %5166 }
 0x443   : > { %v6062_v8 = vperm.slane %v5167_v56, %v11499_v16 }
 0x445   : > { %v6063_v0 = vsel %vm6013_vm10, %v6062_v8, %v6061_v29 }
 0x446   : > { %v5265_v40 = vpop.xlane.xlu0 %5264  ;;  %v6065_v59 = vsel %vm6017_vm3, %v6064_v7, %v6063_v0 }
 0x447   : > { %v6089_v27 = vperm.slane %v5265_v40, %v11451_v44  ;;  %v5286_v26 = vpop.xlane.xlu2 %5285  ;;  %v11522_v40 = vadd.s32 4294967232, %v8425_v41 }
 0x449   : > { %v6090_v61 = vsel %vm6005_vm9, %v6089_v27, %v6088_v9  ;;  %v4966_v9 = vadd.f32 %v11143_v2, %v10662_v60  ;;  %v11525_v27 = vadd.s32 4294967224, %v8425_v41 }
 0x44a   : > { %v5062_v13 = vpop.xlane.xlu1 %5061  ;;  %v6092_v35 = vsel %vm6009_vm13, %v6091_v54, %v6090_v61 }
 0x44b   : > { %v6016_v33 = vperm.slane %v5062_v13, %v11495_v46  ;;  %v5399_v13 = vmax.f32 %v4966_v9, %v4967_v30  ;;  %v6095_v9 = vperm.slane %v5286_v26, %v11495_v46  ;;  %v4970_v30 = vadd.f32 %v11172_v31, %v10672_v42 }
 0x44f   : > { %v5055_v28 = vpop.xlane.xlu0 %5054 }
 0x450   : > { %v6012_v47 = vperm.slane %v5055_v28, %v11499_v16 }
 0x451   : > { %v5188_v54 = vpop.xlane.xlu2 %5187 }
 0x452   : > { %v6014_v29 = vsel %vm6013_vm10, %v6012_v47, %v6010_v52  ;;  %v5384_v14 = vpop.xlane.xlu1 %5383  ;;  %v6068_v34 = vperm.slane %v5188_v54, %v11525_v27 }
 0x453   : > { %v6018_v7 = vsel %vm6017_vm3, %v6016_v33, %v6014_v29  ;;  %v6122_v0 = vperm.slane %v5384_v14, %v11469_v53  ;;  %v4968_v53 = vadd.f32 %v11164_v62, %v10668_v51  ;;  %v4969_v62 = vadd.f32 %v11181_v10, %v10670_v48 }
 0x455   : > { %v5400_v14 = vmax.f32 %v5399_v13, %v4968_v53 }
 0x458   : > { %v5377_v56 = vpop.xlane.xlu0 %5376 }
 0x459   : > { %v6120_v8 = vperm.slane %v5377_v56, %v11451_v44 }
 0x45a   : > { %v11534_v47 = vpop.f32.mrf.mxu0  ;;  %v11551_v26 = vpop.xlane.xlu2 %5299 }
 0x45b   : > { %v6121_v52 = vsel %vm6005_vm9, %v6120_v8, %v6119_v32 }
 0x45c   : > { %v6123_v61 = vsel %vm6009_vm13, %v6122_v0, %v6121_v52  ;;  %v5181_v44 = vpop.xlane.xlu1 %5180  ;;  %v5401_v52 = vmax.f32 %v5400_v14, %v4969_v62 }
 0x45d   : > { %v6066_v2 = vperm.slane %v5181_v44, %v11522_v40  ;;  %v5402_v44 = vsel %vm5009_vm1, %v4970_v30, -inf }
 0x45f   : > { %v6067_v28 = vsel %vm6021_vm4, %v6066_v2, %v6065_v59  ;;  %v11536_v33 = vpop.f32.mrf.mxu2  ;;  %v5403_v2 = vmax.f32 %v5401_v52, %v5402_v44 }
 0x460   : > { %v5279_v32 = vpop.xlane.xlu0 %5278  ;;  %v6346_v29 = vmax.f32 %v11536_v33, %v11534_v47  ;;  %v6069_v56 = vsel %vm6025_vm12, %v6068_v34, %v6067_v28 }
 0x461   : > { %v6093_v8 = vperm.slane %v5279_v32, %v11499_v16 }
 0x462   : > { %6347 = vmax.xlane.f32.xlu0 %v6346_v29 }
 0x463   : > { %v6094_v59 = vsel %vm6013_vm10, %v6093_v8, %v6092_v35 }
 0x464   : > { %v5076_v0 = vpop.xlane.xlu1 %5075  ;;  %v6096_v54 = vsel %vm6017_vm3, %v6095_v9, %v6094_v59  ;;  %v11568_v59 = vadd.s32 4294967216, %v8425_v41 }
 0x465   : > { %v6024_v53 = vperm.slane %v5076_v0, %v11525_v27 }
 0x466   : > { %12777 = vst [vmem:[#allocation35_spill] sm:$0xff] %v11568_v59 }
 0x468   : > { %v5069_v13 = vpop.xlane.xlu0 %5068 }
 0x469   : > { %v6020_v34 = vperm.slane %v5069_v13, %v11522_v40 }
 0x46a   : > { %5404 = vmax.xlane.f32.xlu0 %v5403_v2 }
 0x46b   : > { %v6022_v10 = vsel %vm6021_vm4, %v6020_v34, %v6018_v7  ;;  %v11571_v7 = vadd.s32 4294967208, %v8425_v41 }
 0x46c   : > { %v11555_v35 = vpop.xlane.xlu1 %5397  ;;  %v6026_v31 = vsel %vm6025_vm12, %v6024_v53, %v6022_v10 }
 0x46d   : > { %12778 = vst [vmem:[#allocation36_spill] sm:$0xff] %v11571_v7 }
 0x46f   : > { %v11559_v29 = vpop.xlane.xlu2 %6341 }
 0x471   : > { %v5391_v28 = vpop.xlane.xlu0 %5390 }
 0x472   : > { %v6124_v32 = vperm.slane %v5391_v28, %v11499_v16  ;;  %v11592_v28 = vpop.f32.mrf.mxu1 }
 0x473   : > { %12781 = vst [vmem:[#allocation39_spill] sm:$0xff] %v11592_v28 }
 0x474   : > { %v11562_v14 = vsel %vm6013_vm10, %v6124_v32, %v6123_v61 }
 0x475   : > { %v11564_v8 = vpop.xlane.xlu1 %6335 }
 0x479   : > { %v5293_v9 = vpop.xlane.xlu0 %5292  ;;  %v5202_v0 = vpop.xlane.xlu2 %5201 }
 0x47a   : > { %v6097_v62 = vperm.slane %v5293_v9, %v11522_v40  ;;  %v6072_v44 = vperm.slane %v5202_v0, %v11571_v7  ;;  %v11596_v9 = vpop.f32.mrf.mxu3  ;;  %v11623_v7 = vld [vmem:[%s12300_s2 + $0x1e0] sm:$0xff] }
 0x47b   : > { %12782 = vst [vmem:[#allocation40_spill] sm:$0xff] %v11596_v9  ;;  %v4746_v41 = vadd.f32 %v11623_v7, %v12737_v12 }
 0x47c   : > { %v11574_v30 = vsel %vm6021_vm4, %v6097_v62, %v6096_v54 }
 0x47d   : > { %v5195_v16 = vpop.xlane.xlu1 %5194 }
 0x47e   : > { %v6070_v61 = vperm.slane %v5195_v16, %v11568_v59  ;;  %v11577_v52 = vpop.f32.mrf.mxu0 }
 0x480   : > { %v6071_v13 = vsel %vm6029_vm11, %v6070_v61, %v6069_v56  ;;  %v4896_v61 = vadd.f32 %v11289_v19, %v10522_v50 }
 0x481   : > { %v11581_v2 = vpop.xlane.xlu0 %6338  ;;  %v11584_v34 = vsel %vm6033_vm8, %v6072_v44, %v6071_v13  ;;  %v4897_v44 = vadd.f32 %v11296_v6, %v10524_v21  ;;  %v6370_v13 = vmax.f32 %v11596_v9, %v11592_v28  ;;  %v4902_v28 = vadd.f32 %v11345_v37, %v10524_v21 }
 0x482   : > { %12779 = vst [vmem:[#allocation37_spill] sm:$0xff] %v11584_v34  ;;  %v6383_v37 = vsub.f32 %v11227_v24, %v11564_v8  ;;  %v4905_v24 = vadd.f32 %v11383_v36, %v12751_v11 }
 0x484   : > { %v11586_v53 = vpop.f32.mrf.mxu2 }
 0x485   : > { %v6349_v54 = vmax.f32 %v11586_v53, %v11577_v52 }
 0x486   : > { %v11590_v10 = vpop.f32.mrf.mxu0 }
 0x487   : > { %12780 = vst [vmem:[#allocation38_spill] sm:$0xff] %v11590_v10  ;;  %v6352_v32 = vmax.f32 %v11301_v58, %v11590_v10  ;;  %6350 = vmax.xlane.f32.xlu2 %v6349_v54  ;;  %v11610_v54 = vpop.f32.mrf.mxu1 }
 0x488   : > { %12785 = vst [vmem:[#allocation43_spill] sm:$0xff] %v11610_v54 }
 0x489   : > { %v5083_v56 = vpop.xlane.xlu0 %5082  ;;  %6353 = vmax.xlane.f32.xlu1 %v6352_v32 }
 0x48a   : > { %v6028_v62 = vperm.slane %v5083_v56, %v11568_v59  ;;  %v11614_v56 = vpop.f32.mrf.mxu3  ;;  %v4899_v59 = vadd.f32 %v11355_v43, %v12752_v3 }
 0x48b   : > { %12786 = vst [vmem:[#allocation44_spill] sm:$0xff] %v11614_v56 }
 0x48c   : > { %v11600_v16 = vsel %vm6029_vm11, %v6028_v62, %v6026_v31  ;;  %v5301_v31 = vmax.f32 %v4896_v61, %v4897_v44  ;;  %v4898_v62 = vadd.f32 %v11322_v15, %v12749_v38  ;;  %v6373_v44 = vmax.f32 %v11614_v56, %v11610_v54  ;;  %v11654_v56 = vld [vmem:[%s12300_s2 + $0x1f0] sm:$0xff] }
 0x48d   : > { %12783 = vst [vmem:[#allocation41_spill] sm:$0xff] %v11600_v16  ;;  %v4748_v9 = vadd.f32 %v11654_v56, %v10423_v57 }
 0x48e   : > { %v11602_v0 = vpop.f32.mrf.mxu0  ;;  %v5302_v16 = vmax.f32 %v5301_v31, %v4898_v62 }
 0x48f   : > { %12784 = vst [vmem:[#allocation42_spill] sm:$0xff] %v11602_v0  ;;  %v6355_v32 = vmax.f32 %v11349_v39, %v11602_v0  ;;  %v11638_v31 = vpop.f32.mrf.mxu1  ;;  %v4900_v0 = vadd.f32 %v11362_v17, %v12751_v11  ;;  %v4901_v39 = vadd.f32 %v11335_v25, %v10522_v50  ;;  %v11661_v50 = vld [vmem:[%s12300_s2 + $0x200] sm:$0xff] }
 0x490   : > { %12788 = vst [vmem:[#allocation46_spill] sm:$0xff] %v11638_v31  ;;  %v5303_v54 = vmax.f32 %v5302_v16, %v4899_v59  ;;  %v4750_v59 = vadd.f32 %v11661_v50, %v10427_v1  ;;  %v4971_v16 = vadd.f32 %v11052_v22, %v10662_v60  ;;  %v4976_v22 = vadd.f32 %v11289_v19, %v10662_v60  ;;  %v12793_v11 = vld [vmem:[#allocation32_spill] sm:$0xff] }
 0x491   : > { %6371 = vmax.xlane.f32.xlu1 %v6370_v13  ;;  %6356 = vmax.xlane.f32.xlu0 %v6355_v32  ;;  %v11630_v13 = vld [vmem:[%s12300_s2 + $0x1e8] sm:$0xff]  ;;  %v5308_v10 = vmax.f32 %v4901_v39, %v4902_v28  ;;  %v6382_v39 = vsub.f32 %v11214_v20, %v11564_v8  ;;  %v11688_v20 = vld [vmem:[%s12300_s2 + $0x1f8] sm:$0xff] }
 0x492   : > { %v4747_v61 = vadd.f32 %v11630_v13, %v10421_v5  ;;  %v11640_v62 = vpop.f32.mrf.mxu3 }
 0x493   : > { %12789 = vst [vmem:[#allocation47_spill] sm:$0xff] %v11640_v62 }
 0x496   : > { %v11618_v34 = vpop.f32.mrf.mxu0 }
 0x497   : > { %12787 = vst [vmem:[#allocation45_spill] sm:$0xff] %v11618_v34  ;;  %v6358_v32 = vmax.f32 %v11405_v4, %v11618_v34  ;;  %v5091_v34 = vmax.f32 %v4746_v41, %v4747_v61  ;;  %v5304_v4 = vsel %vm5009_vm1, %v4900_v0, -inf  ;;  %v4903_v41 = vadd.f32 %v11374_v45, %v12749_v38  ;;  %v12790_v0 = vld [vmem:[#allocation15_spill] sm:$0xff] }
 0x498   : > { %v4972_v61 = vadd.f32 %v12790_v0, %v10666_v18  ;;  %v4977_v0 = vadd.f32 %v11296_v6, %v10666_v18 }
 0x499   : > { %6374 = vmax.xlane.f32.xlu0 %v6373_v44  ;;  %6359 = vmax.xlane.f32.xlu2 %v6358_v32  ;;  %v6376_v44 = vmax.f32 %v11640_v62, %v11638_v31  ;;  %v5305_v32 = vmax.f32 %v5303_v54, %v5304_v4  ;;  %v5092_v21 = vmax.f32 %v5091_v34, %v4748_v9  ;;  %v11694_v34 = vpop.f32.mrf.mxu1  ;;  %v6414_v9 = vmul.f32 1.442695, %v6382_v39  ;;  %v12794_v39 = vld [vmem:[#allocation30_spill] sm:$0xff] }
 0x49a   : > { %v4749_v4 = vadd.f32 %v11688_v20, %v10425_v49  ;;  %v5309_v8 = vmax.f32 %v5308_v10, %v4903_v41  ;;  %12792 = vst [vmem:[#allocation48_spill] sm:$0xff] %v11694_v34  ;;  %v5406_v19 = vmax.f32 %v4971_v16, %v4972_v61  ;;  %v11696_v6 = vpop.f32.mrf.mxu3  ;;  %v4904_v31 = vadd.f32 %v11395_v63, %v12752_v3 }
 0x49b   : > { %v6416_v62 = vmul.f32 1.442695, %v6383_v37  ;;  %v4973_v10 = vadd.f32 %v12793_v11, %v10668_v51  ;;  %v6384_v41 = vsub.f32 %v11257_v55, %v11581_v2  ;;  %v5311_v61 = vsel %vm5009_vm1, %v4905_v24, -inf  ;;  %v12796_v11 = vld [vmem:[#allocation7_spill] sm:$0xff]  ;;  %v12797_v55 = vld [vmem:[#allocation10_spill] sm:$0xff] }
 0x49c   : > { %v5093_v45 = vmax.f32 %v5092_v21, %v4749_v4  ;;  %v5310_v16 = vmax.f32 %v5309_v8, %v4904_v31  ;;  %v12795_v21 = vld [vmem:[#allocation8_spill] sm:$0xff]  ;;  %v6379_v37 = vmax.f32 %v11696_v6, %v11694_v34  ;;  %6855 = vpow2.f32 %v6414_v9  ;;  %v12798_v24 = vld [vmem:[#allocation31_spill] sm:$0xff] }
 0x49d   : > { %v6369_v54 = vpop.xlane.xlu2 %6368  ;;  %v5407_v4 = vmax.f32 %v5406_v19, %v4973_v10  ;;  %v4826_v31 = vadd.f32 %v11623_v7, %v12797_v55  ;;  %6857 = vpow2.f32 %v6416_v62  ;;  %v6385_v8 = vsub.f32 %v12798_v24, %v11581_v2  ;;  %v12800_v10 = vld [vmem:[#allocation33_spill] sm:$0xff] }
 0x49e   : > { %v11673_v28 = vpop.f32.mrf.mxu0  ;;  %v6418_v34 = vmul.f32 1.442695, %v6384_v41  ;;  %v5312_v19 = vmax.f32 %v5310_v16, %v5311_v61  ;;  %v4980_v62 = vadd.f32 %v11362_v17, %v10672_v42  ;;  %v12804_v17 = vld [vmem:[#allocation26_spill] sm:$0xff] }
 0x49f   : > { %12791 = vst [vmem:[#allocation15_spill] sm:$0xff] %v11673_v28  ;;  %v6361_v38 = vmax.f32 %v11421_v23, %v11673_v28  ;;  %v5094_v28 = vsel %vm5009_vm1, %v4750_v59, -inf  ;;  %v4978_v59 = vadd.f32 %v11322_v15, %v10668_v51  ;;  %v4975_v15 = vadd.f32 %v12800_v10, %v10672_v42  ;;  %v12806_v10 = vld [vmem:[#allocation14_spill] sm:$0xff] }
 0x4a0   : > { %6859 = vpow2.f32 %v6418_v34 }
 0x4a1   : > { %6362 = vmax.xlane.f32.xlu1 %v6361_v38  ;;  %5306 = vmax.xlane.f32.xlu0 %v5305_v32  ;;  %v5413_v38 = vmax.f32 %v4976_v22, %v4977_v0  ;;  %v6404_v32 = vsub.f32 %v12795_v21, %v6369_v54  ;;  %v6405_v22 = vsub.f32 %v12796_v11, %v6369_v54  ;;  %v12799_v21 = vld [vmem:[#allocation11_spill] sm:$0xff]  ;;  %v6420_v54 = vmul.f32 1.442695, %v6385_v8  ;;  %v11746_v11 = vld [vmem:[%s12300_s2 + $0x210] sm:$0xff] }
 0x4a2   : > { %6377 = vmax.xlane.f32.xlu2 %v6376_v44  ;;  %v4974_v44 = vadd.f32 %v12794_v39, %v10670_v48  ;;  %v5095_v0 = vmax.f32 %v5093_v45, %v5094_v28  ;;  %v4827_v3 = vadd.f32 %v11630_v13, %v12799_v21  ;;  %v4979_v28 = vadd.f32 %v11355_v43, %v10670_v48  ;;  %v11726_v41 = vpop.eup %6855  ;;  %v12803_v43 = vld [vmem:[#allocation12_spill] sm:$0xff] }
 0x4a3   : > { %v5414_v39 = vmax.f32 %v5413_v38, %v4978_v59  ;;  %v6458_v9 = vmul.f32 1.442695, %v6404_v32  ;;  %v6460_v2 = vmul.f32 1.442695, %v6405_v22  ;;  %12801 = vst [vmem:[#allocation32_spill] sm:$0xff] %v11726_v41  ;;  %v5409_v16 = vsel %vm5009_vm1, %v4975_v15, -inf  ;;  %v11729_v61 = vpop.eup %6857 }
 0x4a4   : > { %v5408_v45 = vmax.f32 %v5407_v4, %v4974_v44  ;;  %v5203_v59 = vmax.f32 %v4826_v31, %v4827_v3  ;;  %12802 = vst [vmem:[#allocation30_spill] sm:$0xff] %v11729_v61  ;;  %v5416_v32 = vsel %vm5009_vm1, %v4980_v62, -inf  ;;  %v6386_v4 = vsub.f32 %v12804_v17, %v11559_v29  ;;  %v11739_v3 = vld [vmem:[%s12300_s2 + $0x208] sm:$0xff] }
 0x4a5   : > { %v5415_v38 = vmax.f32 %v5414_v39, %v4979_v28  ;;  %6861 = vpow2.f32 %v6458_v9  ;;  %v4751_v34 = vadd.f32 %v11739_v3, %v12737_v12  ;;  %v4752_v22 = vadd.f32 %v11746_v11, %v10421_v5  ;;  %v12808_v28 = vld [vmem:[#allocation13_spill] sm:$0xff] }
 0x4a6   : > { %v5410_v44 = vmax.f32 %v5408_v45, %v5409_v16  ;;  %6863 = vpow2.f32 %v6460_v2  ;;  %v6478_v39 = vadd.f32 %v11729_v61, %v11726_v41  ;;  %v4829_v15 = vadd.f32 %v11688_v20, %v12806_v10  ;;  %v11756_v9 = vpop.eup %6859 }
 0x4a7   : > { %6865 = vpow2.f32 %v6420_v54  ;;  %v5417_v24 = vmax.f32 %v5415_v38, %v5416_v32  ;;  %12807 = vst [vmem:[#allocation8_spill] sm:$0xff] %v11756_v9  ;;  %v6422_v45 = vmul.f32 1.442695, %v6386_v4  ;;  %v4830_v62 = vadd.f32 %v11661_v50, %v12808_v28  ;;  %v6345_v38 = vpop.xlane.xlu1 %6344 }
 0x4a8   : > { %v5098_v2 = vmax.f32 %v4751_v34, %v4752_v22  ;;  %v12813_v34 = vld [vmem:[#allocation6_spill] sm:$0xff] }
 0x4a9   : > { %6380 = vmax.xlane.f32.xlu1 %v6379_v37  ;;  %5096 = vmax.xlane.f32.xlu0 %v5095_v0  ;;  %v4828_v37 = vadd.f32 %v11654_v56, %v12803_v43  ;;  %v12805_v0 = vld [vmem:[#allocation23_spill] sm:$0xff]  ;;  %6867 = vpow2.f32 %v6422_v45 }
 0x4aa   : > { %5313 = vmax.xlane.f32.xlu2 %v5312_v19  ;;  %v6387_v31 = vsub.f32 %v12805_v0, %v11559_v29  ;;  %v6366_v19 = vpop.xlane.xlu0 %6365  ;;  %v12814_v0 = vld [vmem:[#allocation34_spill] sm:$0xff] }
 0x4ab   : > { %v5204_v8 = vmax.f32 %v5203_v59, %v4828_v37  ;;  %v11760_v29 = vpop.eup %6861  ;;  %v11768_v37 = vld [vmem:[%s12300_s2 + $0x218] sm:$0xff]  ;;  %v6403_v22 = vsub.f32 %v12813_v34, %v6366_v19 }
 0x4ac   : > { %12809 = vst [vmem:[#allocation7_spill] sm:$0xff] %v11760_v29  ;;  %v6424_v54 = vmul.f32 1.442695, %v6387_v31  ;;  %v11762_v16 = vpop.eup %6863  ;;  %v4753_v17 = vadd.f32 %v11768_v37, %v10423_v57  ;;  %v6388_v31 = vsub.f32 %v12814_v0, %v6345_v38 }
 0x4ad   : > { %v5205_v59 = vmax.f32 %v5204_v8, %v4829_v15  ;;  %12810 = vst [vmem:[#allocation10_spill] sm:$0xff] %v11762_v16  ;;  %v11772_v4 = vpop.eup %6865  ;;  %v6511_v61 = vadd.f32 %v11762_v16, %v11760_v29  ;;  %v6456_v5 = vmul.f32 1.442695, %v6403_v22 }
 0x4ae   : > { %12812 = vst [vmem:[#allocation31_spill] sm:$0xff] %v11772_v4  ;;  %v5099_v8 = vmax.f32 %v5098_v2, %v4753_v17  ;;  %6869 = vpow2.f32 %v6424_v54  ;;  %v6481_v57 = vadd.f32 %v11772_v4, %v11756_v9  ;;  %v6426_v2 = vmul.f32 1.442695, %v6388_v31  ;;  %v11794_v54 = vld [vmem:[%s12300_s2 + $0x228] sm:$0xff] }
 0x4b1   : > { %5411 = vmax.xlane.f32.xlu1 %v5410_v44  ;;  %5418 = vmax.xlane.f32.xlu0 %v5417_v24  ;;  %v12811_v44 = vld [vmem:[#allocation22_spill] sm:$0xff]  ;;  %v5206_v24 = vsel %vm5009_vm1, %v4830_v62, -inf  ;;  %v6126_v62 = vperm.slane %v11555_v35, %v11495_v46 }
 0x4b2   : > { %6479 = vadd.xlane.f32.xlu2 %v6478_v39  ;;  %v6402_v32 = vsub.f32 %v12811_v44, %v6366_v19  ;;  %v12815_v39 = vld [vmem:[#allocation9_spill] sm:$0xff]  ;;  %v5207_v44 = vmax.f32 %v5205_v59, %v5206_v24  ;;  %v11785_v19 = vld [vmem:[%s12300_s2 + $0x220] sm:$0xff] }
 0x4b3   : > { %v6389_v15 = vsub.f32 %v12815_v39, %v6345_v38  ;;  %v4754_v45 = vadd.f32 %v11785_v19, %v10425_v49  ;;  %v6127_v17 = vsel %vm6017_vm3, %v6126_v62, %v11562_v14 }
 0x4b4   : > { %v6454_v41 = vmul.f32 1.442695, %v6402_v32  ;;  %v11798_v32 = vpop.eup %6867 }
 0x4b5   : > { %v6428_v38 = vmul.f32 1.442695, %v6389_v15  ;;  %v5100_v59 = vmax.f32 %v5099_v8, %v4754_v45  ;;  %12816 = vst [vmem:[#allocation11_spill] sm:$0xff] %v11798_v32  ;;  %v11802_v34 = vpop.eup %6869 }
 0x4b6   : > { %6871 = vpow2.f32 %v6454_v41  ;;  %12817 = vst [vmem:[#allocation33_spill] sm:$0xff] %v11802_v34  ;;  %v6484_v35 = vadd.f32 %v11802_v34, %v11798_v32  ;;  %v12844_v32 = vld [vmem:[#allocation47_spill] sm:$0xff] }
 0x4b7   : > { %6873 = vpow2.f32 %v6456_v5 }
 0x4b8   : > { %6875 = vpow2.f32 %v6426_v2 }
 0x4b9   : > { %5208 = vmax.xlane.f32.xlu1 %v5207_v44  ;;  %6512 = vadd.xlane.f32.xlu0 %v6511_v61  ;;  %v4755_v61 = vadd.f32 %v11794_v54, %v10427_v1  ;;  %6877 = vpow2.f32 %v6428_v38 }
 0x4ba   : > { %6482 = vadd.xlane.f32.xlu2 %v6481_v57 }
 0x4bb   : > { %v5101_v57 = vsel %vm5009_vm1, %v4755_v61, -inf }
 0x4bc   : > { %v5102_v46 = vmax.f32 %v5100_v59, %v5101_v57  ;;  %v11807_v22 = vpop.eup %6871 }
 0x4bd   : > { %12818 = vst [vmem:[#allocation12_spill] sm:$0xff] %v11807_v22  ;;  %v11809_v0 = vpop.eup %6873 }
 0x4be   : > { %12819 = vst [vmem:[#allocation26_spill] sm:$0xff] %v11809_v0  ;;  %v11811_v41 = vpop.eup %6875  ;;  %v6508_v5 = vadd.f32 %v11809_v0, %v11807_v22  ;;  %v12858_v22 = vld [vmem:[#allocation25_spill] sm:$0xff] }
 0x4bf   : > { %12820 = vst [vmem:[#allocation23_spill] sm:$0xff] %v11811_v41  ;;  %v11813_v14 = vpop.eup %6877 }
 0x4c0   : > { %12821 = vst [vmem:[#allocation14_spill] sm:$0xff] %v11813_v14  ;;  %v6487_v31 = vadd.f32 %v11813_v14, %v11811_v41 }
 0x4c1   : > { %5103 = vmax.xlane.f32.xlu1 %v5102_v46 }
 0x4c2   : > { %6485 = vadd.xlane.f32.xlu2 %v6484_v35 }
 0x4c9   : > { %6509 = vadd.xlane.f32.xlu1 %v6508_v5 }
 0x4ca   : > { %6488 = vadd.xlane.f32.xlu2 %v6487_v31 }
 0x4d5   : > { %v6348_v24 = vpop.xlane.xlu0 %6347 }
 0x4d6   : > { %v6390_v8 = vsub.f32 %v11536_v33, %v6348_v24  ;;  %v6391_v39 = vsub.f32 %v11534_v47, %v6348_v24  ;;  %v11831_v33 = vpop.xlane.xlu1 %5089  ;;  %v6099_v47 = vperm.slane %v11551_v26, %v11525_v27 }
 0x4d8   : > { %v6430_v15 = vmul.f32 1.442695, %v6390_v8  ;;  %v6432_v44 = vmul.f32 1.442695, %v6391_v39  ;;  %v12824_v8 = vld [vmem:[#allocation38_spill] sm:$0xff] }
 0x4da   : > { %6879 = vpow2.f32 %v6430_v15 }
 0x4db   : > { %6881 = vpow2.f32 %v6432_v44 }
 0x4dd   : > { %v5405_v45 = vpop.xlane.xlu0 %5404 }
 0x4de   : > { %v6128_v62 = vperm.slane %v5405_v45, %v11522_v40  ;;  %v11837_v40 = vsel %vm6025_vm12, %v6099_v47, %v11574_v30  ;;  %v12828_v47 = vld [vmem:[#allocation29_spill] sm:$0xff] }
 0x4e0   : > { %v11822_v2 = vpop.eup %6879  ;;  %v11825_v61 = vsel %vm6021_vm4, %v6128_v62, %v6127_v17 }
 0x4e1   : > { %12822 = vst [vmem:[#allocation13_spill] sm:$0xff] %v11822_v2  ;;  %v11827_v38 = vpop.eup %6881 }
 0x4e2   : > { %12823 = vst [vmem:[#allocation22_spill] sm:$0xff] %v11827_v38  ;;  %v6490_v59 = vadd.f32 %v11827_v38, %v11822_v2 }
 0x4e4   : > { %6491 = vadd.xlane.f32.xlu2 %v6490_v59 }
 0x4fa   : > { %v6351_v57 = vpop.xlane.xlu2 %6350 }
 0x4fb   : > { %v6392_v46 = vsub.f32 %v11586_v53, %v6351_v57  ;;  %v6393_v17 = vsub.f32 %v11577_v52, %v6351_v57  ;;  %v12826_v53 = vld [vmem:[#allocation40_spill] sm:$0xff]  ;;  %v12827_v52 = vld [vmem:[#allocation39_spill] sm:$0xff] }
 0x4fc   : > { %v6354_v35 = vpop.xlane.xlu1 %6353 }
 0x4fd   : > { %v6434_v5 = vmul.f32 1.442695, %v6392_v46  ;;  %v6436_v31 = vmul.f32 1.442695, %v6393_v17  ;;  %v6394_v24 = vsub.f32 %v11301_v58, %v6354_v35  ;;  %v6395_v39 = vsub.f32 %v12824_v8, %v6354_v35  ;;  %v12829_v46 = vld [vmem:[#allocation42_spill] sm:$0xff] }
 0x4ff   : > { %6883 = vpow2.f32 %v6434_v5  ;;  %v6438_v15 = vmul.f32 1.442695, %v6394_v24  ;;  %v6440_v44 = vmul.f32 1.442695, %v6395_v39 }
 0x500   : > { %6885 = vpow2.f32 %v6436_v31 }
 0x501   : > { %6887 = vpow2.f32 %v6438_v15 }
 0x502   : > { %6889 = vpow2.f32 %v6440_v44 }
 0x504   : > { %v6372_v26 = vpop.xlane.xlu1 %6371  ;;  %v6357_v30 = vpop.xlane.xlu0 %6356 }
 0x505   : > { %v11843_v45 = vpop.eup %6883  ;;  %v6406_v62 = vsub.f32 %v12826_v53, %v6372_v26  ;;  %v6407_v59 = vsub.f32 %v12827_v52, %v6372_v26  ;;  %v6396_v57 = vsub.f32 %v12828_v47, %v6357_v30  ;;  %v6397_v58 = vsub.f32 %v12829_v46, %v6357_v30  ;;  %v12833_v53 = vld [vmem:[#allocation44_spill] sm:$0xff]  ;;  %v12834_v52 = vld [vmem:[#allocation43_spill] sm:$0xff]  ;;  %v12835_v47 = vld [vmem:[#allocation18_spill] sm:$0xff] }
 0x506   : > { %12825 = vst [vmem:[#allocation6_spill] sm:$0xff] %v11843_v45  ;;  %v11849_v17 = vpop.eup %6885  ;;  %v12836_v46 = vld [vmem:[#allocation45_spill] sm:$0xff] }
 0x507   : > { %12830 = vst [vmem:[#allocation34_spill] sm:$0xff] %v11849_v17  ;;  %v11851_v35 = vpop.eup %6887  ;;  %v6462_v5 = vmul.f32 1.442695, %v6406_v62  ;;  %v6464_v31 = vmul.f32 1.442695, %v6407_v59  ;;  %v6493_v8 = vadd.f32 %v11849_v17, %v11843_v45 }
 0x508   : > { %12831 = vst [vmem:[#allocation9_spill] sm:$0xff] %v11851_v35  ;;  %v6442_v24 = vmul.f32 1.442695, %v6396_v57  ;;  %v11855_v39 = vpop.eup %6889  ;;  %v6444_v15 = vmul.f32 1.442695, %v6397_v58 }
 0x509   : > { %12832 = vst [vmem:[#allocation38_spill] sm:$0xff] %v11855_v39  ;;  %6891 = vpow2.f32 %v6462_v5  ;;  %6494 = vadd.xlane.f32.xlu1 %v6493_v8  ;;  %v6496_v44 = vadd.f32 %v11855_v39, %v11851_v35 }
 0x50a   : > { %6893 = vpow2.f32 %v6464_v31 }
 0x50b   : > { %6895 = vpow2.f32 %v6442_v24  ;;  %6497 = vadd.xlane.f32.xlu2 %v6496_v44  ;;  %v4981_v24 = vadd.f32 %v11335_v25, %v10662_v60 }
 0x50c   : > { %6897 = vpow2.f32 %v6444_v15  ;;  %v6375_v26 = vpop.xlane.xlu0 %6374  ;;  %v6360_v30 = vpop.xlane.xlu2 %6359  ;;  %v12839_v15 = vld [vmem:[#allocation28_spill] sm:$0xff] }
 0x50d   : > { %v6408_v62 = vsub.f32 %v12833_v53, %v6375_v26  ;;  %v6409_v59 = vsub.f32 %v12834_v52, %v6375_v26  ;;  %v6398_v57 = vsub.f32 %v12835_v47, %v6360_v30  ;;  %v6399_v4 = vsub.f32 %v12836_v46, %v6360_v30  ;;  %v12842_v47 = vld [vmem:[#allocation15_spill] sm:$0xff] }
 0x50e   : > { %v4982_v44 = vadd.f32 %v12839_v15, %v10666_v18  ;;  %v12843_v46 = vld [vmem:[#allocation35_spill] sm:$0xff] }
 0x50f   : > { %v11863_v58 = vpop.eup %6891  ;;  %v6466_v5 = vmul.f32 1.442695, %v6408_v62  ;;  %v6468_v8 = vmul.f32 1.442695, %v6409_v59  ;;  %v6446_v9 = vmul.f32 1.442695, %v6398_v57 }
 0x510   : > { %12837 = vst [vmem:[#allocation40_spill] sm:$0xff] %v11863_v58  ;;  %v11865_v34 = vpop.eup %6893  ;;  %v6448_v31 = vmul.f32 1.442695, %v6399_v4  ;;  %v5420_v52 = vmax.f32 %v4981_v24, %v4982_v44 }
 0x511   : > { %12838 = vst [vmem:[#allocation39_spill] sm:$0xff] %v11865_v34  ;;  %v11871_v53 = vpop.eup %6895  ;;  %6899 = vpow2.f32 %v6466_v5  ;;  %v6514_v26 = vadd.f32 %v11865_v34, %v11863_v58 }
 0x512   : > { %12840 = vst [vmem:[#allocation29_spill] sm:$0xff] %v11871_v53  ;;  %v11875_v30 = vpop.eup %6897  ;;  %6901 = vpow2.f32 %v6468_v8  ;;  %v12845_v8 = vld [vmem:[#allocation46_spill] sm:$0xff] }
 0x513   : > { %12841 = vst [vmem:[#allocation42_spill] sm:$0xff] %v11875_v30  ;;  %6903 = vpow2.f32 %v6446_v9  ;;  %6515 = vadd.xlane.f32.xlu2 %v6514_v26  ;;  %v6499_v4 = vadd.f32 %v11875_v30, %v11871_v53  ;;  %v12846_v26 = vld [vmem:[#allocation27_spill] sm:$0xff] }
 0x514   : > { %6905 = vpow2.f32 %v6448_v31  ;;  %v6363_v62 = vpop.xlane.xlu1 %6362  ;;  %v5307_v25 = vpop.xlane.xlu0 %5306  ;;  %v4983_v41 = vadd.f32 %v12846_v26, %v10668_v51 }
 0x515   : > { %6500 = vadd.xlane.f32.xlu1 %v6499_v4  ;;  %v6400_v59 = vsub.f32 %v11421_v23, %v6363_v62  ;;  %v6401_v57 = vsub.f32 %v12842_v47, %v6363_v62  ;;  %v6101_v5 = vperm.slane %v5307_v25, %v12843_v46  ;;  %v6378_v15 = vpop.xlane.xlu2 %6377  ;;  %v12848_v23 = vld [vmem:[#allocation19_spill] sm:$0xff]  ;;  %v12850_v47 = vld [vmem:[#allocation20_spill] sm:$0xff] }
 0x516   : > { %v6410_v14 = vsub.f32 %v12844_v32, %v6378_v15  ;;  %v6411_v9 = vsub.f32 %v12845_v8, %v6378_v15  ;;  %v4911_v44 = vadd.f32 %v11739_v3, %v12848_v23  ;;  %v5421_v32 = vmax.f32 %v5420_v52, %v4983_v41 }
 0x517   : > { %v11886_v38 = vpop.eup %6899  ;;  %v6450_v31 = vmul.f32 1.442695, %v6400_v59  ;;  %v6452_v2 = vmul.f32 1.442695, %v6401_v57  ;;  %v6102_v24 = vsel %vm6029_vm11, %v6101_v5, %v11837_v40  ;;  %v4912_v15 = vadd.f32 %v11746_v11, %v12850_v47  ;;  %v12852_v57 = vld [vmem:[#allocation5_spill] sm:$0xff] }
 0x518   : > { %12847 = vst [vmem:[#allocation44_spill] sm:$0xff] %v11886_v38  ;;  %v11892_v4 = vpop.eup %6901  ;;  %v6470_v62 = vmul.f32 1.442695, %v6410_v14  ;;  %v6472_v25 = vmul.f32 1.442695, %v6411_v9  ;;  %v11901_v26 = vadd.s32 4294967200, %v12852_v57  ;;  %v4985_v40 = vadd.f32 %v11383_v36, %v10672_v42 }
 0x519   : > { %12849 = vst [vmem:[#allocation43_spill] sm:$0xff] %v11892_v4  ;;  %v11896_v8 = vpop.eup %6903  ;;  %6907 = vpow2.f32 %v6450_v31  ;;  %v6517_v59 = vadd.f32 %v11892_v4, %v11886_v38  ;;  %v12854_v14 = vld [vmem:[#allocation36_spill] sm:$0xff]  ;;  %v4984_v52 = vadd.f32 %v11395_v63, %v10670_v48  ;;  %v12855_v9 = vld [vmem:[#allocation21_spill] sm:$0xff]  ;;  %v4906_v17 = vadd.f32 %v11623_v7, %v12848_v23 }
 0x51a   : > { %12851 = vst [vmem:[#allocation18_spill] sm:$0xff] %v11896_v8  ;;  %v11905_v5 = vpop.eup %6905  ;;  %v6032_v41 = vperm.slane %v11831_v33, %v12854_v14  ;;  %6909 = vpow2.f32 %v6452_v2  ;;  %v4913_v31 = vadd.f32 %v11768_v37, %v12855_v9  ;;  %v4907_v36 = vadd.f32 %v11630_v13, %v12850_v47 }
 0x51b   : > { %12853 = vst [vmem:[#allocation45_spill] sm:$0xff] %v11905_v5  ;;  %6911 = vpow2.f32 %v6470_v62  ;;  %v6502_v46 = vadd.f32 %v11905_v5, %v11896_v8  ;;  %v5422_v33 = vmax.f32 %v5421_v32, %v4984_v52  ;;  %v5322_v39 = vmax.f32 %v4911_v44, %v4912_v15  ;;  %v12856_v62 = vld [vmem:[#allocation48_spill] sm:$0xff]  ;;  %v12857_v8 = vld [vmem:[#allocation41_spill] sm:$0xff] }
 0x51c   : > { %6913 = vpow2.f32 %v6472_v25  ;;  %v6381_v45 = vpop.xlane.xlu1 %6380  ;;  %v5097_v2 = vpop.xlane.xlu0 %5096  ;;  %v5423_v5 = vsel %vm5009_vm1, %v4985_v40, -inf  ;;  %v6034_v0 = vsel %vm6033_vm8, %v6032_v41, %v12857_v8  ;;  %v4914_v32 = vadd.f32 %v11785_v19, %v12858_v22  ;;  %v12859_v44 = vld [vmem:[#allocation24_spill] sm:$0xff]  ;;  %v11938_v8 = vld [vmem:[%s12300_s2 + $0x258] sm:$0xff] }
 0x51d   : > { %6518 = vadd.xlane.f32.xlu1 %v6517_v59  ;;  %6503 = vadd.xlane.f32.xlu0 %v6502_v46  ;;  %v6412_v63 = vsub.f32 %v11696_v6, %v6381_v45  ;;  %v6413_v35 = vsub.f32 %v12856_v62, %v6381_v45  ;;  %v6036_v30 = vperm.slane %v5097_v2, %v11901_v26  ;;  %v5314_v53 = vpop.xlane.xlu2 %5313 }
 0x51e   : > { %v6103_v25 = vperm.slane %v5314_v53, %v12854_v14  ;;  %v4915_v46 = vadd.f32 %v11794_v54, %v12859_v44  ;;  %v5315_v52 = vmax.f32 %v4906_v17, %v4907_v36  ;;  %v11943_v53 = vld [vmem:[%s12300_s2 + $0x260] sm:$0xff]  ;;  %v4832_v17 = vadd.f32 %v11746_v11, %v12799_v21  ;;  %v11962_v36 = vld [vmem:[%s12300_s2 + $0x238] sm:$0xff] }
 0x51f   : > { %v11930_v15 = vpop.eup %6907  ;;  %v6474_v6 = vmul.f32 1.442695, %v6412_v63  ;;  %v6476_v45 = vmul.f32 1.442695, %v6413_v35  ;;  %v11933_v59 = vsel %vm6037_vm6, %v6036_v30, %v6034_v0  ;;  %v5323_v35 = vmax.f32 %v5322_v39, %v4913_v31  ;;  %v11957_v30 = vld [vmem:[%s12300_s2 + $0x230] sm:$0xff] }
 0x520   : > { %12860 = vst [vmem:[#allocation28_spill] sm:$0xff] %v11930_v15  ;;  %v11945_v40 = vpop.eup %6909  ;;  %v11948_v41 = vsel %vm6033_vm8, %v6103_v25, %v6102_v24  ;;  %v4831_v0 = vadd.f32 %v11739_v3, %v12797_v55  ;;  %v5424_v24 = vmax.f32 %v5422_v33, %v5423_v5  ;;  %v4908_v31 = vadd.f32 %v11654_v56, %v12855_v9 }
 0x521   : > { %12861 = vst [vmem:[#allocation15_spill] sm:$0xff] %v11945_v40  ;;  %v11964_v2 = vpop.eup %6911  ;;  %6915 = vpow2.f32 %v6474_v6  ;;  %v6505_v39 = vadd.f32 %v11945_v40, %v11930_v15  ;;  %v4910_v62 = vadd.f32 %v11661_v50, %v12859_v44  ;;  %v4841_v25 = vadd.f32 %v12797_v55, %v11938_v8 }
 0x522   : > { %12862 = vst [vmem:[#allocation47_spill] sm:$0xff] %v11948_v41  ;;  %v11970_v63 = vpop.eup %6913  ;;  %6917 = vpow2.f32 %v6476_v45  ;;  %v4842_v14 = vadd.f32 %v12799_v21, %v11943_v53  ;;  %v5316_v5 = vmax.f32 %v5315_v52, %v4908_v31  ;;  %v4836_v33 = vadd.f32 %v12797_v55, %v11957_v30  ;;  %v11990_v52 = vld [vmem:[%s12300_s2 + $0x268] sm:$0xff] }
 0x523   : > { %12863 = vst [vmem:[#allocation46_spill] sm:$0xff] %v11964_v2  ;;  %6506 = vadd.xlane.f32.xlu2 %v6505_v39  ;;  %v6520_v6 = vadd.f32 %v11970_v63, %v11964_v2  ;;  %v4837_v45 = vadd.f32 %v12799_v21, %v11962_v36  ;;  %v5324_v40 = vmax.f32 %v5323_v35, %v4914_v32  ;;  %v5325_v55 = vsel %vm5009_vm1, %v4915_v46, -inf }
 0x524   : > { %12864 = vst [vmem:[#allocation27_spill] sm:$0xff] %v11970_v63  ;;  %v5412_v41 = vpop.xlane.xlu1 %5411  ;;  %v5210_v15 = vmax.f32 %v4831_v0, %v4832_v17  ;;  %v4909_v39 = vadd.f32 %v11688_v20, %v12858_v22  ;;  %v5318_v31 = vsel %vm5009_vm1, %v4910_v62, -inf  ;;  %v4833_v21 = vadd.f32 %v11768_v37, %v12803_v43  ;;  %v12012_v17 = vld [vmem:[%s12300_s2 + $0x278] sm:$0xff] }
 0x525   : > { %5425 = vmax.xlane.f32.xlu1 %v5424_v24  ;;  %6521 = vadd.xlane.f32.xlu0 %v6520_v6  ;;  %v6130_v16 = vperm.slane %v5412_v41, %v11525_v27  ;;  %v5224_v32 = vmax.f32 %v4841_v25, %v4842_v14  ;;  %v11999_v27 = vld [vmem:[%s12300_s2 + $0x240] sm:$0xff]  ;;  %v4834_v46 = vadd.f32 %v11785_v19, %v12806_v10 }
 0x526   : > { %v5317_v0 = vmax.f32 %v5316_v5, %v4909_v39  ;;  %v5217_v14 = vmax.f32 %v4836_v33, %v4837_v45  ;;  %v5326_v62 = vmax.f32 %v5324_v40, %v5325_v55  ;;  %v4835_v25 = vadd.f32 %v11794_v54, %v12808_v28  ;;  %v12025_v5 = vld [vmem:[%s12300_s2 + $0x270] sm:$0xff]  ;;  %v12030_v33 = vld [vmem:[%s12300_s2 + $0x248] sm:$0xff]  ;;  %v12867_v45 = vld [vmem:[#allocation16_spill] sm:$0xff] }
 0x527   : > { %v12001_v41 = vpop.eup %6915  ;;  %v12005_v35 = vsel %vm6025_vm12, %v6130_v16, %v11825_v61  ;;  %v5211_v6 = vmax.f32 %v5210_v15, %v4833_v21  ;;  %v4843_v16 = vadd.f32 %v12803_v43, %v11990_v52  ;;  %v4838_v40 = vadd.f32 %v12803_v43, %v11999_v27 }
 0x528   : > { %12865 = vst [vmem:[#allocation19_spill] sm:$0xff] %v12005_v35  ;;  %v12014_v24 = vpop.eup %6917  ;;  %v4756_v15 = vadd.f32 %v12737_v12, %v11957_v30  ;;  %v4757_v39 = vadd.f32 %v12867_v45, %v11962_v36  ;;  %v4845_v55 = vadd.f32 %v12808_v28, %v12012_v17  ;;  %v12043_v35 = vld [vmem:[%s12300_s2 + $0x250] sm:$0xff]  ;;  %v4921_v29 = vadd.f32 %v12848_v23, %v11938_v8 }
 0x529   : > { %12866 = vst [vmem:[#allocation20_spill] sm:$0xff] %v12014_v24  ;;  %v6523_v61 = vadd.f32 %v12014_v24, %v12001_v41  ;;  %v5225_v21 = vmax.f32 %v5224_v32, %v4843_v16  ;;  %v4922_v43 = vadd.f32 %v12850_v47, %v11943_v53  ;;  %v5319_v34 = vmax.f32 %v5317_v0, %v5318_v31 }
 0x52a   : > { %v5218_v58 = vmax.f32 %v5217_v14, %v4838_v40  ;;  %v4761_v4 = vadd.f32 %v12737_v12, %v11938_v8  ;;  %v4762_v32 = vadd.f32 %v12867_v45, %v11943_v53  ;;  %v5212_v38 = vmax.f32 %v5211_v6, %v4834_v46  ;;  %v12868_v6 = vld [vmem:[#allocation37_spill] sm:$0xff] }
 0x52b   : > { %6524 = vadd.xlane.f32.xlu2 %v6523_v61  ;;  %v4844_v63 = vadd.f32 %v12806_v10, %v12025_v5  ;;  %v4839_v2 = vadd.f32 %v12806_v10, %v12030_v33  ;;  %v4840_v31 = vadd.f32 %v12808_v28, %v12043_v35  ;;  %v5105_v0 = vmax.f32 %v4756_v15, %v4757_v39  ;;  %v12869_v10 = vld [vmem:[#allocation17_spill] sm:$0xff] }
 0x52c   : > { %v5209_v16 = vpop.xlane.xlu1 %5208  ;;  %v5213_v12 = vsel %vm5009_vm1, %v4835_v25, -inf  ;;  %v5227_v40 = vsel %vm5009_vm1, %v4845_v55, -inf  ;;  %v5336_v46 = vmax.f32 %v4921_v29, %v4922_v43  ;;  %v4923_v28 = vadd.f32 %v12855_v9, %v11990_v52 }
 0x52d   : > { %5327 = vmax.xlane.f32.xlu1 %v5326_v62  ;;  %5320 = vmax.xlane.f32.xlu0 %v5319_v34  ;;  %v6074_v61 = vperm.slane %v5209_v16, %v11901_v26  ;;  %v5226_v14 = vmax.f32 %v5225_v21, %v4844_v63  ;;  %v5219_v24 = vmax.f32 %v5218_v58, %v4839_v2  ;;  %v5220_v29 = vsel %vm5009_vm1, %v4840_v31, -inf }
 0x52e   : > { %v4758_v34 = vadd.f32 %v12869_v10, %v11999_v27  ;;  %v5112_v62 = vmax.f32 %v4761_v4, %v4762_v32  ;;  %v5214_v16 = vmax.f32 %v5212_v38, %v5213_v12  ;;  %v4986_v25 = vadd.f32 %v11623_v7, %v10662_v60 }
 0x52f   : > { %v12064_v45 = vsel %vm6037_vm6, %v6074_v61, %v12868_v6  ;;  %v4987_v63 = vadd.f32 %v11630_v13, %v10666_v18  ;;  %v12076_v15 = vadd.s32 4294967192, %v12852_v57  ;;  %v4763_v2 = vadd.f32 %v12869_v10, %v11990_v52 }
 0x530   : > { %v5106_v58 = vmax.f32 %v5105_v0, %v4758_v34  ;;  %v5228_v4 = vmax.f32 %v5226_v14, %v5227_v40  ;;  %v4759_v38 = vadd.f32 %v10425_v49, %v12030_v33  ;;  %v4760_v39 = vadd.f32 %v10427_v1, %v12043_v35 }
 0x531   : > { %v5337_v7 = vmax.f32 %v5336_v46, %v4923_v28  ;;  %v5221_v55 = vmax.f32 %v5219_v24, %v5220_v29  ;;  %v5113_v13 = vmax.f32 %v5112_v62, %v4763_v2  ;;  %v4991_v21 = vadd.f32 %v11739_v3, %v10662_v60 }
 0x532   : > { %v4992_v43 = vadd.f32 %v11746_v11, %v10666_v18  ;;  %v4924_v61 = vadd.f32 %v12858_v22, %v12025_v5  ;;  %v4925_v31 = vadd.f32 %v12859_v44, %v12012_v17  ;;  %v5427_v0 = vmax.f32 %v4986_v25, %v4987_v63 }
 0x533   : > { %5215 = vmax.xlane.f32.xlu2 %v5214_v16  ;;  %v5107_v12 = vmax.f32 %v5106_v58, %v4759_v38  ;;  %v4764_v3 = vadd.f32 %v10425_v49, %v12025_v5  ;;  %v4765_v11 = vadd.f32 %v10427_v1, %v12012_v17  ;;  %v4988_v40 = vadd.f32 %v11654_v56, %v10668_v51 }
 0x534   : > { %v5104_v32 = vpop.xlane.xlu1 %5103  ;;  %v5338_v14 = vmax.f32 %v5337_v7, %v4924_v61  ;;  %v5434_v10 = vmax.f32 %v4991_v21, %v4992_v43  ;;  %v5108_v34 = vsel %vm5009_vm1, %v4760_v39, -inf  ;;  %v5339_v62 = vsel %vm5009_vm1, %v4925_v31, -inf }
 0x535   : > { %5229 = vmax.xlane.f32.xlu1 %v5228_v4  ;;  %5222 = vmax.xlane.f32.xlu0 %v5221_v55  ;;  %v6040_v24 = vperm.slane %v5104_v32, %v12076_v15  ;;  %v5114_v6 = vmax.f32 %v5113_v13, %v4764_v3  ;;  %v5428_v16 = vmax.f32 %v5427_v0, %v4988_v40 }
 0x536   : > { %v5109_v28 = vmax.f32 %v5107_v12, %v5108_v34  ;;  %v4993_v49 = vadd.f32 %v11768_v37, %v10668_v51  ;;  %v4916_v1 = vadd.f32 %v12848_v23, %v11957_v30  ;;  %v4917_v56 = vadd.f32 %v12850_v47, %v11962_v36 }
 0x537   : > { %v12101_v46 = vsel %vm6041_vm15, %v6040_v24, %v11933_v59  ;;  %v5340_v25 = vmax.f32 %v5338_v14, %v5339_v62  ;;  %v5115_v59 = vsel %vm5009_vm1, %v4765_v11, -inf  ;;  %v4989_v63 = vadd.f32 %v11688_v20, %v10670_v48 }
 0x538   : > { %v4990_v29 = vadd.f32 %v11661_v50, %v10672_v42  ;;  %v5116_v58 = vmax.f32 %v5114_v6, %v5115_v59  ;;  %v5435_v2 = vmax.f32 %v5434_v10, %v4993_v49  ;;  %v5001_v37 = vadd.f32 %v10662_v60, %v11938_v8 }
 0x539   : > { %v5002_v23 = vadd.f32 %v10666_v18, %v11943_v53  ;;  %v5429_v4 = vmax.f32 %v5428_v16, %v4989_v63  ;;  %v4994_v47 = vadd.f32 %v11785_v19, %v10670_v48  ;;  %v5329_v38 = vmax.f32 %v4916_v1, %v4917_v56 }
 0x53a   : > { %v4995_v20 = vadd.f32 %v11794_v54, %v10672_v42  ;;  %v5430_v50 = vsel %vm5009_vm1, %v4990_v29, -inf  ;;  %v4918_v7 = vadd.f32 %v12855_v9, %v11999_v27  ;;  %v5003_v53 = vadd.f32 %v10668_v51, %v11990_v52 }
 0x53b   : > { %5110 = vmax.xlane.f32.xlu2 %v5109_v28  ;;  %v5436_v39 = vmax.f32 %v5435_v2, %v4994_v47  ;;  %v5448_v8 = vmax.f32 %v5001_v37, %v5002_v23  ;;  %v5431_v55 = vmax.f32 %v5429_v4, %v5430_v50  ;;  %v4996_v21 = vadd.f32 %v10662_v60, %v11957_v30  ;;  %v12870_v4 = vld [vmem:[#allocation20_spill] sm:$0xff] }
 0x53c   : > { %v5330_v13 = vmax.f32 %v5329_v38, %v4918_v7  ;;  %v4997_v19 = vadd.f32 %v10666_v18, %v11962_v36  ;;  %v5437_v54 = vsel %vm5009_vm1, %v4995_v20, -inf  ;;  %v4919_v32 = vadd.f32 %v12858_v22, %v12030_v33  ;;  %v6510_v10 = vpop.xlane.xlu1 %6509 }
 0x53d   : > { %5341 = vmax.xlane.f32.xlu1 %v5340_v25  ;;  %5117 = vmax.xlane.f32.xlu0 %v5116_v58  ;;  %v5438_v43 = vmax.f32 %v5436_v39, %v5437_v54  ;;  %v5449_v9 = vmax.f32 %v5448_v8, %v5003_v53  ;;  %v4920_v61 = vadd.f32 %v12859_v44, %v12043_v35  ;;  %v12174_v20 = vadd.s32 4294967184, %v12852_v57  ;;  %v12871_v39 = vld [vmem:[#allocation46_spill] sm:$0xff]  ;;  %v12872_v8 = vld [vmem:[#allocation27_spill] sm:$0xff] }
 0x53e   : > { %v5331_v31 = vmax.f32 %v5330_v13, %v4919_v32  ;;  %v5004_v52 = vadd.f32 %v10670_v48, %v12025_v5  ;;  %v5441_v60 = vmax.f32 %v4996_v21, %v4997_v19  ;;  %v5005_v18 = vadd.f32 %v10672_v42, %v12012_v17  ;;  %v12874_v19 = vld [vmem:[#allocation43_spill] sm:$0xff] }
 0x53f   : > { %v4998_v36 = vadd.f32 %v10668_v51, %v11999_v27  ;;  %v5332_v0 = vsel %vm5009_vm1, %v4920_v61, -inf  ;;  %v4999_v3 = vadd.f32 %v10670_v48, %v12030_v33  ;;  %v5000_v5 = vadd.f32 %v10672_v42, %v12043_v35  ;;  %v12151_v51 = vpop.xlane.xlu2 %6479  ;;  %v12161_v48 = vpop.xlane.xlu0 %5418 }
 0x540   : > { %v5450_v30 = vmax.f32 %v5449_v9, %v5004_v52  ;;  %v5333_v22 = vmax.f32 %v5331_v31, %v5332_v0  ;;  %v5451_v12 = vsel %vm5009_vm1, %v5005_v18, -inf  ;;  %v12875_v9 = vld [vmem:[#allocation40_spill] sm:$0xff]  ;;  %v12876_v31 = vld [vmem:[#allocation39_spill] sm:$0xff]  ;;  %v12185_v18 = vadd.s32 4294967176, %v12852_v57 }
 0x541   : > { %v5442_v24 = vmax.f32 %v5441_v60, %v4998_v36  ;;  %v5444_v14 = vsel %vm5009_vm1, %v5000_v5, -inf  ;;  %vm6045_vm1 = vcmask 982912  }
 0x542   : > { %v5452_v44 = vmax.f32 %v5450_v30, %v5451_v12  ;;  %v12878_v12 = vld [vmem:[#allocation10_spill] sm:$0xff] }
 0x543   : > { %5432 = vmax.xlane.f32.xlu2 %v5431_v55  ;;  %v5443_v17 = vmax.f32 %v5442_v24, %v4999_v3 }
 0x545   : > { %5439 = vmax.xlane.f32.xlu0 %v5438_v43  ;;  %v5445_v11 = vmax.f32 %v5443_v17, %v5444_v14 }
 0x547   : > { %v12153_v27 = vpop.xlane.xlu2 %6482  ;;  %v6513_v33 = vpop.xlane.xlu0 %6512 }
 0x54b   : > { %5334 = vmax.xlane.f32.xlu2 %v5333_v22  ;;  %v12877_v22 = vld [vmem:[#allocation7_spill] sm:$0xff] }
 0x54d   : > { %5453 = vmax.xlane.f32.xlu0 %v5452_v44 }
 0x54f   : > { %v12155_v40 = vpop.xlane.xlu2 %6485 }
 0x553   : > { %5446 = vmax.xlane.f32.xlu2 %v5445_v11  ;;  %v12879_v11 = vld [vmem:[#allocation12_spill] sm:$0xff] }
 0x557   : > { %v12157_v6 = vpop.xlane.xlu2 %6488 }
 0x55f   : > { %v12159_v34 = vpop.xlane.xlu2 %6491 }
 0x57c   : > { %v12163_v42 = vpop.xlane.xlu1 %6494 }
 0x57e   : > { %v6498_v35 = vpop.xlane.xlu2 %6497 }
 0x586   : > { %v6516_v16 = vpop.xlane.xlu2 %6515 }
 0x588   : > { %v6501_v62 = vpop.xlane.xlu1 %6500 }
 0x590   : > { %v6519_v28 = vpop.xlane.xlu1 %6518  ;;  %v6504_v49 = vpop.xlane.xlu0 %6503 }
 0x596   : > { %v6507_v1 = vpop.xlane.xlu2 %6506 }
 0x598   : > { %v6522_v56 = vpop.xlane.xlu0 %6521  ;;  %v12165_v25 = vpop.xlane.xlu1 %5425 }
 0x599   : > { %6919 = vrcp.f32 %v6522_v56  ;;  %v12882_v56 = vld [vmem:[#allocation15_spill] sm:$0xff] }
 0x59e   : > { %v6525_v59 = vpop.xlane.xlu2 %6524 }
 0x59f   : > { %6921 = vrcp.f32 %v6525_v59  ;;  %v6920_v29 = vpop.eup %6919 }
 0x5a0   : > { %v12167_v63 = vpop.xlane.xlu0 %5320  ;;  %6923 = vrcp.f32 %v6519_v28  ;;  %v12169_v58 = vpop.xlane.xlu1 %5327  ;;  %v6570_v7 = vmul.f32 %v6920_v29, %v12871_v39  ;;  %v6571_v55 = vmul.f32 %v6920_v29, %v12872_v8 }
 0x5a1   : > { %6925 = vrcp.f32 %v6516_v16 }
 0x5a2   : > { %6927 = vrcp.f32 %v6513_v33 }
 0x5a3   : > { %6929 = vrcp.f32 %v6510_v10  ;;  %v12880_v10 = vld [vmem:[#allocation26_spill] sm:$0xff] }
 0x5a4   : > { %6931 = vrcp.f32 %v6507_v1 }
 0x5a5   : > { %v6922_v2 = vpop.eup %6921  ;;  %6933 = vrcp.f32 %v6504_v49  ;;  %v12881_v49 = vld [vmem:[#allocation28_spill] sm:$0xff] }
 0x5a6   : > { %v5216_v37 = vpop.xlane.xlu2 %5215  ;;  %v6572_v23 = vmul.f32 %v6922_v2, %v12001_v41  ;;  %v6573_v47 = vmul.f32 %v6922_v2, %v12870_v4  ;;  %v6924_v38 = vpop.eup %6923  ;;  %v12873_v41 = vld [vmem:[#allocation44_spill] sm:$0xff]  ;;  %6935 = vrcp.f32 %v6501_v62 }
 0x5a7   : > { %v6926_v13 = vpop.eup %6925  ;;  %v6076_v53 = vperm.slane %v5216_v37, %v12076_v15  ;;  %v6568_v21 = vmul.f32 %v6924_v38, %v12873_v41  ;;  %v6569_v54 = vmul.f32 %v6924_v38, %v12874_v19  ;;  %6937 = vrcp.f32 %v6498_v35  ;;  %v12888_v41 = vld [vmem:[#allocation38_spill] sm:$0xff] }
 0x5a8   : > { %v5223_v50 = vpop.xlane.xlu0 %5222  ;;  %6574 = vmatpush.msra.mxu1 %v6572_v23  ;;  %6594 = vmatpush.msrb.mxu2 %v6573_v47  ;;  %v6928_v43 = vpop.eup %6927  ;;  %v6566_v61 = vmul.f32 %v6926_v13, %v12875_v9  ;;  %v6567_v52 = vmul.f32 %v6926_v13, %v12876_v31  ;;  %6939 = vrcp.f32 %v12163_v42  ;;  %v12883_v23 = vld [vmem:[#allocation18_spill] sm:$0xff]  ;;  %v12887_v13 = vld [vmem:[#allocation9_spill] sm:$0xff] }
 0x5a9   : > { %v6078_v32 = vperm.slane %v5223_v50, %v12174_v20  ;;  %v6930_v60 = vpop.eup %6929  ;;  %v6077_v30 = vsel %vm6041_vm15, %v6076_v53, %v12064_v45  ;;  %v5230_v36 = vpop.xlane.xlu1 %5229  ;;  %v6564_v24 = vmul.f32 %v6928_v43, %v12877_v22  ;;  %v6565_v44 = vmul.f32 %v6928_v43, %v12878_v12  ;;  %v12885_v50 = vld [vmem:[#allocation29_spill] sm:$0xff]  ;;  %v12890_v43 = vld [vmem:[#allocation34_spill] sm:$0xff]  ;;  %v12894_v22 = vld [vmem:[#allocation47_spill] sm:$0xff] }
 0x5aa   : > { %6575 = vmatpush.msra.mxu1 %v6570_v7  ;;  %6595 = vmatpush.msrb.mxu2 %v6571_v55  ;;  %v6932_v3 = vpop.eup %6931  ;;  %v6562_v45 = vmul.f32 %v6930_v60, %v12879_v11  ;;  %v6563_v33 = vmul.f32 %v6930_v60, %v12880_v10  ;;  %v6080_v16 = vperm.slane %v5230_v36, %v12185_v18  ;;  %6941 = vrcp.f32 %v12159_v34  ;;  %v12886_v7 = vld [vmem:[#allocation42_spill] sm:$0xff]  ;;  %v12893_v36 = vld [vmem:[#allocation35_spill] sm:$0xff] }
 0x5ab   : > { %v6079_v17 = vsel %vm6045_vm1, %v6078_v32, %v6077_v30  ;;  %v6934_v62 = vpop.eup %6933  ;;  %v6560_v1 = vmul.f32 %v6932_v3, %v12881_v49  ;;  %v6561_v59 = vmul.f32 %v6932_v3, %v12882_v56  ;;  %6943 = vrcp.f32 %v12157_v6  ;;  %v12889_v6 = vld [vmem:[#allocation6_spill] sm:$0xff]  ;;  %v12898_v10 = vld [vmem:[#allocation11_spill] sm:$0xff] }
 0x5ac   : > { %6576 = vmatpush.msra.mxu1 %v6568_v21  ;;  %6596 = vmatpush.msrb.mxu2 %v6569_v54  ;;  %v6936_v29 = vpop.eup %6935  ;;  %v6081_v2 = vsel %vm6049_vm14, %v6080_v16, %v6079_v17  ;;  %v6558_v4 = vmul.f32 %v6934_v62, %v12883_v23  ;;  %6945 = vrcp.f32 %v12155_v40  ;;  %v6105_v40 = vperm.slane %v12167_v63, %v11901_v26  ;;  %v12892_v30 = vld [vmem:[#allocation22_spill] sm:$0xff]  ;;  %v12899_v16 = vld [vmem:[#allocation33_spill] sm:$0xff]  ;;  %v12900_v49 = vld [vmem:[#allocation19_spill] sm:$0xff] }
 0x5ad   : > { %v6938_v38 = vpop.eup %6937  ;;  %v6556_v39 = vmul.f32 %v6936_v29, %v12885_v50  ;;  %v6557_v8 = vmul.f32 %v6936_v29, %v12886_v7  ;;  %6947 = vrcp.f32 %v12153_v27  ;;  %v12891_v27 = vld [vmem:[#allocation13_spill] sm:$0xff]  ;;  %v12901_v29 = vld [vmem:[#allocation8_spill] sm:$0xff] }
 0x5ae   : > { %6577 = vmatpush.msra.mxu1 %v6566_v61  ;;  %6597 = vmatpush.msrb.mxu2 %v6567_v52  ;;  %v5111_v0 = vpop.xlane.xlu2 %5110  ;;  %v6940_v55 = vpop.eup %6939  ;;  %v6554_v53 = vmul.f32 %v6938_v38, %v12887_v13  ;;  %v6555_v21 = vmul.f32 %v6938_v38, %v12888_v41  ;;  %6949 = vrcp.f32 %v12151_v51  ;;  %v6107_v52 = vperm.slane %v12169_v58, %v12076_v15  ;;  %v12903_v38 = vld [vmem:[#allocation32_spill] sm:$0xff] }
 0x5af   : > { %v6044_v5 = vperm.slane %v5111_v0, %v12174_v20  ;;  %v6552_v54 = vmul.f32 %v6940_v55, %v12889_v6  ;;  %v6553_v32 = vmul.f32 %v6940_v55, %v12890_v43  ;;  %v6132_v0 = vperm.slane %v12161_v48, %v12893_v36 }
 0x5b0   : > { %v5118_v14 = vpop.xlane.xlu0 %5117  ;;  %6578 = vmatpush.msra.mxu1 %v6564_v24  ;;  %6598 = vmatpush.msrb.mxu2 %v6565_v44  ;;  %v6942_v19 = vpop.eup %6941  ;;  %v6106_v24 = vsel %vm6037_vm6, %v6105_v40, %v12894_v22  ;;  %v12895_v44 = vld [vmem:[#allocation23_spill] sm:$0xff] }
 0x5b1   : > { %v6048_v28 = vperm.slane %v5118_v14, %v12185_v18  ;;  %v6046_v35 = vsel %vm6045_vm1, %v6044_v5, %v12101_v46  ;;  %v12884_v46 = vld [vmem:[#allocation45_spill] sm:$0xff]  ;;  %v6944_v9 = vpop.eup %6943  ;;  %v6550_v60 = vmul.f32 %v6942_v19, %v12891_v27  ;;  %v6551_v63 = vmul.f32 %v6942_v19, %v12892_v30  ;;  %v5342_v12 = vpop.xlane.xlu1 %5341  ;;  %v12896_v5 = vld [vmem:[#allocation14_spill] sm:$0xff]  ;;  %v12897_v14 = vld [vmem:[#allocation36_spill] sm:$0xff] }
 0x5b2   : > { %6579 = vmatpush.msra.mxu1 %v6562_v45  ;;  %6599 = vmatpush.msrb.mxu2 %v6563_v33  ;;  %v6559_v47 = vmul.f32 %v6934_v62, %v12884_v46  ;;  %v6946_v31 = vpop.eup %6945  ;;  %v6548_v3 = vmul.f32 %v6944_v9, %v12895_v44  ;;  %v6549_v58 = vmul.f32 %v6944_v9, %v12896_v5  ;;  %v7047_v19 = vld [vmem:[%s7403_s10] sm:$0xff] }
 0x5b3   : > { %v6050_v42 = vsel %vm6049_vm14, %v6048_v28, %v6046_v35  ;;  %v6948_v17 = vpop.eup %6947  ;;  %v6134_v11 = vperm.slane %v12165_v25, %v12897_v14  ;;  %v6546_v33 = vmul.f32 %v6946_v31, %v12898_v10  ;;  %v6111_v48 = vperm.slane %v5342_v12, %v12185_v18 }
 0x5b4   : > { %v6144_v37 = vsel %vm658_vm7, %v6081_v2, %v6050_v42  ;;  %6580 = vmatpush.msra.mxu1 %v6560_v1  ;;  %6600 = vmatpush.msrb.mxu2 %v6561_v59  ;;  %v6108_v62 = vsel %vm6041_vm15, %v6107_v52, %v6106_v24  ;;  %v6547_v28 = vmul.f32 %v6946_v31, %v12899_v16  ;;  %v6950_v35 = vpop.eup %6949  ;;  %v12902_v42 = vld [vmem:[#allocation31_spill] sm:$0xff]  ;;  %vm12905_vm7 = vcmask 1043459  }
 0x5b5   : > { %v6133_v1 = vsel %vm6029_vm11, %v6132_v0, %v12900_v49  ;;  %v6544_v2 = vmul.f32 %v6948_v17, %v12901_v29  ;;  %v6545_v23 = vmul.f32 %v6948_v17, %v12902_v42 }
 0x5b6   : > { %6581 = vmatpush.msra.mxu1 %v6558_v4  ;;  %6601 = vmatpush.msrb.mxu2 %v6559_v47  ;;  %v5433_v34 = vpop.xlane.xlu2 %5432  ;;  %v6135_v4 = vsel %vm6033_vm8, %v6134_v11, %v6133_v1 }
 0x5b7   : > { %v6136_v56 = vperm.slane %v5433_v34, %v11901_v26  ;;  %v6542_v26 = vmul.f32 %v6950_v35, %v12903_v38  ;;  %v12904_v34 = vld [vmem:[#allocation30_spill] sm:$0xff] }
 0x5b8   : > { %6582 = vmatpush.msra.mxu1 %v6556_v39  ;;  %6602 = vmatpush.msrb.mxu2 %v6557_v8  ;;  %v5440_v61 = vpop.xlane.xlu0 %5439  ;;  %v6543_v50 = vmul.f32 %v6950_v35, %v12904_v34 }
 0x5b9   : > { %v6138_v47 = vperm.slane %v5440_v61, %v12076_v15  ;;  %v6137_v39 = vsel %vm6037_vm6, %v6136_v56, %v6135_v4 }
 0x5ba   : > { %6583 = vmatpush.msra.mxu1 %v6554_v53  ;;  %6603 = vmatpush.msrb.mxu2 %v6555_v21 }
 0x5bc   : > { %6584 = vmatpush.msra.mxu1 %v6552_v54  ;;  %6604 = vmatpush.msrb.mxu2 %v6553_v32  ;;  %v7048_v54 = vld [vmem:[%s7403_s10 + $0x8] sm:$0xff] }
 0x5be   : > { %6585 = vmatpush.msra.mxu1 %v6550_v60  ;;  %6605 = vmatpush.msrb.mxu2 %v6551_v63  ;;  %v5335_v51 = vpop.xlane.xlu2 %5334 }
 0x5bf   : > { %v6109_v45 = vperm.slane %v5335_v51, %v12174_v20 }
 0x5c0   : > { %6586 = vmatpush.msra.mxu1 %v6548_v3  ;;  %6606 = vmatpush.msrb.mxu2 %v6549_v58  ;;  %v5454_v7 = vpop.xlane.xlu0 %5453 }
 0x5c1   : > { %v6110_v25 = vsel %vm6045_vm1, %v6109_v45, %v6108_v62  ;;  %v6142_v13 = vperm.slane %v5454_v7, %v12185_v18 }
 0x5c2   : > { %v6112_v59 = vsel %vm6049_vm14, %v6111_v48, %v6110_v25  ;;  %6587 = vmatpush.msra.mxu1 %v6546_v33  ;;  %6607 = vmatpush.msrb.mxu2 %v6547_v28 }
 0x5c3   : > { %v6145_v46 = vsel %vm667_vm2, %v6112_v59, %v6144_v37  ;;  %v6139_v37 = vsel %vm6041_vm15, %v6138_v47, %v6137_v39  ;;  %vm5490_vm2 = vcmp.lt.s32.totalorder %v12852_v57, 110 }
 0x5c4   : > { %6588 = vmatpush.msra.mxu1 %v6544_v2  ;;  %6608 = vmatpush.msrb.mxu2 %v6545_v23 }
 0x5c6   : > { %6589 = vmatpush.msra.mxu1 %v6542_v26  ;;  %6609 = vmatpush.msrb.mxu2 %v6543_v50  ;;  %v5447_v8 = vpop.xlane.xlu2 %5446 }
 0x5c7   : > { %v6140_v55 = vperm.slane %v5447_v8, %v12174_v20  ;;  %v6614_v20 = vld [vmem:[%s12303_s5] sm:$0xff] }
 0x5c9   : > { %v6141_v15 = vsel %vm6045_vm1, %v6140_v55, %v6139_v37 }
 0x5ca   : > { %v6143_v53 = vsel %vm6049_vm14, %v6142_v13, %v6141_v15 }
 0x5cb   : > { %v6146_v41 = vsel %vm12905_vm7, %v6143_v53, %v6145_v46 }
 0x5cc   : > { %6799 = vmatmul.msk.f32.vlgmr.msra.gmra.mxu1 %vm5490_vm2, %v6146_v41  ;;  %6800 = vmatmul.msk.f32.vlgmr.msrb.gmra.mxu2 %vm5490_vm2, %v6146_v41 }
 0x649   : > { %v6591_v21 = vpop.f32.mrf.mxu1 }
 0x64a   : > { %6801 = vmatpush.msk.msrb.mxu1 %vm3218_vm0, %v6591_v21 }
 0x64b   : > { %6802 = vmatmul.msk.f32.vlgmr.msrb.gmra.mxu1 %vm6149_vm5, %v6614_v20 }
 0x64f   : > { %v6611_v18 = vpop.f32.mrf.mxu2 }
 0x650   : > { %6803 = vmatpush.msk.msra.mxu2 %vm3218_vm0, %v6611_v18 }
 0x651   : > { %6804 = vmatmul.msk.f32.vlgmr.msra.gmra.mxu2 %vm6149_vm5, %v6614_v20 }
 0x6c8   : > { %v6641_v57 = vpop.f32.mrf.mxu1 }
 0x6c9   : > { %v6642_v40 = vadd.f32 %v7047_v19, %v6641_v57 }
 0x6cb   : > { %6664 = vst [vmem:[%s259_s19] sm:$0xff] %v6642_v40 }
 0x6d4   : > { %v6661_v6 = vpop.f32.mrf.mxu2 }
 0x6d5   : > { %v6662_v43 = vadd.f32 %v7048_v54, %v6661_v6 }
 0x6d7   : > { %6665 = vst [vmem:[%s259_s19 + $0x8] sm:$0xff] %v6662_v43 }
 0x6d8   : > { %7076 = shalt.err (!%p7073_p3)
}
 0x6d9   : > { %6815 = dma.vmem_to_hbm [thread:$0]  (%p7187_p5), %s6681_s29, 256, %s6683_s11, %s6667_s12  }
 0x6da PF: > { %p6821_p4 = scmp.ge.s32.totalorder %s7111_s24, 2  ;;  %s6694_s10 = sand.u32 1, %s7099_s21  }
 0x6db   : > { %s6695_s17 = scalar_lea.sflag [#allocation3], %s6694_s10 }
 0x6dc   : > { %p6818_p7 = pnand %p6821_p4, %p7191_p6 }
 0x6de   : > { %p6819_p8 = pneg %p6818_p7 }
 0x6e0   : > { %7094 = dma.done.wait (%p6819_p8), %s6695_s17, 256  }
 0x6e1   : > { %7096 = vsyncadd (%p6819_p8), %s6695_s17, 4294967040  ;;  %p16_p9 = scmp.ge.s32.totalorder %s7174_s27, 4   ;;  %s12906_s21 = smov %s7103_s22 }
 0x6e2   : > { %s12907_s22 = smov %s7107_s23  ;;  %s12908_s23 = smov %s7185_s30 }
 0x6e3   : > { %s12909_s24 = smov %s7174_s27  ;;  %18 = sbr.rel (!%p16_p9) target bundleno = 3 (0x3), region = 86 }
 0x6e8   :  { %6701 = vsyncpa [#allocation3], 1 }
 0x6e9   :  { %6703 = vsyncpa [#allocation3 + $0x1], 1 }

</bundles_post_ra>
